<compile_context>
chip_gen: v7x
topology: tpu7x:2x2x1
jax: 0.10.0
libtpu: 0.0.40
codegen_flags: <defaults>
</compile_context>

<pallas_src>
import functools

import numpy as np
import jax
import jax.numpy as jnp
from jax.experimental import pallas as pl
from jax.experimental.pallas import tpu as pltpu

_HIGHEST = jax.lax.Precision.HIGHEST
_VMEM_LIMIT = 32 * 1024 * 1024


def _pick_hw_tile(hw, max_tile=2048):
    """Largest lane-dense tile along the flattened H*W axis."""
    if hw <= max_tile:
        return hw
    return (max_tile // 128) * 128


# -------------------- k1: fused conv1 + conv_f (1x1 convs) ------------------
# Reads x channel-major (C, hw) tiles; emits c1_ (hw, f) [NHWC-flat] and
# cf (f, hw) [NCHW] directly -> no wrapper transpose or slice of big tensors.

def _conv1_kernel(x_ref, w_ref, b_ref, c1_ref, cf_ref, *, f):
    y = jnp.dot(w_ref[...], x_ref[0], preferred_element_type=jnp.float32)
    y = y + b_ref[...]                                   # (2f, hw)
    cf_ref[0] = y[f:2 * f, :]                            # NCHW half (f, hw)
    c1_ref[0] = y[0:f, :].T                              # NHWC half (hw, f)


def conv1_fused(x_cm, wcat_t, bcat, f, hw_tile):
    N, C, HW = x_cm.shape
    grid = (N, pl.cdiv(HW, hw_tile))
    c1, cf = pl.pallas_call(
        functools.partial(_conv1_kernel, f=f),
        out_shape=(jax.ShapeDtypeStruct((N, HW, f), jnp.float32),
                   jax.ShapeDtypeStruct((N, f, HW), jnp.float32)),
        grid=grid,
        in_specs=[
            pl.BlockSpec((1, C, hw_tile), lambda n, i: (n, 0, i)),
            pl.BlockSpec((2 * f, C), lambda n, i: (0, 0)),
            pl.BlockSpec((2 * f, 1), lambda n, i: (0, 0)),
        ],
        out_specs=(
            pl.BlockSpec((1, hw_tile, f), lambda n, i: (n, i, 0)),
            pl.BlockSpec((1, f, hw_tile), lambda n, i: (n, 0, i)),
        ),
        compiler_params=pltpu.CompilerParams(
            dimension_semantics=("parallel", "parallel"),
            vmem_limit_bytes=_VMEM_LIMIT),
    )(x_cm, wcat_t, bcat)
    return c1, cf


# -------------------- width-unrolled conv weights (wrapper glue) ------------

def width_unroll(w_kkio, w_in, w_out, stride, pad):
    """w_kkio: (3,3,fi,fo) taps (ki,kj,cin,cout).  Returns V: (3, w_in*fi,
    w_out*fo) so that a (rows, w_in*fi) slab @ V[ki] applies the (ki,:) taps
    of the conv along width, including the width zero-padding."""
    k, _, fi, fo = w_kkio.shape
    S = np.zeros((k, w_in, w_out), np.float32)
    for kj in range(k):
        for j in range(w_out):
            wi = j * stride + kj - pad
            if 0 <= wi < w_in:
                S[kj, wi, j] = 1.0
    V = jnp.einsum("qwj,kqcg->kwcjg", jnp.asarray(S), w_kkio,
                   precision=_HIGHEST)
    return V.reshape(k, w_in * fi, w_out * fo)


def _bilinear_matrix_np(out_size, in_size):
    """Interpolation weights matching F.interpolate(mode='bilinear',
    align_corners=False)."""
    scale = in_size / out_size
    i = np.arange(out_size, dtype=np.float64)
    src = np.maximum((i + 0.5) * scale - 0.5, 0.0)
    i0 = np.clip(np.floor(src).astype(np.int64), 0, in_size - 1)
    i1 = np.minimum(i0 + 1, in_size - 1)
    lam = src - i0
    M = np.zeros((out_size, in_size), np.float32)
    M[np.arange(out_size), i0] += (1.0 - lam)
    M[np.arange(out_size), i1] += lam
    return M


def bilinear_matrix(out_size, in_size):
    return jnp.asarray(_bilinear_matrix_np(out_size, in_size))


# -------- k2: fused conv2 + maxpool(7,3) + conv_max + conv3 + conv3_ --------
# -------------------- + full separable bilinear upsample --------------------

def _lowres_kernel(c1_ref, s2_ref, v2_ref, b2_ref, gp_ref, sp_ref,
                   um_ref, bm_ref, u3_ref, b3_ref, u3b_ref, b3b_ref,
                   a_ref, uw_ref, out_ref, pad_ref, *, Hp, Wpf, f):
    x = c1_ref[0]                                       # (H, W*f)

    # conv2: 3x3, stride 2, pad 0.  Height taps via exact 0/1 row-selection
    # matmuls, width taps + weights via width-unrolled matrices.
    acc = None
    for ki in range(3):
        rows = jnp.dot(s2_ref[ki], x, preferred_element_type=jnp.float32)
        t = jnp.dot(rows, v2_ref[ki], preferred_element_type=jnp.float32)
        acc = t if acc is None else acc + t
    c2 = acc + b2_ref[...]                              # (H2, W2*f)

    # max_pool2d(kernel=7, stride=3), separable: width taps (exact 0/1
    # column-gather matmuls) then height taps (exact 0/1 row-gather matmuls).
    # All windows are fully in range (VALID pooling) -> no -inf padding.
    wmax = None
    for v in range(7):
        t = jnp.dot(c2, gp_ref[v], preferred_element_type=jnp.float32)
        wmax = t if wmax is None else jnp.maximum(wmax, t)
    pmax = None
    for u in range(7):
        t = jnp.dot(sp_ref[u], wmax, preferred_element_type=jnp.float32)
        pmax = t if pmax is None else jnp.maximum(pmax, t)   # (Hp, Wp*f)

    # three 3x3 / pad-1 convs with width-unrolled weights; the height zero
    # padding comes from scratch rows 0 and Hp+1 (zeroed once).
    pad_ref[...] = jnp.zeros((Hp + 2, Wpf), jnp.float32)

    def conv3x3_pad1(t, u_ref, brow_ref, relu):
        pad_ref[1:Hp + 1, :] = t
        a = jnp.dot(pad_ref[0:Hp, :], u_ref[0],
                    preferred_element_type=jnp.float32)
        a = a + jnp.dot(pad_ref[1:Hp + 1, :], u_ref[1],
                        preferred_element_type=jnp.float32)
        a = a + jnp.dot(pad_ref[2:Hp + 2, :], u_ref[2],
                        preferred_element_type=jnp.float32)
        a = a + brow_ref[...]
        return jnp.maximum(a, 0.0) if relu else a

    v_range = conv3x3_pad1(pmax, um_ref, bm_ref, True)       # relu(conv_max)
    c3 = conv3x3_pad1(v_range, u3_ref, b3_ref, True)         # relu(conv3)
    c3 = conv3x3_pad1(c3, u3b_ref, b3b_ref, False)           # conv3_

    # separable bilinear upsample to (H, W), emitted channel-major (NCHW):
    # H axis once, then W axis per channel (tiny per-batch data).
    t_h = jnp.dot(a_ref[...], c3, preferred_element_type=jnp.float32)  # (H, Wp*f)
    for c in range(f):
        out_ref[0, c] = jnp.dot(t_h, uw_ref[c],
                                preferred_element_type=jnp.float32)    # (H, W)


def lowres_chain(c1_slab, params, H, W, f):
    """c1_slab: (N, H, W*f) NHWC-flat.  Returns upsampled c3 as NCHW
    (N, f, H, W)."""
    N = c1_slab.shape[0]
    H2 = (H - 3) // 2 + 1
    W2 = (W - 3) // 2 + 1
    Hp = (H2 - 7) // 3 + 1
    Wp = (W2 - 7) // 3 + 1
    Wpf = Wp * f

    # Shape-dependent constants (built at trace time; all selections exact).
    S2 = np.zeros((3, H2, H), np.float32)           # conv2 height stride 2
    for ki in range(3):
        S2[ki, np.arange(H2), 2 * np.arange(H2) + ki] = 1.0
    Gp = np.zeros((7, W2 * f, Wpf), np.float32)     # pool width taps
    eye_f = np.eye(f, dtype=np.float32)
    for v in range(7):
        for j in range(Wp):
            Gp[v, (3 * j + v) * f:(3 * j + v) * f + f,
               j * f:j * f + f] = eye_f
    Sp = np.zeros((7, Hp, H2), np.float32)          # pool height taps
    for u in range(7):
        Sp[u, np.arange(Hp), 3 * np.arange(Hp) + u] = 1.0

    # NOTE: V2 scales ~6*f^2*W^2 bytes; for very large W re-tile over W2
    # column blocks (extra grid axis) to stay inside v7x/v5e VMEM.
    V2 = width_unroll(params["w2"], W, W2, stride=2, pad=0)   # (3, W*f, W2*f)
    Um = width_unroll(params["wmax"], Wp, Wp, 1, 1)
    U3 = width_unroll(params["w3"], Wp, Wp, 1, 1)
    U3b = width_unroll(params["w3_"], Wp, Wp, 1, 1)
    b2row = jnp.tile(params["b2"], W2).reshape(1, W2 * f)
    bm_row = jnp.tile(params["bmax"], Wp).reshape(1, Wpf)
    b3_row = jnp.tile(params["b3"], Wp).reshape(1, Wpf)
    b3b_row = jnp.tile(params["b3_"], Wp).reshape(1, Wpf)

    A = _bilinear_matrix_np(H, Hp)                            # (H, Hp)
    Bm = _bilinear_matrix_np(W, Wp)                           # (W, Wp)
    UW = np.zeros((f, Wpf, W), np.float32)                    # per-channel W-up
    for c in range(f):
        UW[c, c::f, :] = Bm.T

    out = pl.pallas_call(
        functools.partial(_lowres_kernel, Hp=Hp, Wpf=Wpf, f=f),
        out_shape=jax.ShapeDtypeStruct((N, f, H, W), jnp.float32),
        grid=(N,),
        in_specs=[
            pl.BlockSpec((1, H, W * f), lambda n: (n, 0, 0)),
            pl.BlockSpec((3, H2, H), lambda n: (0, 0, 0)),
            pl.BlockSpec((3, W * f, W2 * f), lambda n: (0, 0, 0)),
            pl.BlockSpec((1, W2 * f), lambda n: (0, 0)),
            pl.BlockSpec((7, W2 * f, Wpf), lambda n: (0, 0, 0)),
            pl.BlockSpec((7, Hp, H2), lambda n: (0, 0, 0)),
            pl.BlockSpec((3, Wpf, Wpf), lambda n: (0, 0, 0)),
            pl.BlockSpec((1, Wpf), lambda n: (0, 0)),
            pl.BlockSpec((3, Wpf, Wpf), lambda n: (0, 0, 0)),
            pl.BlockSpec((1, Wpf), lambda n: (0, 0)),
            pl.BlockSpec((3, Wpf, Wpf), lambda n: (0, 0, 0)),
            pl.BlockSpec((1, Wpf), lambda n: (0, 0)),
            pl.BlockSpec((H, Hp), lambda n: (0, 0)),
            pl.BlockSpec((f, Wpf, W), lambda n: (0, 0, 0)),
        ],
        out_specs=pl.BlockSpec((1, f, H, W), lambda n: (n, 0, 0, 0)),
        scratch_shapes=[pltpu.VMEM((Hp + 2, Wpf), jnp.float32)],
        compiler_params=pltpu.CompilerParams(
            dimension_semantics=("parallel",),
            vmem_limit_bytes=_VMEM_LIMIT),
    )(c1_slab, jnp.asarray(S2), V2, b2row, jnp.asarray(Gp), jnp.asarray(Sp),
      Um, bm_row, U3, b3_row, U3b, b3b_row, jnp.asarray(A), jnp.asarray(UW))
    return out


# -------------------- k3: conv4 (1x1) + sigmoid + gating --------------------
# Channel-major in and out: result is written NCHW directly.

def _esa_final_kernel(x_ref, cf_ref, c3_ref, w4_ref, b4_ref, o_ref):
    s = cf_ref[0] + c3_ref[0]                                    # (f, hw)
    c4 = jnp.dot(w4_ref[...], s, preferred_element_type=jnp.float32)
    c4 = c4 + b4_ref[...]                                        # (C, hw)
    m = pl.reciprocal(1.0 + jnp.exp(-c4), approx=True)           # sigmoid
    o_ref[0] = x_ref[0] * m


def esa_final(x_cm, cf_cm, c3_cm, w4_t, b4_col, hw_tile):
    N, C, HW = x_cm.shape
    f = w4_t.shape[1]
    grid = (N, pl.cdiv(HW, hw_tile))
    return pl.pallas_call(
        _esa_final_kernel,
        out_shape=jax.ShapeDtypeStruct((N, C, HW), jnp.float32),
        grid=grid,
        in_specs=[
            pl.BlockSpec((1, C, hw_tile), lambda n, i: (n, 0, i)),
            pl.BlockSpec((1, f, hw_tile), lambda n, i: (n, 0, i)),
            pl.BlockSpec((1, f, hw_tile), lambda n, i: (n, 0, i)),
            pl.BlockSpec((C, f), lambda n, i: (0, 0)),
            pl.BlockSpec((C, 1), lambda n, i: (0, 0)),
        ],
        out_specs=pl.BlockSpec((1, C, hw_tile), lambda n, i: (n, 0, i)),
        compiler_params=pltpu.CompilerParams(
            dimension_semantics=("parallel", "parallel"),
            vmem_limit_bytes=_VMEM_LIMIT),
    )(x_cm, cf_cm, c3_cm, w4_t, b4_col)


# ------------------------------- JAX glue ------------------------------------

def init_params(key, n_feats):
    f = n_feats // 16
    ks = jax.random.split(key, 14)

    def u(k, fan_in, shape):
        bound = 1.0 / np.sqrt(fan_in)
        return jax.random.uniform(k, shape, jnp.float32, -bound, bound)

    p = {}
    # 1x1 convs stored as (Cin, Cout); 3x3 convs as (ki, kj, Cin, Cout).
    p["w1"] = u(ks[0], n_feats, (n_feats, f)); p["b1"] = u(ks[1], n_feats, (f,))
    p["wf"] = u(ks[2], f, (f, f));             p["bf"] = u(ks[3], f, (f,))
    p["w4"] = u(ks[4], f, (f, n_feats));       p["b4"] = u(ks[5], f, (n_feats,))
    p["w2"] = u(ks[6], 9 * f, (3, 3, f, f));   p["b2"] = u(ks[7], 9 * f, (f,))
    p["wmax"] = u(ks[8], 9 * f, (3, 3, f, f)); p["bmax"] = u(ks[9], 9 * f, (f,))
    p["w3"] = u(ks[10], 9 * f, (3, 3, f, f));  p["b3"] = u(ks[11], 9 * f, (f,))
    p["w3_"] = u(ks[12], 9 * f, (3, 3, f, f)); p["b3_"] = u(ks[13], 9 * f, (f,))
    return p


def esa_layer(x_nchw, params):
    """ESALayer.forward: x (N, n_feats, H, W) -> x * sigmoid(attention_map)."""
    N, C, H, W = x_nchw.shape
    f = params["b1"].shape[0]
    HW = H * W
    hw_tile = _pick_hw_tile(HW)

    x_cm = x_nchw.reshape(N, C, HW)                       # free reshape (NCHW)

    # k1: conv1 and conv_f folded (both 1x1, no nonlinearity in between).
    wcat_t = jnp.concatenate(
        [params["w1"].T,
         jnp.dot(params["w1"], params["wf"], precision=_HIGHEST).T], axis=0)
    bcat = jnp.concatenate(
        [params["b1"],
         jnp.dot(params["b1"], params["wf"], precision=_HIGHEST)
         + params["bf"]]).reshape(2 * f, 1)
    c1_nhwc, cf_cm = conv1_fused(x_cm, wcat_t, bcat, f, hw_tile)

    # k2: fused low-res chain, emitted NCHW (N, f, H, W).
    c1_slab = c1_nhwc.reshape(N, H, W * f)                # free reshape
    c3_up = lowres_chain(c1_slab, params, H, W, f)

    # k3: conv4 (1x1) + sigmoid + gate, NCHW in / NCHW out.
    out_cm = esa_final(x_cm, cf_cm, c3_up.reshape(N, f, HW),
                       params["w4"].T, params["b4"].reshape(C, 1), hw_tile)
    return out_cm.reshape(N, C, H, W)                     # free reshape


# ---------------------- pure-JAX reference (sanity check) --------------------

def esa_layer_reference(x_nchw, params):
    x = jnp.transpose(x_nchw, (0, 2, 3, 1))
    dn = ("NHWC", "HWIO", "NHWC")

    def conv1x1_ref(t, w, b):
        return jnp.einsum("nhwc,cd->nhwd", t, w, precision=_HIGHEST) + b

    def conv3x3_ref(t, w, b, stride, pad):
        return jax.lax.conv_general_dilated(
            t, w, (stride, stride), [(pad, pad), (pad, pad)],
            dimension_numbers=dn, precision=_HIGHEST) + b

    c1_ = conv1x1_ref(x, params["w1"], params["b1"])
    cf = conv1x1_ref(c1_, params["wf"], params["bf"])
    c1 = conv3x3_ref(c1_, params["w2"], params["b2"], 2, 0)
    v_max = jax.lax.reduce_window(c1, -jnp.inf, jax.lax.max,
                                  (1, 7, 7, 1), (1, 3, 3, 1), "VALID")
    v_range = jax.nn.relu(conv3x3_ref(v_max, params["wmax"], params["bmax"], 1, 1))
    c3 = jax.nn.relu(conv3x3_ref(v_range, params["w3"], params["b3"], 1, 1))
    c3 = conv3x3_ref(c3, params["w3_"], params["b3_"], 1, 1)
    A = bilinear_matrix(x.shape[1], c3.shape[1])
    Bm = bilinear_matrix(x.shape[2], c3.shape[2])
    c3u = jnp.einsum("hp,wq,npqf->nhwf", A, Bm, c3, precision=_HIGHEST)
    c4 = conv1x1_ref(c3u + cf, params["w4"], params["b4"])
    out = x * jax.nn.sigmoid(c4)
    return jnp.transpose(out, (0, 3, 1, 2))


if __name__ == "__main__":
    key = jax.random.PRNGKey(0)
    kx, kp = jax.random.split(key)
    # n_feats must be >= 16 (f = n_feats // 16); spatial >= 17 for the 7/3 pool.
    N, n_feats, H, W = 2, 128, 32, 32
    x = jax.random.normal(kx, (N, n_feats, H, W), jnp.float32)
    params = init_params(kp, n_feats)

    out = jax.jit(esa_layer)(x, params)
    jax.block_until_ready(out)
    assert out.shape == x.shape and out.dtype == jnp.float32

    ref = jax.jit(esa_layer_reference)(x, params)
    err = float(jnp.max(jnp.abs(out - ref)))
    # Tolerance covers MXU rounding over the ~10 chained matmul stages plus
    # the approx-reciprocal sigmoid (~2^-12).
    assert err < 5e-2, f"kernel vs reference mismatch: max abs err = {err}"
    print("KERNEL_OK")
</pallas_src>

<mosaic_0001>
module attributes {stable_mosaic.version = 11 : i64} {
  func.func @_conv1_kernel(%arg0: i32, %arg1: i32, %arg2: memref<1x128x1024xf32, #tpu.memory_space<vmem>>, %arg3: memref<16x128xf32, #tpu.memory_space<vmem>>, %arg4: memref<16x1xf32, #tpu.memory_space<vmem>>, %arg5: memref<1x1024x8xf32, #tpu.memory_space<vmem>>, %arg6: memref<1x8x1024xf32, #tpu.memory_space<vmem>>) attributes {dimension_semantics = [#tpu.dimension_semantics<parallel>, #tpu.dimension_semantics<parallel>], iteration_bounds = array<i64: 2, 1>, scalar_prefetch = 0 : i64, scratch_operands = 0 : i64, tpu.core_type = #tpu.core_type<tc>, window_params = [{transform_indices = @transform_0, window_bounds = array<i64: 1, 128, 1024>}, {pipeline_mode = #tpu.pipeline_mode<synchronous>, transform_indices = @transform_1, window_bounds = array<i64: 16, 128>}, {pipeline_mode = #tpu.pipeline_mode<synchronous>, transform_indices = @transform_2, window_bounds = array<i64: 16, 1>}, {transform_indices = @transform_3, window_bounds = array<i64: 1, 1024, 8>}, {transform_indices = @transform_4, window_bounds = array<i64: 1, 8, 1024>}]} {
    %c0 = arith.constant 0 : index
    %c0_0 = arith.constant 0 : index
    %0 = vector.load %arg3[%c0, %c0_0] : memref<16x128xf32, #tpu.memory_space<vmem>>, vector<16x128xf32>
    %c0_1 = arith.constant 0 : index
    %c0_2 = arith.constant 0 : index
    %c0_3 = arith.constant 0 : index
    %1 = vector.load %arg2[%c0_1, %c0_2, %c0_3] : memref<1x128x1024xf32, #tpu.memory_space<vmem>>, vector<1x128x1024xf32>
    %2 = vector.shape_cast %1 : vector<1x128x1024xf32> to vector<128x1024xf32>
    %cst = arith.constant dense<0.000000e+00> : vector<16x1024xf32>
    %3 = tpu.matmul %0, %2, %cst {dimension_numbers = #tpu.dot_dimension_numbers<[1], [0], [0], [1], [0, 0, 1, 1], [], []>} : vector<16x128xf32>, vector<128x1024xf32>, vector<16x1024xf32> -> vector<16x1024xf32>
    %c0_4 = arith.constant 0 : index
    %c0_5 = arith.constant 0 : index
    %4 = vector.load %arg4[%c0_4, %c0_5] : memref<16x1xf32, #tpu.memory_space<vmem>>, vector<16x1xf32>
    %5 = vector.broadcast %4 : vector<16x1xf32> to vector<16x1024xf32>
    %6 = arith.addf %3, %5 : vector<16x1024xf32>
    %7 = vector.extract_strided_slice %6 {offsets = [8, 0], sizes = [8, 1024], strides = [1, 1]} : vector<16x1024xf32> to vector<8x1024xf32>
    %c0_6 = arith.constant 0 : index
    %c0_7 = arith.constant 0 : index
    %c0_8 = arith.constant 0 : index
    %8 = vector.load %arg6[%c0_6, %c0_7, %c0_8] : memref<1x8x1024xf32, #tpu.memory_space<vmem>>, vector<1x8x1024xf32>
    %9 = vector.shape_cast %8 : vector<1x8x1024xf32> to vector<8x1024xf32>
    %10 = vector.shape_cast %7 : vector<8x1024xf32> to vector<1x8x1024xf32>
    tpu.vector_store %arg6[%c0_6, %c0_7, %c0_8], %10 {strides = array<i32>} : memref<1x8x1024xf32, #tpu.memory_space<vmem>>, vector<1x8x1024xf32>,
    %11 = vector.extract_strided_slice %6 {offsets = [0, 0], sizes = [8, 1024], strides = [1, 1]} : vector<16x1024xf32> to vector<8x1024xf32>
    %12 = tpu.transpose %11, [1, 0] : vector<8x1024xf32> -> vector<1024x8xf32>
    %c0_9 = arith.constant 0 : index
    %c0_10 = arith.constant 0 : index
    %c0_11 = arith.constant 0 : index
    %13 = vector.load %arg5[%c0_9, %c0_10, %c0_11] : memref<1x1024x8xf32, #tpu.memory_space<vmem>>, vector<1x1024x8xf32>
    %14 = vector.shape_cast %13 : vector<1x1024x8xf32> to vector<1024x8xf32>
    %15 = vector.shape_cast %12 : vector<1024x8xf32> to vector<1x1024x8xf32>
    tpu.vector_store %arg5[%c0_9, %c0_10, %c0_11], %15 {strides = array<i32>} : memref<1x1024x8xf32, #tpu.memory_space<vmem>>, vector<1x1024x8xf32>,
    return
  }
  func.func @transform_0(%arg0: i32, %arg1: i32) -> (i32, i32, i32) {
    %c0_i32 = arith.constant 0 : i32
    %c0_i32_0 = arith.constant 0 : i32
    return %arg0, %c0_i32, %arg1 : i32, i32, i32
  }
  func.func @transform_1(%arg0: i32, %arg1: i32) -> (i32, i32) {
    %c0_i32 = arith.constant 0 : i32
    %c0_i32_0 = arith.constant 0 : i32
    %c0_i32_1 = arith.constant 0 : i32
    return %c0_i32, %c0_i32_0 : i32, i32
  }
  func.func @transform_2(%arg0: i32, %arg1: i32) -> (i32, i32) {
    %c0_i32 = arith.constant 0 : i32
    %c0_i32_0 = arith.constant 0 : i32
    %c0_i32_1 = arith.constant 0 : i32
    return %c0_i32, %c0_i32_0 : i32, i32
  }
  func.func @transform_3(%arg0: i32, %arg1: i32) -> (i32, i32, i32) {
    %c0_i32 = arith.constant 0 : i32
    %c0_i32_0 = arith.constant 0 : i32
    return %arg0, %arg1, %c0_i32 : i32, i32, i32
  }
  func.func @transform_4(%arg0: i32, %arg1: i32) -> (i32, i32, i32) {
    %c0_i32 = arith.constant 0 : i32
    %c0_i32_0 = arith.constant 0 : i32
    return %arg0, %c0_i32, %arg1 : i32, i32, i32
  }
}

module attributes {stable_mosaic.version = 11 : i64} {
  func.func @_lowres_kernel(%arg0: i32, %arg1: memref<1x32x256xf32, #tpu.memory_space<vmem>>, %arg2: memref<3x15x32xf32, #tpu.memory_space<vmem>>, %arg3: memref<3x256x120xf32, #tpu.memory_space<vmem>>, %arg4: memref<1x120xf32, #tpu.memory_space<vmem>>, %arg5: memref<7x120x24xf32, #tpu.memory_space<vmem>>, %arg6: memref<7x3x15xf32, #tpu.memory_space<vmem>>, %arg7: memref<3x24x24xf32, #tpu.memory_space<vmem>>, %arg8: memref<1x24xf32, #tpu.memory_space<vmem>>, %arg9: memref<3x24x24xf32, #tpu.memory_space<vmem>>, %arg10: memref<1x24xf32, #tpu.memory_space<vmem>>, %arg11: memref<3x24x24xf32, #tpu.memory_space<vmem>>, %arg12: memref<1x24xf32, #tpu.memory_space<vmem>>, %arg13: memref<32x3xf32, #tpu.memory_space<vmem>>, %arg14: memref<8x24x32xf32, #tpu.memory_space<vmem>>, %arg15: memref<1x8x32x32xf32, #tpu.memory_space<vmem>>, %arg16: memref<5x24xf32, #tpu.memory_space<vmem>>) attributes {dimension_semantics = [#tpu.dimension_semantics<parallel>], iteration_bounds = array<i64: 2>, scalar_prefetch = 0 : i64, scratch_operands = 1 : i64, tpu.core_type = #tpu.core_type<tc>, window_params = [{transform_indices = @transform_0, window_bounds = array<i64: 1, 32, 256>}, {pipeline_mode = #tpu.pipeline_mode<synchronous>, transform_indices = @transform_1, window_bounds = array<i64: 3, 15, 32>}, {pipeline_mode = #tpu.pipeline_mode<synchronous>, transform_indices = @transform_2, window_bounds = array<i64: 3, 256, 120>}, {pipeline_mode = #tpu.pipeline_mode<synchronous>, transform_indices = @transform_3, window_bounds = array<i64: 1, 120>}, {pipeline_mode = #tpu.pipeline_mode<synchronous>, transform_indices = @transform_4, window_bounds = array<i64: 7, 120, 24>}, {pipeline_mode = #tpu.pipeline_mode<synchronous>, transform_indices = @transform_5, window_bounds = array<i64: 7, 3, 15>}, {pipeline_mode = #tpu.pipeline_mode<synchronous>, transform_indices = @transform_6, window_bounds = array<i64: 3, 24, 24>}, {pipeline_mode = #tpu.pipeline_mode<synchronous>, transform_indices = @transform_7, window_bounds = array<i64: 1, 24>}, {pipeline_mode = #tpu.pipeline_mode<synchronous>, transform_indices = @transform_8, window_bounds = array<i64: 3, 24, 24>}, {pipeline_mode = #tpu.pipeline_mode<synchronous>, transform_indices = @transform_9, window_bounds = array<i64: 1, 24>}, {pipeline_mode = #tpu.pipeline_mode<synchronous>, transform_indices = @transform_10, window_bounds = array<i64: 3, 24, 24>}, {pipeline_mode = #tpu.pipeline_mode<synchronous>, transform_indices = @transform_11, window_bounds = array<i64: 1, 24>}, {pipeline_mode = #tpu.pipeline_mode<synchronous>, transform_indices = @transform_12, window_bounds = array<i64: 32, 3>}, {pipeline_mode = #tpu.pipeline_mode<synchronous>, transform_indices = @transform_13, window_bounds = array<i64: 8, 24, 32>}, {transform_indices = @transform_14, window_bounds = array<i64: 1, 8, 32, 32>}]} {
    %c0 = arith.constant 0 : index
    %c0_0 = arith.constant 0 : index
    %c0_1 = arith.constant 0 : index
    %0 = vector.load %arg1[%c0, %c0_0, %c0_1] : memref<1x32x256xf32, #tpu.memory_space<vmem>>, vector<1x32x256xf32>
    %1 = vector.shape_cast %0 : vector<1x32x256xf32> to vector<32x256xf32>
    %c0_2 = arith.constant 0 : index
    %c0_3 = arith.constant 0 : index
    %c0_4 = arith.constant 0 : index
    %2 = vector.load %arg2[%c0_2, %c0_3, %c0_4] : memref<3x15x32xf32, #tpu.memory_space<vmem>>, vector<1x15x32xf32>
    %3 = vector.shape_cast %2 : vector<1x15x32xf32> to vector<15x32xf32>
    %cst = arith.constant dense<0.000000e+00> : vector<15x256xf32>
    %4 = tpu.matmul %3, %1, %cst {dimension_numbers = #tpu.dot_dimension_numbers<[1], [0], [0], [1], [0, 0, 1, 1], [], []>} : vector<15x32xf32>, vector<32x256xf32>, vector<15x256xf32> -> vector<15x256xf32>
    %c0_5 = arith.constant 0 : index
    %c0_6 = arith.constant 0 : index
    %c0_7 = arith.constant 0 : index
    %5 = vector.load %arg3[%c0_5, %c0_6, %c0_7] : memref<3x256x120xf32, #tpu.memory_space<vmem>>, vector<1x256x120xf32>
    %6 = vector.shape_cast %5 : vector<1x256x120xf32> to vector<256x120xf32>
    %cst_8 = arith.constant dense<0.000000e+00> : vector<15x120xf32>
    %7 = tpu.matmul %4, %6, %cst_8 {dimension_numbers = #tpu.dot_dimension_numbers<[1], [0], [0], [1], [0, 0, 1, 1], [], []>} : vector<15x256xf32>, vector<256x120xf32>, vector<15x120xf32> -> vector<15x120xf32>
    %c1 = arith.constant 1 : index
    %c0_9 = arith.constant 0 : index
    %c0_10 = arith.constant 0 : index
    %8 = vector.load %arg2[%c1, %c0_9, %c0_10] : memref<3x15x32xf32, #tpu.memory_space<vmem>>, vector<1x15x32xf32>
    %9 = vector.shape_cast %8 : vector<1x15x32xf32> to vector<15x32xf32>
    %cst_11 = arith.constant dense<0.000000e+00> : vector<15x256xf32>
    %10 = tpu.matmul %9, %1, %cst_11 {dimension_numbers = #tpu.dot_dimension_numbers<[1], [0], [0], [1], [0, 0, 1, 1], [], []>} : vector<15x32xf32>, vector<32x256xf32>, vector<15x256xf32> -> vector<15x256xf32>
    %c1_12 = arith.constant 1 : index
    %c0_13 = arith.constant 0 : index
    %c0_14 = arith.constant 0 : index
    %11 = vector.load %arg3[%c1_12, %c0_13, %c0_14] : memref<3x256x120xf32, #tpu.memory_space<vmem>>, vector<1x256x120xf32>
    %12 = vector.shape_cast %11 : vector<1x256x120xf32> to vector<256x120xf32>
    %cst_15 = arith.constant dense<0.000000e+00> : vector<15x120xf32>
    %13 = tpu.matmul %10, %12, %cst_15 {dimension_numbers = #tpu.dot_dimension_numbers<[1], [0], [0], [1], [0, 0, 1, 1], [], []>} : vector<15x256xf32>, vector<256x120xf32>, vector<15x120xf32> -> vector<15x120xf32>
    %14 = arith.addf %7, %13 : vector<15x120xf32>
    %c2 = arith.constant 2 : index
    %c0_16 = arith.constant 0 : index
    %c0_17 = arith.constant 0 : index
    %15 = vector.load %arg2[%c2, %c0_16, %c0_17] : memref<3x15x32xf32, #tpu.memory_space<vmem>>, vector<1x15x32xf32>
    %16 = vector.shape_cast %15 : vector<1x15x32xf32> to vector<15x32xf32>
    %cst_18 = arith.constant dense<0.000000e+00> : vector<15x256xf32>
    %17 = tpu.matmul %16, %1, %cst_18 {dimension_numbers = #tpu.dot_dimension_numbers<[1], [0], [0], [1], [0, 0, 1, 1], [], []>} : vector<15x32xf32>, vector<32x256xf32>, vector<15x256xf32> -> vector<15x256xf32>
    %c2_19 = arith.constant 2 : index
    %c0_20 = arith.constant 0 : index
    %c0_21 = arith.constant 0 : index
    %18 = vector.load %arg3[%c2_19, %c0_20, %c0_21] : memref<3x256x120xf32, #tpu.memory_space<vmem>>, vector<1x256x120xf32>
    %19 = vector.shape_cast %18 : vector<1x256x120xf32> to vector<256x120xf32>
    %cst_22 = arith.constant dense<0.000000e+00> : vector<15x120xf32>
    %20 = tpu.matmul %17, %19, %cst_22 {dimension_numbers = #tpu.dot_dimension_numbers<[1], [0], [0], [1], [0, 0, 1, 1], [], []>} : vector<15x256xf32>, vector<256x120xf32>, vector<15x120xf32> -> vector<15x120xf32>
    %21 = arith.addf %14, %20 : vector<15x120xf32>
    %c0_23 = arith.constant 0 : index
    %c0_24 = arith.constant 0 : index
    %22 = vector.load %arg4[%c0_23, %c0_24] : memref<1x120xf32, #tpu.memory_space<vmem>>, vector<1x120xf32>
    %23 = vector.broadcast %22 : vector<1x120xf32> to vector<15x120xf32>
    %24 = arith.addf %21, %23 : vector<15x120xf32>
    %c0_25 = arith.constant 0 : index
    %c0_26 = arith.constant 0 : index
    %c0_27 = arith.constant 0 : index
    %25 = vector.load %arg5[%c0_25, %c0_26, %c0_27] : memref<7x120x24xf32, #tpu.memory_space<vmem>>, vector<1x120x24xf32>
    %26 = vector.shape_cast %25 : vector<1x120x24xf32> to vector<120x24xf32>
    %cst_28 = arith.constant dense<0.000000e+00> : vector<15x24xf32>
    %27 = tpu.matmul %24, %26, %cst_28 {dimension_numbers = #tpu.dot_dimension_numbers<[1], [0], [0], [1], [0, 0, 1, 1], [], []>} : vector<15x120xf32>, vector<120x24xf32>, vector<15x24xf32> -> vector<15x24xf32>
    %c1_29 = arith.constant 1 : index
    %c0_30 = arith.constant 0 : index
    %c0_31 = arith.constant 0 : index
    %28 = vector.load %arg5[%c1_29, %c0_30, %c0_31] : memref<7x120x24xf32, #tpu.memory_space<vmem>>, vector<1x120x24xf32>
    %29 = vector.shape_cast %28 : vector<1x120x24xf32> to vector<120x24xf32>
    %cst_32 = arith.constant dense<0.000000e+00> : vector<15x24xf32>
    %30 = tpu.matmul %24, %29, %cst_32 {dimension_numbers = #tpu.dot_dimension_numbers<[1], [0], [0], [1], [0, 0, 1, 1], [], []>} : vector<15x120xf32>, vector<120x24xf32>, vector<15x24xf32> -> vector<15x24xf32>
    %31 = arith.maximumf %27, %30 : vector<15x24xf32>
    %c2_33 = arith.constant 2 : index
    %c0_34 = arith.constant 0 : index
    %c0_35 = arith.constant 0 : index
    %32 = vector.load %arg5[%c2_33, %c0_34, %c0_35] : memref<7x120x24xf32, #tpu.memory_space<vmem>>, vector<1x120x24xf32>
    %33 = vector.shape_cast %32 : vector<1x120x24xf32> to vector<120x24xf32>
    %cst_36 = arith.constant dense<0.000000e+00> : vector<15x24xf32>
    %34 = tpu.matmul %24, %33, %cst_36 {dimension_numbers = #tpu.dot_dimension_numbers<[1], [0], [0], [1], [0, 0, 1, 1], [], []>} : vector<15x120xf32>, vector<120x24xf32>, vector<15x24xf32> -> vector<15x24xf32>
    %35 = arith.maximumf %31, %34 : vector<15x24xf32>
    %c3 = arith.constant 3 : index
    %c0_37 = arith.constant 0 : index
    %c0_38 = arith.constant 0 : index
    %36 = vector.load %arg5[%c3, %c0_37, %c0_38] : memref<7x120x24xf32, #tpu.memory_space<vmem>>, vector<1x120x24xf32>
    %37 = vector.shape_cast %36 : vector<1x120x24xf32> to vector<120x24xf32>
    %cst_39 = arith.constant dense<0.000000e+00> : vector<15x24xf32>
    %38 = tpu.matmul %24, %37, %cst_39 {dimension_numbers = #tpu.dot_dimension_numbers<[1], [0], [0], [1], [0, 0, 1, 1], [], []>} : vector<15x120xf32>, vector<120x24xf32>, vector<15x24xf32> -> vector<15x24xf32>
    %39 = arith.maximumf %35, %38 : vector<15x24xf32>
    %c4 = arith.constant 4 : index
    %c0_40 = arith.constant 0 : index
    %c0_41 = arith.constant 0 : index
    %40 = vector.load %arg5[%c4, %c0_40, %c0_41] : memref<7x120x24xf32, #tpu.memory_space<vmem>>, vector<1x120x24xf32>
    %41 = vector.shape_cast %40 : vector<1x120x24xf32> to vector<120x24xf32>
    %cst_42 = arith.constant dense<0.000000e+00> : vector<15x24xf32>
    %42 = tpu.matmul %24, %41, %cst_42 {dimension_numbers = #tpu.dot_dimension_numbers<[1], [0], [0], [1], [0, 0, 1, 1], [], []>} : vector<15x120xf32>, vector<120x24xf32>, vector<15x24xf32> -> vector<15x24xf32>
    %43 = arith.maximumf %39, %42 : vector<15x24xf32>
    %c5 = arith.constant 5 : index
    %c0_43 = arith.constant 0 : index
    %c0_44 = arith.constant 0 : index
    %44 = vector.load %arg5[%c5, %c0_43, %c0_44] : memref<7x120x24xf32, #tpu.memory_space<vmem>>, vector<1x120x24xf32>
    %45 = vector.shape_cast %44 : vector<1x120x24xf32> to vector<120x24xf32>
    %cst_45 = arith.constant dense<0.000000e+00> : vector<15x24xf32>
    %46 = tpu.matmul %24, %45, %cst_45 {dimension_numbers = #tpu.dot_dimension_numbers<[1], [0], [0], [1], [0, 0, 1, 1], [], []>} : vector<15x120xf32>, vector<120x24xf32>, vector<15x24xf32> -> vector<15x24xf32>
    %47 = arith.maximumf %43, %46 : vector<15x24xf32>
    %c6 = arith.constant 6 : index
    %c0_46 = arith.constant 0 : index
    %c0_47 = arith.constant 0 : index
    %48 = vector.load %arg5[%c6, %c0_46, %c0_47] : memref<7x120x24xf32, #tpu.memory_space<vmem>>, vector<1x120x24xf32>
    %49 = vector.shape_cast %48 : vector<1x120x24xf32> to vector<120x24xf32>
    %cst_48 = arith.constant dense<0.000000e+00> : vector<15x24xf32>
    %50 = tpu.matmul %24, %49, %cst_48 {dimension_numbers = #tpu.dot_dimension_numbers<[1], [0], [0], [1], [0, 0, 1, 1], [], []>} : vector<15x120xf32>, vector<120x24xf32>, vector<15x24xf32> -> vector<15x24xf32>
    %51 = arith.maximumf %47, %50 : vector<15x24xf32>
    %c0_49 = arith.constant 0 : index
    %c0_50 = arith.constant 0 : index
    %c0_51 = arith.constant 0 : index
    %52 = vector.load %arg6[%c0_49, %c0_50, %c0_51] : memref<7x3x15xf32, #tpu.memory_space<vmem>>, vector<1x3x15xf32>
    %53 = vector.shape_cast %52 : vector<1x3x15xf32> to vector<3x15xf32>
    %cst_52 = arith.constant dense<0.000000e+00> : vector<3x24xf32>
    %54 = tpu.matmul %53, %51, %cst_52 {dimension_numbers = #tpu.dot_dimension_numbers<[1], [0], [0], [1], [0, 0, 1, 1], [], []>} : vector<3x15xf32>, vector<15x24xf32>, vector<3x24xf32> -> vector<3x24xf32>
    %c1_53 = arith.constant 1 : index
    %c0_54 = arith.constant 0 : index
    %c0_55 = arith.constant 0 : index
    %55 = vector.load %arg6[%c1_53, %c0_54, %c0_55] : memref<7x3x15xf32, #tpu.memory_space<vmem>>, vector<1x3x15xf32>
    %56 = vector.shape_cast %55 : vector<1x3x15xf32> to vector<3x15xf32>
    %cst_56 = arith.constant dense<0.000000e+00> : vector<3x24xf32>
    %57 = tpu.matmul %56, %51, %cst_56 {dimension_numbers = #tpu.dot_dimension_numbers<[1], [0], [0], [1], [0, 0, 1, 1], [], []>} : vector<3x15xf32>, vector<15x24xf32>, vector<3x24xf32> -> vector<3x24xf32>
    %58 = arith.maximumf %54, %57 : vector<3x24xf32>
    %c2_57 = arith.constant 2 : index
    %c0_58 = arith.constant 0 : index
    %c0_59 = arith.constant 0 : index
    %59 = vector.load %arg6[%c2_57, %c0_58, %c0_59] : memref<7x3x15xf32, #tpu.memory_space<vmem>>, vector<1x3x15xf32>
    %60 = vector.shape_cast %59 : vector<1x3x15xf32> to vector<3x15xf32>
    %cst_60 = arith.constant dense<0.000000e+00> : vector<3x24xf32>
    %61 = tpu.matmul %60, %51, %cst_60 {dimension_numbers = #tpu.dot_dimension_numbers<[1], [0], [0], [1], [0, 0, 1, 1], [], []>} : vector<3x15xf32>, vector<15x24xf32>, vector<3x24xf32> -> vector<3x24xf32>
    %62 = arith.maximumf %58, %61 : vector<3x24xf32>
    %c3_61 = arith.constant 3 : index
    %c0_62 = arith.constant 0 : index
    %c0_63 = arith.constant 0 : index
    %63 = vector.load %arg6[%c3_61, %c0_62, %c0_63] : memref<7x3x15xf32, #tpu.memory_space<vmem>>, vector<1x3x15xf32>
    %64 = vector.shape_cast %63 : vector<1x3x15xf32> to vector<3x15xf32>
    %cst_64 = arith.constant dense<0.000000e+00> : vector<3x24xf32>
    %65 = tpu.matmul %64, %51, %cst_64 {dimension_numbers = #tpu.dot_dimension_numbers<[1], [0], [0], [1], [0, 0, 1, 1], [], []>} : vector<3x15xf32>, vector<15x24xf32>, vector<3x24xf32> -> vector<3x24xf32>
    %66 = arith.maximumf %62, %65 : vector<3x24xf32>
    %c4_65 = arith.constant 4 : index
    %c0_66 = arith.constant 0 : index
    %c0_67 = arith.constant 0 : index
    %67 = vector.load %arg6[%c4_65, %c0_66, %c0_67] : memref<7x3x15xf32, #tpu.memory_space<vmem>>, vector<1x3x15xf32>
    %68 = vector.shape_cast %67 : vector<1x3x15xf32> to vector<3x15xf32>
    %cst_68 = arith.constant dense<0.000000e+00> : vector<3x24xf32>
    %69 = tpu.matmul %68, %51, %cst_68 {dimension_numbers = #tpu.dot_dimension_numbers<[1], [0], [0], [1], [0, 0, 1, 1], [], []>} : vector<3x15xf32>, vector<15x24xf32>, vector<3x24xf32> -> vector<3x24xf32>
    %70 = arith.maximumf %66, %69 : vector<3x24xf32>
    %c5_69 = arith.constant 5 : index
    %c0_70 = arith.constant 0 : index
    %c0_71 = arith.constant 0 : index
    %71 = vector.load %arg6[%c5_69, %c0_70, %c0_71] : memref<7x3x15xf32, #tpu.memory_space<vmem>>, vector<1x3x15xf32>
    %72 = vector.shape_cast %71 : vector<1x3x15xf32> to vector<3x15xf32>
    %cst_72 = arith.constant dense<0.000000e+00> : vector<3x24xf32>
    %73 = tpu.matmul %72, %51, %cst_72 {dimension_numbers = #tpu.dot_dimension_numbers<[1], [0], [0], [1], [0, 0, 1, 1], [], []>} : vector<3x15xf32>, vector<15x24xf32>, vector<3x24xf32> -> vector<3x24xf32>
    %74 = arith.maximumf %70, %73 : vector<3x24xf32>
    %c6_73 = arith.constant 6 : index
    %c0_74 = arith.constant 0 : index
    %c0_75 = arith.constant 0 : index
    %75 = vector.load %arg6[%c6_73, %c0_74, %c0_75] : memref<7x3x15xf32, #tpu.memory_space<vmem>>, vector<1x3x15xf32>
    %76 = vector.shape_cast %75 : vector<1x3x15xf32> to vector<3x15xf32>
    %cst_76 = arith.constant dense<0.000000e+00> : vector<3x24xf32>
    %77 = tpu.matmul %76, %51, %cst_76 {dimension_numbers = #tpu.dot_dimension_numbers<[1], [0], [0], [1], [0, 0, 1, 1], [], []>} : vector<3x15xf32>, vector<15x24xf32>, vector<3x24xf32> -> vector<3x24xf32>
    %78 = arith.maximumf %74, %77 : vector<3x24xf32>
    %cst_77 = arith.constant 0.000000e+00 : f32
    %79 = vector.broadcast %cst_77 : f32 to vector<5x24xf32>
    %c0_78 = arith.constant 0 : index
    %c0_79 = arith.constant 0 : index
    %80 = vector.load %arg16[%c0_78, %c0_79] : memref<5x24xf32, #tpu.memory_space<vmem>>, vector<5x24xf32>
    tpu.vector_store %arg16[%c0_78, %c0_79], %79 {strides = array<i32>} : memref<5x24xf32, #tpu.memory_space<vmem>>, vector<5x24xf32>,
    %c1_80 = arith.constant 1 : index
    %c0_81 = arith.constant 0 : index
    %81 = vector.load %arg16[%c1_80, %c0_81] : memref<5x24xf32, #tpu.memory_space<vmem>>, vector<3x24xf32>
    tpu.vector_store %arg16[%c1_80, %c0_81], %78 {strides = array<i32>} : memref<5x24xf32, #tpu.memory_space<vmem>>, vector<3x24xf32>,
    %c0_82 = arith.constant 0 : index
    %c0_83 = arith.constant 0 : index
    %82 = vector.load %arg16[%c0_82, %c0_83] : memref<5x24xf32, #tpu.memory_space<vmem>>, vector<3x24xf32>
    %c0_84 = arith.constant 0 : index
    %c0_85 = arith.constant 0 : index
    %c0_86 = arith.constant 0 : index
    %83 = vector.load %arg7[%c0_84, %c0_85, %c0_86] : memref<3x24x24xf32, #tpu.memory_space<vmem>>, vector<1x24x24xf32>
    %84 = vector.shape_cast %83 : vector<1x24x24xf32> to vector<24x24xf32>
    %cst_87 = arith.constant dense<0.000000e+00> : vector<3x24xf32>
    %85 = tpu.matmul %82, %84, %cst_87 {dimension_numbers = #tpu.dot_dimension_numbers<[1], [0], [0], [1], [0, 0, 1, 1], [], []>} : vector<3x24xf32>, vector<24x24xf32>, vector<3x24xf32> -> vector<3x24xf32>
    %c1_88 = arith.constant 1 : index
    %c0_89 = arith.constant 0 : index
    %86 = vector.load %arg16[%c1_88, %c0_89] : memref<5x24xf32, #tpu.memory_space<vmem>>, vector<3x24xf32>
    %c1_90 = arith.constant 1 : index
    %c0_91 = arith.constant 0 : index
    %c0_92 = arith.constant 0 : index
    %87 = vector.load %arg7[%c1_90, %c0_91, %c0_92] : memref<3x24x24xf32, #tpu.memory_space<vmem>>, vector<1x24x24xf32>
    %88 = vector.shape_cast %87 : vector<1x24x24xf32> to vector<24x24xf32>
    %cst_93 = arith.constant dense<0.000000e+00> : vector<3x24xf32>
    %89 = tpu.matmul %86, %88, %cst_93 {dimension_numbers = #tpu.dot_dimension_numbers<[1], [0], [0], [1], [0, 0, 1, 1], [], []>} : vector<3x24xf32>, vector<24x24xf32>, vector<3x24xf32> -> vector<3x24xf32>
    %90 = arith.addf %85, %89 : vector<3x24xf32>
    %c2_94 = arith.constant 2 : index
    %c0_95 = arith.constant 0 : index
    %91 = vector.load %arg16[%c2_94, %c0_95] : memref<5x24xf32, #tpu.memory_space<vmem>>, vector<3x24xf32>
    %c2_96 = arith.constant 2 : index
    %c0_97 = arith.constant 0 : index
    %c0_98 = arith.constant 0 : index
    %92 = vector.load %arg7[%c2_96, %c0_97, %c0_98] : memref<3x24x24xf32, #tpu.memory_space<vmem>>, vector<1x24x24xf32>
    %93 = vector.shape_cast %92 : vector<1x24x24xf32> to vector<24x24xf32>
    %cst_99 = arith.constant dense<0.000000e+00> : vector<3x24xf32>
    %94 = tpu.matmul %91, %93, %cst_99 {dimension_numbers = #tpu.dot_dimension_numbers<[1], [0], [0], [1], [0, 0, 1, 1], [], []>} : vector<3x24xf32>, vector<24x24xf32>, vector<3x24xf32> -> vector<3x24xf32>
    %95 = arith.addf %90, %94 : vector<3x24xf32>
    %c0_100 = arith.constant 0 : index
    %c0_101 = arith.constant 0 : index
    %96 = vector.load %arg8[%c0_100, %c0_101] : memref<1x24xf32, #tpu.memory_space<vmem>>, vector<1x24xf32>
    %97 = vector.broadcast %96 : vector<1x24xf32> to vector<3x24xf32>
    %98 = arith.addf %95, %97 : vector<3x24xf32>
    %cst_102 = arith.constant 0.000000e+00 : f32
    %99 = vector.broadcast %cst_102 : f32 to vector<3x24xf32>
    %100 = arith.maximumf %98, %99 : vector<3x24xf32>
    %c1_103 = arith.constant 1 : index
    %c0_104 = arith.constant 0 : index
    %101 = vector.load %arg16[%c1_103, %c0_104] : memref<5x24xf32, #tpu.memory_space<vmem>>, vector<3x24xf32>
    tpu.vector_store %arg16[%c1_103, %c0_104], %100 {strides = array<i32>} : memref<5x24xf32, #tpu.memory_space<vmem>>, vector<3x24xf32>,
    %c0_105 = arith.constant 0 : index
    %c0_106 = arith.constant 0 : index
    %102 = vector.load %arg16[%c0_105, %c0_106] : memref<5x24xf32, #tpu.memory_space<vmem>>, vector<3x24xf32>
    %c0_107 = arith.constant 0 : index
    %c0_108 = arith.constant 0 : index
    %c0_109 = arith.constant 0 : index
    %103 = vector.load %arg9[%c0_107, %c0_108, %c0_109] : memref<3x24x24xf32, #tpu.memory_space<vmem>>, vector<1x24x24xf32>
    %104 = vector.shape_cast %103 : vector<1x24x24xf32> to vector<24x24xf32>
    %cst_110 = arith.constant dense<0.000000e+00> : vector<3x24xf32>
    %105 = tpu.matmul %102, %104, %cst_110 {dimension_numbers = #tpu.dot_dimension_numbers<[1], [0], [0], [1], [0, 0, 1, 1], [], []>} : vector<3x24xf32>, vector<24x24xf32>, vector<3x24xf32> -> vector<3x24xf32>
    %c1_111 = arith.constant 1 : index
    %c0_112 = arith.constant 0 : index
    %106 = vector.load %arg16[%c1_111, %c0_112] : memref<5x24xf32, #tpu.memory_space<vmem>>, vector<3x24xf32>
    %c1_113 = arith.constant 1 : index
    %c0_114 = arith.constant 0 : index
    %c0_115 = arith.constant 0 : index
    %107 = vector.load %arg9[%c1_113, %c0_114, %c0_115] : memref<3x24x24xf32, #tpu.memory_space<vmem>>, vector<1x24x24xf32>
    %108 = vector.shape_cast %107 : vector<1x24x24xf32> to vector<24x24xf32>
    %cst_116 = arith.constant dense<0.000000e+00> : vector<3x24xf32>
    %109 = tpu.matmul %106, %108, %cst_116 {dimension_numbers = #tpu.dot_dimension_numbers<[1], [0], [0], [1], [0, 0, 1, 1], [], []>} : vector<3x24xf32>, vector<24x24xf32>, vector<3x24xf32> -> vector<3x24xf32>
    %110 = arith.addf %105, %109 : vector<3x24xf32>
    %c2_117 = arith.constant 2 : index
    %c0_118 = arith.constant 0 : index
    %111 = vector.load %arg16[%c2_117, %c0_118] : memref<5x24xf32, #tpu.memory_space<vmem>>, vector<3x24xf32>
    %c2_119 = arith.constant 2 : index
    %c0_120 = arith.constant 0 : index
    %c0_121 = arith.constant 0 : index
    %112 = vector.load %arg9[%c2_119, %c0_120, %c0_121] : memref<3x24x24xf32, #tpu.memory_space<vmem>>, vector<1x24x24xf32>
    %113 = vector.shape_cast %112 : vector<1x24x24xf32> to vector<24x24xf32>
    %cst_122 = arith.constant dense<0.000000e+00> : vector<3x24xf32>
    %114 = tpu.matmul %111, %113, %cst_122 {dimension_numbers = #tpu.dot_dimension_numbers<[1], [0], [0], [1], [0, 0, 1, 1], [], []>} : vector<3x24xf32>, vector<24x24xf32>, vector<3x24xf32> -> vector<3x24xf32>
    %115 = arith.addf %110, %114 : vector<3x24xf32>
    %c0_123 = arith.constant 0 : index
    %c0_124 = arith.constant 0 : index
    %116 = vector.load %arg10[%c0_123, %c0_124] : memref<1x24xf32, #tpu.memory_space<vmem>>, vector<1x24xf32>
    %117 = vector.broadcast %116 : vector<1x24xf32> to vector<3x24xf32>
    %118 = arith.addf %115, %117 : vector<3x24xf32>
    %cst_125 = arith.constant 0.000000e+00 : f32
    %119 = vector.broadcast %cst_125 : f32 to vector<3x24xf32>
    %120 = arith.maximumf %118, %119 : vector<3x24xf32>
    %c1_126 = arith.constant 1 : index
    %c0_127 = arith.constant 0 : index
    %121 = vector.load %arg16[%c1_126, %c0_127] : memref<5x24xf32, #tpu.memory_space<vmem>>, vector<3x24xf32>
    tpu.vector_store %arg16[%c1_126, %c0_127], %120 {strides = array<i32>} : memref<5x24xf32, #tpu.memory_space<vmem>>, vector<3x24xf32>,
    %c0_128 = arith.constant 0 : index
    %c0_129 = arith.constant 0 : index
    %122 = vector.load %arg16[%c0_128, %c0_129] : memref<5x24xf32, #tpu.memory_space<vmem>>, vector<3x24xf32>
    %c0_130 = arith.constant 0 : index
    %c0_131 = arith.constant 0 : index
    %c0_132 = arith.constant 0 : index
    %123 = vector.load %arg11[%c0_130, %c0_131, %c0_132] : memref<3x24x24xf32, #tpu.memory_space<vmem>>, vector<1x24x24xf32>
    %124 = vector.shape_cast %123 : vector<1x24x24xf32> to vector<24x24xf32>
    %cst_133 = arith.constant dense<0.000000e+00> : vector<3x24xf32>
    %125 = tpu.matmul %122, %124, %cst_133 {dimension_numbers = #tpu.dot_dimension_numbers<[1], [0], [0], [1], [0, 0, 1, 1], [], []>} : vector<3x24xf32>, vector<24x24xf32>, vector<3x24xf32> -> vector<3x24xf32>
    %c1_134 = arith.constant 1 : index
    %c0_135 = arith.constant 0 : index
    %126 = vector.load %arg16[%c1_134, %c0_135] : memref<5x24xf32, #tpu.memory_space<vmem>>, vector<3x24xf32>
    %c1_136 = arith.constant 1 : index
    %c0_137 = arith.constant 0 : index
    %c0_138 = arith.constant 0 : index
    %127 = vector.load %arg11[%c1_136, %c0_137, %c0_138] : memref<3x24x24xf32, #tpu.memory_space<vmem>>, vector<1x24x24xf32>
    %128 = vector.shape_cast %127 : vector<1x24x24xf32> to vector<24x24xf32>
    %cst_139 = arith.constant dense<0.000000e+00> : vector<3x24xf32>
    %129 = tpu.matmul %126, %128, %cst_139 {dimension_numbers = #tpu.dot_dimension_numbers<[1], [0], [0], [1], [0, 0, 1, 1], [], []>} : vector<3x24xf32>, vector<24x24xf32>, vector<3x24xf32> -> vector<3x24xf32>
    %130 = arith.addf %125, %129 : vector<3x24xf32>
    %c2_140 = arith.constant 2 : index
    %c0_141 = arith.constant 0 : index
    %131 = vector.load %arg16[%c2_140, %c0_141] : memref<5x24xf32, #tpu.memory_space<vmem>>, vector<3x24xf32>
    %c2_142 = arith.constant 2 : index
    %c0_143 = arith.constant 0 : index
    %c0_144 = arith.constant 0 : index
    %132 = vector.load %arg11[%c2_142, %c0_143, %c0_144] : memref<3x24x24xf32, #tpu.memory_space<vmem>>, vector<1x24x24xf32>
    %133 = vector.shape_cast %132 : vector<1x24x24xf32> to vector<24x24xf32>
    %cst_145 = arith.constant dense<0.000000e+00> : vector<3x24xf32>
    %134 = tpu.matmul %131, %133, %cst_145 {dimension_numbers = #tpu.dot_dimension_numbers<[1], [0], [0], [1], [0, 0, 1, 1], [], []>} : vector<3x24xf32>, vector<24x24xf32>, vector<3x24xf32> -> vector<3x24xf32>
    %135 = arith.addf %130, %134 : vector<3x24xf32>
    %c0_146 = arith.constant 0 : index
    %c0_147 = arith.constant 0 : index
    %136 = vector.load %arg12[%c0_146, %c0_147] : memref<1x24xf32, #tpu.memory_space<vmem>>, vector<1x24xf32>
    %137 = vector.broadcast %136 : vector<1x24xf32> to vector<3x24xf32>
    %138 = arith.addf %135, %137 : vector<3x24xf32>
    %c0_148 = arith.constant 0 : index
    %c0_149 = arith.constant 0 : index
    %139 = vector.load %arg13[%c0_148, %c0_149] : memref<32x3xf32, #tpu.memory_space<vmem>>, vector<32x3xf32>
    %cst_150 = arith.constant dense<0.000000e+00> : vector<32x24xf32>
    %140 = tpu.matmul %139, %138, %cst_150 {dimension_numbers = #tpu.dot_dimension_numbers<[1], [0], [0], [1], [0, 0, 1, 1], [], []>} : vector<32x3xf32>, vector<3x24xf32>, vector<32x24xf32> -> vector<32x24xf32>
    %c0_151 = arith.constant 0 : index
    %c0_152 = arith.constant 0 : index
    %c0_153 = arith.constant 0 : index
    %141 = vector.load %arg14[%c0_151, %c0_152, %c0_153] : memref<8x24x32xf32, #tpu.memory_space<vmem>>, vector<1x24x32xf32>
    %142 = vector.shape_cast %141 : vector<1x24x32xf32> to vector<24x32xf32>
    %cst_154 = arith.constant dense<0.000000e+00> : vector<32x32xf32>
    %143 = tpu.matmul %140, %142, %cst_154 {dimension_numbers = #tpu.dot_dimension_numbers<[1], [0], [0], [1], [0, 0, 1, 1], [], []>} : vector<32x24xf32>, vector<24x32xf32>, vector<32x32xf32> -> vector<32x32xf32>
    %c0_155 = arith.constant 0 : index
    %c0_156 = arith.constant 0 : index
    %c0_157 = arith.constant 0 : index
    %c0_158 = arith.constant 0 : index
    %144 = vector.load %arg15[%c0_155, %c0_156, %c0_157, %c0_158] : memref<1x8x32x32xf32, #tpu.memory_space<vmem>>, vector<1x1x32x32xf32>
    %145 = vector.shape_cast %144 : vector<1x1x32x32xf32> to vector<32x32xf32>
    %146 = vector.shape_cast %143 : vector<32x32xf32> to vector<1x1x32x32xf32>
    tpu.vector_store %arg15[%c0_155, %c0_156, %c0_157, %c0_158], %146 {strides = array<i32>} : memref<1x8x32x32xf32, #tpu.memory_space<vmem>>, vector<1x1x32x32xf32>,
    %c1_159 = arith.constant 1 : index
    %c0_160 = arith.constant 0 : index
    %c0_161 = arith.constant 0 : index
    %147 = vector.load %arg14[%c1_159, %c0_160, %c0_161] : memref<8x24x32xf32, #tpu.memory_space<vmem>>, vector<1x24x32xf32>
    %148 = vector.shape_cast %147 : vector<1x24x32xf32> to vector<24x32xf32>
    %cst_162 = arith.constant dense<0.000000e+00> : vector<32x32xf32>
    %149 = tpu.matmul %140, %148, %cst_162 {dimension_numbers = #tpu.dot_dimension_numbers<[1], [0], [0], [1], [0, 0, 1, 1], [], []>} : vector<32x24xf32>, vector<24x32xf32>, vector<32x32xf32> -> vector<32x32xf32>
    %c0_163 = arith.constant 0 : index
    %c1_164 = arith.constant 1 : index
    %c0_165 = arith.constant 0 : index
    %c0_166 = arith.constant 0 : index
    %150 = vector.load %arg15[%c0_163, %c1_164, %c0_165, %c0_166] : memref<1x8x32x32xf32, #tpu.memory_space<vmem>>, vector<1x1x32x32xf32>
    %151 = vector.shape_cast %150 : vector<1x1x32x32xf32> to vector<32x32xf32>
    %152 = vector.shape_cast %149 : vector<32x32xf32> to vector<1x1x32x32xf32>
    tpu.vector_store %arg15[%c0_163, %c1_164, %c0_165, %c0_166], %152 {strides = array<i32>} : memref<1x8x32x32xf32, #tpu.memory_space<vmem>>, vector<1x1x32x32xf32>,
    %c2_167 = arith.constant 2 : index
    %c0_168 = arith.constant 0 : index
    %c0_169 = arith.constant 0 : index
    %153 = vector.load %arg14[%c2_167, %c0_168, %c0_169] : memref<8x24x32xf32, #tpu.memory_space<vmem>>, vector<1x24x32xf32>
    %154 = vector.shape_cast %153 : vector<1x24x32xf32> to vector<24x32xf32>
    %cst_170 = arith.constant dense<0.000000e+00> : vector<32x32xf32>
    %155 = tpu.matmul %140, %154, %cst_170 {dimension_numbers = #tpu.dot_dimension_numbers<[1], [0], [0], [1], [0, 0, 1, 1], [], []>} : vector<32x24xf32>, vector<24x32xf32>, vector<32x32xf32> -> vector<32x32xf32>
    %c0_171 = arith.constant 0 : index
    %c2_172 = arith.constant 2 : index
    %c0_173 = arith.constant 0 : index
    %c0_174 = arith.constant 0 : index
    %156 = vector.load %arg15[%c0_171, %c2_172, %c0_173, %c0_174] : memref<1x8x32x32xf32, #tpu.memory_space<vmem>>, vector<1x1x32x32xf32>
    %157 = vector.shape_cast %156 : vector<1x1x32x32xf32> to vector<32x32xf32>
    %158 = vector.shape_cast %155 : vector<32x32xf32> to vector<1x1x32x32xf32>
    tpu.vector_store %arg15[%c0_171, %c2_172, %c0_173, %c0_174], %158 {strides = array<i32>} : memref<1x8x32x32xf32, #tpu.memory_space<vmem>>, vector<1x1x32x32xf32>,
    %c3_175 = arith.constant 3 : index
    %c0_176 = arith.constant 0 : index
    %c0_177 = arith.constant 0 : index
    %159 = vector.load %arg14[%c3_175, %c0_176, %c0_177] : memref<8x24x32xf32, #tpu.memory_space<vmem>>, vector<1x24x32xf32>
    %160 = vector.shape_cast %159 : vector<1x24x32xf32> to vector<24x32xf32>
    %cst_178 = arith.constant dense<0.000000e+00> : vector<32x32xf32>
    %161 = tpu.matmul %140, %160, %cst_178 {dimension_numbers = #tpu.dot_dimension_numbers<[1], [0], [0], [1], [0, 0, 1, 1], [], []>} : vector<32x24xf32>, vector<24x32xf32>, vector<32x32xf32> -> vector<32x32xf32>
    %c0_179 = arith.constant 0 : index
    %c3_180 = arith.constant 3 : index
    %c0_181 = arith.constant 0 : index
    %c0_182 = arith.constant 0 : index
    %162 = vector.load %arg15[%c0_179, %c3_180, %c0_181, %c0_182] : memref<1x8x32x32xf32, #tpu.memory_space<vmem>>, vector<1x1x32x32xf32>
    %163 = vector.shape_cast %162 : vector<1x1x32x32xf32> to vector<32x32xf32>
    %164 = vector.shape_cast %161 : vector<32x32xf32> to vector<1x1x32x32xf32>
    tpu.vector_store %arg15[%c0_179, %c3_180, %c0_181, %c0_182], %164 {strides = array<i32>} : memref<1x8x32x32xf32, #tpu.memory_space<vmem>>, vector<1x1x32x32xf32>,
    %c4_183 = arith.constant 4 : index
    %c0_184 = arith.constant 0 : index
    %c0_185 = arith.constant 0 : index
    %165 = vector.load %arg14[%c4_183, %c0_184, %c0_185] : memref<8x24x32xf32, #tpu.memory_space<vmem>>, vector<1x24x32xf32>
    %166 = vector.shape_cast %165 : vector<1x24x32xf32> to vector<24x32xf32>
    %cst_186 = arith.constant dense<0.000000e+00> : vector<32x32xf32>
    %167 = tpu.matmul %140, %166, %cst_186 {dimension_numbers = #tpu.dot_dimension_numbers<[1], [0], [0], [1], [0, 0, 1, 1], [], []>} : vector<32x24xf32>, vector<24x32xf32>, vector<32x32xf32> -> vector<32x32xf32>
    %c0_187 = arith.constant 0 : index
    %c4_188 = arith.constant 4 : index
    %c0_189 = arith.constant 0 : index
    %c0_190 = arith.constant 0 : index
    %168 = vector.load %arg15[%c0_187, %c4_188, %c0_189, %c0_190] : memref<1x8x32x32xf32, #tpu.memory_space<vmem>>, vector<1x1x32x32xf32>
    %169 = vector.shape_cast %168 : vector<1x1x32x32xf32> to vector<32x32xf32>
    %170 = vector.shape_cast %167 : vector<32x32xf32> to vector<1x1x32x32xf32>
    tpu.vector_store %arg15[%c0_187, %c4_188, %c0_189, %c0_190], %170 {strides = array<i32>} : memref<1x8x32x32xf32, #tpu.memory_space<vmem>>, vector<1x1x32x32xf32>,
    %c5_191 = arith.constant 5 : index
    %c0_192 = arith.constant 0 : index
    %c0_193 = arith.constant 0 : index
    %171 = vector.load %arg14[%c5_191, %c0_192, %c0_193] : memref<8x24x32xf32, #tpu.memory_space<vmem>>, vector<1x24x32xf32>
    %172 = vector.shape_cast %171 : vector<1x24x32xf32> to vector<24x32xf32>
    %cst_194 = arith.constant dense<0.000000e+00> : vector<32x32xf32>
    %173 = tpu.matmul %140, %172, %cst_194 {dimension_numbers = #tpu.dot_dimension_numbers<[1], [0], [0], [1], [0, 0, 1, 1], [], []>} : vector<32x24xf32>, vector<24x32xf32>, vector<32x32xf32> -> vector<32x32xf32>
    %c0_195 = arith.constant 0 : index
    %c5_196 = arith.constant 5 : index
    %c0_197 = arith.constant 0 : index
    %c0_198 = arith.constant 0 : index
    %174 = vector.load %arg15[%c0_195, %c5_196, %c0_197, %c0_198] : memref<1x8x32x32xf32, #tpu.memory_space<vmem>>, vector<1x1x32x32xf32>
    %175 = vector.shape_cast %174 : vector<1x1x32x32xf32> to vector<32x32xf32>
    %176 = vector.shape_cast %173 : vector<32x32xf32> to vector<1x1x32x32xf32>
    tpu.vector_store %arg15[%c0_195, %c5_196, %c0_197, %c0_198], %176 {strides = array<i32>} : memref<1x8x32x32xf32, #tpu.memory_space<vmem>>, vector<1x1x32x32xf32>,
    %c6_199 = arith.constant 6 : index
    %c0_200 = arith.constant 0 : index
    %c0_201 = arith.constant 0 : index
    %177 = vector.load %arg14[%c6_199, %c0_200, %c0_201] : memref<8x24x32xf32, #tpu.memory_space<vmem>>, vector<1x24x32xf32>
    %178 = vector.shape_cast %177 : vector<1x24x32xf32> to vector<24x32xf32>
    %cst_202 = arith.constant dense<0.000000e+00> : vector<32x32xf32>
    %179 = tpu.matmul %140, %178, %cst_202 {dimension_numbers = #tpu.dot_dimension_numbers<[1], [0], [0], [1], [0, 0, 1, 1], [], []>} : vector<32x24xf32>, vector<24x32xf32>, vector<32x32xf32> -> vector<32x32xf32>
    %c0_203 = arith.constant 0 : index
    %c6_204 = arith.constant 6 : index
    %c0_205 = arith.constant 0 : index
    %c0_206 = arith.constant 0 : index
    %180 = vector.load %arg15[%c0_203, %c6_204, %c0_205, %c0_206] : memref<1x8x32x32xf32, #tpu.memory_space<vmem>>, vector<1x1x32x32xf32>
    %181 = vector.shape_cast %180 : vector<1x1x32x32xf32> to vector<32x32xf32>
    %182 = vector.shape_cast %179 : vector<32x32xf32> to vector<1x1x32x32xf32>
    tpu.vector_store %arg15[%c0_203, %c6_204, %c0_205, %c0_206], %182 {strides = array<i32>} : memref<1x8x32x32xf32, #tpu.memory_space<vmem>>, vector<1x1x32x32xf32>,
    %c7 = arith.constant 7 : index
    %c0_207 = arith.constant 0 : index
    %c0_208 = arith.constant 0 : index
    %183 = vector.load %arg14[%c7, %c0_207, %c0_208] : memref<8x24x32xf32, #tpu.memory_space<vmem>>, vector<1x24x32xf32>
    %184 = vector.shape_cast %183 : vector<1x24x32xf32> to vector<24x32xf32>
    %cst_209 = arith.constant dense<0.000000e+00> : vector<32x32xf32>
    %185 = tpu.matmul %140, %184, %cst_209 {dimension_numbers = #tpu.dot_dimension_numbers<[1], [0], [0], [1], [0, 0, 1, 1], [], []>} : vector<32x24xf32>, vector<24x32xf32>, vector<32x32xf32> -> vector<32x32xf32>
    %c0_210 = arith.constant 0 : index
    %c7_211 = arith.constant 7 : index
    %c0_212 = arith.constant 0 : index
    %c0_213 = arith.constant 0 : index
    %186 = vector.load %arg15[%c0_210, %c7_211, %c0_212, %c0_213] : memref<1x8x32x32xf32, #tpu.memory_space<vmem>>, vector<1x1x32x32xf32>
    %187 = vector.shape_cast %186 : vector<1x1x32x32xf32> to vector<32x32xf32>
    %188 = vector.shape_cast %185 : vector<32x32xf32> to vector<1x1x32x32xf32>
    tpu.vector_store %arg15[%c0_210, %c7_211, %c0_212, %c0_213], %188 {strides = array<i32>} : memref<1x8x32x32xf32, #tpu.memory_space<vmem>>, vector<1x1x32x32xf32>,
    return
  }
  func.func @transform_0(%arg0: i32) -> (i32, i32, i32) {
    %c0_i32 = arith.constant 0 : i32
    %c0_i32_0 = arith.constant 0 : i32
    %c0_i32_1 = arith.constant 0 : i32
    return %arg0, %c0_i32, %c0_i32_0 : i32, i32, i32
  }
  func.func @transform_1(%arg0: i32) -> (i32, i32, i32) {
    %c0_i32 = arith.constant 0 : i32
    %c0_i32_0 = arith.constant 0 : i32
    %c0_i32_1 = arith.constant 0 : i32
    %c0_i32_2 = arith.constant 0 : i32
    return %c0_i32, %c0_i32_0, %c0_i32_1 : i32, i32, i32
  }
  func.func @transform_2(%arg0: i32) -> (i32, i32, i32) {
    %c0_i32 = arith.constant 0 : i32
    %c0_i32_0 = arith.constant 0 : i32
    %c0_i32_1 = arith.constant 0 : i32
    %c0_i32_2 = arith.constant 0 : i32
    return %c0_i32, %c0_i32_0, %c0_i32_1 : i32, i32, i32
  }
  func.func @transform_3(%arg0: i32) -> (i32, i32) {
    %c0_i32 = arith.constant 0 : i32
    %c0_i32_0 = arith.constant 0 : i32
    %c0_i32_1 = arith.constant 0 : i32
    return %c0_i32, %c0_i32_0 : i32, i32
  }
  func.func @transform_4(%arg0: i32) -> (i32, i32, i32) {
    %c0_i32 = arith.constant 0 : i32
    %c0_i32_0 = arith.constant 0 : i32
    %c0_i32_1 = arith.constant 0 : i32
    %c0_i32_2 = arith.constant 0 : i32
    return %c0_i32, %c0_i32_0, %c0_i32_1 : i32, i32, i32
  }
  func.func @transform_5(%arg0: i32) -> (i32, i32, i32) {
    %c0_i32 = arith.constant 0 : i32
    %c0_i32_0 = arith.constant 0 : i32
    %c0_i32_1 = arith.constant 0 : i32
    %c0_i32_2 = arith.constant 0 : i32
    return %c0_i32, %c0_i32_0, %c0_i32_1 : i32, i32, i32
  }
  func.func @transform_6(%arg0: i32) -> (i32, i32, i32) {
    %c0_i32 = arith.constant 0 : i32
    %c0_i32_0 = arith.constant 0 : i32
    %c0_i32_1 = arith.constant 0 : i32
    %c0_i32_2 = arith.constant 0 : i32
    return %c0_i32, %c0_i32_0, %c0_i32_1 : i32, i32, i32
  }
  func.func @transform_7(%arg0: i32) -> (i32, i32) {
    %c0_i32 = arith.constant 0 : i32
    %c0_i32_0 = arith.constant 0 : i32
    %c0_i32_1 = arith.constant 0 : i32
    return %c0_i32, %c0_i32_0 : i32, i32
  }
  func.func @transform_8(%arg0: i32) -> (i32, i32, i32) {
    %c0_i32 = arith.constant 0 : i32
    %c0_i32_0 = arith.constant 0 : i32
    %c0_i32_1 = arith.constant 0 : i32
    %c0_i32_2 = arith.constant 0 : i32
    return %c0_i32, %c0_i32_0, %c0_i32_1 : i32, i32, i32
  }
  func.func @transform_9(%arg0: i32) -> (i32, i32) {
    %c0_i32 = arith.constant 0 : i32
    %c0_i32_0 = arith.constant 0 : i32
    %c0_i32_1 = arith.constant 0 : i32
    return %c0_i32, %c0_i32_0 : i32, i32
  }
  func.func @transform_10(%arg0: i32) -> (i32, i32, i32) {
    %c0_i32 = arith.constant 0 : i32
    %c0_i32_0 = arith.constant 0 : i32
    %c0_i32_1 = arith.constant 0 : i32
    %c0_i32_2 = arith.constant 0 : i32
    return %c0_i32, %c0_i32_0, %c0_i32_1 : i32, i32, i32
  }
  func.func @transform_11(%arg0: i32) -> (i32, i32) {
    %c0_i32 = arith.constant 0 : i32
    %c0_i32_0 = arith.constant 0 : i32
    %c0_i32_1 = arith.constant 0 : i32
    return %c0_i32, %c0_i32_0 : i32, i32
  }
  func.func @transform_12(%arg0: i32) -> (i32, i32) {
    %c0_i32 = arith.constant 0 : i32
    %c0_i32_0 = arith.constant 0 : i32
    %c0_i32_1 = arith.constant 0 : i32
    return %c0_i32, %c0_i32_0 : i32, i32
  }
  func.func @transform_13(%arg0: i32) -> (i32, i32, i32) {
    %c0_i32 = arith.constant 0 : i32
    %c0_i32_0 = arith.constant 0 : i32
    %c0_i32_1 = arith.constant 0 : i32
    %c0_i32_2 = arith.constant 0 : i32
    return %c0_i32, %c0_i32_0, %c0_i32_1 : i32, i32, i32
  }
  func.func @transform_14(%arg0: i32) -> (i32, i32, i32, i32) {
    %c0_i32 = arith.constant 0 : i32
    %c0_i32_0 = arith.constant 0 : i32
    %c0_i32_1 = arith.constant 0 : i32
    %c0_i32_2 = arith.constant 0 : i32
    return %arg0, %c0_i32, %c0_i32_0, %c0_i32_1 : i32, i32, i32, i32
  }
}

module attributes {stable_mosaic.version = 11 : i64} {
  func.func @_esa_final_kernel(%arg0: i32, %arg1: i32, %arg2: memref<1x128x1024xf32, #tpu.memory_space<vmem>>, %arg3: memref<1x8x1024xf32, #tpu.memory_space<vmem>>, %arg4: memref<1x8x1024xf32, #tpu.memory_space<vmem>>, %arg5: memref<128x8xf32, #tpu.memory_space<vmem>>, %arg6: memref<128x1xf32, #tpu.memory_space<vmem>>, %arg7: memref<1x128x1024xf32, #tpu.memory_space<vmem>>) attributes {dimension_semantics = [#tpu.dimension_semantics<parallel>, #tpu.dimension_semantics<parallel>], iteration_bounds = array<i64: 2, 1>, scalar_prefetch = 0 : i64, scratch_operands = 0 : i64, tpu.core_type = #tpu.core_type<tc>, window_params = [{transform_indices = @transform_0, window_bounds = array<i64: 1, 128, 1024>}, {transform_indices = @transform_1, window_bounds = array<i64: 1, 8, 1024>}, {transform_indices = @transform_2, window_bounds = array<i64: 1, 8, 1024>}, {pipeline_mode = #tpu.pipeline_mode<synchronous>, transform_indices = @transform_3, window_bounds = array<i64: 128, 8>}, {pipeline_mode = #tpu.pipeline_mode<synchronous>, transform_indices = @transform_4, window_bounds = array<i64: 128, 1>}, {transform_indices = @transform_5, window_bounds = array<i64: 1, 128, 1024>}]} {
    %c0 = arith.constant 0 : index
    %c0_0 = arith.constant 0 : index
    %c0_1 = arith.constant 0 : index
    %0 = vector.load %arg3[%c0, %c0_0, %c0_1] : memref<1x8x1024xf32, #tpu.memory_space<vmem>>, vector<1x8x1024xf32>
    %1 = vector.shape_cast %0 : vector<1x8x1024xf32> to vector<8x1024xf32>
    %c0_2 = arith.constant 0 : index
    %c0_3 = arith.constant 0 : index
    %c0_4 = arith.constant 0 : index
    %2 = vector.load %arg4[%c0_2, %c0_3, %c0_4] : memref<1x8x1024xf32, #tpu.memory_space<vmem>>, vector<1x8x1024xf32>
    %3 = vector.shape_cast %2 : vector<1x8x1024xf32> to vector<8x1024xf32>
    %4 = arith.addf %1, %3 : vector<8x1024xf32>
    %c0_5 = arith.constant 0 : index
    %c0_6 = arith.constant 0 : index
    %5 = vector.load %arg5[%c0_5, %c0_6] : memref<128x8xf32, #tpu.memory_space<vmem>>, vector<128x8xf32>
    %cst = arith.constant dense<0.000000e+00> : vector<128x1024xf32>
    %6 = tpu.matmul %5, %4, %cst {dimension_numbers = #tpu.dot_dimension_numbers<[1], [0], [0], [1], [0, 0, 1, 1], [], []>} : vector<128x8xf32>, vector<8x1024xf32>, vector<128x1024xf32> -> vector<128x1024xf32>
    %c0_7 = arith.constant 0 : index
    %c0_8 = arith.constant 0 : index
    %7 = vector.load %arg6[%c0_7, %c0_8] : memref<128x1xf32, #tpu.memory_space<vmem>>, vector<128x1xf32>
    %8 = vector.broadcast %7 : vector<128x1xf32> to vector<128x1024xf32>
    %9 = arith.addf %6, %8 : vector<128x1024xf32>
    %cst_9 = arith.constant 0.000000e+00 : f32
    %10 = vector.broadcast %cst_9 : f32 to vector<128x1024xf32>
    %11 = arith.subf %10, %9 : vector<128x1024xf32>
    %12 = math.exp %11 : vector<128x1024xf32>
    %cst_10 = arith.constant 1.000000e+00 : f32
    %13 = vector.broadcast %cst_10 : f32 to vector<128x1024xf32>
    %14 = arith.addf %13, %12 : vector<128x1024xf32>
    %15 = tpu.reciprocal %14 {approx = true} : vector<128x1024xf32> -> vector<128x1024xf32>
    %c0_11 = arith.constant 0 : index
    %c0_12 = arith.constant 0 : index
    %c0_13 = arith.constant 0 : index
    %16 = vector.load %arg2[%c0_11, %c0_12, %c0_13] : memref<1x128x1024xf32, #tpu.memory_space<vmem>>, vector<1x128x1024xf32>
    %17 = vector.shape_cast %16 : vector<1x128x1024xf32> to vector<128x1024xf32>
    %18 = arith.mulf %17, %15 : vector<128x1024xf32>
    %c0_14 = arith.constant 0 : index
    %c0_15 = arith.constant 0 : index
    %c0_16 = arith.constant 0 : index
    %19 = vector.load %arg7[%c0_14, %c0_15, %c0_16] : memref<1x128x1024xf32, #tpu.memory_space<vmem>>, vector<1x128x1024xf32>
    %20 = vector.shape_cast %19 : vector<1x128x1024xf32> to vector<128x1024xf32>
    %21 = vector.shape_cast %18 : vector<128x1024xf32> to vector<1x128x1024xf32>
    tpu.vector_store %arg7[%c0_14, %c0_15, %c0_16], %21 {strides = array<i32>} : memref<1x128x1024xf32, #tpu.memory_space<vmem>>, vector<1x128x1024xf32>,
    return
  }
  func.func @transform_0(%arg0: i32, %arg1: i32) -> (i32, i32, i32) {
    %c0_i32 = arith.constant 0 : i32
    %c0_i32_0 = arith.constant 0 : i32
    return %arg0, %c0_i32, %arg1 : i32, i32, i32
  }
  func.func @transform_1(%arg0: i32, %arg1: i32) -> (i32, i32, i32) {
    %c0_i32 = arith.constant 0 : i32
    %c0_i32_0 = arith.constant 0 : i32
    return %arg0, %c0_i32, %arg1 : i32, i32, i32
  }
  func.func @transform_2(%arg0: i32, %arg1: i32) -> (i32, i32, i32) {
    %c0_i32 = arith.constant 0 : i32
    %c0_i32_0 = arith.constant 0 : i32
    return %arg0, %c0_i32, %arg1 : i32, i32, i32
  }
  func.func @transform_3(%arg0: i32, %arg1: i32) -> (i32, i32) {
    %c0_i32 = arith.constant 0 : i32
    %c0_i32_0 = arith.constant 0 : i32
    %c0_i32_1 = arith.constant 0 : i32
    return %c0_i32, %c0_i32_0 : i32, i32
  }
  func.func @transform_4(%arg0: i32, %arg1: i32) -> (i32, i32) {
    %c0_i32 = arith.constant 0 : i32
    %c0_i32_0 = arith.constant 0 : i32
    %c0_i32_1 = arith.constant 0 : i32
    return %c0_i32, %c0_i32_0 : i32, i32
  }
  func.func @transform_5(%arg0: i32, %arg1: i32) -> (i32, i32, i32) {
    %c0_i32 = arith.constant 0 : i32
    %c0_i32_0 = arith.constant 0 : i32
    return %arg0, %c0_i32, %arg1 : i32, i32, i32
  }
}

</mosaic_0001>

<bundles_post_ra>
// kernel: esa_layer.3
= control target key start
LH: loop header
LB: loop body
LE: loop exit
PB: predicated region body
PF: predicated region fallthrough
CT: control target
= control target key end

     0   :  { %s1463_s15 = smov 0   ;;  %s1465_s16 = smov 0   ;;  %s1943_s0 = inlined_call_operand.vmem [shape: f32[2,128,1024], index: 0, kind: input, shape index: {}]   ;;  %s1944_s1 = inlined_call_operand.vmem [shape: f32[16,128], index: 1, kind: input, shape index: {}]   ;;  %s1945_s2 = inlined_call_operand.vmem [shape: f32[16,1], index: 2, kind: input, shape index: {}]   ;;  %s1946_s3 = inlined_call_operand.vmem [shape: f32[2,1024,8], index: 3, kind: output, shape index: {0}]   ;;  %s1947_s4 = inlined_call_operand.vmem [shape: f32[2,8,1024], index: 4, kind: output, shape index: {1}]  }
   0x1   :  { %s1467_s17 = smov 0  }
   0x2 LB: > { %s27_s18 = sadd.s32 1, %s1430_s16  ;;  %p1245_p0 = scmp.ge.s32.totalorder %s1434_s17, 1  ;;  %s1434_s17 = sphi %s1467_s17, %s15_s17   ;;  %s1430_s16 = sphi %s1465_s16, %s1949_s16   ;;  %s1426_s15 = sphi %s1463_s15, %s1948_s15  }
   0x3   : > { %p29_p1 = scmp.ge.s32.totalorder %s27_s18, 2  ;;  %p188_p2 = scmp.lt.s32.totalorder %s1434_s17, 3 }
   0x5   : > { %s1951_s18 = smov (%p29_p1, %s27_s18), 0  ;;  %p189_p3 = pnand %p1245_p0, %p188_p2 }
   0x6   : > { %p232_p4 = scmp.lt.s32.totalorder (!%p189_p3), %s1426_s15, 1  ;;  %v391_v0 = vld [vmem:[%s1945_s2] sm:$0xff] (!%p189_p3)  ;;  %v1436_v1 = vmov (!%p189_p3), 0.0   ;;  %v1437_v2 = vmov (!%p189_p3), 0   ;;  %v392_v3 = vld [vmem:[%s1945_s2 + $0x8] sm:$0xff] (!%p189_p3)  ;;  %vm975_vm0 = vcmask (!%p189_p3), 64512  }
   0x7   : > { %192 = sbr.rel (%p189_p3) target bundleno = 650 (0x28a), region = 32  ;;  %467 = vmatprep.mubr.f32.mxu0 (!%p189_p3), %v1436_v1  ;;  %544 = vmatprep.mubr.f32.mxu1 (!%p189_p3), %v1436_v1 }
   0x8   : > { %1411 = vset.pattern.permute.xlu0 (!%p189_p3), %v1437_v2 }
   0x9   : > { %395 = vperm.xlu0 (!%p189_p3), %1411, %v391_v0  }
   0xd   : > { %400 = vperm.xlu0 (!%p189_p3), %1411, %v392_v3  }
   0xe   : > { %s1953_s15 = smov (!%p232_p4, %s1426_s15), 1 }
   0xf   : > { %s1254_s21 = sshll.u32 %s1953_s15, 10  ;;  %s1256_s5 = sshll.u32 %s1953_s15, 6 }
  0x10   : > { %s1497_s26 = scalar_lea.vmem %s1943_s0, %s1254_s21  ;;  %s259_s8 = scalar_lea.vmem %s1947_s4, %s1256_s5 }
  0x11   : > { %v264_v4 = vld [vmem:[%s1497_s26 + $0x8] sm:$0xff]  ;;  %v266_v6 = vld [vmem:[%s1497_s26 + $0x18] sm:$0xff]  ;;  %v263_v9 = vld [vmem:[%s1497_s26] sm:$0xff]  ;;  %s1672_s11 = scalar_lea.vmem %s1946_s3, %s1254_s21 }
  0x12   : > { %v272_v5 = vld [vmem:[%s1497_s26 + $0x48] sm:$0xff]  ;;  %v274_v8 = vld [vmem:[%s1497_s26 + $0x58] sm:$0xff]  ;;  %v271_v10 = vld [vmem:[%s1497_s26 + $0x40] sm:$0xff] }
  0x13   : > { %v1257_v7 = vpack.c.bf16 %v272_v5, %v264_v4  ;;  %v1289_v11 = vpack.c.bf16 %v274_v8, %v266_v6  ;;  %v1259_v12 = vpack.c.bf16 %v271_v10, %v263_v9  ;;  %v265_v13 = vld [vmem:[%s1497_s26 + $0x10] sm:$0xff]  ;;  %v280_v15 = vld [vmem:[%s1497_s26 + $0x88] sm:$0xff]  ;;  %v282_v18 = vld [vmem:[%s1497_s26 + $0x98] sm:$0xff] }
  0x14   : > { %v273_v14 = vld [vmem:[%s1497_s26 + $0x50] sm:$0xff]  ;;  %v288_v17 = vld [vmem:[%s1497_s26 + $0xc8] sm:$0xff]  ;;  %v290_v19 = vld [vmem:[%s1497_s26 + $0xd8] sm:$0xff] }
  0x15   : > { %1258 = vmatprep.subr.bf16.mxu0 %v1257_v7  ;;  %v1291_v16 = vpack.c.bf16 %v273_v14, %v265_v13  ;;  %1290 = vmatprep.subr.bf16.mxu1 %v1289_v11  ;;  %v1261_v20 = vpack.c.bf16 %v288_v17, %v280_v15  ;;  %v1293_v21 = vpack.c.bf16 %v290_v19, %v282_v18  ;;  %v279_v22 = vld [vmem:[%s1497_s26 + $0x80] sm:$0xff]  ;;  %v281_v24 = vld [vmem:[%s1497_s26 + $0x90] sm:$0xff]  ;;  %v296_v27 = vld [vmem:[%s1497_s26 + $0x108] sm:$0xff] }
  0x16   : > { %1260 = vmatpush1.bf16.msra.mxu0 %v1259_v12  ;;  %v287_v23 = vld [vmem:[%s1497_s26 + $0xc0] sm:$0xff]  ;;  %v289_v26 = vld [vmem:[%s1497_s26 + $0xd0] sm:$0xff]  ;;  %v304_v28 = vld [vmem:[%s1497_s26 + $0x148] sm:$0xff] }
  0x17   : > { %1292 = vmatpush1.bf16.msra.mxu1 %v1291_v16  ;;  %v1263_v25 = vpack.c.bf16 %v287_v23, %v279_v22  ;;  %1262 = vmatprep.subr.bf16.mxu0 %v1261_v20  ;;  %v1295_v29 = vpack.c.bf16 %v289_v26, %v281_v24  ;;  %v1265_v30 = vpack.c.bf16 %v304_v28, %v296_v27  ;;  %v298_v31 = vld [vmem:[%s1497_s26 + $0x118] sm:$0xff]  ;;  %v295_v33 = vld [vmem:[%s1497_s26 + $0x100] sm:$0xff]  ;;  %v297_v36 = vld [vmem:[%s1497_s26 + $0x110] sm:$0xff] }
  0x18   : > { %1294 = vmatprep.subr.bf16.mxu1 %v1293_v21  ;;  %v306_v32 = vld [vmem:[%s1497_s26 + $0x158] sm:$0xff]  ;;  %v303_v35 = vld [vmem:[%s1497_s26 + $0x140] sm:$0xff]  ;;  %v305_v37 = vld [vmem:[%s1497_s26 + $0x150] sm:$0xff] }
  0x19   : > { %v1297_v34 = vpack.c.bf16 %v306_v32, %v298_v31  ;;  %v1267_v38 = vpack.c.bf16 %v303_v35, %v295_v33  ;;  %v312_v39 = vld [vmem:[%s1497_s26 + $0x188] sm:$0xff]  ;;  %v314_v41 = vld [vmem:[%s1497_s26 + $0x198] sm:$0xff]  ;;  %v1299_v42 = vpack.c.bf16 %v305_v37, %v297_v36  ;;  %v311_v45 = vld [vmem:[%s1497_s26 + $0x180] sm:$0xff] }
  0x1a   : > { %1264 = vmatpush1.bf16.msra.mxu0 %v1263_v25  ;;  %v320_v40 = vld [vmem:[%s1497_s26 + $0x1c8] sm:$0xff]  ;;  %v322_v44 = vld [vmem:[%s1497_s26 + $0x1d8] sm:$0xff]  ;;  %v319_v46 = vld [vmem:[%s1497_s26 + $0x1c0] sm:$0xff] }
  0x1b   : > { %1296 = vmatpush1.bf16.msra.mxu1 %v1295_v29  ;;  %1266 = vmatprep.subr.bf16.mxu0 %v1265_v30  ;;  %v1269_v43 = vpack.c.bf16 %v320_v40, %v312_v39  ;;  %v1301_v47 = vpack.c.bf16 %v322_v44, %v314_v41  ;;  %v313_v48 = vld [vmem:[%s1497_s26 + $0x190] sm:$0xff]  ;;  %v328_v50 = vld [vmem:[%s1497_s26 + $0x208] sm:$0xff]  ;;  %v330_v52 = vld [vmem:[%s1497_s26 + $0x218] sm:$0xff]  ;;  %v1271_v54 = vpack.c.bf16 %v319_v46, %v311_v45 }
  0x1c   : > { %1298 = vmatprep.subr.bf16.mxu1 %v1297_v34  ;;  %v321_v49 = vld [vmem:[%s1497_s26 + $0x1d0] sm:$0xff]  ;;  %v336_v51 = vld [vmem:[%s1497_s26 + $0x248] sm:$0xff]  ;;  %v338_v53 = vld [vmem:[%s1497_s26 + $0x258] sm:$0xff] }
  0x1d   : > { %v1303_v55 = vpack.c.bf16 %v321_v49, %v313_v48  ;;  %v1273_v56 = vpack.c.bf16 %v336_v51, %v328_v50  ;;  %v327_v57 = vld [vmem:[%s1497_s26 + $0x200] sm:$0xff]  ;;  %v329_v59 = vld [vmem:[%s1497_s26 + $0x210] sm:$0xff]  ;;  %v1305_v60 = vpack.c.bf16 %v338_v53, %v330_v52  ;;  %v344_v62 = vld [vmem:[%s1497_s26 + $0x288] sm:$0xff] }
  0x1e   : > { %1268 = vmatpush1.bf16.msra.mxu0 %v1267_v38  ;;  %v335_v58 = vld [vmem:[%s1497_s26 + $0x240] sm:$0xff]  ;;  %v337_v61 = vld [vmem:[%s1497_s26 + $0x250] sm:$0xff]  ;;  %v352_v63 = vld [vmem:[%s1497_s26 + $0x2c8] sm:$0xff] }
  0x1f   : > { %1300 = vmatpush1.bf16.msra.mxu1 %v1299_v42  ;;  %1270 = vmatprep.subr.bf16.mxu0 %v1269_v43  ;;  %v346_v0 = vld [vmem:[%s1497_s26 + $0x298] sm:$0xff]  ;;  %v1275_v3 = vpack.c.bf16 %v335_v58, %v327_v57  ;;  %v1307_v4 = vpack.c.bf16 %v337_v61, %v329_v59  ;;  %v1277_v5 = vpack.c.bf16 %v352_v63, %v344_v62  ;;  %v343_v6 = vld [vmem:[%s1497_s26 + $0x280] sm:$0xff]  ;;  %v345_v8 = vld [vmem:[%s1497_s26 + $0x290] sm:$0xff] }
  0x20   : > { %1302 = vmatprep.subr.bf16.mxu1 %v1301_v47  ;;  %v354_v2 = vld [vmem:[%s1497_s26 + $0x2d8] sm:$0xff]  ;;  %v351_v7 = vld [vmem:[%s1497_s26 + $0x2c0] sm:$0xff]  ;;  %v353_v10 = vld [vmem:[%s1497_s26 + $0x2d0] sm:$0xff] }
  0x21   : > { %v1309_v9 = vpack.c.bf16 %v354_v2, %v346_v0  ;;  %v360_v11 = vld [vmem:[%s1497_s26 + $0x308] sm:$0xff]  ;;  %v362_v13 = vld [vmem:[%s1497_s26 + $0x318] sm:$0xff]  ;;  %v1279_v15 = vpack.c.bf16 %v351_v7, %v343_v6  ;;  %v1311_v16 = vpack.c.bf16 %v353_v10, %v345_v8  ;;  %v359_v18 = vld [vmem:[%s1497_s26 + $0x300] sm:$0xff] }
  0x22   : > { %1272 = vmatpush1.bf16.msra.mxu0 %v1271_v54  ;;  %v368_v12 = vld [vmem:[%s1497_s26 + $0x348] sm:$0xff]  ;;  %v370_v14 = vld [vmem:[%s1497_s26 + $0x358] sm:$0xff]  ;;  %v367_v19 = vld [vmem:[%s1497_s26 + $0x340] sm:$0xff] }
  0x23   : > { %1304 = vmatpush1.bf16.msra.mxu1 %v1303_v55  ;;  %1274 = vmatprep.subr.bf16.mxu0 %v1273_v56  ;;  %v1281_v17 = vpack.c.bf16 %v368_v12, %v360_v11  ;;  %v361_v20 = vld [vmem:[%s1497_s26 + $0x310] sm:$0xff]  ;;  %v1313_v21 = vpack.c.bf16 %v370_v14, %v362_v13  ;;  %v376_v23 = vld [vmem:[%s1497_s26 + $0x388] sm:$0xff]  ;;  %v378_v25 = vld [vmem:[%s1497_s26 + $0x398] sm:$0xff]  ;;  %v1283_v27 = vpack.c.bf16 %v367_v19, %v359_v18 }
  0x24   : > { %1306 = vmatprep.subr.bf16.mxu1 %v1305_v60  ;;  %v369_v22 = vld [vmem:[%s1497_s26 + $0x350] sm:$0xff]  ;;  %v384_v24 = vld [vmem:[%s1497_s26 + $0x3c8] sm:$0xff]  ;;  %v386_v26 = vld [vmem:[%s1497_s26 + $0x3d8] sm:$0xff] }
  0x25   : > { %v1315_v28 = vpack.c.bf16 %v369_v22, %v361_v20  ;;  %v1285_v29 = vpack.c.bf16 %v384_v24, %v376_v23  ;;  %v375_v30 = vld [vmem:[%s1497_s26 + $0x380] sm:$0xff]  ;;  %v377_v32 = vld [vmem:[%s1497_s26 + $0x390] sm:$0xff]  ;;  %v1317_v33 = vpack.c.bf16 %v386_v26, %v378_v25  ;;  %v268_v35 = vld [vmem:[%s1497_s26 + $0x28] sm:$0xff] }
  0x26   : > { %1276 = vmatpush1.bf16.msra.mxu0 %v1275_v3  ;;  %v383_v31 = vld [vmem:[%s1497_s26 + $0x3c0] sm:$0xff]  ;;  %v385_v34 = vld [vmem:[%s1497_s26 + $0x3d0] sm:$0xff]  ;;  %v276_v36 = vld [vmem:[%s1497_s26 + $0x68] sm:$0xff] }
  0x27   : > { %1308 = vmatpush1.bf16.msra.mxu1 %v1307_v4  ;;  %1278 = vmatprep.subr.bf16.mxu0 %v1277_v5  ;;  %v270_v37 = vld [vmem:[%s1497_s26 + $0x38] sm:$0xff]  ;;  %v1287_v39 = vpack.c.bf16 %v383_v31, %v375_v30  ;;  %v1319_v40 = vpack.c.bf16 %v385_v34, %v377_v32  ;;  %v1321_v41 = vpack.c.bf16 %v276_v36, %v268_v35  ;;  %v267_v42 = vld [vmem:[%s1497_s26 + $0x20] sm:$0xff]  ;;  %v269_v45 = vld [vmem:[%s1497_s26 + $0x30] sm:$0xff] }
  0x28   : > { %1310 = vmatprep.subr.bf16.mxu1 %v1309_v9  ;;  %v278_v38 = vld [vmem:[%s1497_s26 + $0x78] sm:$0xff]  ;;  %v275_v43 = vld [vmem:[%s1497_s26 + $0x60] sm:$0xff]  ;;  %v277_v46 = vld [vmem:[%s1497_s26 + $0x70] sm:$0xff] }
  0x29   : > { %v1353_v44 = vpack.c.bf16 %v278_v38, %v270_v37  ;;  %v284_v47 = vld [vmem:[%s1497_s26 + $0xa8] sm:$0xff]  ;;  %v1576_v49 = vld [vmem:[%s1944_s1] sm:$0xff]  ;;  %v1323_v50 = vpack.c.bf16 %v275_v43, %v267_v42  ;;  %v286_v51 = vld [vmem:[%s1497_s26 + $0xb8] sm:$0xff]  ;;  %v1355_v53 = vpack.c.bf16 %v277_v46, %v269_v45 }
  0x2a   : > { %1280 = vmatpush1.bf16.msra.mxu0 %v1279_v15  ;;  %v292_v48 = vld [vmem:[%s1497_s26 + $0xe8] sm:$0xff]  ;;  %v294_v52 = vld [vmem:[%s1497_s26 + $0xf8] sm:$0xff]  ;;  %v283_v54 = vld [vmem:[%s1497_s26 + $0xa0] sm:$0xff] }
  0x2b   : > { %1312 = vmatpush1.bf16.msra.mxu1 %v1311_v16  ;;  %1282 = vmatprep.subr.bf16.mxu0 %v1281_v17  ;;  %v291_v55 = vld [vmem:[%s1497_s26 + $0xe0] sm:$0xff]  ;;  %v285_v56 = vld [vmem:[%s1497_s26 + $0xb0] sm:$0xff]  ;;  %v1325_v57 = vpack.c.bf16 %v292_v48, %v284_v47  ;;  %v300_v59 = vld [vmem:[%s1497_s26 + $0x128] sm:$0xff]  ;;  %v1357_v61 = vpack.c.bf16 %v294_v52, %v286_v51 }
  0x2c   : > { %1314 = vmatprep.subr.bf16.mxu1 %v1313_v21  ;;  %v293_v58 = vld [vmem:[%s1497_s26 + $0xf0] sm:$0xff]  ;;  %v308_v60 = vld [vmem:[%s1497_s26 + $0x168] sm:$0xff]  ;;  %v302_v62 = vld [vmem:[%s1497_s26 + $0x138] sm:$0xff]  ;;  %v1327_v2 = vpack.c.bf16 %v291_v55, %v283_v54 }
  0x2d   : > { %v310_v63 = vld [vmem:[%s1497_s26 + $0x178] sm:$0xff]  ;;  %v1593_v0 = vld [vmem:[%s1944_s1 + $0x8] sm:$0xff]  ;;  %v1359_v3 = vpack.c.bf16 %v293_v58, %v285_v56  ;;  %v1329_v4 = vpack.c.bf16 %v308_v60, %v300_v59  ;;  %v299_v5 = vld [vmem:[%s1497_s26 + $0x120] sm:$0xff] }
  0x2e   : > { %1284 = vmatpush1.bf16.msra.mxu0 %v1283_v27  ;;  %v307_v6 = vld [vmem:[%s1497_s26 + $0x160] sm:$0xff]  ;;  %v301_v7 = vld [vmem:[%s1497_s26 + $0x130] sm:$0xff]  ;;  %v1361_v8 = vpack.c.bf16 %v310_v63, %v302_v62  ;;  %v316_v10 = vld [vmem:[%s1497_s26 + $0x1a8] sm:$0xff] }
  0x2f   : > { %1316 = vmatpush1.bf16.msra.mxu1 %v1315_v28  ;;  %1286 = vmatprep.subr.bf16.mxu0 %v1285_v29  ;;  %v309_v9 = vld [vmem:[%s1497_s26 + $0x170] sm:$0xff]  ;;  %v324_v11 = vld [vmem:[%s1497_s26 + $0x1e8] sm:$0xff]  ;;  %v318_v12 = vld [vmem:[%s1497_s26 + $0x1b8] sm:$0xff]  ;;  %v1331_v14 = vpack.c.bf16 %v307_v6, %v299_v5 }
  0x30   : > { %1318 = vmatprep.subr.bf16.mxu1 %v1317_v33  ;;  %v326_v13 = vld [vmem:[%s1497_s26 + $0x1f8] sm:$0xff]  ;;  %v1363_v15 = vpack.c.bf16 %v309_v9, %v301_v7  ;;  %v1333_v16 = vpack.c.bf16 %v324_v11, %v316_v10  ;;  %v315_v17 = vld [vmem:[%s1497_s26 + $0x1a0] sm:$0xff]  ;;  %v317_v19 = vld [vmem:[%s1497_s26 + $0x1b0] sm:$0xff] }
  0x31   : > { %v323_v18 = vld [vmem:[%s1497_s26 + $0x1e0] sm:$0xff]  ;;  %v1365_v20 = vpack.c.bf16 %v326_v13, %v318_v12  ;;  %v325_v21 = vld [vmem:[%s1497_s26 + $0x1f0] sm:$0xff]  ;;  %v332_v22 = vld [vmem:[%s1497_s26 + $0x228] sm:$0xff] }
  0x32   : > { %1288 = vmatpush1.bf16.msra.mxu0 %v1287_v39  ;;  %v340_v23 = vld [vmem:[%s1497_s26 + $0x268] sm:$0xff]  ;;  %v334_v24 = vld [vmem:[%s1497_s26 + $0x238] sm:$0xff]  ;;  %v1335_v26 = vpack.c.bf16 %v323_v18, %v315_v17  ;;  %v1367_v27 = vpack.c.bf16 %v325_v21, %v317_v19  ;;  %v331_v29 = vld [vmem:[%s1497_s26 + $0x220] sm:$0xff] }
  0x33   : > { %1320 = vmatpush1.bf16.msra.mxu1 %v1319_v40  ;;  %1322 = vmatprep.subr.bf16.mxu0 %v1321_v41  ;;  %v342_v25 = vld [vmem:[%s1497_s26 + $0x278] sm:$0xff]  ;;  %v1337_v28 = vpack.c.bf16 %v340_v23, %v332_v22  ;;  %v339_v30 = vld [vmem:[%s1497_s26 + $0x260] sm:$0xff]  ;;  %v333_v31 = vld [vmem:[%s1497_s26 + $0x230] sm:$0xff] }
  0x34   : > { %1354 = vmatprep.subr.bf16.mxu1 %v1353_v44  ;;  %v1369_v32 = vpack.c.bf16 %v342_v25, %v334_v24  ;;  %v341_v33 = vld [vmem:[%s1497_s26 + $0x270] sm:$0xff]  ;;  %v348_v34 = vld [vmem:[%s1497_s26 + $0x2a8] sm:$0xff]  ;;  %v350_v36 = vld [vmem:[%s1497_s26 + $0x2b8] sm:$0xff]  ;;  %v1339_v38 = vpack.c.bf16 %v339_v30, %v331_v29 }
  0x35   : > { %468 = vmatmul.mubr.f32.vlgmr.msra.gmra.mrb[0].mxu0 %v1576_v49  ;;  %v356_v35 = vld [vmem:[%s1497_s26 + $0x2e8] sm:$0xff]  ;;  %v358_v37 = vld [vmem:[%s1497_s26 + $0x2f8] sm:$0xff]  ;;  %v1371_v39 = vpack.c.bf16 %v341_v33, %v333_v31  ;;  %v347_v41 = vld [vmem:[%s1497_s26 + $0x2a0] sm:$0xff] }
  0x36   : > { %545 = vmatmul.mubr.f32.vlgmr.msra.gmra.mrb[0].mxu1 %v1576_v49  ;;  %1324 = vmatpush1.bf16.msra.mxu0 %v1323_v50  ;;  %v1341_v40 = vpack.c.bf16 %v356_v35, %v348_v34  ;;  %v355_v42 = vld [vmem:[%s1497_s26 + $0x2e0] sm:$0xff]  ;;  %v349_v43 = vld [vmem:[%s1497_s26 + $0x2b0] sm:$0xff]  ;;  %v1373_v44 = vpack.c.bf16 %v358_v37, %v350_v36  ;;  %v364_v46 = vld [vmem:[%s1497_s26 + $0x328] sm:$0xff] }
  0x37   : > { %1356 = vmatpush1.bf16.msra.mxu1 %v1355_v53  ;;  %473 = vmatprep.mubr.f32.mxu0 %v1436_v1  ;;  %v357_v45 = vld [vmem:[%s1497_s26 + $0x2f0] sm:$0xff]  ;;  %v372_v47 = vld [vmem:[%s1497_s26 + $0x368] sm:$0xff]  ;;  %v366_v48 = vld [vmem:[%s1497_s26 + $0x338] sm:$0xff]  ;;  %v1343_v51 = vpack.c.bf16 %v355_v42, %v347_v41 }
  0x38   : > { %550 = vmatprep.mubr.f32.mxu1 %v1436_v1  ;;  %1326 = vmatprep.subr.bf16.mxu0 %v1325_v57  ;;  %v374_v50 = vld [vmem:[%s1497_s26 + $0x378] sm:$0xff]  ;;  %v1375_v52 = vpack.c.bf16 %v357_v45, %v349_v43  ;;  %v1345_v53 = vpack.c.bf16 %v372_v47, %v364_v46  ;;  %v363_v54 = vld [vmem:[%s1497_s26 + $0x320] sm:$0xff]  ;;  %v365_v56 = vld [vmem:[%s1497_s26 + $0x330] sm:$0xff] }
  0x39   : > { %474 = vmatmul.mubr.f32.gmra.mrb[2].mxu0 %v1593_v0  ;;  %1358 = vmatprep.subr.bf16.mxu1 %v1357_v61  ;;  %v371_v55 = vld [vmem:[%s1497_s26 + $0x360] sm:$0xff]  ;;  %v1377_v57 = vpack.c.bf16 %v374_v50, %v366_v48  ;;  %v373_v58 = vld [vmem:[%s1497_s26 + $0x370] sm:$0xff]  ;;  %v380_v59 = vld [vmem:[%s1497_s26 + $0x3a8] sm:$0xff] }
  0x3a   : > { %551 = vmatmul.mubr.f32.gmra.mrb[2].mxu1 %v1593_v0  ;;  %1328 = vmatpush1.bf16.msra.mxu0 %v1327_v2  ;;  %v388_v60 = vld [vmem:[%s1497_s26 + $0x3e8] sm:$0xff]  ;;  %v382_v61 = vld [vmem:[%s1497_s26 + $0x3b8] sm:$0xff]  ;;  %v1347_v63 = vpack.c.bf16 %v371_v55, %v363_v54  ;;  %v1379_v2 = vpack.c.bf16 %v373_v58, %v365_v56  ;;  %v387_v5 = vld [vmem:[%s1497_s26 + $0x3e0] sm:$0xff] }
  0x3b   : > { %1360 = vmatpush1.bf16.msra.mxu1 %v1359_v3  ;;  %1330 = vmatprep.subr.bf16.mxu0 %v1329_v4  ;;  %v390_v62 = vld [vmem:[%s1497_s26 + $0x3f8] sm:$0xff]  ;;  %v1349_v3 = vpack.c.bf16 %v388_v60, %v380_v59  ;;  %v379_v4 = vld [vmem:[%s1497_s26 + $0x3a0] sm:$0xff]  ;;  %v381_v7 = vld [vmem:[%s1497_s26 + $0x3b0] sm:$0xff] }
  0x3c   : > { %1362 = vmatprep.subr.bf16.mxu1 %v1361_v8  ;;  %621 = vmatprep.mubr.f32.mxu0 %v1436_v1  ;;  %v1381_v6 = vpack.c.bf16 %v390_v62, %v382_v61  ;;  %v389_v8 = vld [vmem:[%s1497_s26 + $0x3f0] sm:$0xff]  ;;  %v1351_v9 = vpack.c.bf16 %v387_v5, %v379_v4 }
  0x3d   : > { %698 = vmatprep.mubr.f32.mxu1 %v1436_v1  ;;  %v1383_v10 = vpack.c.bf16 %v389_v8, %v381_v7 }
  0x3e   : > { %1332 = vmatpush1.bf16.msra.mxu0 %v1331_v14 }
  0x3f   : > { %1364 = vmatpush1.bf16.msra.mxu1 %v1363_v15  ;;  %1334 = vmatprep.subr.bf16.mxu0 %v1333_v16 }
  0x40   : > { %1366 = vmatprep.subr.bf16.mxu1 %v1365_v20 }
  0x42   : > { %1336 = vmatpush1.bf16.msra.mxu0 %v1335_v26 }
  0x43   : > { %1368 = vmatpush1.bf16.msra.mxu1 %v1367_v27  ;;  %1338 = vmatprep.subr.bf16.mxu0 %v1337_v28 }
  0x44   : > { %1370 = vmatprep.subr.bf16.mxu1 %v1369_v32 }
  0x46   : > { %1340 = vmatpush1.bf16.msra.mxu0 %v1339_v38 }
  0x47   : > { %1372 = vmatpush1.bf16.msra.mxu1 %v1371_v39  ;;  %1342 = vmatprep.subr.bf16.mxu0 %v1341_v40 }
  0x48   : > { %1374 = vmatprep.subr.bf16.mxu1 %v1373_v44 }
  0x4a   : > { %1344 = vmatpush1.bf16.msra.mxu0 %v1343_v51 }
  0x4b   : > { %1376 = vmatpush1.bf16.msra.mxu1 %v1375_v52  ;;  %1346 = vmatprep.subr.bf16.mxu0 %v1345_v53 }
  0x4c   : > { %1378 = vmatprep.subr.bf16.mxu1 %v1377_v57 }
  0x4e   : > { %1348 = vmatpush1.bf16.msra.mxu0 %v1347_v63 }
  0x4f   : > { %1380 = vmatpush1.bf16.msra.mxu1 %v1379_v2  ;;  %1350 = vmatprep.subr.bf16.mxu0 %v1349_v3 }
  0x50   : > { %1382 = vmatprep.subr.bf16.mxu1 %v1381_v6 }
  0x52   : > { %1352 = vmatpush1.bf16.msra.mxu0 %v1351_v9 }
  0x53   : > { %1384 = vmatpush1.bf16.msra.mxu1 %v1383_v10 }
  0x55   : > { %622 = vmatmul.mubr.f32.vlgmr.msra.gmra.mrb[4].mxu0 %v1576_v49 }
  0x56   : > { %699 = vmatmul.mubr.f32.vlgmr.msra.gmra.mrb[4].mxu1 %v1576_v49  ;;  %627 = vmatprep.mubr.f32.mxu0 %v1436_v1 }
  0x57   : > { %704 = vmatprep.mubr.f32.mxu1 %v1436_v1 }
  0x59   : > { %628 = vmatmul.mubr.f32.gmra.mrb[6].mxu0 %v1593_v0 }
  0x5a   : > { %705 = vmatmul.mubr.f32.gmra.mrb[6].mxu1 %v1593_v0 }
  0x88   : > { %v1651_v11 = vpop.permute.xlu0 %395 }
  0x8c   : > { %v401_v49 = vpop.permute.xlu0 %400 }
 0x108   : > { %v469_v12 = vpop.f32.mrb[0].mxu0 }
 0x109   : > { %v546_v13 = vpop.f32.mrb[0].mxu1  ;;  %v471_v14 = vpop.f32.mrb[1].mxu0  ;;  %v470_v15 = vadd.f32 %v469_v12, %v1651_v11 }
 0x10a   : > { %v547_v16 = vadd.f32 %v546_v13, %v1651_v11  ;;  %v548_v17 = vpop.f32.mrb[1].mxu1  ;;  %v472_v36 = vadd.f32 %v471_v14, %v1651_v11 }
 0x10b   : > { %719 = vxpose.xlu1.b32.start.end [1/1] (short) %v470_v15, 128  ;;  %v549_v37 = vadd.f32 %v548_v17, %v1651_v11 }
 0x10c   : > { %783 = vxpose.xlu0.b32.start.end [1/1] (short) %v547_v16, 128  ;;  %v475_v1 = vpop.f32.mrb[2].mxu0 }
 0x10d   : > { %v476_v0 = vadd.f32 %v475_v1, %v401_v49  ;;  %v552_v18 = vpop.f32.mrb[2].mxu1  ;;  %v477_v19 = vpop.f32.mrb[3].mxu0 }
 0x10e   : > { %v553_v20 = vadd.f32 %v552_v18, %v401_v49  ;;  %v478_v21 = vadd.f32 %v477_v19, %v401_v49  ;;  %v554_v22 = vpop.f32.mrb[3].mxu1 }
 0x10f   : > { %711 = vst [vmem:[%s259_s8] sm:$0xff] %v476_v0  ;;  %v555_v23 = vadd.f32 %v554_v22, %v401_v49 }
 0x110   : > { %713 = vst [vmem:[%s259_s8 + $0x10] sm:$0xff] %v553_v20  ;;  %712 = vst [vmem:[%s259_s8 + $0x8] sm:$0xff] %v478_v21 }
 0x111   : > { %714 = vst [vmem:[%s259_s8 + $0x18] sm:$0xff] %v555_v23 }
 0x128   : > { %v623_v24 = vpop.f32.mrb[4].mxu0 }
 0x129   : > { %v1659_v25 = vpop.f32.mrb[4].mxu1  ;;  %v625_v26 = vpop.f32.mrb[5].mxu0  ;;  %v624_v38 = vadd.f32 %v623_v24, %v1651_v11 }
 0x12a   : > { %v1661_v27 = vpop.f32.mrb[5].mxu1  ;;  %v626_v39 = vadd.f32 %v625_v26, %v1651_v11  ;;  %v701_v7 = vadd.f32 %v1659_v25, %v1651_v11 }
 0x12b   : > { %v703_v8 = vadd.f32 %v1661_v27, %v1651_v11 }
 0x12c   : > { %v629_v28 = vpop.f32.mrb[6].mxu0 }
 0x12d   : > { %v630_v29 = vadd.f32 %v629_v28, %v401_v49  ;;  %v706_v30 = vpop.f32.mrb[6].mxu1  ;;  %v631_v31 = vpop.f32.mrb[7].mxu0 }
 0x12e   : > { %v707_v32 = vadd.f32 %v706_v30, %v401_v49  ;;  %v632_v33 = vadd.f32 %v631_v31, %v401_v49  ;;  %v708_v34 = vpop.f32.mrb[7].mxu1 }
 0x12f   : > { %715 = vst [vmem:[%s259_s8 + $0x20] sm:$0xff] %v630_v29  ;;  %v709_v35 = vadd.f32 %v708_v34, %v401_v49 }
 0x130   : > { %717 = vst [vmem:[%s259_s8 + $0x30] sm:$0xff] %v707_v32  ;;  %716 = vst [vmem:[%s259_s8 + $0x28] sm:$0xff] %v632_v33 }
 0x131   : > { %718 = vst [vmem:[%s259_s8 + $0x38] sm:$0xff] %v709_v35 }
 0x148   : > { %751 = vxpose.xlu1.b32.start.end [1/1] (short) %v472_v36, 128 }
 0x149   : > { %815 = vxpose.xlu0.b32.start.end [1/1] (short) %v549_v37, 128 }
 0x185   : > { %847 = vxpose.xlu1.b32.start.end [1/1] (short) %v624_v38, 128 }
 0x186   : > { %879 = vxpose.xlu0.b32.start.end [1/1] (short) %v626_v39, 128 }
 0x18b   : > { %v735_v40 = vpop.trf.xlu1 }
 0x18c   : > { %v799_v41 = vpop.trf.xlu0  ;;  %976 = vst.msk [vmem:[%s1672_s11] sm:$0xff] %vm975_vm0, %v735_v40 }
 0x18d   : > { %1008 = vst.msk [vmem:[%s1672_s11 + $0x100] sm:$0xff] %vm975_vm0, %v799_v41 }
 0x18f   : > { %v736_v42 = vpop.trf.xlu1 }
 0x190   : > { %v800_v43 = vpop.trf.xlu0  ;;  %977 = vst.msk [vmem:[%s1672_s11 + $0x8] sm:$0xff] %vm975_vm0, %v736_v42 }
 0x191   : > { %1009 = vst.msk [vmem:[%s1672_s11 + $0x108] sm:$0xff] %vm975_vm0, %v800_v43 }
 0x193   : > { %v737_v44 = vpop.trf.xlu1 }
 0x194   : > { %v801_v45 = vpop.trf.xlu0  ;;  %978 = vst.msk [vmem:[%s1672_s11 + $0x10] sm:$0xff] %vm975_vm0, %v737_v44 }
 0x195   : > { %1010 = vst.msk [vmem:[%s1672_s11 + $0x110] sm:$0xff] %vm975_vm0, %v801_v45 }
 0x197   : > { %v738_v46 = vpop.trf.xlu1 }
 0x198   : > { %v802_v47 = vpop.trf.xlu0  ;;  %979 = vst.msk [vmem:[%s1672_s11 + $0x18] sm:$0xff] %vm975_vm0, %v738_v46 }
 0x199   : > { %1011 = vst.msk [vmem:[%s1672_s11 + $0x118] sm:$0xff] %vm975_vm0, %v802_v47 }
 0x19b   : > { %v739_v48 = vpop.trf.xlu1 }
 0x19c   : > { %v803_v50 = vpop.trf.xlu0  ;;  %980 = vst.msk [vmem:[%s1672_s11 + $0x20] sm:$0xff] %vm975_vm0, %v739_v48 }
 0x19d   : > { %1012 = vst.msk [vmem:[%s1672_s11 + $0x120] sm:$0xff] %vm975_vm0, %v803_v50 }
 0x19f   : > { %v740_v51 = vpop.trf.xlu1 }
 0x1a0   : > { %v804_v52 = vpop.trf.xlu0  ;;  %981 = vst.msk [vmem:[%s1672_s11 + $0x28] sm:$0xff] %vm975_vm0, %v740_v51 }
 0x1a1   : > { %1013 = vst.msk [vmem:[%s1672_s11 + $0x128] sm:$0xff] %vm975_vm0, %v804_v52 }
 0x1a3   : > { %v741_v53 = vpop.trf.xlu1 }
 0x1a4   : > { %v805_v54 = vpop.trf.xlu0  ;;  %982 = vst.msk [vmem:[%s1672_s11 + $0x30] sm:$0xff] %vm975_vm0, %v741_v53 }
 0x1a5   : > { %1014 = vst.msk [vmem:[%s1672_s11 + $0x130] sm:$0xff] %vm975_vm0, %v805_v54 }
 0x1a7   : > { %v742_v55 = vpop.trf.xlu1 }
 0x1a8   : > { %v806_v56 = vpop.trf.xlu0  ;;  %983 = vst.msk [vmem:[%s1672_s11 + $0x38] sm:$0xff] %vm975_vm0, %v742_v55 }
 0x1a9   : > { %1015 = vst.msk [vmem:[%s1672_s11 + $0x138] sm:$0xff] %vm975_vm0, %v806_v56 }
 0x1ab   : > { %v743_v57 = vpop.trf.xlu1 }
 0x1ac   : > { %v807_v58 = vpop.trf.xlu0  ;;  %984 = vst.msk [vmem:[%s1672_s11 + $0x40] sm:$0xff] %vm975_vm0, %v743_v57 }
 0x1ad   : > { %1016 = vst.msk [vmem:[%s1672_s11 + $0x140] sm:$0xff] %vm975_vm0, %v807_v58 }
 0x1af   : > { %v744_v59 = vpop.trf.xlu1 }
 0x1b0   : > { %v808_v60 = vpop.trf.xlu0  ;;  %985 = vst.msk [vmem:[%s1672_s11 + $0x48] sm:$0xff] %vm975_vm0, %v744_v59 }
 0x1b1   : > { %1017 = vst.msk [vmem:[%s1672_s11 + $0x148] sm:$0xff] %vm975_vm0, %v808_v60 }
 0x1b3   : > { %v745_v61 = vpop.trf.xlu1 }
 0x1b4   : > { %v809_v62 = vpop.trf.xlu0  ;;  %986 = vst.msk [vmem:[%s1672_s11 + $0x50] sm:$0xff] %vm975_vm0, %v745_v61 }
 0x1b5   : > { %1018 = vst.msk [vmem:[%s1672_s11 + $0x150] sm:$0xff] %vm975_vm0, %v809_v62 }
 0x1b7   : > { %v746_v63 = vpop.trf.xlu1 }
 0x1b8   : > { %v810_v2 = vpop.trf.xlu0  ;;  %987 = vst.msk [vmem:[%s1672_s11 + $0x58] sm:$0xff] %vm975_vm0, %v746_v63 }
 0x1b9   : > { %1019 = vst.msk [vmem:[%s1672_s11 + $0x158] sm:$0xff] %vm975_vm0, %v810_v2 }
 0x1bb   : > { %v747_v3 = vpop.trf.xlu1 }
 0x1bc   : > { %v811_v4 = vpop.trf.xlu0  ;;  %988 = vst.msk [vmem:[%s1672_s11 + $0x60] sm:$0xff] %vm975_vm0, %v747_v3 }
 0x1bd   : > { %1020 = vst.msk [vmem:[%s1672_s11 + $0x160] sm:$0xff] %vm975_vm0, %v811_v4 }
 0x1bf   : > { %v748_v5 = vpop.trf.xlu1 }
 0x1c0   : > { %v812_v6 = vpop.trf.xlu0  ;;  %989 = vst.msk [vmem:[%s1672_s11 + $0x68] sm:$0xff] %vm975_vm0, %v748_v5 }
 0x1c1   : > { %1021 = vst.msk [vmem:[%s1672_s11 + $0x168] sm:$0xff] %vm975_vm0, %v812_v6 }
 0x1c3   : > { %v749_v9 = vpop.trf.xlu1  ;;  %911 = vxpose.xlu1.b32.start.end [1/1] (short) %v701_v7, 128 }
 0x1c4   : > { %v813_v10 = vpop.trf.xlu0  ;;  %943 = vxpose.xlu0.b32.start.end [1/1] (short) %v703_v8, 128  ;;  %990 = vst.msk [vmem:[%s1672_s11 + $0x70] sm:$0xff] %vm975_vm0, %v749_v9 }
 0x1c5   : > { %1022 = vst.msk [vmem:[%s1672_s11 + $0x170] sm:$0xff] %vm975_vm0, %v813_v10 }
 0x1c7   : > { %v750_v12 = vpop.trf.xlu1 }
 0x1c8   : > { %v814_v13 = vpop.trf.xlu0  ;;  %991 = vst.msk [vmem:[%s1672_s11 + $0x78] sm:$0xff] %vm975_vm0, %v750_v12 }
 0x1c9   : > { %1023 = vst.msk [vmem:[%s1672_s11 + $0x178] sm:$0xff] %vm975_vm0, %v814_v13 }
 0x1cb   : > { %v767_v11 = vpop.trf.xlu1 }
 0x1cc   : > { %v831_v14 = vpop.trf.xlu0  ;;  %992 = vst.msk [vmem:[%s1672_s11 + $0x80] sm:$0xff] %vm975_vm0, %v767_v11 }
 0x1cd   : > { %1024 = vst.msk [vmem:[%s1672_s11 + $0x180] sm:$0xff] %vm975_vm0, %v831_v14 }
 0x1cf   : > { %v768_v15 = vpop.trf.xlu1 }
 0x1d0   : > { %v832_v16 = vpop.trf.xlu0  ;;  %993 = vst.msk [vmem:[%s1672_s11 + $0x88] sm:$0xff] %vm975_vm0, %v768_v15 }
 0x1d1   : > { %1025 = vst.msk [vmem:[%s1672_s11 + $0x188] sm:$0xff] %vm975_vm0, %v832_v16 }
 0x1d3   : > { %v769_v17 = vpop.trf.xlu1 }
 0x1d4   : > { %v833_v49 = vpop.trf.xlu0  ;;  %994 = vst.msk [vmem:[%s1672_s11 + $0x90] sm:$0xff] %vm975_vm0, %v769_v17 }
 0x1d5   : > { %1026 = vst.msk [vmem:[%s1672_s11 + $0x190] sm:$0xff] %vm975_vm0, %v833_v49 }
 0x1d7   : > { %v770_v1 = vpop.trf.xlu1 }
 0x1d8   : > { %v834_v0 = vpop.trf.xlu0  ;;  %995 = vst.msk [vmem:[%s1672_s11 + $0x98] sm:$0xff] %vm975_vm0, %v770_v1 }
 0x1d9   : > { %1027 = vst.msk [vmem:[%s1672_s11 + $0x198] sm:$0xff] %vm975_vm0, %v834_v0 }
 0x1db   : > { %v771_v18 = vpop.trf.xlu1 }
 0x1dc   : > { %v835_v19 = vpop.trf.xlu0  ;;  %996 = vst.msk [vmem:[%s1672_s11 + $0xa0] sm:$0xff] %vm975_vm0, %v771_v18 }
 0x1dd   : > { %1028 = vst.msk [vmem:[%s1672_s11 + $0x1a0] sm:$0xff] %vm975_vm0, %v835_v19 }
 0x1df   : > { %v772_v20 = vpop.trf.xlu1 }
 0x1e0   : > { %v836_v21 = vpop.trf.xlu0  ;;  %997 = vst.msk [vmem:[%s1672_s11 + $0xa8] sm:$0xff] %vm975_vm0, %v772_v20 }
 0x1e1   : > { %1029 = vst.msk [vmem:[%s1672_s11 + $0x1a8] sm:$0xff] %vm975_vm0, %v836_v21 }
 0x1e3   : > { %v773_v22 = vpop.trf.xlu1 }
 0x1e4   : > { %v837_v23 = vpop.trf.xlu0  ;;  %998 = vst.msk [vmem:[%s1672_s11 + $0xb0] sm:$0xff] %vm975_vm0, %v773_v22 }
 0x1e5   : > { %1030 = vst.msk [vmem:[%s1672_s11 + $0x1b0] sm:$0xff] %vm975_vm0, %v837_v23 }
 0x1e7   : > { %v774_v24 = vpop.trf.xlu1 }
 0x1e8   : > { %v838_v25 = vpop.trf.xlu0  ;;  %999 = vst.msk [vmem:[%s1672_s11 + $0xb8] sm:$0xff] %vm975_vm0, %v774_v24 }
 0x1e9   : > { %1031 = vst.msk [vmem:[%s1672_s11 + $0x1b8] sm:$0xff] %vm975_vm0, %v838_v25 }
 0x1eb   : > { %v775_v26 = vpop.trf.xlu1 }
 0x1ec   : > { %v839_v27 = vpop.trf.xlu0  ;;  %1000 = vst.msk [vmem:[%s1672_s11 + $0xc0] sm:$0xff] %vm975_vm0, %v775_v26 }
 0x1ed   : > { %1032 = vst.msk [vmem:[%s1672_s11 + $0x1c0] sm:$0xff] %vm975_vm0, %v839_v27 }
 0x1ef   : > { %v776_v28 = vpop.trf.xlu1 }
 0x1f0   : > { %v840_v29 = vpop.trf.xlu0  ;;  %1001 = vst.msk [vmem:[%s1672_s11 + $0xc8] sm:$0xff] %vm975_vm0, %v776_v28 }
 0x1f1   : > { %1033 = vst.msk [vmem:[%s1672_s11 + $0x1c8] sm:$0xff] %vm975_vm0, %v840_v29 }
 0x1f3   : > { %v777_v30 = vpop.trf.xlu1 }
 0x1f4   : > { %v841_v31 = vpop.trf.xlu0  ;;  %1002 = vst.msk [vmem:[%s1672_s11 + $0xd0] sm:$0xff] %vm975_vm0, %v777_v30 }
 0x1f5   : > { %1034 = vst.msk [vmem:[%s1672_s11 + $0x1d0] sm:$0xff] %vm975_vm0, %v841_v31 }
 0x1f7   : > { %v778_v32 = vpop.trf.xlu1 }
 0x1f8   : > { %v842_v33 = vpop.trf.xlu0  ;;  %1003 = vst.msk [vmem:[%s1672_s11 + $0xd8] sm:$0xff] %vm975_vm0, %v778_v32 }
 0x1f9   : > { %1035 = vst.msk [vmem:[%s1672_s11 + $0x1d8] sm:$0xff] %vm975_vm0, %v842_v33 }
 0x1fb   : > { %v779_v34 = vpop.trf.xlu1 }
 0x1fc   : > { %v843_v35 = vpop.trf.xlu0  ;;  %1004 = vst.msk [vmem:[%s1672_s11 + $0xe0] sm:$0xff] %vm975_vm0, %v779_v34 }
 0x1fd   : > { %1036 = vst.msk [vmem:[%s1672_s11 + $0x1e0] sm:$0xff] %vm975_vm0, %v843_v35 }
 0x1ff   : > { %v780_v36 = vpop.trf.xlu1 }
 0x200   : > { %v844_v37 = vpop.trf.xlu0  ;;  %1005 = vst.msk [vmem:[%s1672_s11 + $0xe8] sm:$0xff] %vm975_vm0, %v780_v36 }
 0x201   : > { %1037 = vst.msk [vmem:[%s1672_s11 + $0x1e8] sm:$0xff] %vm975_vm0, %v844_v37 }
 0x203   : > { %v781_v38 = vpop.trf.xlu1 }
 0x204   : > { %v845_v39 = vpop.trf.xlu0  ;;  %1006 = vst.msk [vmem:[%s1672_s11 + $0xf0] sm:$0xff] %vm975_vm0, %v781_v38 }
 0x205   : > { %1038 = vst.msk [vmem:[%s1672_s11 + $0x1f0] sm:$0xff] %vm975_vm0, %v845_v39 }
 0x207   : > { %v782_v40 = vpop.trf.xlu1 }
 0x208   : > { %v846_v41 = vpop.trf.xlu0  ;;  %1007 = vst.msk [vmem:[%s1672_s11 + $0xf8] sm:$0xff] %vm975_vm0, %v782_v40 }
 0x209   : > { %1039 = vst.msk [vmem:[%s1672_s11 + $0x1f8] sm:$0xff] %vm975_vm0, %v846_v41 }
 0x20b   : > { %v863_v42 = vpop.trf.xlu1 }
 0x20c   : > { %v895_v43 = vpop.trf.xlu0  ;;  %1040 = vst.msk [vmem:[%s1672_s11 + $0x200] sm:$0xff] %vm975_vm0, %v863_v42 }
 0x20d   : > { %1056 = vst.msk [vmem:[%s1672_s11 + $0x280] sm:$0xff] %vm975_vm0, %v895_v43 }
 0x20f   : > { %v864_v44 = vpop.trf.xlu1 }
 0x210   : > { %v896_v45 = vpop.trf.xlu0  ;;  %1041 = vst.msk [vmem:[%s1672_s11 + $0x208] sm:$0xff] %vm975_vm0, %v864_v44 }
 0x211   : > { %1057 = vst.msk [vmem:[%s1672_s11 + $0x288] sm:$0xff] %vm975_vm0, %v896_v45 }
 0x213   : > { %v865_v46 = vpop.trf.xlu1 }
 0x214   : > { %v897_v47 = vpop.trf.xlu0  ;;  %1042 = vst.msk [vmem:[%s1672_s11 + $0x210] sm:$0xff] %vm975_vm0, %v865_v46 }
 0x215   : > { %1058 = vst.msk [vmem:[%s1672_s11 + $0x290] sm:$0xff] %vm975_vm0, %v897_v47 }
 0x217   : > { %v866_v48 = vpop.trf.xlu1 }
 0x218   : > { %v898_v50 = vpop.trf.xlu0  ;;  %1043 = vst.msk [vmem:[%s1672_s11 + $0x218] sm:$0xff] %vm975_vm0, %v866_v48 }
 0x219   : > { %1059 = vst.msk [vmem:[%s1672_s11 + $0x298] sm:$0xff] %vm975_vm0, %v898_v50 }
 0x21b   : > { %v867_v51 = vpop.trf.xlu1 }
 0x21c   : > { %v899_v52 = vpop.trf.xlu0  ;;  %1044 = vst.msk [vmem:[%s1672_s11 + $0x220] sm:$0xff] %vm975_vm0, %v867_v51 }
 0x21d   : > { %1060 = vst.msk [vmem:[%s1672_s11 + $0x2a0] sm:$0xff] %vm975_vm0, %v899_v52 }
 0x21f   : > { %v868_v53 = vpop.trf.xlu1 }
 0x220   : > { %v900_v54 = vpop.trf.xlu0  ;;  %1045 = vst.msk [vmem:[%s1672_s11 + $0x228] sm:$0xff] %vm975_vm0, %v868_v53 }
 0x221   : > { %1061 = vst.msk [vmem:[%s1672_s11 + $0x2a8] sm:$0xff] %vm975_vm0, %v900_v54 }
 0x223   : > { %v869_v55 = vpop.trf.xlu1 }
 0x224   : > { %v901_v56 = vpop.trf.xlu0  ;;  %1046 = vst.msk [vmem:[%s1672_s11 + $0x230] sm:$0xff] %vm975_vm0, %v869_v55 }
 0x225   : > { %1062 = vst.msk [vmem:[%s1672_s11 + $0x2b0] sm:$0xff] %vm975_vm0, %v901_v56 }
 0x227   : > { %v870_v57 = vpop.trf.xlu1 }
 0x228   : > { %v902_v58 = vpop.trf.xlu0  ;;  %1047 = vst.msk [vmem:[%s1672_s11 + $0x238] sm:$0xff] %vm975_vm0, %v870_v57 }
 0x229   : > { %1063 = vst.msk [vmem:[%s1672_s11 + $0x2b8] sm:$0xff] %vm975_vm0, %v902_v58 }
 0x22b   : > { %v871_v59 = vpop.trf.xlu1 }
 0x22c   : > { %v903_v60 = vpop.trf.xlu0  ;;  %1048 = vst.msk [vmem:[%s1672_s11 + $0x240] sm:$0xff] %vm975_vm0, %v871_v59 }
 0x22d   : > { %1064 = vst.msk [vmem:[%s1672_s11 + $0x2c0] sm:$0xff] %vm975_vm0, %v903_v60 }
 0x22f   : > { %v872_v61 = vpop.trf.xlu1 }
 0x230   : > { %v904_v62 = vpop.trf.xlu0  ;;  %1049 = vst.msk [vmem:[%s1672_s11 + $0x248] sm:$0xff] %vm975_vm0, %v872_v61 }
 0x231   : > { %1065 = vst.msk [vmem:[%s1672_s11 + $0x2c8] sm:$0xff] %vm975_vm0, %v904_v62 }
 0x233   : > { %v873_v63 = vpop.trf.xlu1 }
 0x234   : > { %v905_v2 = vpop.trf.xlu0  ;;  %1050 = vst.msk [vmem:[%s1672_s11 + $0x250] sm:$0xff] %vm975_vm0, %v873_v63 }
 0x235   : > { %1066 = vst.msk [vmem:[%s1672_s11 + $0x2d0] sm:$0xff] %vm975_vm0, %v905_v2 }
 0x237   : > { %v874_v3 = vpop.trf.xlu1 }
 0x238   : > { %v906_v4 = vpop.trf.xlu0  ;;  %1051 = vst.msk [vmem:[%s1672_s11 + $0x258] sm:$0xff] %vm975_vm0, %v874_v3 }
 0x239   : > { %1067 = vst.msk [vmem:[%s1672_s11 + $0x2d8] sm:$0xff] %vm975_vm0, %v906_v4 }
 0x23b   : > { %v875_v5 = vpop.trf.xlu1 }
 0x23c   : > { %v907_v6 = vpop.trf.xlu0  ;;  %1052 = vst.msk [vmem:[%s1672_s11 + $0x260] sm:$0xff] %vm975_vm0, %v875_v5 }
 0x23d   : > { %1068 = vst.msk [vmem:[%s1672_s11 + $0x2e0] sm:$0xff] %vm975_vm0, %v907_v6 }
 0x23f   : > { %v876_v7 = vpop.trf.xlu1 }
 0x240   : > { %v908_v8 = vpop.trf.xlu0  ;;  %1053 = vst.msk [vmem:[%s1672_s11 + $0x268] sm:$0xff] %vm975_vm0, %v876_v7 }
 0x241   : > { %1069 = vst.msk [vmem:[%s1672_s11 + $0x2e8] sm:$0xff] %vm975_vm0, %v908_v8 }
 0x243   : > { %v877_v9 = vpop.trf.xlu1 }
 0x244   : > { %v909_v10 = vpop.trf.xlu0  ;;  %1054 = vst.msk [vmem:[%s1672_s11 + $0x270] sm:$0xff] %vm975_vm0, %v877_v9 }
 0x245   : > { %1070 = vst.msk [vmem:[%s1672_s11 + $0x2f0] sm:$0xff] %vm975_vm0, %v909_v10 }
 0x247   : > { %v878_v12 = vpop.trf.xlu1 }
 0x248   : > { %v910_v13 = vpop.trf.xlu0  ;;  %1055 = vst.msk [vmem:[%s1672_s11 + $0x278] sm:$0xff] %vm975_vm0, %v878_v12 }
 0x249   : > { %1071 = vst.msk [vmem:[%s1672_s11 + $0x2f8] sm:$0xff] %vm975_vm0, %v910_v13 }
 0x24b   : > { %v927_v11 = vpop.trf.xlu1 }
 0x24c   : > { %v959_v14 = vpop.trf.xlu0  ;;  %1072 = vst.msk [vmem:[%s1672_s11 + $0x300] sm:$0xff] %vm975_vm0, %v927_v11 }
 0x24d   : > { %1088 = vst.msk [vmem:[%s1672_s11 + $0x380] sm:$0xff] %vm975_vm0, %v959_v14 }
 0x24f   : > { %v928_v15 = vpop.trf.xlu1 }
 0x250   : > { %v960_v16 = vpop.trf.xlu0  ;;  %1073 = vst.msk [vmem:[%s1672_s11 + $0x308] sm:$0xff] %vm975_vm0, %v928_v15 }
 0x251   : > { %1089 = vst.msk [vmem:[%s1672_s11 + $0x388] sm:$0xff] %vm975_vm0, %v960_v16 }
 0x253   : > { %v929_v17 = vpop.trf.xlu1 }
 0x254   : > { %v961_v49 = vpop.trf.xlu0  ;;  %1074 = vst.msk [vmem:[%s1672_s11 + $0x310] sm:$0xff] %vm975_vm0, %v929_v17 }
 0x255   : > { %1090 = vst.msk [vmem:[%s1672_s11 + $0x390] sm:$0xff] %vm975_vm0, %v961_v49 }
 0x257   : > { %v930_v1 = vpop.trf.xlu1 }
 0x258   : > { %v962_v0 = vpop.trf.xlu0  ;;  %1075 = vst.msk [vmem:[%s1672_s11 + $0x318] sm:$0xff] %vm975_vm0, %v930_v1 }
 0x259   : > { %1091 = vst.msk [vmem:[%s1672_s11 + $0x398] sm:$0xff] %vm975_vm0, %v962_v0 }
 0x25b   : > { %v931_v18 = vpop.trf.xlu1 }
 0x25c   : > { %v963_v19 = vpop.trf.xlu0  ;;  %1076 = vst.msk [vmem:[%s1672_s11 + $0x320] sm:$0xff] %vm975_vm0, %v931_v18 }
 0x25d   : > { %1092 = vst.msk [vmem:[%s1672_s11 + $0x3a0] sm:$0xff] %vm975_vm0, %v963_v19 }
 0x25f   : > { %v932_v20 = vpop.trf.xlu1 }
 0x260   : > { %v964_v21 = vpop.trf.xlu0  ;;  %1077 = vst.msk [vmem:[%s1672_s11 + $0x328] sm:$0xff] %vm975_vm0, %v932_v20 }
 0x261   : > { %1093 = vst.msk [vmem:[%s1672_s11 + $0x3a8] sm:$0xff] %vm975_vm0, %v964_v21 }
 0x263   : > { %v933_v22 = vpop.trf.xlu1 }
 0x264   : > { %v965_v23 = vpop.trf.xlu0  ;;  %1078 = vst.msk [vmem:[%s1672_s11 + $0x330] sm:$0xff] %vm975_vm0, %v933_v22 }
 0x265   : > { %1094 = vst.msk [vmem:[%s1672_s11 + $0x3b0] sm:$0xff] %vm975_vm0, %v965_v23 }
 0x267   : > { %v934_v24 = vpop.trf.xlu1 }
 0x268   : > { %v966_v25 = vpop.trf.xlu0  ;;  %1079 = vst.msk [vmem:[%s1672_s11 + $0x338] sm:$0xff] %vm975_vm0, %v934_v24 }
 0x269   : > { %1095 = vst.msk [vmem:[%s1672_s11 + $0x3b8] sm:$0xff] %vm975_vm0, %v966_v25 }
 0x26b   : > { %v935_v26 = vpop.trf.xlu1 }
 0x26c   : > { %v967_v27 = vpop.trf.xlu0  ;;  %1080 = vst.msk [vmem:[%s1672_s11 + $0x340] sm:$0xff] %vm975_vm0, %v935_v26 }
 0x26d   : > { %1096 = vst.msk [vmem:[%s1672_s11 + $0x3c0] sm:$0xff] %vm975_vm0, %v967_v27 }
 0x26f   : > { %v936_v28 = vpop.trf.xlu1 }
 0x270   : > { %v968_v29 = vpop.trf.xlu0  ;;  %1081 = vst.msk [vmem:[%s1672_s11 + $0x348] sm:$0xff] %vm975_vm0, %v936_v28 }
 0x271   : > { %1097 = vst.msk [vmem:[%s1672_s11 + $0x3c8] sm:$0xff] %vm975_vm0, %v968_v29 }
 0x273   : > { %v937_v30 = vpop.trf.xlu1 }
 0x274   : > { %v969_v31 = vpop.trf.xlu0  ;;  %1082 = vst.msk [vmem:[%s1672_s11 + $0x350] sm:$0xff] %vm975_vm0, %v937_v30 }
 0x275   : > { %1098 = vst.msk [vmem:[%s1672_s11 + $0x3d0] sm:$0xff] %vm975_vm0, %v969_v31 }
 0x277   : > { %v938_v32 = vpop.trf.xlu1 }
 0x278   : > { %v970_v33 = vpop.trf.xlu0  ;;  %1083 = vst.msk [vmem:[%s1672_s11 + $0x358] sm:$0xff] %vm975_vm0, %v938_v32 }
 0x279   : > { %1099 = vst.msk [vmem:[%s1672_s11 + $0x3d8] sm:$0xff] %vm975_vm0, %v970_v33 }
 0x27b   : > { %v939_v34 = vpop.trf.xlu1 }
 0x27c   : > { %v971_v35 = vpop.trf.xlu0  ;;  %1084 = vst.msk [vmem:[%s1672_s11 + $0x360] sm:$0xff] %vm975_vm0, %v939_v34 }
 0x27d   : > { %1100 = vst.msk [vmem:[%s1672_s11 + $0x3e0] sm:$0xff] %vm975_vm0, %v971_v35 }
 0x27f   : > { %v940_v36 = vpop.trf.xlu1 }
 0x280   : > { %v972_v37 = vpop.trf.xlu0  ;;  %1085 = vst.msk [vmem:[%s1672_s11 + $0x368] sm:$0xff] %vm975_vm0, %v940_v36 }
 0x281   : > { %1101 = vst.msk [vmem:[%s1672_s11 + $0x3e8] sm:$0xff] %vm975_vm0, %v972_v37 }
 0x283   : > { %v941_v38 = vpop.trf.xlu1 }
 0x284   : > { %v973_v39 = vpop.trf.xlu0  ;;  %1086 = vst.msk [vmem:[%s1672_s11 + $0x370] sm:$0xff] %vm975_vm0, %v941_v38 }
 0x285   : > { %1102 = vst.msk [vmem:[%s1672_s11 + $0x3f0] sm:$0xff] %vm975_vm0, %v973_v39 }
 0x287   : > { %v942_v40 = vpop.trf.xlu1 }
 0x288   : > { %v974_v41 = vpop.trf.xlu0  ;;  %1087 = vst.msk [vmem:[%s1672_s11 + $0x378] sm:$0xff] %vm975_vm0, %v942_v40 }
 0x289   : > { %1103 = vst.msk [vmem:[%s1672_s11 + $0x3f8] sm:$0xff] %vm975_vm0, %v974_v41 }
 0x28a PF: > { %s15_s17 = sadd.s32 1, %s1434_s17   ;;  %s1948_s15 = smov %s1430_s16 }
 0x28b   : > { %p12_p5 = scmp.ge.s32.totalorder %s15_s17, 4   ;;  %s1949_s16 = smov %s1951_s18 }
 0x28d   :  { %14 = sbr.rel (!%p12_p5) target bundleno = 2 (0x2), region = 74 }

// kernel: tile.23
= control target key start
LH: loop header
LB: loop body
LE: loop exit
PB: predicated region body
PF: predicated region fallthrough
CT: control target
= control target key end

     0   :  { %s28_s0 = inlined_call_operand.vmem [shape: f32[8], index: 0, kind: input, shape index: {}]   ;;  %s29_s1 = inlined_call_operand.vmem [shape: f32[15,8], index: 1, kind: output, shape index: {}]  }
   0x1   :  { %v4_v0 = vld [vmem:[%s28_s0] ss:$0 sm:$0xff] }
   0x2   :  { %5 = vst [vmem:[%s29_s1] sm:$0xff] %v4_v0  ;;  %8 = vst [vmem:[%s29_s1 + $0x8] sm:$0xff] %v4_v0 }

// kernel: tile.24
= control target key start
LH: loop header
LB: loop body
LE: loop exit
PB: predicated region body
PF: predicated region fallthrough
CT: control target
= control target key end

     0   :  { %s123_s10 = smov 112   ;;  %s124_s11 = smov 96   ;;  %vm3_vm0 = vcmask 64512   ;;  %vm9_vm1 = vcmask 982912   ;;  %vm15_vm2 = vcmask 917312   ;;  %vm21_vm3 = vcmask 851712   ;;  %s195_s0 = inlined_call_operand.vmem [shape: f32[15,8], index: 0, kind: input, shape index: {}]   ;;  %s196_s1 = inlined_call_operand.vmem [shape: f32[1,120], index: 1, kind: output, shape index: {}]  }
   0x1   :  { %v95_v0 = vld [vmem:[%s195_s0 + $0xe] sm:$0x1]   ;;  %v97_v1 = vld [vmem:[%s195_s0 + $0xc] sm:$0x1]   ;;  %v96_v2 = vld [vmem:[%s195_s0 + $0xd] sm:$0x1]  }
   0x2   :  { %7 = vrot.lane.b32.xlu0 %v95_v0, %s123_s10  ;;  %19 = vrot.lane.b32.xlu1 %v97_v1, %s124_s11  ;;  %v98_v3 = vld [vmem:[%s195_s0 + $0xb] sm:$0x1]   ;;  %s125_s16 = smov 104   ;;  %s126_s17 = smov 88   ;;  %v99_v4 = vld [vmem:[%s195_s0 + $0xa] sm:$0x1]  }
   0x3   :  { %v100_v5 = vld [vmem:[%s195_s0 + $0x9] sm:$0x1]   ;;  %v2_v6 = vld [vmem:[%s195_s0] sm:$0x1]   ;;  %s127_s24 = smov 80   ;;  %s128_s25 = smov 72  }
   0x4   :  { %4 = vst.msk [vmem:[#allocation0] sm:$0x1] %vm3_vm0, %v2_v6   ;;  %v101_v7 = vld [vmem:[%s195_s0 + $0x8] sm:$0x1]   ;;  %v102_v8 = vld [vmem:[%s195_s0 + $0x7] sm:$0x1]  }
   0x5   :  { %s129_s30 = smov 64   ;;  %s130_s2 = smov 56   ;;  %v103_v9 = vld [vmem:[%s195_s0 + $0x6] sm:$0x1]   ;;  %v104_v10 = vld [vmem:[%s195_s0 + $0x5] sm:$0x1]  }
   0x6   :  { %13 = vrot.lane.b32.xlu0 %v96_v2, %s125_s16  ;;  %25 = vrot.lane.b32.xlu1 %v98_v3, %s126_s17  ;;  %s131_s7 = smov 48   ;;  %s132_s8 = smov 40   ;;  %v105_v11 = vld [vmem:[%s195_s0 + $0x4] sm:$0x1]   ;;  %v106_v12 = vld [vmem:[%s195_s0 + $0x3] sm:$0x1]  }
   0x7   :  { %s133_s13 = smov 32   ;;  %s134_s14 = smov 24   ;;  %v107_v13 = vld [vmem:[%s195_s0 + $0x2] sm:$0x1]   ;;  %v108_v14 = vld [vmem:[%s195_s0 + $0x1] sm:$0x1]  }
   0x8   :  { %s135_s0 = smov 16   ;;  %s136_s19 = smov 8   ;;  %vm27_vm4 = vcmask 786112   ;;  %vm33_vm5 = vcmask 720512   ;;  %vm39_vm6 = vcmask 654912   ;;  %vm45_vm7 = vcmask 589312  }
   0x9   :  { %vm51_vm8 = vcmask 523712   ;;  %vm57_vm9 = vcmask 458112   ;;  %vm63_vm10 = vcmask 392512   ;;  %vm69_vm11 = vcmask 326912  }
   0xa   :  { %31 = vrot.lane.b32.xlu0 %v99_v4, %s127_s24  ;;  %37 = vrot.lane.b32.xlu1 %v100_v5, %s128_s25  ;;  %vm75_vm12 = vcmask 261312   ;;  %vm81_vm13 = vcmask 195712   ;;  %vm87_vm14 = vcmask 130112  }
   0xe   :  { %43 = vrot.lane.b32.xlu0 %v101_v7, %s129_s30  ;;  %49 = vrot.lane.b32.xlu1 %v102_v8, %s130_s2 }
  0x12   :  { %55 = vrot.lane.b32.xlu0 %v103_v9, %s131_s7  ;;  %61 = vrot.lane.b32.xlu1 %v104_v10, %s132_s8 }
  0x16   :  { %67 = vrot.lane.b32.xlu0 %v105_v11, %s133_s13  ;;  %73 = vrot.lane.b32.xlu1 %v106_v12, %s134_s14 }
  0x1a   :  { %79 = vrot.lane.b32.xlu0 %v107_v13, %s135_s0  ;;  %85 = vrot.lane.b32.xlu1 %v108_v14, %s136_s19 }
  0x74   :  { %v8_v15 = vpop.permute.xlu0 %7   ;;  %v20_v16 = vpop.permute.xlu1 %19  }
  0x75   :  { %10 = vst.msk [vmem:[#allocation0] sm:$0x1] %vm9_vm1, %v8_v15  }
  0x78   :  { %v14_v17 = vpop.permute.xlu0 %13   ;;  %v26_v18 = vpop.permute.xlu1 %25  }
  0x79   :  { %16 = vst.msk [vmem:[#allocation0] sm:$0x1] %vm15_vm2, %v14_v17  }
  0x7a   :  { %22 = vst.msk [vmem:[#allocation0] sm:$0x1] %vm21_vm3, %v20_v16  }
  0x7b   :  { %28 = vst.msk [vmem:[#allocation0] sm:$0x1] %vm27_vm4, %v26_v18  }
  0x7c   :  { %v32_v19 = vpop.permute.xlu0 %31   ;;  %v38_v20 = vpop.permute.xlu1 %37  }
  0x7d   :  { %34 = vst.msk [vmem:[#allocation0] sm:$0x1] %vm33_vm5, %v32_v19  }
  0x7e   :  { %40 = vst.msk [vmem:[#allocation0] sm:$0x1] %vm39_vm6, %v38_v20  }
  0x80   :  { %v44_v21 = vpop.permute.xlu0 %43   ;;  %v50_v22 = vpop.permute.xlu1 %49  }
  0x81   :  { %46 = vst.msk [vmem:[#allocation0] sm:$0x1] %vm45_vm7, %v44_v21  }
  0x82   :  { %52 = vst.msk [vmem:[#allocation0] sm:$0x1] %vm51_vm8, %v50_v22  }
  0x84   :  { %v56_v23 = vpop.permute.xlu0 %55   ;;  %v62_v24 = vpop.permute.xlu1 %61  }
  0x85   :  { %58 = vst.msk [vmem:[#allocation0] sm:$0x1] %vm57_vm9, %v56_v23  }
  0x86   :  { %64 = vst.msk [vmem:[#allocation0] sm:$0x1] %vm63_vm10, %v62_v24  }
  0x88   :  { %v68_v25 = vpop.permute.xlu0 %67   ;;  %v74_v26 = vpop.permute.xlu1 %73  }
  0x89   :  { %70 = vst.msk [vmem:[#allocation0] sm:$0x1] %vm69_vm11, %v68_v25  }
  0x8a   :  { %76 = vst.msk [vmem:[#allocation0] sm:$0x1] %vm75_vm12, %v74_v26  }
  0x8c   :  { %v80_v27 = vpop.permute.xlu0 %79   ;;  %v86_v28 = vpop.permute.xlu1 %85  }
  0x8d   :  { %82 = vst.msk [vmem:[#allocation0] sm:$0x1] %vm81_vm13, %v80_v27  }
  0x8e   :  { %88 = vst.msk [vmem:[#allocation0] sm:$0x1] %vm87_vm14, %v86_v28  }
  0x95   :  { %v92_v29 = vld [vmem:[#allocation0] sm:$0x1] }
  0x96   :  { %94 = vst [vmem:[%s196_s1] sm:$0x1] %v92_v29 }

// kernel: tile.28
= control target key start
LH: loop header
LB: loop body
LE: loop exit
PB: predicated region body
PF: predicated region fallthrough
CT: control target
= control target key end

     0   :  { %s22_s0 = inlined_call_operand.vmem [shape: f32[8], index: 0, kind: input, shape index: {}]   ;;  %s23_s1 = inlined_call_operand.vmem [shape: f32[3,8], index: 1, kind: output, shape index: {}]  }
   0x1   :  { %v4_v0 = vld [vmem:[%s22_s0] ss:$0 sm:$0xff] }
   0x2   :  { %5 = vst [vmem:[%s23_s1] sm:$0xf] %v4_v0 }

// kernel: tile.29
= control target key start
LH: loop header
LB: loop body
LE: loop exit
PB: predicated region body
PF: predicated region fallthrough
CT: control target
= control target key end

     0   :  { %vm7_vm0 = vcmask 64512   ;;  %s30_s8 = smov 8   ;;  %vm13_vm1 = vcmask 195712   ;;  %vm19_vm2 = vcmask 130112   ;;  %s47_s0 = inlined_call_operand.vmem [shape: f32[3,8], index: 0, kind: input, shape index: {}]   ;;  %s48_s1 = inlined_call_operand.vmem [shape: f32[1,24], index: 1, kind: output, shape index: {}]  }
   0x1   :  { %v4_v0 = vld [vmem:[%s47_s0] sm:$0xf]  ;;  %s29_s0 = smov 16  }
   0x2   :  { %5 = vst [vmem:[#allocation1] sm:$0xf] %v4_v0 }
   0x9   :  { %v10_v1 = vld [vmem:[#allocation1 + $0x2] sm:$0x1]   ;;  %v6_v2 = vld [vmem:[#allocation1] sm:$0x1]   ;;  %v16_v3 = vld [vmem:[#allocation1 + $0x1] sm:$0x1]  }
   0xa   :  { %11 = vrot.lane.b32.xlu0 %v10_v1, %s29_s0  ;;  %8 = vst.msk [vmem:[#allocation0] sm:$0x1] %vm7_vm0, %v6_v2  }
   0xe   :  { %17 = vrot.lane.b32.xlu0 %v16_v3, %s30_s8 }
  0x7c   :  { %v12_v4 = vpop.permute.xlu0 %11  }
  0x7d   :  { %14 = vst.msk [vmem:[#allocation0] sm:$0x1] %vm13_vm1, %v12_v4  }
  0x80   :  { %v18_v5 = vpop.permute.xlu0 %17  }
  0x81   :  { %20 = vst.msk [vmem:[#allocation0] sm:$0x1] %vm19_vm2, %v18_v5  }
  0x88   :  { %v24_v6 = vld [vmem:[#allocation0] sm:$0x1] }
  0x89   :  { %26 = vst [vmem:[%s48_s1] sm:$0x1] %v24_v6 }

// kernel: esa_layer.5
= control target key start
LH: loop header
LB: loop body
LE: loop exit
PB: predicated region body
PF: predicated region fallthrough
CT: control target
= control target key end

     0   :  { %s2991_s18 = smov 0   ;;  %s2993_s19 = smov 0   ;;  %s4099_s0 = inlined_call_operand.vmem [shape: f32[2,128,1024], index: 0, kind: input, shape index: {}]   ;;  %s4100_s1 = inlined_call_operand.vmem [shape: f32[2,8,1024], index: 1, kind: input, shape index: {}]   ;;  %s4101_s2 = inlined_call_operand.vmem [shape: f32[2,8,1024], index: 2, kind: input, shape index: {}]   ;;  %s4102_s3 = inlined_call_operand.vmem [shape: f32[128,8], index: 3, kind: input, shape index: {}]   ;;  %s4103_s4 = inlined_call_operand.vmem [shape: f32[128,1], index: 4, kind: input, shape index: {}]   ;;  %s4104_s5 = inlined_call_operand.vmem [shape: f32[2,128,1024], index: 5, kind: output, shape index: {}]  }
   0x1   :  { %s2995_s20 = smov 0  }
   0x2 LB: > { %s27_s21 = sadd.s32 1, %s2953_s19  ;;  %p2316_p0 = scmp.ge.s32.totalorder %s2957_s20, 1  ;;  %s2957_s20 = sphi %s2995_s20, %s15_s20   ;;  %s2953_s19 = sphi %s2993_s19, %s4192_s19   ;;  %s2949_s18 = sphi %s2991_s18, %s4191_s18  }
   0x3   : > { %p29_p1 = scmp.ge.s32.totalorder %s27_s21, 2  ;;  %p242_p2 = scmp.lt.s32.totalorder %s2957_s20, 3 }
   0x5   : > { %s4194_s21 = smov (%p29_p1, %s27_s21), 0  ;;  %p243_p3 = pnand %p2316_p0, %p242_p2 }
   0x7   : > { %246 = sbr.rel (%p243_p3) target bundleno = 520 (0x208), region = 40 }
   0xe   : > { %p297_p4 = scmp.lt.s32.totalorder %s2949_s18, 1  ;;  %v2959_v0 = vmov 0.0   ;;  %v2960_v1 = vmov 0   ;;  %v376_v2 = vld [vmem:[%s4103_s4] sm:$0xff]  ;;  %vm472_vm0 = vcmask 64512   ;;  %v3035_v28 = vld [vmem:[%s4102_s3 + $0x8] sm:$0xff] }
   0xf   : > { %585 = vmatprep.mubr.f32.mxu0 %v2959_v0  ;;  %746 = vmatprep.mubr.f32.mxu1 %v2959_v0  ;;  %v3026_v9 = vld [vmem:[%s4102_s3] sm:$0xff]  ;;  %v377_v29 = vld [vmem:[%s4103_s4 + $0x8] sm:$0xff]  ;;  %v378_v30 = vld [vmem:[%s4103_s4 + $0x10] sm:$0xff] }
  0x10   : > { %s4196_s18 = smov (!%p297_p4, %s2949_s18), 1  ;;  %2421 = vset.pattern.permute.xlu0 %v2960_v1  ;;  %2422 = vset.pattern.permute.xlu1 %v2960_v1  ;;  %v3054_v31 = vld [vmem:[%s4102_s3 + $0x10] sm:$0xff]  ;;  %v379_v32 = vld [vmem:[%s4103_s4 + $0x18] sm:$0xff]  ;;  %v380_v33 = vld [vmem:[%s4103_s4 + $0x20] sm:$0xff] }
  0x11   : > { %s2392_s22 = sshll.u32 %s4196_s18, 6  ;;  %394 = vperm.xlu0 %2421, %v376_v2   ;;  %404 = vperm.xlu1 %2422, %v378_v30   ;;  %v3071_v34 = vld [vmem:[%s4102_s3 + $0x18] sm:$0xff]  ;;  %v381_v35 = vld [vmem:[%s4103_s4 + $0x28] sm:$0xff]  ;;  %v382_v36 = vld [vmem:[%s4103_s4 + $0x30] sm:$0xff] }
  0x12   : > { %s314_s25 = scalar_lea.vmem %s4100_s1, %s2392_s22  ;;  %s324_s30 = scalar_lea.vmem %s4101_s2, %s2392_s22  ;;  %v3088_v37 = vld [vmem:[%s4102_s3 + $0x20] sm:$0xff]  ;;  %v383_v38 = vld [vmem:[%s4103_s4 + $0x38] sm:$0xff]  ;;  %v3105_v40 = vld [vmem:[%s4102_s3 + $0x28] sm:$0xff] }
  0x13   : > { %v337_v3 = vld [vmem:[%s314_s25 + $0x8] sm:$0xff]  ;;  %v339_v4 = vld [vmem:[%s314_s25 + $0x18] sm:$0xff]  ;;  %v336_v5 = vld [vmem:[%s314_s25] sm:$0xff] }
  0x14   : > { %v345_v6 = vld [vmem:[%s324_s30 + $0x8] sm:$0xff]  ;;  %v347_v7 = vld [vmem:[%s324_s30 + $0x18] sm:$0xff]  ;;  %v344_v8 = vld [vmem:[%s324_s30] sm:$0xff] }
  0x15   : > { %v353_v10 = vadd.f32 %v345_v6, %v337_v3  ;;  %v355_v11 = vadd.f32 %v347_v7, %v339_v4  ;;  %v352_v12 = vadd.f32 %v344_v8, %v336_v5  ;;  %v338_v13 = vld [vmem:[%s314_s25 + $0x10] sm:$0xff]  ;;  %v341_v15 = vld [vmem:[%s314_s25 + $0x28] sm:$0xff]  ;;  %v343_v18 = vld [vmem:[%s314_s25 + $0x38] sm:$0xff]  ;;  %399 = vperm.xlu0 %2421, %v377_v29   ;;  %409 = vperm.xlu1 %2422, %v379_v32  }
  0x16   : > { %v346_v14 = vld [vmem:[%s324_s30 + $0x10] sm:$0xff]  ;;  %v349_v17 = vld [vmem:[%s324_s30 + $0x28] sm:$0xff]  ;;  %v351_v19 = vld [vmem:[%s324_s30 + $0x38] sm:$0xff] }
  0x17   : > { %v354_v16 = vadd.f32 %v346_v14, %v338_v13  ;;  %521 = vmatprep.subr.mxu0 %v353_v10  ;;  %682 = vmatprep.subr.mxu1 %v355_v11  ;;  %v357_v20 = vadd.f32 %v349_v17, %v341_v15  ;;  %v359_v21 = vadd.f32 %v351_v19, %v343_v18  ;;  %v340_v22 = vld [vmem:[%s314_s25 + $0x20] sm:$0xff]  ;;  %v342_v24 = vld [vmem:[%s314_s25 + $0x30] sm:$0xff]  ;;  %v385_v41 = vld [vmem:[%s4103_s4 + $0x48] sm:$0xff] }
  0x18   : > { %v348_v23 = vld [vmem:[%s324_s30 + $0x20] sm:$0xff]  ;;  %522 = vmatpush1.msra.mxu0 %v352_v12  ;;  %v350_v26 = vld [vmem:[%s324_s30 + $0x30] sm:$0xff]  ;;  %v387_v44 = vld [vmem:[%s4103_s4 + $0x58] sm:$0xff]  ;;  %s2391_s30 = sshll.u32 %s4196_s18, 10 }
  0x19   : > { %683 = vmatpush1.msra.mxu1 %v354_v16  ;;  %v356_v25 = vadd.f32 %v348_v23, %v340_v22  ;;  %2325 = vmatmul.mubr.msk.f32.vlgmr.msra.gmra.mrb[0].mxu0 %vm472_vm0, %v3026_v9  ;;  %v358_v27 = vadd.f32 %v350_v26, %v342_v24  ;;  %v384_v39 = vld [vmem:[%s4103_s4 + $0x40] sm:$0xff]  ;;  %v386_v42 = vld [vmem:[%s4103_s4 + $0x50] sm:$0xff]  ;;  %v3139_v46 = vld [vmem:[%s4102_s3 + $0x38] sm:$0xff]  ;;  %s3378_s8 = scalar_lea.vmem %s4099_s0, %s2391_s30  ;;  %s3406_s11 = scalar_lea.vmem %s4104_s5, %s2391_s30 }
  0x1a   : > { %2341 = vmatmul.mubr.msk.f32.vlgmr.msra.gmra.mrb[0].mxu1 %vm472_vm0, %v3026_v9  ;;  %843 = vmatprep.subr.mxu0 %v357_v20  ;;  %v3122_v43 = vld [vmem:[%s4102_s3 + $0x30] sm:$0xff]  ;;  %v388_v45 = vld [vmem:[%s4103_s4 + $0x60] sm:$0xff]  ;;  %v389_v47 = vld [vmem:[%s4103_s4 + $0x68] sm:$0xff] }
  0x1b   : > { %1004 = vmatprep.subr.mxu1 %v359_v21  ;;  %844 = vmatpush1.msra.mxu0 %v356_v25  ;;  %v390_v48 = vld [vmem:[%s4103_s4 + $0x70] sm:$0xff]  ;;  %v3156_v49 = vld [vmem:[%s4102_s3 + $0x40] sm:$0xff]  ;;  %v391_v50 = vld [vmem:[%s4103_s4 + $0x78] sm:$0xff] }
  0x1c   : > { %1005 = vmatpush1.msra.mxu1 %v358_v27  ;;  %591 = vmatprep.mubr.f32.mxu0 %v2959_v0  ;;  %v3170_v51 = vld [vmem:[%s4102_s3 + $0x48] sm:$0xff]  ;;  %v3181_v52 = vld [vmem:[%s4102_s3 + $0x50] sm:$0xff]  ;;  %v3192_v53 = vld [vmem:[%s4102_s3 + $0x58] sm:$0xff] }
  0x1d   : > { %752 = vmatprep.mubr.f32.mxu1 %v2959_v0  ;;  %2326 = vmatmul.mubr.msk.f32.gmra.mrb[2].mxu0 %vm472_vm0, %v3035_v28  ;;  %v3203_v54 = vld [vmem:[%s4102_s3 + $0x60] sm:$0xff]  ;;  %v3214_v55 = vld [vmem:[%s4102_s3 + $0x68] sm:$0xff]  ;;  %v3225_v56 = vld [vmem:[%s4102_s3 + $0x70] sm:$0xff] }
  0x1e   : > { %2342 = vmatmul.mubr.msk.f32.gmra.mrb[2].mxu1 %vm472_vm0, %v3035_v28  ;;  %597 = vmatprep.mubr.f32.mxu0 %v2959_v0  ;;  %v3236_v57 = vld [vmem:[%s4102_s3 + $0x78] sm:$0xff] }
  0x1f   : > { %758 = vmatprep.mubr.f32.mxu1 %v2959_v0  ;;  %414 = vperm.xlu0 %2421, %v380_v33  }
  0x20   : > { %419 = vperm.xlu1 %2422, %v381_v35  }
  0x21   : > { %2327 = vmatmul.mubr.msk.f32.gmra.mrb[4].mxu0 %vm472_vm0, %v3054_v31 }
  0x22   : > { %2343 = vmatmul.mubr.msk.f32.gmra.mrb[4].mxu1 %vm472_vm0, %v3054_v31  ;;  %603 = vmatprep.mubr.f32.mxu0 %v2959_v0 }
  0x23   : > { %764 = vmatprep.mubr.f32.mxu1 %v2959_v0  ;;  %424 = vperm.xlu0 %2421, %v382_v36  }
  0x24   : > { %429 = vperm.xlu1 %2422, %v383_v38  }
  0x25   : > { %2328 = vmatmul.mubr.msk.f32.gmra.mrb[6].mxu0 %vm472_vm0, %v3071_v34 }
  0x26   : > { %2344 = vmatmul.mubr.msk.f32.gmra.mrb[6].mxu1 %vm472_vm0, %v3071_v34  ;;  %609 = vmatprep.mubr.f32.mxu0 %v2959_v0 }
  0x27   : > { %770 = vmatprep.mubr.f32.mxu1 %v2959_v0  ;;  %434 = vperm.xlu0 %2421, %v384_v39  }
  0x28   : > { %439 = vperm.xlu1 %2422, %v385_v41  }
  0x29   : > { %2329 = vmatmul.mubr.msk.f32.gmra.mrb[8].mxu0 %vm472_vm0, %v3088_v37 }
  0x2a   : > { %2345 = vmatmul.mubr.msk.f32.gmra.mrb[8].mxu1 %vm472_vm0, %v3088_v37  ;;  %615 = vmatprep.mubr.f32.mxu0 %v2959_v0 }
  0x2b   : > { %776 = vmatprep.mubr.f32.mxu1 %v2959_v0  ;;  %444 = vperm.xlu0 %2421, %v386_v42  }
  0x2c   : > { %449 = vperm.xlu1 %2422, %v387_v44  }
  0x2d   : > { %2330 = vmatmul.mubr.msk.f32.gmra.mrb[10].mxu0 %vm472_vm0, %v3105_v40 }
  0x2e   : > { %2346 = vmatmul.mubr.msk.f32.gmra.mrb[10].mxu1 %vm472_vm0, %v3105_v40  ;;  %621 = vmatprep.mubr.f32.mxu0 %v2959_v0 }
  0x2f   : > { %782 = vmatprep.mubr.f32.mxu1 %v2959_v0  ;;  %454 = vperm.xlu0 %2421, %v388_v45  }
  0x30   : > { %459 = vperm.xlu1 %2422, %v389_v47  }
  0x31   : > { %2331 = vmatmul.mubr.msk.f32.gmra.mrb[12].mxu0 %vm472_vm0, %v3122_v43 }
  0x32   : > { %2347 = vmatmul.mubr.msk.f32.gmra.mrb[12].mxu1 %vm472_vm0, %v3122_v43  ;;  %627 = vmatprep.mubr.f32.mxu0 %v2959_v0 }
  0x33   : > { %788 = vmatprep.mubr.f32.mxu1 %v2959_v0  ;;  %464 = vperm.xlu0 %2421, %v390_v48  }
  0x34   : > { %469 = vperm.xlu1 %2422, %v391_v50  }
  0x35   : > { %2332 = vmatmul.mubr.msk.f32.gmra.mrb[14].mxu0 %vm472_vm0, %v3139_v46 }
  0x36   : > { %2348 = vmatmul.mubr.msk.f32.gmra.mrb[14].mxu1 %vm472_vm0, %v3139_v46  ;;  %633 = vmatprep.mubr.f32.mxu0 %v2959_v0 }
  0x37   : > { %794 = vmatprep.mubr.f32.mxu1 %v2959_v0 }
  0x39   : > { %2333 = vmatmul.mubr.msk.f32.gmra.mrb[16].mxu0 %vm472_vm0, %v3156_v49 }
  0x3a   : > { %2349 = vmatmul.mubr.msk.f32.gmra.mrb[16].mxu1 %vm472_vm0, %v3156_v49  ;;  %639 = vmatprep.mubr.f32.mxu0 %v2959_v0 }
  0x3b   : > { %800 = vmatprep.mubr.f32.mxu1 %v2959_v0 }
  0x3d   : > { %2334 = vmatmul.mubr.msk.f32.gmra.mrb[18].mxu0 %vm472_vm0, %v3170_v51 }
  0x3e   : > { %2350 = vmatmul.mubr.msk.f32.gmra.mrb[18].mxu1 %vm472_vm0, %v3170_v51  ;;  %645 = vmatprep.mubr.f32.mxu0 %v2959_v0 }
  0x3f   : > { %806 = vmatprep.mubr.f32.mxu1 %v2959_v0 }
  0x41   : > { %2335 = vmatmul.mubr.msk.f32.gmra.mrb[20].mxu0 %vm472_vm0, %v3181_v52 }
  0x42   : > { %2351 = vmatmul.mubr.msk.f32.gmra.mrb[20].mxu1 %vm472_vm0, %v3181_v52  ;;  %651 = vmatprep.mubr.f32.mxu0 %v2959_v0 }
  0x43   : > { %812 = vmatprep.mubr.f32.mxu1 %v2959_v0 }
  0x45   : > { %2336 = vmatmul.mubr.msk.f32.gmra.mrb[22].mxu0 %vm472_vm0, %v3192_v53 }
  0x46   : > { %2352 = vmatmul.mubr.msk.f32.gmra.mrb[22].mxu1 %vm472_vm0, %v3192_v53  ;;  %657 = vmatprep.mubr.f32.mxu0 %v2959_v0 }
  0x47   : > { %818 = vmatprep.mubr.f32.mxu1 %v2959_v0 }
  0x49   : > { %2337 = vmatmul.mubr.msk.f32.gmra.mrb[24].mxu0 %vm472_vm0, %v3203_v54 }
  0x4a   : > { %2353 = vmatmul.mubr.msk.f32.gmra.mrb[24].mxu1 %vm472_vm0, %v3203_v54  ;;  %663 = vmatprep.mubr.f32.mxu0 %v2959_v0 }
  0x4b   : > { %824 = vmatprep.mubr.f32.mxu1 %v2959_v0 }
  0x4d   : > { %2338 = vmatmul.mubr.msk.f32.gmra.mrb[26].mxu0 %vm472_vm0, %v3214_v55 }
  0x4e   : > { %2354 = vmatmul.mubr.msk.f32.gmra.mrb[26].mxu1 %vm472_vm0, %v3214_v55  ;;  %669 = vmatprep.mubr.f32.mxu0 %v2959_v0 }
  0x4f   : > { %830 = vmatprep.mubr.f32.mxu1 %v2959_v0 }
  0x51   : > { %2339 = vmatmul.mubr.msk.f32.gmra.mrb[28].mxu0 %vm472_vm0, %v3225_v56 }
  0x52   : > { %2355 = vmatmul.mubr.msk.f32.gmra.mrb[28].mxu1 %vm472_vm0, %v3225_v56  ;;  %675 = vmatprep.mubr.f32.mxu0 %v2959_v0 }
  0x53   : > { %836 = vmatprep.mubr.f32.mxu1 %v2959_v0 }
  0x55   : > { %2340 = vmatmul.mubr.msk.f32.gmra.mrb[30].mxu0 %vm472_vm0, %v3236_v57 }
  0x56   : > { %2356 = vmatmul.mubr.msk.f32.gmra.mrb[30].mxu1 %vm472_vm0, %v3236_v57  ;;  %907 = vmatprep.mubr.f32.mxu0 %v2959_v0 }
  0x57   : > { %1068 = vmatprep.mubr.f32.mxu1 %v2959_v0 }
  0x59   : > { %2357 = vmatmul.mubr.msk.f32.vlgmr.msra.gmra.mrb[32].mxu0 %vm472_vm0, %v3026_v9 }
  0x5a   : > { %2373 = vmatmul.mubr.msk.f32.vlgmr.msra.gmra.mrb[32].mxu1 %vm472_vm0, %v3026_v9  ;;  %913 = vmatprep.mubr.f32.mxu0 %v2959_v0 }
  0x5b   : > { %1074 = vmatprep.mubr.f32.mxu1 %v2959_v0 }
  0x5d   : > { %2358 = vmatmul.mubr.msk.f32.gmra.mrb[34].mxu0 %vm472_vm0, %v3035_v28 }
  0x5e   : > { %2374 = vmatmul.mubr.msk.f32.gmra.mrb[34].mxu1 %vm472_vm0, %v3035_v28  ;;  %919 = vmatprep.mubr.f32.mxu0 %v2959_v0 }
  0x5f   : > { %1080 = vmatprep.mubr.f32.mxu1 %v2959_v0 }
  0x61   : > { %2359 = vmatmul.mubr.msk.f32.gmra.mrb[36].mxu0 %vm472_vm0, %v3054_v31 }
  0x62   : > { %2375 = vmatmul.mubr.msk.f32.gmra.mrb[36].mxu1 %vm472_vm0, %v3054_v31  ;;  %925 = vmatprep.mubr.f32.mxu0 %v2959_v0 }
  0x63   : > { %1086 = vmatprep.mubr.f32.mxu1 %v2959_v0 }
  0x65   : > { %2360 = vmatmul.mubr.msk.f32.gmra.mrb[38].mxu0 %vm472_vm0, %v3071_v34 }
  0x66   : > { %2376 = vmatmul.mubr.msk.f32.gmra.mrb[38].mxu1 %vm472_vm0, %v3071_v34  ;;  %931 = vmatprep.mubr.f32.mxu0 %v2959_v0 }
  0x67   : > { %1092 = vmatprep.mubr.f32.mxu1 %v2959_v0 }
  0x69   : > { %2361 = vmatmul.mubr.msk.f32.gmra.mrb[40].mxu0 %vm472_vm0, %v3088_v37 }
  0x6a   : > { %2377 = vmatmul.mubr.msk.f32.gmra.mrb[40].mxu1 %vm472_vm0, %v3088_v37  ;;  %937 = vmatprep.mubr.f32.mxu0 %v2959_v0 }
  0x6b   : > { %1098 = vmatprep.mubr.f32.mxu1 %v2959_v0 }
  0x6d   : > { %2362 = vmatmul.mubr.msk.f32.gmra.mrb[42].mxu0 %vm472_vm0, %v3105_v40 }
  0x6e   : > { %2378 = vmatmul.mubr.msk.f32.gmra.mrb[42].mxu1 %vm472_vm0, %v3105_v40  ;;  %943 = vmatprep.mubr.f32.mxu0 %v2959_v0 }
  0x6f   : > { %1104 = vmatprep.mubr.f32.mxu1 %v2959_v0 }
  0x71   : > { %2363 = vmatmul.mubr.msk.f32.gmra.mrb[44].mxu0 %vm472_vm0, %v3122_v43 }
  0x72   : > { %2379 = vmatmul.mubr.msk.f32.gmra.mrb[44].mxu1 %vm472_vm0, %v3122_v43  ;;  %949 = vmatprep.mubr.f32.mxu0 %v2959_v0 }
  0x73   : > { %1110 = vmatprep.mubr.f32.mxu1 %v2959_v0 }
  0x75   : > { %2364 = vmatmul.mubr.msk.f32.gmra.mrb[46].mxu0 %vm472_vm0, %v3139_v46 }
  0x76   : > { %2380 = vmatmul.mubr.msk.f32.gmra.mrb[46].mxu1 %vm472_vm0, %v3139_v46  ;;  %955 = vmatprep.mubr.f32.mxu0 %v2959_v0 }
  0x77   : > { %1116 = vmatprep.mubr.f32.mxu1 %v2959_v0 }
  0x79   : > { %2365 = vmatmul.mubr.msk.f32.gmra.mrb[48].mxu0 %vm472_vm0, %v3156_v49 }
  0x7a   : > { %2381 = vmatmul.mubr.msk.f32.gmra.mrb[48].mxu1 %vm472_vm0, %v3156_v49  ;;  %961 = vmatprep.mubr.f32.mxu0 %v2959_v0 }
  0x7b   : > { %1122 = vmatprep.mubr.f32.mxu1 %v2959_v0 }
  0x7d   : > { %2366 = vmatmul.mubr.msk.f32.gmra.mrb[50].mxu0 %vm472_vm0, %v3170_v51 }
  0x7e   : > { %2382 = vmatmul.mubr.msk.f32.gmra.mrb[50].mxu1 %vm472_vm0, %v3170_v51  ;;  %967 = vmatprep.mubr.f32.mxu0 %v2959_v0 }
  0x7f   : > { %1128 = vmatprep.mubr.f32.mxu1 %v2959_v0 }
  0x81   : > { %2367 = vmatmul.mubr.msk.f32.gmra.mrb[52].mxu0 %vm472_vm0, %v3181_v52 }
  0x82   : > { %2383 = vmatmul.mubr.msk.f32.gmra.mrb[52].mxu1 %vm472_vm0, %v3181_v52  ;;  %973 = vmatprep.mubr.f32.mxu0 %v2959_v0 }
  0x83   : > { %1134 = vmatprep.mubr.f32.mxu1 %v2959_v0 }
  0x85   : > { %2368 = vmatmul.mubr.msk.f32.gmra.mrb[54].mxu0 %vm472_vm0, %v3192_v53 }
  0x86   : > { %2384 = vmatmul.mubr.msk.f32.gmra.mrb[54].mxu1 %vm472_vm0, %v3192_v53  ;;  %979 = vmatprep.mubr.f32.mxu0 %v2959_v0 }
  0x87   : > { %1140 = vmatprep.mubr.f32.mxu1 %v2959_v0 }
  0x89   : > { %2369 = vmatmul.mubr.msk.f32.gmra.mrb[56].mxu0 %vm472_vm0, %v3203_v54 }
  0x8a   : > { %2385 = vmatmul.mubr.msk.f32.gmra.mrb[56].mxu1 %vm472_vm0, %v3203_v54  ;;  %985 = vmatprep.mubr.f32.mxu0 %v2959_v0 }
  0x8b   : > { %1146 = vmatprep.mubr.f32.mxu1 %v2959_v0 }
  0x8d   : > { %2370 = vmatmul.mubr.msk.f32.gmra.mrb[58].mxu0 %vm472_vm0, %v3214_v55 }
  0x8e   : > { %2386 = vmatmul.mubr.msk.f32.gmra.mrb[58].mxu1 %vm472_vm0, %v3214_v55  ;;  %991 = vmatprep.mubr.f32.mxu0 %v2959_v0 }
  0x8f   : > { %1152 = vmatprep.mubr.f32.mxu1 %v2959_v0 }
  0x90   : > { %v3338_v58 = vpop.permute.xlu0 %394  ;;  %v3346_v6 = vpop.permute.xlu1 %404 }
  0x91   : > { %2371 = vmatmul.mubr.msk.f32.gmra.mrb[60].mxu0 %vm472_vm0, %v3225_v56 }
  0x92   : > { %2387 = vmatmul.mubr.msk.f32.gmra.mrb[60].mxu1 %vm472_vm0, %v3225_v56  ;;  %997 = vmatprep.mubr.f32.mxu0 %v2959_v0 }
  0x93   : > { %1158 = vmatprep.mubr.f32.mxu1 %v2959_v0 }
  0x94   : > { %v3344_v3 = vpop.permute.xlu0 %399  ;;  %v3356_v38 = vpop.permute.xlu1 %409 }
  0x95   : > { %2372 = vmatmul.mubr.msk.f32.gmra.mrb[62].mxu0 %vm472_vm0, %v3236_v57 }
  0x96   : > { %2388 = vmatmul.mubr.msk.f32.gmra.mrb[62].mxu1 %vm472_vm0, %v3236_v57 }
  0xec   : > { %v587_v59 = vpop.f32.mrb[0].mxu0 }
  0xed   : > { %v748_v60 = vpop.f32.mrb[0].mxu1  ;;  %v588_v61 = vadd.f32 %v587_v59, %v3338_v58  ;;  %v589_v63 = vpop.f32.mrb[1].mxu0 }
  0xee   : > { %v749_v62 = vadd.f32 %v748_v60, %v3338_v58  ;;  %v750_v1 = vpop.f32.mrb[1].mxu1  ;;  %v590_v2 = vadd.f32 %v589_v63, %v3338_v58  ;;  %v3361_v63 = vpop.permute.xlu0 %414 }
  0xef   : > { %v751_v0 = vadd.f32 %v750_v1, %v3338_v58  ;;  %v1165_v4 = vsub.f32 0.0, %v588_v61  ;;  %4127 = vst [vmem:[#allocation2_spill] sm:$0xff] %v3361_v63 }
  0xf0   : > { %v1167_v5 = vsub.f32 0.0, %v749_v62  ;;  %v1166_v7 = vsub.f32 0.0, %v590_v2  ;;  %v593_v9 = vpop.f32.mrb[2].mxu0 }
  0xf1   : > { %v1168_v8 = vsub.f32 0.0, %v751_v0  ;;  %v754_v10 = vpop.f32.mrb[2].mxu1  ;;  %v1293_v11 = vmul.f32 1.442695, %v1165_v4  ;;  %v594_v13 = vadd.f32 %v593_v9, %v3344_v3  ;;  %v595_v15 = vpop.f32.mrb[3].mxu0 }
  0xf2   : > { %v1297_v12 = vmul.f32 1.442695, %v1167_v5  ;;  %v755_v14 = vadd.f32 %v754_v10, %v3344_v3  ;;  %v756_v16 = vpop.f32.mrb[3].mxu1  ;;  %v1295_v17 = vmul.f32 1.442695, %v1166_v7  ;;  %v596_v19 = vadd.f32 %v595_v15, %v3344_v3 }
  0xf3   : > { %v1299_v18 = vmul.f32 1.442695, %v1168_v8  ;;  %v757_v20 = vadd.f32 %v756_v16, %v3344_v3  ;;  %2423 = vpow2.f32 %v1293_v11  ;;  %v1173_v21 = vsub.f32 0.0, %v594_v13 }
  0xf4   : > { %v1175_v22 = vsub.f32 0.0, %v755_v14  ;;  %2425 = vpow2.f32 %v1297_v12  ;;  %v1174_v23 = vsub.f32 0.0, %v596_v19  ;;  %v599_v25 = vpop.f32.mrb[4].mxu0  ;;  %v3366_v19 = vpop.permute.xlu1 %419 }
  0xf5   : > { %v1176_v24 = vsub.f32 0.0, %v757_v20  ;;  %v760_v26 = vpop.f32.mrb[4].mxu1  ;;  %2427 = vpow2.f32 %v1295_v17  ;;  %v1309_v27 = vmul.f32 1.442695, %v1173_v21  ;;  %v600_v29 = vadd.f32 %v599_v25, %v3346_v6  ;;  %v601_v30 = vpop.f32.mrb[5].mxu0  ;;  %4128 = vst [vmem:[#allocation3_spill] sm:$0xff] %v3366_v19 }
  0xf6   : > { %v1313_v28 = vmul.f32 1.442695, %v1175_v22  ;;  %v762_v31 = vpop.f32.mrb[5].mxu1  ;;  %2429 = vpow2.f32 %v1299_v18  ;;  %v1311_v32 = vmul.f32 1.442695, %v1174_v23  ;;  %v761_v34 = vadd.f32 %v760_v26, %v3346_v6 }
  0xf7   : > { %v1315_v33 = vmul.f32 1.442695, %v1176_v24  ;;  %2431 = vpow2.f32 %v1309_v27  ;;  %v1181_v35 = vsub.f32 0.0, %v600_v29  ;;  %v602_v36 = vadd.f32 %v601_v30, %v3346_v6 }
  0xf8   : > { %v763_v37 = vadd.f32 %v762_v31, %v3346_v6  ;;  %2433 = vpow2.f32 %v1313_v28  ;;  %v1183_v39 = vsub.f32 0.0, %v761_v34  ;;  %v605_v40 = vpop.f32.mrb[6].mxu0 }
  0xf9   : > { %v766_v41 = vpop.f32.mrb[6].mxu1  ;;  %2435 = vpow2.f32 %v1311_v32  ;;  %v1325_v42 = vmul.f32 1.442695, %v1181_v35  ;;  %v1182_v43 = vsub.f32 0.0, %v602_v36  ;;  %v607_v45 = vpop.f32.mrb[7].mxu0  ;;  %v606_v50 = vadd.f32 %v605_v40, %v3356_v38 }
  0xfa   : > { %v1184_v44 = vsub.f32 0.0, %v763_v37  ;;  %v768_v46 = vpop.f32.mrb[7].mxu1  ;;  %2437 = vpow2.f32 %v1315_v33  ;;  %v1329_v47 = vmul.f32 1.442695, %v1183_v39  ;;  %v767_v54 = vadd.f32 %v766_v41, %v3356_v38  ;;  %v3386_v41 = vpop.permute.xlu0 %424 }
  0xfb   : > { %2439 = vpow2.f32 %v1325_v42  ;;  %v1327_v48 = vmul.f32 1.442695, %v1182_v43  ;;  %v608_v62 = vadd.f32 %v607_v45, %v3356_v38  ;;  %v1189_v0 = vsub.f32 0.0, %v606_v50  ;;  %4129 = vst [vmem:[#allocation4_spill] sm:$0xff] %v3386_v41  ;;  %v1805_v43 = vld [vmem:[%s3378_s8] sm:$0xff] }
  0xfc   : > { %v1331_v49 = vmul.f32 1.442695, %v1184_v44  ;;  %2441 = vpow2.f32 %v1329_v47  ;;  %v611_v51 = vpop.f32.mrb[8].mxu0  ;;  %v1191_v9 = vsub.f32 0.0, %v767_v54  ;;  %v769_v10 = vadd.f32 %v768_v46, %v3356_v38 }
  0xfd   : > { %v772_v52 = vpop.f32.mrb[8].mxu1  ;;  %v2424_v53 = vpop.eup %2423  ;;  %2443 = vpow2.f32 %v1327_v48  ;;  %v612_v14 = vadd.f32 %v611_v51, %v3361_v63  ;;  %v1190_v18 = vsub.f32 0.0, %v608_v62  ;;  %v1341_v22 = vmul.f32 1.442695, %v1189_v0 }
  0xfe   : > { %v613_v55 = vpop.f32.mrb[9].mxu0  ;;  %v774_v56 = vpop.f32.mrb[9].mxu1  ;;  %v1549_v59 = vadd.f32 1.0, %v2424_v53  ;;  %2445 = vpow2.f32 %v1331_v49  ;;  %v3369_v23 = vadd.f32 %v772_v52, %v3361_v63  ;;  %v1345_v28 = vmul.f32 1.442695, %v1191_v9  ;;  %v1807_v49 = vld [vmem:[%s3378_s8 + $0x10] sm:$0xff] }
  0xff   : > { %v2426_v57 = vpop.eup %2425  ;;  %v1192_v29 = vsub.f32 0.0, %v769_v10  ;;  %v1197_v34 = vsub.f32 0.0, %v612_v14  ;;  %v614_v35 = vadd.f32 %v613_v55, %v3361_v63  ;;  %v1343_v39 = vmul.f32 1.442695, %v1190_v18  ;;  %v1815_v14 = vld [vmem:[%s3378_s8 + $0x50] sm:$0xff] }
 0x100   : > { %v2428_v60 = vpop.eup %2427  ;;  %v1551_v61 = vadd.f32 1.0, %v2426_v57  ;;  %2447 = vrcp.f32 %v1549_v59  ;;  %v617_v4 = vpop.f32.mrb[10].mxu0  ;;  %v775_v40 = vadd.f32 %v774_v56, %v3361_v63  ;;  %v1199_v45 = vsub.f32 0.0, %v3369_v23  ;;  %v1806_v56 = vld [vmem:[%s3378_s8 + $0x8] sm:$0xff] }
 0x101   : > { %v2430_v1 = vpop.eup %2429  ;;  %v1550_v2 = vadd.f32 1.0, %v2428_v60  ;;  %v778_v5 = vpop.f32.mrb[10].mxu1  ;;  %v618_v46 = vadd.f32 %v617_v4, %v3366_v19  ;;  %v1347_v51 = vmul.f32 1.442695, %v1192_v29  ;;  %v1357_v57 = vmul.f32 1.442695, %v1197_v34 }
 0x102   : > { %v2432_v7 = vpop.eup %2431  ;;  %2449 = vrcp.f32 %v1551_v61  ;;  %v1552_v8 = vadd.f32 1.0, %v2430_v1  ;;  %v619_v11 = vpop.f32.mrb[11].mxu0  ;;  %v779_v52 = vadd.f32 %v778_v5, %v3366_v19  ;;  %v1198_v59 = vsub.f32 0.0, %v614_v35  ;;  %v1808_v1 = vld [vmem:[%s3378_s8 + $0x18] sm:$0xff]  ;;  %v1821_v35 = vld [vmem:[%s3378_s8 + $0x80] sm:$0xff] }
 0x103   : > { %v2434_v12 = vpop.eup %2433  ;;  %2451 = vrcp.f32 %v1550_v2  ;;  %v1557_v13 = vadd.f32 1.0, %v2432_v7  ;;  %v780_v15 = vpop.f32.mrb[11].mxu1  ;;  %v620_v60 = vadd.f32 %v619_v11, %v3366_v19  ;;  %v1200_v2 = vsub.f32 0.0, %v775_v40  ;;  %v1813_v7 = vld [vmem:[%s3378_s8 + $0x40] sm:$0xff] }
 0x104   : > { %v2436_v16 = vpop.eup %2435  ;;  %2453 = vrcp.f32 %v1552_v8  ;;  %v1559_v17 = vadd.f32 1.0, %v2434_v12  ;;  %v623_v24 = vpop.f32.mrb[12].mxu0  ;;  %v781_v0 = vadd.f32 %v780_v15, %v3366_v19  ;;  %v1205_v8 = vsub.f32 0.0, %v618_v46 }
 0x105   : > { %v2438_v20 = vpop.eup %2437  ;;  %2455 = vrcp.f32 %v1557_v13  ;;  %v1558_v21 = vadd.f32 1.0, %v2436_v16  ;;  %v3371_v25 = vpop.f32.mrb[12].mxu1  ;;  %v624_v9 = vadd.f32 %v623_v24, %v3386_v41  ;;  %v1361_v15 = vmul.f32 1.442695, %v1199_v45 }
 0x106   : > { %v2440_v26 = vpop.eup %2439  ;;  %2457 = vrcp.f32 %v1559_v17  ;;  %v1560_v27 = vadd.f32 1.0, %v2438_v20  ;;  %v3380_v30 = vpop.f32.mrb[13].mxu0  ;;  %v1207_v16 = vsub.f32 0.0, %v779_v52  ;;  %v1359_v23 = vmul.f32 1.442695, %v1198_v59  ;;  %v1822_v52 = vld [vmem:[%s3378_s8 + $0x88] sm:$0xff] }
 0x107   : > { %v3382_v31 = vpop.f32.mrb[13].mxu1  ;;  %v2442_v32 = vpop.eup %2441  ;;  %2459 = vrcp.f32 %v1558_v21  ;;  %v1565_v33 = vadd.f32 1.0, %v2440_v26  ;;  %v1206_v24 = vsub.f32 0.0, %v620_v60  ;;  %v1363_v29 = vmul.f32 1.442695, %v1200_v2  ;;  %v1824_v59 = vld [vmem:[%s3378_s8 + $0x98] sm:$0xff] }
 0x108   : > { %v2444_v36 = vpop.eup %2443  ;;  %2461 = vrcp.f32 %v1560_v27  ;;  %v1567_v37 = vadd.f32 1.0, %v2442_v32  ;;  %v3391_v47 = vpop.f32.mrb[14].mxu0  ;;  %v1208_v32 = vsub.f32 0.0, %v781_v0  ;;  %v1377_v45 = vmul.f32 1.442695, %v1207_v16 }
 0x109   : > { %v2446_v42 = vpop.eup %2445  ;;  %2463 = vrcp.f32 %v1565_v33  ;;  %v1566_v44 = vadd.f32 1.0, %v2444_v36  ;;  %v3393_v48 = vpop.f32.mrb[14].mxu1  ;;  %v1373_v36 = vmul.f32 1.442695, %v1205_v8  ;;  %v626_v16 = vadd.f32 %v3380_v30, %v3386_v41 }
 0x10a   : > { %2465 = vrcp.f32 %v1567_v37  ;;  %v1568_v50 = vadd.f32 1.0, %v2446_v42  ;;  %v3397_v53 = vpop.f32.mrb[15].mxu0  ;;  %v3399_v54 = vpop.f32.mrb[15].mxu1  ;;  %v1213_v37 = vsub.f32 0.0, %v624_v9  ;;  %v1379_v60 = vmul.f32 1.442695, %v1208_v32 }
 0x10b   : > { %v2448_v55 = vpop.eup %2447  ;;  %2467 = vrcp.f32 %v1566_v44  ;;  %v1823_v44 = vld [vmem:[%s3378_s8 + $0x90] sm:$0xff] }
 0x10c   : > { %v2450_v61 = vpop.eup %2449  ;;  %v1933_v62 = vmul.f32 %v2448_v55, %v1805_v43  ;;  %2469 = vrcp.f32 %v1568_v50  ;;  %v3414_v10 = vpop.f32.mrb[16].mxu0  ;;  %v1375_v55 = vmul.f32 1.442695, %v1206_v24 }
 0x10d   : > { %v2452_v4 = vpop.eup %2451  ;;  %v1935_v5 = vmul.f32 %v2450_v61, %v1807_v49  ;;  %2471 = vpow2.f32 %v1341_v22  ;;  %v3416_v11 = vpop.f32.mrb[16].mxu1  ;;  %v1814_v22 = vld [vmem:[%s3378_s8 + $0x48] sm:$0xff] }
 0x10e   : > { %v2454_v12 = vpop.eup %2453  ;;  %2061 = vst [vmem:[%s3406_s11] sm:$0xff] %v1933_v62  ;;  %v1934_v13 = vmul.f32 %v2452_v4, %v1806_v56  ;;  %2473 = vpow2.f32 %v1345_v28  ;;  %v3420_v17 = vpop.f32.mrb[17].mxu0  ;;  %v1816_v28 = vld [vmem:[%s3378_s8 + $0x58] sm:$0xff] }
 0x10f   : > { %v3422_v18 = vpop.f32.mrb[17].mxu1  ;;  %v2456_v20 = vpop.eup %2455  ;;  %2063 = vst [vmem:[%s3406_s11 + $0x10] sm:$0xff] %v1935_v5  ;;  %v1936_v21 = vmul.f32 %v2454_v12, %v1808_v1  ;;  %2475 = vpow2.f32 %v1343_v39  ;;  %v1389_v1 = vmul.f32 1.442695, %v1213_v37  ;;  %v1214_v37 = vsub.f32 0.0, %v626_v16  ;;  %v1829_v16 = vld [vmem:[%s3378_s8 + $0xc0] sm:$0xff] }
 0x110   : > { %v2458_v26 = vpop.eup %2457  ;;  %2062 = vst [vmem:[%s3406_s11 + $0x8] sm:$0xff] %v1934_v13  ;;  %v1941_v27 = vmul.f32 %v2456_v20, %v1813_v7  ;;  %2477 = vpow2.f32 %v1347_v51  ;;  %v3430_v39 = vpop.f32.mrb[18].mxu0  ;;  %v785_v13 = vadd.f32 %v3371_v25, %v3386_v41 }
 0x111   : > { %v2460_v33 = vpop.eup %2459  ;;  %2064 = vst [vmem:[%s3406_s11 + $0x18] sm:$0xff] %v1936_v21  ;;  %v1943_v34 = vmul.f32 %v2458_v26, %v1815_v14  ;;  %2479 = vpow2.f32 %v1357_v57  ;;  %v3432_v40 = vpop.f32.mrb[18].mxu1 }
 0x112   : > { %v2462_v42 = vpop.eup %2461  ;;  %2069 = vst [vmem:[%s3406_s11 + $0x40] sm:$0xff] %v1941_v27  ;;  %v1942_v43 = vmul.f32 %v2460_v33, %v1814_v22  ;;  %2481 = vpow2.f32 %v1361_v15  ;;  %v3436_v46 = vpop.f32.mrb[19].mxu0  ;;  %v787_v27 = vadd.f32 %v3382_v31, %v3386_v41  ;;  %v1215_v32 = vsub.f32 0.0, %v785_v13  ;;  %v1854_v41 = vld [vmem:[%s3378_s8 + $0x188] sm:$0xff] }
 0x113   : > { %v3438_v49 = vpop.f32.mrb[19].mxu1  ;;  %v2464_v50 = vpop.eup %2463  ;;  %2071 = vst [vmem:[%s3406_s11 + $0x50] sm:$0xff] %v1943_v34  ;;  %v1944_v51 = vmul.f32 %v2462_v42, %v1816_v28  ;;  %2483 = vpow2.f32 %v1359_v23 }
 0x114   : > { %v2466_v56 = vpop.eup %2465  ;;  %2070 = vst [vmem:[%s3406_s11 + $0x48] sm:$0xff] %v1942_v43  ;;  %v1949_v57 = vmul.f32 %v2464_v50, %v1821_v35  ;;  %2485 = vpow2.f32 %v1363_v29  ;;  %v3445_v2 = vpop.f32.mrb[20].mxu0 }
 0x115   : > { %v2468_v61 = vpop.eup %2467  ;;  %2072 = vst [vmem:[%s3406_s11 + $0x58] sm:$0xff] %v1944_v51  ;;  %v1951_v62 = vmul.f32 %v2466_v56, %v1823_v44  ;;  %2487 = vpow2.f32 %v1373_v36  ;;  %v3447_v0 = vpop.f32.mrb[20].mxu1 }
 0x116   : > { %v2470_v4 = vpop.eup %2469  ;;  %2077 = vst [vmem:[%s3406_s11 + $0x80] sm:$0xff] %v1949_v57  ;;  %v1950_v5 = vmul.f32 %v2468_v61, %v1822_v52  ;;  %2489 = vpow2.f32 %v1377_v45  ;;  %v3450_v7 = vpop.f32.mrb[21].mxu0  ;;  %v1216_v52 = vsub.f32 0.0, %v787_v27 }
 0x117   : > { %v3452_v8 = vpop.f32.mrb[21].mxu1  ;;  %v2472_v9 = vpop.eup %2471  ;;  %2079 = vst [vmem:[%s3406_s11 + $0x90] sm:$0xff] %v1951_v62  ;;  %v1952_v12 = vmul.f32 %v2470_v4, %v1824_v59  ;;  %2491 = vpow2.f32 %v1375_v55  ;;  %v1393_v59 = vmul.f32 1.442695, %v1215_v32 }
 0x118   : > { %v2474_v14 = vpop.eup %2473  ;;  %2078 = vst [vmem:[%s3406_s11 + $0x88] sm:$0xff] %v1950_v5  ;;  %v1573_v15 = vadd.f32 1.0, %v2472_v9  ;;  %2493 = vpow2.f32 %v1379_v60  ;;  %v3460_v20 = vpop.permute.xlu1 %429 }
 0x119   : > { %4130 = vst [vmem:[#allocation5_spill] sm:$0xff] %v3460_v20  ;;  %v2476_v21 = vpop.eup %2475  ;;  %2080 = vst [vmem:[%s3406_s11 + $0x98] sm:$0xff] %v1952_v12  ;;  %v1575_v22 = vadd.f32 1.0, %v2474_v14  ;;  %2495 = vpow2.f32 %v1389_v1  ;;  %v3463_v23 = vpop.f32.mrb[22].mxu0  ;;  %v630_v33 = vadd.f32 %v3391_v47, %v3460_v20  ;;  %v791_v42 = vadd.f32 %v3393_v48, %v3460_v20 }
 0x11a   : > { %v3465_v24 = vpop.f32.mrb[22].mxu1  ;;  %v2478_v26 = vpop.eup %2477  ;;  %2497 = vrcp.f32 %v1573_v15  ;;  %v1574_v25 = vadd.f32 1.0, %v2476_v21  ;;  %v3479_v44 = vadd.f32 %v3397_v53, %v3460_v20  ;;  %v1391_v1 = vmul.f32 1.442695, %v1214_v37 }
 0x11b   : > { %v3469_v28 = vpop.f32.mrb[23].mxu0  ;;  %v2480_v29 = vpop.eup %2479  ;;  %2499 = vrcp.f32 %v1575_v22  ;;  %v1576_v30 = vadd.f32 1.0, %v2478_v26  ;;  %v1221_v60 = vsub.f32 0.0, %v630_v33  ;;  %v1223_v4 = vsub.f32 0.0, %v791_v42 }
 0x11c   : > { %v3473_v34 = vpop.f32.mrb[23].mxu1  ;;  %v2482_v35 = vpop.eup %2481  ;;  %2501 = vrcp.f32 %v1574_v25  ;;  %v1581_v36 = vadd.f32 1.0, %v2480_v29  ;;  %v1222_v12 = vsub.f32 0.0, %v3479_v44  ;;  %v793_v13 = vadd.f32 %v3399_v54, %v3460_v20 }
 0x11d   : > { %v2484_v43 = vpop.eup %2483  ;;  %2503 = vrcp.f32 %v1576_v30  ;;  %v1583_v31 = vadd.f32 1.0, %v2482_v35  ;;  %v3481_v45 = vpop.f32.mrb[24].mxu0  ;;  %v1395_v22 = vmul.f32 1.442695, %v1216_v52  ;;  %v1831_v30 = vld [vmem:[%s3378_s8 + $0xd0] sm:$0xff] }
 0x11e   : > { %v3483_v50 = vpop.f32.mrb[24].mxu1  ;;  %v2486_v47 = vpop.eup %2485  ;;  %2505 = vrcp.f32 %v1581_v36  ;;  %v1582_v51 = vadd.f32 1.0, %v2484_v43  ;;  %v1405_v32 = vmul.f32 1.442695, %v1221_v60  ;;  %v1409_v43 = vmul.f32 1.442695, %v1223_v4 }
 0x11f   : > { %v3485_v55 = vpop.f32.mrb[25].mxu0  ;;  %v3487_v56 = vpop.f32.mrb[25].mxu1  ;;  %2507 = vrcp.f32 %v1583_v31  ;;  %v1584_v57 = vadd.f32 1.0, %v2486_v47 }
 0x120   : > { %v2488_v48 = vpop.eup %2487  ;;  %v3489_v53 = vpop.permute.xlu0 %434  ;;  %2509 = vrcp.f32 %v1582_v51  ;;  %v1832_v51 = vld [vmem:[%s3378_s8 + $0xd8] sm:$0xff] }
 0x121   : > { %4131 = vst [vmem:[#allocation6_spill] sm:$0xff] %v3489_v53  ;;  %v2490_v61 = vpop.eup %2489  ;;  %v1589_v62 = vadd.f32 1.0, %v2488_v48  ;;  %2511 = vrcp.f32 %v1584_v57  ;;  %v3494_v14 = vpop.f32.mrb[26].mxu0  ;;  %v636_v26 = vadd.f32 %v3414_v10, %v3489_v53  ;;  %v797_v33 = vadd.f32 %v3416_v11, %v3489_v53  ;;  %v1830_v10 = vld [vmem:[%s3378_s8 + $0xc8] sm:$0xff] }
 0x122   : > { %v2492_v5 = vpop.eup %2491  ;;  %v1591_v9 = vadd.f32 1.0, %v2490_v61  ;;  %v3499_v25 = vpop.f32.mrb[26].mxu1  ;;  %v638_v31 = vadd.f32 %v3420_v17, %v3489_v53  ;;  %v1224_v11 = vsub.f32 0.0, %v793_v13  ;;  %v799_v52 = vadd.f32 %v3422_v18, %v3489_v53  ;;  %v1855_v53 = vld [vmem:[%s3378_s8 + $0x190] sm:$0xff] }
 0x123   : > { %v2494_v15 = vpop.eup %2493  ;;  %2513 = vrcp.f32 %v1589_v62  ;;  %v1590_v21 = vadd.f32 1.0, %v2492_v5  ;;  %v3501_v27 = vpop.f32.mrb[27].mxu0  ;;  %v1837_v62 = vld [vmem:[%s3378_s8 + $0x100] sm:$0xff]  ;;  %v1229_v17 = vsub.f32 0.0, %v636_v26  ;;  %v1838_v26 = vld [vmem:[%s3378_s8 + $0x108] sm:$0xff] }
 0x124   : > { %v2496_v29 = vpop.eup %2495  ;;  %2515 = vrcp.f32 %v1591_v9  ;;  %v1592_v54 = vadd.f32 1.0, %v2494_v15  ;;  %v3506_v35 = vpop.permute.xlu1 %439  ;;  %v1839_v15 = vld [vmem:[%s3378_s8 + $0x110] sm:$0xff] }
 0x125   : > { %4132 = vst [vmem:[#allocation7_spill] sm:$0xff] %v3506_v35  ;;  %v3508_v36 = vpop.f32.mrb[27].mxu1  ;;  %v2498_v37 = vpop.eup %2497  ;;  %2517 = vrcp.f32 %v1590_v21  ;;  %v1597_v42 = vadd.f32 1.0, %v2496_v29  ;;  %v642_v4 = vadd.f32 %v3430_v39, %v3506_v35  ;;  %v1231_v21 = vsub.f32 0.0, %v797_v33 }
 0x126   : > { %v2500_v44 = vpop.eup %2499  ;;  %v1957_v47 = vmul.f32 %v2498_v37, %v1829_v16  ;;  %2519 = vrcp.f32 %v1592_v54  ;;  %v3516_v48 = vpop.f32.mrb[28].mxu0  ;;  %v1407_v16 = vmul.f32 1.442695, %v1222_v12  ;;  %v1230_v39 = vsub.f32 0.0, %v638_v31  ;;  %v1845_v31 = vld [vmem:[%s3378_s8 + $0x140] sm:$0xff] }
 0x127   : > { %v3518_v57 = vpop.f32.mrb[28].mxu1  ;;  %v2502_v60 = vpop.eup %2501  ;;  %v1959_v61 = vmul.f32 %v2500_v44, %v1831_v30  ;;  %2521 = vpow2.f32 %v1393_v59  ;;  %v803_v30 = vadd.f32 %v3432_v40, %v3506_v35  ;;  %v1840_v44 = vld [vmem:[%s3378_s8 + $0x118] sm:$0xff]  ;;  %v1232_v12 = vsub.f32 0.0, %v799_v52 }
 0x128   : > { %v3523_v5 = vpop.f32.mrb[29].mxu0  ;;  %v3525_v9 = vpop.f32.mrb[29].mxu1  ;;  %2085 = vst [vmem:[%s3406_s11 + $0xc0] sm:$0xff] %v1957_v47  ;;  %v1958_v13 = vmul.f32 %v2502_v60, %v1830_v10  ;;  %2523 = vrcp.f32 %v1597_v42  ;;  %v1411_v10 = vmul.f32 1.442695, %v1224_v11 }
 0x129   : > { %v2504_v18 = vpop.eup %2503  ;;  %2087 = vst [vmem:[%s3406_s11 + $0xd0] sm:$0xff] %v1959_v61  ;;  %2525 = vpow2.f32 %v1391_v1  ;;  %v3535_v33 = vpop.f32.mrb[30].mxu0  ;;  %v1421_v40 = vmul.f32 1.442695, %v1229_v17  ;;  %v1847_v61 = vld [vmem:[%s3378_s8 + $0x150] sm:$0xff]  ;;  %v1239_v17 = vsub.f32 0.0, %v803_v30 }
 0x12a   : > { %v2506_v29 = vpop.eup %2505  ;;  %v1960_v59 = vmul.f32 %v2504_v18, %v1832_v51  ;;  %2086 = vst [vmem:[%s3406_s11 + $0xc8] sm:$0xff] %v1958_v13  ;;  %2527 = vpow2.f32 %v1395_v22  ;;  %v3537_v42 = vpop.f32.mrb[30].mxu1  ;;  %v1237_v51 = vsub.f32 0.0, %v642_v4 }
 0x12b   : > { %v2508_v54 = vpop.eup %2507  ;;  %v1965_v37 = vmul.f32 %v2506_v29, %v1837_v62  ;;  %2529 = vpow2.f32 %v1405_v32  ;;  %v3541_v60 = vpop.f32.mrb[31].mxu0  ;;  %v1425_v62 = vmul.f32 1.442695, %v1231_v21  ;;  %v1423_v32 = vmul.f32 1.442695, %v1230_v39 }
 0x12c   : > { %v2510_v47 = vpop.eup %2509  ;;  %2088 = vst [vmem:[%s3406_s11 + $0xd8] sm:$0xff] %v1960_v59  ;;  %v1967_v1 = vmul.f32 %v2508_v54, %v1839_v15  ;;  %v3543_v22 = vpop.f32.mrb[31].mxu1  ;;  %2531 = vpow2.f32 %v1409_v43  ;;  %v1846_v15 = vld [vmem:[%s3378_s8 + $0x148] sm:$0xff]  ;;  %v1848_v59 = vld [vmem:[%s3378_s8 + $0x158] sm:$0xff]  ;;  %v1427_v54 = vmul.f32 1.442695, %v1232_v12 }
 0x12d   : > { %v2512_v11 = vpop.eup %2511  ;;  %2093 = vst [vmem:[%s3406_s11 + $0x100] sm:$0xff] %v1965_v37  ;;  %v1966_v52 = vmul.f32 %v2510_v47, %v1838_v26  ;;  %2533 = vpow2.f32 %v1407_v16  ;;  %v3551_v26 = vpop.f32.mrb[32].mxu0  ;;  %v1437_v16 = vmul.f32 1.442695, %v1237_v51 }
 0x12e   : > { %v2514_v18 = vpop.eup %2513  ;;  %2095 = vst [vmem:[%s3406_s11 + $0x110] sm:$0xff] %v1967_v1  ;;  %v1968_v13 = vmul.f32 %v2512_v11, %v1840_v44  ;;  %2535 = vpow2.f32 %v1411_v10  ;;  %v3553_v43 = vpop.f32.mrb[32].mxu1  ;;  %v1853_v10 = vld [vmem:[%s3378_s8 + $0x180] sm:$0xff] }
 0x12f   : > { %v2516_v4 = vpop.eup %2515  ;;  %2094 = vst [vmem:[%s3406_s11 + $0x108] sm:$0xff] %v1966_v52  ;;  %v1973_v29 = vmul.f32 %v2514_v18, %v1845_v31  ;;  %2537 = vpow2.f32 %v1421_v40  ;;  %v3556_v39 = vpop.f32.mrb[33].mxu0  ;;  %v1441_v31 = vmul.f32 1.442695, %v1239_v17  ;;  %v644_v52 = vadd.f32 %v3436_v46, %v3506_v35 }
 0x130   : > { %v2518_v21 = vpop.eup %2517  ;;  %2096 = vst [vmem:[%s3406_s11 + $0x118] sm:$0xff] %v1968_v13  ;;  %v1975_v37 = vmul.f32 %v2516_v4, %v1847_v61  ;;  %v3558_v30 = vpop.f32.mrb[33].mxu1  ;;  %2539 = vpow2.f32 %v1425_v62 }
 0x131   : > { %v2520_v44 = vpop.eup %2519  ;;  %2101 = vst [vmem:[%s3406_s11 + $0x140] sm:$0xff] %v1973_v29  ;;  %v1974_v47 = vmul.f32 %v2518_v21, %v1846_v15  ;;  %2541 = vpow2.f32 %v1423_v32  ;;  %v3563_v11 = vpop.permute.xlu0 %444  ;;  %v805_v15 = vadd.f32 %v3438_v49, %v3506_v35 }
 0x132   : > { %v2522_v12 = vpop.eup %2521  ;;  %2103 = vst [vmem:[%s3406_s11 + $0x150] sm:$0xff] %v1975_v37  ;;  %v1976_v1 = vmul.f32 %v2520_v44, %v1848_v59  ;;  %4133 = vst [vmem:[#allocation8_spill] sm:$0xff] %v3563_v11  ;;  %2543 = vpow2.f32 %v1427_v54  ;;  %v3568_v61 = vpop.f32.mrb[34].mxu0  ;;  %v648_v46 = vadd.f32 %v3445_v2, %v3563_v11  ;;  %v809_v21 = vadd.f32 %v3447_v0, %v3563_v11 }
 0x133   : > { %v2524_v40 = vpop.eup %2523  ;;  %2102 = vst [vmem:[%s3406_s11 + $0x148] sm:$0xff] %v1974_v47  ;;  %v1599_v51 = vadd.f32 1.0, %v2522_v12  ;;  %v3570_v18 = vpop.f32.mrb[34].mxu1  ;;  %2545 = vpow2.f32 %v1437_v16  ;;  %v1238_v16 = vsub.f32 0.0, %v644_v52  ;;  %v650_v2 = vadd.f32 %v3450_v7, %v3563_v11 }
 0x134   : > { %v2526_v62 = vpop.eup %2525  ;;  %2104 = vst [vmem:[%s3406_s11 + $0x158] sm:$0xff] %v1976_v1  ;;  %v1981_v13 = vmul.f32 %v2524_v40, %v1853_v10  ;;  %v3575_v32 = vpop.f32.mrb[35].mxu0  ;;  %v1240_v1 = vsub.f32 0.0, %v805_v15  ;;  %v811_v7 = vadd.f32 %v3452_v8, %v3563_v11 }
 0x135   : > { %v3577_v17 = vpop.f32.mrb[35].mxu1  ;;  %v2528_v4 = vpop.eup %2527  ;;  %2547 = vrcp.f32 %v1599_v51  ;;  %v1598_v29 = vadd.f32 1.0, %v2526_v62  ;;  %v1245_v62 = vsub.f32 0.0, %v648_v46 }
 0x136   : > { %v2530_v59 = vpop.eup %2529  ;;  %2109 = vst [vmem:[%s3406_s11 + $0x180] sm:$0xff] %v1981_v13  ;;  %v1600_v54 = vadd.f32 1.0, %v2528_v4  ;;  %2549 = vpow2.f32 %v1441_v31  ;;  %v3584_v44 = vpop.f32.mrb[36].mxu0  ;;  %v1247_v4 = vsub.f32 0.0, %v809_v21  ;;  %v1443_v46 = vmul.f32 1.442695, %v1240_v1 }
 0x137   : > { %v2532_v37 = vpop.eup %2531  ;;  %2551 = vrcp.f32 %v1598_v29  ;;  %v1605_v49 = vadd.f32 1.0, %v2530_v59  ;;  %v3586_v47 = vpop.f32.mrb[36].mxu1 }
 0x138   : > { %v2534_v10 = vpop.eup %2533  ;;  %2553 = vrcp.f32 %v1600_v54  ;;  %v1607_v12 = vadd.f32 1.0, %v2532_v37  ;;  %v3590_v40 = vpop.f32.mrb[37].mxu0  ;;  %v1439_v54 = vmul.f32 1.442695, %v1238_v16  ;;  %v1453_v16 = vmul.f32 1.442695, %v1245_v62 }
 0x139   : > { %v3592_v31 = vpop.f32.mrb[37].mxu1  ;;  %v2536_v0 = vpop.eup %2535  ;;  %2555 = vrcp.f32 %v1605_v49  ;;  %v1606_v51 = vadd.f32 1.0, %v2534_v10  ;;  %v1246_v10 = vsub.f32 0.0, %v650_v2  ;;  %v1457_v2 = vmul.f32 1.442695, %v1247_v4 }
 0x13a   : > { %v2538_v52 = vpop.eup %2537  ;;  %2557 = vrcp.f32 %v1607_v12  ;;  %v1608_v13 = vadd.f32 1.0, %v2536_v0  ;;  %v3594_v29 = vpop.permute.xlu1 %449  ;;  %v1248_v62 = vsub.f32 0.0, %v811_v7  ;;  %v1861_v7 = vld [vmem:[%s3378_s8 + $0x1c0] sm:$0xff] }
 0x13b   : > { %4134 = vst [vmem:[#allocation9_spill] sm:$0xff] %v3594_v29  ;;  %v2540_v59 = vpop.eup %2539  ;;  %2559 = vrcp.f32 %v1606_v51  ;;  %v1613_v15 = vadd.f32 1.0, %v2538_v52  ;;  %v3598_v37 = vpop.f32.mrb[38].mxu0  ;;  %v654_v8 = vadd.f32 %v3463_v23, %v3594_v29  ;;  %v656_v23 = vadd.f32 %v3469_v28, %v3594_v29 }
 0x13c   : > { %v2542_v35 = vpop.eup %2541  ;;  %2561 = vrcp.f32 %v1608_v13  ;;  %v1615_v49 = vadd.f32 1.0, %v2540_v59  ;;  %v3600_v12 = vpop.f32.mrb[38].mxu1  ;;  %v815_v13 = vadd.f32 %v3465_v24, %v3594_v29  ;;  %v1856_v24 = vld [vmem:[%s3378_s8 + $0x198] sm:$0xff]  ;;  %v817_v63 = vadd.f32 %v3473_v34, %v3594_v29 }
 0x13d   : > { %v3602_v21 = vpop.f32.mrb[39].mxu0  ;;  %v2544_v0 = vpop.eup %2543  ;;  %2563 = vrcp.f32 %v1613_v15  ;;  %v1614_v51 = vadd.f32 1.0, %v2542_v35 }
 0x13e   : > { %v3607_v52 = vpop.f32.mrb[39].mxu1  ;;  %v2546_v11 = vpop.eup %2545  ;;  %2565 = vrcp.f32 %v1615_v49  ;;  %v1616_v1 = vadd.f32 1.0, %v2544_v0  ;;  %v1455_v0 = vmul.f32 1.442695, %v1246_v10  ;;  %v1255_v34 = vsub.f32 0.0, %v815_v13  ;;  %v1864_v13 = vld [vmem:[%s3378_s8 + $0x1d8] sm:$0xff] }
 0x13f   : > { %4135 = vst [vmem:[#allocation10_spill] sm:$0xff] %v3607_v52  ;;  %v3611_v59 = vpop.permute.xlu0 %454  ;;  %v2548_v20 = vpop.eup %2547  ;;  %2567 = vrcp.f32 %v1614_v51  ;;  %v1621_v35 = vadd.f32 1.0, %v2546_v11  ;;  %v1862_v52 = vld [vmem:[%s3378_s8 + $0x1c8] sm:$0xff] }
 0x140   : > { %4136 = vst [vmem:[#allocation11_spill] sm:$0xff] %v3611_v59  ;;  %v3616_v15 = vpop.f32.mrb[40].mxu0  ;;  %v3618_v19 = vpop.f32.mrb[40].mxu1  ;;  %v1983_v49 = vmul.f32 %v2548_v20, %v1855_v53  ;;  %2569 = vrcp.f32 %v1616_v1  ;;  %v660_v20 = vadd.f32 %v3481_v45, %v3611_v59  ;;  %v1863_v1 = vld [vmem:[%s3378_s8 + $0x1d0] sm:$0xff]  ;;  %v821_v29 = vadd.f32 %v3483_v50, %v3611_v59 }
 0x141   : > { %4137 = vst [vmem:[#allocation12_spill] sm:$0xff] %v3616_v15  ;;  %4138 = vst [vmem:[#allocation13_spill] sm:$0xff] %v3618_v19  ;;  %v2550_v4 = vpop.eup %2549  ;;  %v3623_v51 = vpop.f32.mrb[41].mxu0  ;;  %2571 = vrcp.f32 %v1621_v35  ;;  %v1253_v19 = vsub.f32 0.0, %v654_v8  ;;  %v1459_v8 = vmul.f32 1.442695, %v1248_v62 }
 0x142   : > { %4139 = vst [vmem:[#allocation14_spill] sm:$0xff] %v3623_v51  ;;  %v3625_v11 = vpop.f32.mrb[41].mxu1  ;;  %v2552_v28 = vpop.eup %2551  ;;  %v1623_v15 = vadd.f32 1.0, %v2550_v4  ;;  %2111 = vst [vmem:[%s3406_s11 + $0x190] sm:$0xff] %v1983_v49  ;;  %2573 = vpow2.f32 %v1439_v54  ;;  %v1254_v35 = vsub.f32 0.0, %v656_v23  ;;  %v1256_v50 = vsub.f32 0.0, %v817_v63 }
 0x143   : > { %4140 = vst [vmem:[#allocation15_spill] sm:$0xff] %v3625_v11  ;;  %v2554_v53 = vpop.eup %2553  ;;  %v1982_v10 = vmul.f32 %v2552_v28, %v1854_v41  ;;  %v3635_v45 = vpop.f32.mrb[42].mxu0  ;;  %v662_v49 = vadd.f32 %v3485_v55, %v3611_v59  ;;  %v1869_v28 = vld [vmem:[%s3378_s8 + $0x200] sm:$0xff]  ;;  %v1473_v55 = vmul.f32 1.442695, %v1255_v34 }
 0x144   : > { %v2556_v11 = vpop.eup %2555  ;;  %v1984_v51 = vmul.f32 %v2554_v53, %v1856_v24  ;;  %2575 = vrcp.f32 %v1623_v15  ;;  %v3637_v4 = vpop.f32.mrb[42].mxu1  ;;  %v1469_v53 = vmul.f32 1.442695, %v1253_v19 }
 0x145   : > { %v2558_v41 = vpop.eup %2557  ;;  %2110 = vst [vmem:[%s3406_s11 + $0x188] sm:$0xff] %v1982_v10  ;;  %v1989_v54 = vmul.f32 %v2556_v11, %v1861_v7  ;;  %2577 = vpow2.f32 %v1443_v46  ;;  %v3643_v24 = vpop.f32.mrb[43].mxu0  ;;  %v1261_v11 = vsub.f32 0.0, %v660_v20  ;;  %v1871_v46 = vld [vmem:[%s3378_s8 + $0x210] sm:$0xff]  ;;  %v1263_v10 = vsub.f32 0.0, %v821_v29 }
 0x146   : > { %4141 = vst [vmem:[#allocation16_spill] sm:$0xff] %v3643_v24  ;;  %v3645_v62 = vpop.f32.mrb[43].mxu1  ;;  %v2560_v23 = vpop.eup %2559  ;;  %2112 = vst [vmem:[%s3406_s11 + $0x198] sm:$0xff] %v1984_v51  ;;  %v1991_v15 = vmul.f32 %v2558_v41, %v1863_v1  ;;  %2579 = vpow2.f32 %v1453_v16  ;;  %v1870_v51 = vld [vmem:[%s3378_s8 + $0x208] sm:$0xff]  ;;  %v1471_v1 = vmul.f32 1.442695, %v1254_v35 }
 0x147   : > { %4142 = vst [vmem:[#allocation17_spill] sm:$0xff] %v3645_v62  ;;  %v2562_v7 = vpop.eup %2561  ;;  %2117 = vst [vmem:[%s3406_s11 + $0x1c0] sm:$0xff] %v1989_v54  ;;  %v1990_v63 = vmul.f32 %v2560_v23, %v1862_v52  ;;  %2581 = vpow2.f32 %v1457_v2  ;;  %v3653_v16 = vpop.f32.mrb[44].mxu0  ;;  %v1872_v41 = vld [vmem:[%s3378_s8 + $0x218] sm:$0xff]  ;;  %v1475_v2 = vmul.f32 1.442695, %v1256_v50 }
 0x148   : > { %v2564_v24 = vpop.eup %2563  ;;  %2119 = vst [vmem:[%s3406_s11 + $0x1d0] sm:$0xff] %v1991_v15  ;;  %v1992_v62 = vmul.f32 %v2562_v7, %v1864_v13  ;;  %2583 = vpow2.f32 %v1455_v0  ;;  %v3655_v19 = vpop.f32.mrb[44].mxu1  ;;  %v1262_v29 = vsub.f32 0.0, %v662_v49  ;;  %v1877_v13 = vld [vmem:[%s3378_s8 + $0x240] sm:$0xff]  ;;  %v1485_v23 = vmul.f32 1.442695, %v1261_v11 }
 0x149   : > { %v2566_v20 = vpop.eup %2565  ;;  %2118 = vst [vmem:[%s3406_s11 + $0x1c8] sm:$0xff] %v1990_v63  ;;  %v1997_v52 = vmul.f32 %v2564_v24, %v1869_v28  ;;  %2585 = vpow2.f32 %v1459_v8  ;;  %v3659_v34 = vpop.f32.mrb[45].mxu0  ;;  %v1489_v8 = vmul.f32 1.442695, %v1263_v10  ;;  %v1879_v7 = vld [vmem:[%s3378_s8 + $0x250] sm:$0xff] }
 0x14a   : > { %v3661_v54 = vpop.f32.mrb[45].mxu1  ;;  %v2568_v0 = vpop.eup %2567  ;;  %2120 = vst [vmem:[%s3406_s11 + $0x1d8] sm:$0xff] %v1992_v62  ;;  %v1999_v35 = vmul.f32 %v2566_v20, %v1871_v46  ;;  %2587 = vpow2.f32 %v1469_v53  ;;  %v1487_v46 = vmul.f32 1.442695, %v1262_v29 }
 0x14b   : > { %v2570_v15 = vpop.eup %2569  ;;  %2125 = vst [vmem:[%s3406_s11 + $0x200] sm:$0xff] %v1997_v52  ;;  %v1998_v24 = vmul.f32 %v2568_v0, %v1870_v51  ;;  %2589 = vpow2.f32 %v1473_v55  ;;  %v3666_v50 = vpop.permute.xlu1 %459 }
 0x14c   : > { %4143 = vst [vmem:[#allocation18_spill] sm:$0xff] %v3666_v50  ;;  %v2572_v49 = vpop.eup %2571  ;;  %2127 = vst [vmem:[%s3406_s11 + $0x210] sm:$0xff] %v1999_v35  ;;  %v2000_v28 = vmul.f32 %v2570_v15, %v1872_v41  ;;  %2591 = vpow2.f32 %v1471_v1  ;;  %v3670_v63 = vpop.f32.mrb[46].mxu0  ;;  %v823_v1 = vadd.f32 %v3487_v56, %v3611_v59  ;;  %v827_v35 = vadd.f32 %v3499_v25, %v3666_v50 }
 0x14d   : > { %v3672_v62 = vpop.f32.mrb[46].mxu1  ;;  %v2574_v53 = vpop.eup %2573  ;;  %2126 = vst [vmem:[%s3406_s11 + $0x208] sm:$0xff] %v1998_v24  ;;  %v2005_v11 = vmul.f32 %v2572_v49, %v1877_v13  ;;  %2593 = vpow2.f32 %v1475_v2  ;;  %v666_v2 = vadd.f32 %v3494_v14, %v3666_v50  ;;  %v668_v24 = vadd.f32 %v3501_v27, %v3666_v50 }
 0x14e   : > { %v3675_v55 = vpop.f32.mrb[47].mxu0  ;;  %v3677_v10 = vpop.f32.mrb[47].mxu1  ;;  %2128 = vst [vmem:[%s3406_s11 + $0x218] sm:$0xff] %v2000_v28  ;;  %v1622_v20 = vadd.f32 1.0, %v2574_v53  ;;  %2595 = vpow2.f32 %v1485_v23 }
 0x14f   : > { %v2576_v51 = vpop.eup %2575  ;;  %2133 = vst [vmem:[%s3406_s11 + $0x240] sm:$0xff] %v2005_v11  ;;  %2597 = vpow2.f32 %v1489_v8  ;;  %v3687_v13 = vpop.f32.mrb[48].mxu0  ;;  %v1269_v11 = vsub.f32 0.0, %v666_v2  ;;  %v1270_v59 = vsub.f32 0.0, %v668_v24 }
 0x150   : > { %v2578_v52 = vpop.eup %2577  ;;  %v2007_v41 = vmul.f32 %v2576_v51, %v1879_v7  ;;  %2599 = vrcp.f32 %v1622_v20  ;;  %v3689_v15 = vpop.f32.mrb[48].mxu1  ;;  %v1264_v7 = vsub.f32 0.0, %v823_v1 }
 0x151   : > { %v2580_v29 = vpop.eup %2579  ;;  %v1624_v0 = vadd.f32 1.0, %v2578_v52  ;;  %2601 = vpow2.f32 %v1487_v46  ;;  %v3694_v8 = vpop.f32.mrb[49].mxu0  ;;  %v1271_v52 = vsub.f32 0.0, %v827_v35 }
 0x152   : > { %v2582_v23 = vpop.eup %2581  ;;  %2135 = vst [vmem:[%s3406_s11 + $0x250] sm:$0xff] %v2007_v41  ;;  %v1629_v56 = vadd.f32 1.0, %v2580_v29  ;;  %v3696_v14 = vpop.f32.mrb[49].mxu1 }
 0x153   : > { %4144 = vst [vmem:[#allocation19_spill] sm:$0xff] %v3696_v14  ;;  %v2584_v49 = vpop.eup %2583  ;;  %2603 = vrcp.f32 %v1624_v0  ;;  %v1631_v28 = vadd.f32 1.0, %v2582_v23  ;;  %v3698_v51 = vpop.permute.xlu0 %464  ;;  %v829_v0 = vadd.f32 %v3508_v36, %v3666_v50 }
 0x154   : > { %v2586_v25 = vpop.eup %2585  ;;  %2605 = vrcp.f32 %v1629_v56  ;;  %v1630_v53 = vadd.f32 1.0, %v2584_v49  ;;  %4145 = vst [vmem:[#allocation20_spill] sm:$0xff] %v3698_v51  ;;  %v3700_v41 = vpop.f32.mrb[50].mxu0  ;;  %v1491_v49 = vmul.f32 1.442695, %v1264_v7  ;;  %v672_v35 = vadd.f32 %v3516_v48, %v3698_v51 }
 0x155   : > { %v2588_v20 = vpop.eup %2587  ;;  %2607 = vrcp.f32 %v1631_v28  ;;  %v1632_v46 = vadd.f32 1.0, %v2586_v25  ;;  %4146 = vst [vmem:[#allocation21_spill] sm:$0xff] %v3700_v41  ;;  %v3704_v1 = vpop.f32.mrb[50].mxu1  ;;  %v3714_v36 = vadd.f32 %v3518_v57, %v3698_v51  ;;  %v3721_v48 = vadd.f32 %v3523_v5, %v3698_v51 }
 0x156   : > { %v2590_v27 = vpop.eup %2589  ;;  %2609 = vrcp.f32 %v1630_v53  ;;  %v1637_v29 = vadd.f32 1.0, %v2588_v20  ;;  %4147 = vst [vmem:[#allocation22_spill] sm:$0xff] %v3704_v1  ;;  %v3706_v23 = vpop.f32.mrb[51].mxu0  ;;  %v1501_v53 = vmul.f32 1.442695, %v1269_v11  ;;  %v1277_v41 = vsub.f32 0.0, %v672_v35 }
 0x157   : > { %4148 = vst [vmem:[#allocation23_spill] sm:$0xff] %v3706_v23  ;;  %v2592_v2 = vpop.eup %2591  ;;  %2611 = vrcp.f32 %v1632_v46  ;;  %v1639_v56 = vadd.f32 1.0, %v2590_v27  ;;  %v3710_v28 = vpop.f32.mrb[51].mxu1  ;;  %v1878_v46 = vld [vmem:[%s3378_s8 + $0x248] sm:$0xff]  ;;  %v1505_v27 = vmul.f32 1.442695, %v1271_v52  ;;  %v835_v5 = vadd.f32 %v3525_v9, %v3698_v51 }
 0x158   : > { %4149 = vst [vmem:[#allocation24_spill] sm:$0xff] %v3710_v28  ;;  %v2594_v25 = vpop.eup %2593  ;;  %2613 = vrcp.f32 %v1637_v29  ;;  %v1638_v24 = vadd.f32 1.0, %v2592_v2  ;;  %v3716_v20 = vpop.permute.xlu1 %469  ;;  %v1503_v2 = vmul.f32 1.442695, %v1270_v59  ;;  %v1272_v23 = vsub.f32 0.0, %v829_v0 }
 0x159   : > { %v2596_v50 = vpop.eup %2595  ;;  %2615 = vrcp.f32 %v1639_v56  ;;  %v1640_v7 = vadd.f32 1.0, %v2594_v25  ;;  %v3723_v28 = vpop.f32.mrb[52].mxu0  ;;  %v1880_v25 = vld [vmem:[%s3378_s8 + $0x258] sm:$0xff]  ;;  %v1279_v59 = vsub.f32 0.0, %v3714_v36  ;;  %v678_v0 = vadd.f32 %v3535_v33, %v3716_v20  ;;  %v1886_v33 = vld [vmem:[%s3378_s8 + $0x288] sm:$0xff] }
 0x15a   : > { %4150 = vst [vmem:[#allocation25_spill] sm:$0xff] %v3723_v28  ;;  %v3725_v29 = vpop.f32.mrb[52].mxu1  ;;  %v2598_v11 = vpop.eup %2597  ;;  %2617 = vrcp.f32 %v1638_v24  ;;  %v1645_v57 = vadd.f32 1.0, %v2596_v50  ;;  %v1885_v50 = vld [vmem:[%s3378_s8 + $0x280] sm:$0xff]  ;;  %v1278_v9 = vsub.f32 0.0, %v3721_v48 }
 0x15b   : > { %4151 = vst [vmem:[#allocation26_spill] sm:$0xff] %v3725_v29  ;;  %v3727_v1 = vpop.f32.mrb[53].mxu0  ;;  %v2600_v56 = vpop.eup %2599  ;;  %2619 = vrcp.f32 %v1640_v7  ;;  %v1647_v52 = vadd.f32 1.0, %v2598_v11  ;;  %v1887_v7 = vld [vmem:[%s3378_s8 + $0x290] sm:$0xff]  ;;  %v839_v11 = vadd.f32 %v3537_v42, %v3716_v20 }
 0x15c   : > { %v3732_v28 = vpop.f32.mrb[53].mxu1  ;;  %v2602_v29 = vpop.eup %2601  ;;  %v2006_v14 = vmul.f32 %v2600_v56, %v1878_v46  ;;  %2621 = vrcp.f32 %v1645_v57  ;;  %v1507_v56 = vmul.f32 1.442695, %v1272_v23  ;;  %v1893_v23 = vld [vmem:[%s3378_s8 + $0x2c0] sm:$0xff] }
 0x15d   : > { %4152 = vst [vmem:[#allocation27_spill] sm:$0xff] %v3732_v28  ;;  %v2604_v24 = vpop.eup %2603  ;;  %2623 = vrcp.f32 %v1647_v52  ;;  %v1646_v35 = vadd.f32 1.0, %v2602_v29  ;;  %v3742_v51 = vpop.f32.mrb[54].mxu0  ;;  %v680_v29 = vadd.f32 %v3541_v60, %v3716_v20  ;;  %v1517_v28 = vmul.f32 1.442695, %v1277_v41 }
 0x15e   : > { %4153 = vst [vmem:[#allocation28_spill] sm:$0xff] %v3742_v51  ;;  %v3744_v46 = vpop.f32.mrb[54].mxu1  ;;  %v2606_v57 = vpop.eup %2605  ;;  %2134 = vst [vmem:[%s3406_s11 + $0x248] sm:$0xff] %v2006_v14  ;;  %v2008_v36 = vmul.f32 %v2604_v24, %v1880_v25  ;;  %2625 = vpow2.f32 %v1491_v49  ;;  %v1280_v14 = vsub.f32 0.0, %v835_v5  ;;  %v1285_v60 = vsub.f32 0.0, %v678_v0 }
 0x15f   : > { %4154 = vst [vmem:[#allocation29_spill] sm:$0xff] %v3744_v46  ;;  %v3750_v52 = vpop.f32.mrb[55].mxu0  ;;  %v3752_v48 = vpop.f32.mrb[55].mxu1  ;;  %v2013_v51 = vmul.f32 %v2606_v57, %v1885_v50  ;;  %v1888_v46 = vld [vmem:[%s3378_s8 + $0x298] sm:$0xff]  ;;  %2627 = vrcp.f32 %v1646_v35  ;;  %v841_v24 = vadd.f32 %v3543_v22, %v3716_v20  ;;  %v1895_v50 = vld [vmem:[%s3378_s8 + $0x2d0] sm:$0xff]  ;;  %v1287_v5 = vsub.f32 0.0, %v839_v11 }
 0x160   : > { %4155 = vst [vmem:[#allocation30_spill] sm:$0xff] %v3750_v52  ;;  %4156 = vst [vmem:[#allocation31_spill] sm:$0xff] %v3752_v48  ;;  %v2608_v42 = vpop.eup %2607  ;;  %2629 = vpow2.f32 %v1501_v53  ;;  %v1521_v41 = vmul.f32 1.442695, %v1279_v59  ;;  %v3761_v35 = vpop.f32.mrb[56].mxu0  ;;  %v1894_v53 = vld [vmem:[%s3378_s8 + $0x2c8] sm:$0xff] }
 0x161   : > { %v2610_v25 = vpop.eup %2609  ;;  %2136 = vst [vmem:[%s3406_s11 + $0x258] sm:$0xff] %v2008_v36  ;;  %v2015_v49 = vmul.f32 %v2608_v42, %v1887_v7  ;;  %2141 = vst [vmem:[%s3406_s11 + $0x280] sm:$0xff] %v2013_v51  ;;  %2631 = vpow2.f32 %v1505_v27  ;;  %v1519_v0 = vmul.f32 1.442695, %v1278_v9  ;;  %v1286_v22 = vsub.f32 0.0, %v680_v29  ;;  %v3765_v36 = vpop.f32.mrb[56].mxu1 }
 0x162   : > { %v2612_v52 = vpop.eup %2611  ;;  %v2014_v48 = vmul.f32 %v2610_v25, %v1886_v33  ;;  %2633 = vpow2.f32 %v1503_v2  ;;  %v3767_v51 = vpop.f32.mrb[57].mxu0  ;;  %v1896_v11 = vld [vmem:[%s3378_s8 + $0x2d8] sm:$0xff]  ;;  %v1523_v33 = vmul.f32 1.442695, %v1280_v14  ;;  %v1901_v9 = vld [vmem:[%s3378_s8 + $0x300] sm:$0xff] }
 0x163   : > { %v2614_v57 = vpop.eup %2613  ;;  %2143 = vst [vmem:[%s3406_s11 + $0x290] sm:$0xff] %v2015_v49  ;;  %v2016_v7 = vmul.f32 %v2612_v52, %v1888_v46  ;;  %2635 = vpow2.f32 %v1507_v56  ;;  %v3771_v42 = vpop.f32.mrb[57].mxu1  ;;  %v1533_v29 = vmul.f32 1.442695, %v1285_v60  ;;  %v1288_v52 = vsub.f32 0.0, %v841_v24  ;;  %v1903_v49 = vld [vmem:[%s3378_s8 + $0x310] sm:$0xff] }
 0x164   : > { %v2616_v27 = vpop.eup %2615  ;;  %2142 = vst [vmem:[%s3406_s11 + $0x288] sm:$0xff] %v2014_v48  ;;  %v2021_v59 = vmul.f32 %v2614_v57, %v1893_v23  ;;  %2637 = vpow2.f32 %v1517_v28  ;;  %v1537_v23 = vmul.f32 1.442695, %v1287_v5  ;;  %v3777_v56 = vpop.f32.mrb[58].mxu0  ;;  %v1535_v28 = vmul.f32 1.442695, %v1286_v22 }
 0x165   : > { %v2618_v46 = vpop.eup %2617  ;;  %2144 = vst [vmem:[%s3406_s11 + $0x298] sm:$0xff] %v2016_v7  ;;  %v2023_v2 = vmul.f32 %v2616_v27, %v1895_v50  ;;  %2639 = vpow2.f32 %v1521_v41  ;;  %v3779_v14 = vpop.f32.mrb[58].mxu1  ;;  %v1902_v7 = vld [vmem:[%s3378_s8 + $0x308] sm:$0xff] }
 0x166   : > { %v2620_v25 = vpop.eup %2619  ;;  %2149 = vst [vmem:[%s3406_s11 + $0x2c0] sm:$0xff] %v2021_v59  ;;  %v2022_v48 = vmul.f32 %v2618_v46, %v1894_v53  ;;  %2641 = vpow2.f32 %v1519_v0  ;;  %v3784_v53 = vpop.f32.mrb[59].mxu0  ;;  %v1539_v59 = vmul.f32 1.442695, %v1288_v52  ;;  %v910_v0 = vadd.f32 %v3551_v26, %v3338_v58 }
 0x167   : > { %v2622_v57 = vpop.eup %2621  ;;  %2151 = vst [vmem:[%s3406_s11 + $0x2d0] sm:$0xff] %v2023_v2  ;;  %v2024_v50 = vmul.f32 %v2620_v25, %v1896_v11  ;;  %2643 = vpow2.f32 %v1523_v33  ;;  %v3786_v41 = vpop.f32.mrb[59].mxu1  ;;  %v912_v26 = vadd.f32 %v3556_v39, %v3338_v58 }
 0x168   : > { %v2624_v60 = vpop.eup %2623  ;;  %2150 = vst [vmem:[%s3406_s11 + $0x2c8] sm:$0xff] %v2022_v48  ;;  %v2029_v24 = vmul.f32 %v2622_v57, %v1901_v9  ;;  %2645 = vpow2.f32 %v1533_v29  ;;  %v3792_v22 = vpop.f32.mrb[60].mxu0  ;;  %v1071_v29 = vadd.f32 %v3553_v43, %v3338_v58 }
 0x169   : > { %v2626_v5 = vpop.eup %2625  ;;  %2152 = vst [vmem:[%s3406_s11 + $0x2d8] sm:$0xff] %v2024_v50  ;;  %v2031_v27 = vmul.f32 %v2624_v60, %v1903_v49  ;;  %2647 = vpow2.f32 %v1537_v23  ;;  %v3794_v33 = vpop.f32.mrb[60].mxu1  ;;  %v1169_v60 = vsub.f32 0.0, %v910_v0  ;;  %v916_v0 = vadd.f32 %v3568_v61, %v3344_v3 }
 0x16a   : > { %v2628_v46 = vpop.eup %2627  ;;  %2157 = vst [vmem:[%s3406_s11 + $0x300] sm:$0xff] %v2029_v24  ;;  %v1648_v11 = vadd.f32 1.0, %v2626_v5  ;;  %2649 = vpow2.f32 %v1535_v28  ;;  %v3799_v52 = vpop.f32.mrb[61].mxu0  ;;  %v1171_v5 = vsub.f32 0.0, %v1071_v29 }
 0x16b   : > { %v2630_v2 = vpop.eup %2629  ;;  %2159 = vst [vmem:[%s3406_s11 + $0x310] sm:$0xff] %v2031_v27  ;;  %v2030_v9 = vmul.f32 %v2628_v46, %v1902_v7  ;;  %v3801_v25 = vpop.f32.mrb[61].mxu1  ;;  %v1073_v27 = vadd.f32 %v3558_v30, %v3338_v58  ;;  %v1077_v58 = vadd.f32 %v3570_v18, %v3344_v3  ;;  %v1177_v18 = vsub.f32 0.0, %v916_v0 }
 0x16c   : > { %v2632_v48 = vpop.eup %2631  ;;  %2651 = vrcp.f32 %v1648_v11  ;;  %v1653_v49 = vadd.f32 1.0, %v2630_v2  ;;  %v3806_v24 = vpop.f32.mrb[62].mxu0  ;;  %v1170_v2 = vsub.f32 0.0, %v912_v26 }
 0x16d   : > { %v2634_v23 = vpop.eup %2633  ;;  %2158 = vst [vmem:[%s3406_s11 + $0x308] sm:$0xff] %v2030_v9  ;;  %v1655_v57 = vadd.f32 1.0, %v2632_v48  ;;  %2653 = vpow2.f32 %v1539_v59  ;;  %v3810_v46 = vpop.f32.mrb[62].mxu1 }
 0x16e   : > { %v2636_v50 = vpop.eup %2635  ;;  %2655 = vrcp.f32 %v1653_v49  ;;  %v1654_v28 = vadd.f32 1.0, %v2634_v23  ;;  %v3812_v39 = vpop.f32.mrb[63].mxu0  ;;  %v1301_v23 = vmul.f32 1.442695, %v1169_v60  ;;  %v1179_v60 = vsub.f32 0.0, %v1077_v58 }
 0x16f   : > { %v2638_v43 = vpop.eup %2637  ;;  %2657 = vrcp.f32 %v1655_v57  ;;  %v1656_v7 = vadd.f32 1.0, %v2636_v50  ;;  %4157 = vst [vmem:[#allocation32_spill] sm:$0xff] %v3812_v39  ;;  %v3816_v9 = vpop.f32.mrb[63].mxu1  ;;  %v918_v57 = vadd.f32 %v3575_v32, %v3344_v3  ;;  %v1305_v50 = vmul.f32 1.442695, %v1171_v5 }
 0x170   : > { %v2640_v11 = vpop.eup %2639  ;;  %2659 = vrcp.f32 %v1654_v28  ;;  %v1661_v59 = vadd.f32 1.0, %v2638_v43  ;;  %4158 = vst [vmem:[#allocation33_spill] sm:$0xff] %v3816_v9  ;;  %v1172_v28 = vsub.f32 0.0, %v1073_v27  ;;  %v1904_v9 = vld [vmem:[%s3378_s8 + $0x318] sm:$0xff]  ;;  %v1079_v32 = vadd.f32 %v3577_v17, %v3344_v3  ;;  %v1910_v17 = vld [vmem:[%s3378_s8 + $0x348] sm:$0xff] }
 0x171   : > { %v2642_v48 = vpop.eup %2641  ;;  %2661 = vrcp.f32 %v1656_v7  ;;  %v1663_v29 = vadd.f32 1.0, %v2640_v11  ;;  %v1303_v11 = vmul.f32 1.442695, %v1170_v2  ;;  %v1178_v27 = vsub.f32 0.0, %v918_v57 }
 0x172   : > { %v2644_v30 = vpop.eup %2643  ;;  %2663 = vrcp.f32 %v1661_v59  ;;  %v1662_v49 = vadd.f32 1.0, %v2642_v48  ;;  %v1083_v58 = vadd.f32 %v3586_v47, %v3346_v6  ;;  %v924_v57 = vadd.f32 %v3590_v40, %v3346_v6 }
 0x173   : > { %v2646_v26 = vpop.eup %2645  ;;  %2665 = vrcp.f32 %v1663_v29  ;;  %v1664_v61 = vadd.f32 1.0, %v2644_v30  ;;  %v1909_v29 = vld [vmem:[%s3378_s8 + $0x340] sm:$0xff]  ;;  %v922_v30 = vadd.f32 %v3584_v44, %v3346_v6  ;;  %v1085_v47 = vadd.f32 %v3592_v31, %v3346_v6 }
 0x174   : > { %v2648_v43 = vpop.eup %2647  ;;  %2667 = vrcp.f32 %v1662_v49  ;;  %v1669_v7 = vadd.f32 1.0, %v2646_v26  ;;  %v1911_v49 = vld [vmem:[%s3378_s8 + $0x350] sm:$0xff]  ;;  %v1307_v26 = vmul.f32 1.442695, %v1172_v28  ;;  %v1180_v28 = vsub.f32 0.0, %v1079_v32 }
 0x175   : > { %v2650_v39 = vpop.eup %2649  ;;  %2669 = vrcp.f32 %v1664_v61  ;;  %v1671_v59 = vadd.f32 1.0, %v2648_v43  ;;  %v1912_v43 = vld [vmem:[%s3378_s8 + $0x358] sm:$0xff]  ;;  %v928_v32 = vadd.f32 %v3598_v37, %v3356_v38 }
 0x176   : > { %v2652_v48 = vpop.eup %2651  ;;  %2671 = vrcp.f32 %v1669_v7  ;;  %v1670_v5 = vadd.f32 1.0, %v2650_v39  ;;  %v1317_v39 = vmul.f32 1.442695, %v1177_v18  ;;  %v1321_v18 = vmul.f32 1.442695, %v1179_v60 }
 0x177   : > { %v2654_v2 = vpop.eup %2653  ;;  %v2032_v0 = vmul.f32 %v2652_v48, %v1904_v9  ;;  %2673 = vrcp.f32 %v1671_v59  ;;  %v1917_v48 = vld [vmem:[%s3378_s8 + $0x380] sm:$0xff]  ;;  %v1319_v60 = vmul.f32 1.442695, %v1178_v27 }
 0x178   : > { %v2656_v3 = vpop.eup %2655  ;;  %2675 = vrcp.f32 %v1670_v5  ;;  %v1672_v61 = vadd.f32 1.0, %v2654_v2  ;;  %v1185_v5 = vsub.f32 0.0, %v922_v30  ;;  %v1186_v30 = vsub.f32 0.0, %v924_v57 }
 0x179   : > { %v2658_v44 = vpop.eup %2657  ;;  %2160 = vst [vmem:[%s3406_s11 + $0x318] sm:$0xff] %v2032_v0  ;;  %v2037_v9 = vmul.f32 %v2656_v3, %v1909_v29  ;;  %2677 = vpow2.f32 %v1301_v23  ;;  %v1919_v29 = vld [vmem:[%s3378_s8 + $0x390] sm:$0xff]  ;;  %v1187_v23 = vsub.f32 0.0, %v1083_v58  ;;  %v1918_v0 = vld [vmem:[%s3378_s8 + $0x388] sm:$0xff]  ;;  %v1188_v58 = vsub.f32 0.0, %v1085_v47 }
 0x17a   : > { %v2660_v7 = vpop.eup %2659  ;;  %v2039_v59 = vmul.f32 %v2658_v44, %v1911_v49  ;;  %2679 = vrcp.f32 %v1672_v61  ;;  %v1925_v44 = vld [vmem:[%s3378_s8 + $0x3c0] sm:$0xff] }
 0x17b   : > { %v2662_v40 = vpop.eup %2661  ;;  %2165 = vst [vmem:[%s3406_s11 + $0x340] sm:$0xff] %v2037_v9  ;;  %v2038_v2 = vmul.f32 %v2660_v7, %v1910_v17  ;;  %2681 = vpow2.f32 %v1305_v50  ;;  %v1920_v17 = vld [vmem:[%s3378_s8 + $0x398] sm:$0xff]  ;;  %v1323_v50 = vmul.f32 1.442695, %v1180_v28  ;;  %v1927_v9 = vld [vmem:[%s3378_s8 + $0x3d0] sm:$0xff]  ;;  %v1926_v7 = vld [vmem:[%s3378_s8 + $0x3c8] sm:$0xff] }
 0x17c   : > { %v2664_v6 = vpop.eup %2663  ;;  %2167 = vst [vmem:[%s3406_s11 + $0x350] sm:$0xff] %v2039_v59  ;;  %v2040_v31 = vmul.f32 %v2662_v40, %v1912_v43  ;;  %2683 = vpow2.f32 %v1303_v11  ;;  %v1333_v11 = vmul.f32 1.442695, %v1185_v5  ;;  %v1337_v43 = vmul.f32 1.442695, %v1187_v23 }
 0x17d   : > { %v2666_v49 = vpop.eup %2665  ;;  %2166 = vst [vmem:[%s3406_s11 + $0x348] sm:$0xff] %v2038_v2  ;;  %v2045_v3 = vmul.f32 %v2664_v6, %v1917_v48  ;;  %2685 = vpow2.f32 %v1307_v26  ;;  %v1193_v26 = vsub.f32 0.0, %v928_v32  ;;  %v1335_v59 = vmul.f32 1.442695, %v1186_v30  ;;  %v1928_v2 = vld [vmem:[%s3378_s8 + $0x3d8] sm:$0xff] }
 0x17e   : > { %v2668_v37 = vpop.eup %2667  ;;  %2168 = vst [vmem:[%s3406_s11 + $0x358] sm:$0xff] %v2040_v31  ;;  %v2047_v61 = vmul.f32 %v2666_v49, %v1919_v29  ;;  %2687 = vpow2.f32 %v1317_v39  ;;  %v1339_v5 = vmul.f32 1.442695, %v1188_v58  ;;  %v930_v49 = vadd.f32 %v3602_v21, %v3356_v38 }
 0x17f   : > { %v2670_v27 = vpop.eup %2669  ;;  %2173 = vst [vmem:[%s3406_s11 + $0x380] sm:$0xff] %v2045_v3  ;;  %v2046_v57 = vmul.f32 %v2668_v37, %v1918_v0  ;;  %2689 = vpow2.f32 %v1321_v18  ;;  %v1349_v32 = vmul.f32 1.442695, %v1193_v26  ;;  %v1089_v0 = vadd.f32 %v3600_v12, %v3356_v38  ;;  %v4159_v37 = vld [vmem:[#allocation10_spill] sm:$0xff] }
 0x180   : > { %v2672_v28 = vpop.eup %2671  ;;  %2175 = vst [vmem:[%s3406_s11 + $0x390] sm:$0xff] %v2047_v61  ;;  %v2048_v47 = vmul.f32 %v2670_v27, %v1920_v17  ;;  %2691 = vpow2.f32 %v1319_v60  ;;  %v1091_v61 = vadd.f32 %v4159_v37, %v3356_v38  ;;  %v4160_v27 = vld [vmem:[#allocation2_spill] sm:$0xff]  ;;  %v1194_v26 = vsub.f32 0.0, %v930_v49 }
 0x181   : > { %v2674_v48 = vpop.eup %2673  ;;  %2174 = vst [vmem:[%s3406_s11 + $0x388] sm:$0xff] %v2046_v57  ;;  %v2053_v39 = vmul.f32 %v2672_v28, %v1925_v44  ;;  %2693 = vpow2.f32 %v1323_v50  ;;  %v4161_v57 = vld [vmem:[#allocation12_spill] sm:$0xff]  ;;  %v4162_v28 = vld [vmem:[#allocation13_spill] sm:$0xff] }
 0x182   : > { %v2676_v40 = vpop.eup %2675  ;;  %2176 = vst [vmem:[%s3406_s11 + $0x398] sm:$0xff] %v2048_v47  ;;  %v2055_v18 = vmul.f32 %v2674_v48, %v1927_v9  ;;  %2695 = vpow2.f32 %v1333_v11  ;;  %v1195_v11 = vsub.f32 0.0, %v1089_v0  ;;  %v934_v9 = vadd.f32 %v4161_v57, %v4160_v27  ;;  %v4163_v48 = vld [vmem:[#allocation14_spill] sm:$0xff]  ;;  %v1811_v57 = vld [vmem:[%s3378_s8 + $0x30] sm:$0xff] }
 0x183   : > { %v2678_v29 = vpop.eup %2677  ;;  %2181 = vst [vmem:[%s3406_s11 + $0x3c0] sm:$0xff] %v2053_v39  ;;  %v2054_v23 = vmul.f32 %v2676_v40, %v1926_v7  ;;  %2697 = vpow2.f32 %v1337_v43  ;;  %v1095_v47 = vadd.f32 %v4162_v28, %v4160_v27  ;;  %v936_v38 = vadd.f32 %v4163_v48, %v4160_v27  ;;  %v1810_v28 = vld [vmem:[%s3378_s8 + $0x28] sm:$0xff]  ;;  %v1812_v48 = vld [vmem:[%s3378_s8 + $0x38] sm:$0xff] }
 0x184   : > { %v2680_v6 = vpop.eup %2679  ;;  %2183 = vst [vmem:[%s3406_s11 + $0x3d0] sm:$0xff] %v2055_v18  ;;  %v1553_v31 = vadd.f32 1.0, %v2678_v29  ;;  %2699 = vpow2.f32 %v1335_v59  ;;  %v1196_v40 = vsub.f32 0.0, %v1091_v61  ;;  %v1353_v29 = vmul.f32 1.442695, %v1195_v11 }
 0x185   : > { %v2682_v60 = vpop.eup %2681  ;;  %2182 = vst [vmem:[%s3406_s11 + $0x3c8] sm:$0xff] %v2054_v23  ;;  %v2056_v30 = vmul.f32 %v2680_v6, %v1928_v2  ;;  %2701 = vpow2.f32 %v1339_v5  ;;  %v1201_v23 = vsub.f32 0.0, %v934_v9  ;;  %v1203_v0 = vsub.f32 0.0, %v1095_v47 }
 0x186   : > { %v2684_v3 = vpop.eup %2683  ;;  %2703 = vrcp.f32 %v1553_v31  ;;  %v1555_v17 = vadd.f32 1.0, %v2682_v60  ;;  %v1351_v31 = vmul.f32 1.442695, %v1194_v26  ;;  %v1355_v61 = vmul.f32 1.442695, %v1196_v40 }
 0x187   : > { %v2686_v50 = vpop.eup %2685  ;;  %2184 = vst [vmem:[%s3406_s11 + $0x3d8] sm:$0xff] %v2056_v30  ;;  %v1554_v58 = vadd.f32 1.0, %v2684_v3  ;;  %2705 = vpow2.f32 %v1349_v32  ;;  %v1809_v30 = vld [vmem:[%s3378_s8 + $0x20] sm:$0xff]  ;;  %v1202_v3 = vsub.f32 0.0, %v936_v38  ;;  %v1369_v47 = vmul.f32 1.442695, %v1203_v0 }
 0x188   : > { %v2688_v44 = vpop.eup %2687  ;;  %2707 = vrcp.f32 %v1555_v17  ;;  %v1556_v12 = vadd.f32 1.0, %v2686_v50  ;;  %v4164_v17 = vld [vmem:[#allocation15_spill] sm:$0xff] }
 0x189   : > { %v2690_v43 = vpop.eup %2689  ;;  %2709 = vrcp.f32 %v1554_v58  ;;  %v1561_v21 = vadd.f32 1.0, %v2688_v44  ;;  %v1097_v50 = vadd.f32 %v4164_v17, %v4160_v27  ;;  %v4165_v44 = vld [vmem:[#allocation3_spill] sm:$0xff] }
 0x18a   : > { %v2692_v7 = vpop.eup %2691  ;;  %2711 = vrcp.f32 %v1556_v12  ;;  %v1563_v59 = vadd.f32 1.0, %v2690_v43  ;;  %v940_v12 = vadd.f32 %v3635_v45, %v4165_v44  ;;  %v1365_v43 = vmul.f32 1.442695, %v1201_v23 }
 0x18b   : > { %v2694_v39 = vpop.eup %2693  ;;  %2713 = vrcp.f32 %v1561_v21  ;;  %v1562_v5 = vadd.f32 1.0, %v2692_v7  ;;  %v1101_v21 = vadd.f32 %v3637_v4, %v4165_v44  ;;  %v4166_v7 = vld [vmem:[#allocation16_spill] sm:$0xff] }
 0x18c   : > { %v2696_v18 = vpop.eup %2695  ;;  %2715 = vrcp.f32 %v1563_v59  ;;  %v1564_v2 = vadd.f32 1.0, %v2694_v39  ;;  %v942_v59 = vadd.f32 %v4166_v7, %v4165_v44  ;;  %v1204_v39 = vsub.f32 0.0, %v1097_v50  ;;  %v1827_v7 = vld [vmem:[%s3378_s8 + $0xb0] sm:$0xff] }
 0x18d   : > { %v2698_v32 = vpop.eup %2697  ;;  %2717 = vrcp.f32 %v1562_v5  ;;  %v1569_v6 = vadd.f32 1.0, %v2696_v18  ;;  %v4167_v5 = vld [vmem:[#allocation17_spill] sm:$0xff]  ;;  %v1209_v23 = vsub.f32 0.0, %v940_v12  ;;  %v1211_v17 = vsub.f32 0.0, %v1101_v21 }
 0x18e   : > { %v2700_v60 = vpop.eup %2699  ;;  %2719 = vrcp.f32 %v1564_v2  ;;  %v1571_v49 = vadd.f32 1.0, %v2698_v32  ;;  %v1103_v40 = vadd.f32 %v4167_v5, %v4165_v44  ;;  %v1817_v2 = vld [vmem:[%s3378_s8 + $0x60] sm:$0xff]  ;;  %v4168_v32 = vld [vmem:[#allocation4_spill] sm:$0xff] }
 0x18f   : > { %v2702_v58 = vpop.eup %2701  ;;  %2721 = vrcp.f32 %v1569_v6  ;;  %v1570_v37 = vadd.f32 1.0, %v2700_v60  ;;  %v946_v6 = vadd.f32 %v3653_v16, %v4168_v32  ;;  %v1107_v44 = vadd.f32 %v3655_v19, %v4168_v32 }
 0x190   : > { %v2704_v11 = vpop.eup %2703  ;;  %2723 = vrcp.f32 %v1571_v49  ;;  %v1572_v9 = vadd.f32 1.0, %v2702_v58  ;;  %v1367_v49 = vmul.f32 1.442695, %v1202_v3  ;;  %v1371_v3 = vmul.f32 1.442695, %v1204_v39 }
 0x191   : > { %v2706_v26 = vpop.eup %2705  ;;  %v1937_v27 = vmul.f32 %v2704_v11, %v1809_v30  ;;  %2725 = vrcp.f32 %v1570_v37  ;;  %v1819_v30 = vld [vmem:[%s3378_s8 + $0x70] sm:$0xff]  ;;  %v1818_v37 = vld [vmem:[%s3378_s8 + $0x68] sm:$0xff]  ;;  %v1820_v11 = vld [vmem:[%s3378_s8 + $0x78] sm:$0xff] }
 0x192   : > { %v2708_v45 = vpop.eup %2707  ;;  %2727 = vrcp.f32 %v1572_v9  ;;  %v1577_v38 = vadd.f32 1.0, %v2706_v26  ;;  %v1825_v26 = vld [vmem:[%s3378_s8 + $0xa0] sm:$0xff] }
 0x193   : > { %v2710_v4 = vpop.eup %2709  ;;  %2065 = vst [vmem:[%s3406_s11 + $0x20] sm:$0xff] %v1937_v27  ;;  %v1939_v18 = vmul.f32 %v2708_v45, %v1811_v57  ;;  %2729 = vpow2.f32 %v1353_v29  ;;  %v1210_v29 = vsub.f32 0.0, %v942_v59  ;;  %v1212_v57 = vsub.f32 0.0, %v1103_v40  ;;  %v1828_v40 = vld [vmem:[%s3378_s8 + $0xb8] sm:$0xff] }
 0x194   : > { %v2712_v0 = vpop.eup %2711  ;;  %v1938_v60 = vmul.f32 %v2710_v4, %v1810_v28  ;;  %2731 = vrcp.f32 %v1577_v38  ;;  %v1217_v27 = vsub.f32 0.0, %v946_v6 }
 0x195   : > { %v2714_v50 = vpop.eup %2713  ;;  %2067 = vst [vmem:[%s3406_s11 + $0x30] sm:$0xff] %v1939_v18  ;;  %v1940_v58 = vmul.f32 %v2712_v0, %v1812_v48  ;;  %2733 = vpow2.f32 %v1351_v31  ;;  %v1381_v31 = vmul.f32 1.442695, %v1209_v23  ;;  %v1826_v48 = vld [vmem:[%s3378_s8 + $0xa8] sm:$0xff]  ;;  %v1383_v38 = vmul.f32 1.442695, %v1210_v29 }
 0x196   : > { %v2716_v16 = vpop.eup %2715  ;;  %2066 = vst [vmem:[%s3406_s11 + $0x28] sm:$0xff] %v1938_v60  ;;  %v1945_v12 = vmul.f32 %v2714_v50, %v1817_v2  ;;  %2735 = vpow2.f32 %v1355_v61  ;;  %v1385_v61 = vmul.f32 1.442695, %v1211_v17  ;;  %v1387_v4 = vmul.f32 1.442695, %v1212_v57  ;;  %v1833_v0 = vld [vmem:[%s3378_s8 + $0xe0] sm:$0xff] }
 0x197   : > { %v2718_v9 = vpop.eup %2717  ;;  %2068 = vst [vmem:[%s3406_s11 + $0x38] sm:$0xff] %v1940_v58  ;;  %v1947_v21 = vmul.f32 %v2716_v16, %v1819_v30  ;;  %2737 = vpow2.f32 %v1365_v43  ;;  %v1219_v43 = vsub.f32 0.0, %v1107_v44  ;;  %v1397_v2 = vmul.f32 1.442695, %v1217_v27 }
 0x198   : > { %v2720_v19 = vpop.eup %2719  ;;  %2073 = vst [vmem:[%s3406_s11 + $0x60] sm:$0xff] %v1945_v12  ;;  %v1946_v28 = vmul.f32 %v2718_v9, %v1818_v37  ;;  %2739 = vpow2.f32 %v1369_v47  ;;  %v948_v58 = vadd.f32 %v3659_v34, %v4168_v32  ;;  %v1109_v44 = vadd.f32 %v3661_v54, %v4168_v32 }
 0x199   : > { %v2722_v59 = vpop.eup %2721  ;;  %2075 = vst [vmem:[%s3406_s11 + $0x70] sm:$0xff] %v1947_v21  ;;  %v1948_v45 = vmul.f32 %v2720_v19, %v1820_v11  ;;  %2741 = vpow2.f32 %v1367_v49  ;;  %v1401_v49 = vmul.f32 1.442695, %v1219_v43  ;;  %v4169_v11 = vld [vmem:[#allocation5_spill] sm:$0xff] }
 0x19a   : > { %v2724_v39 = vpop.eup %2723  ;;  %2074 = vst [vmem:[%s3406_s11 + $0x68] sm:$0xff] %v1946_v28  ;;  %v1953_v5 = vmul.f32 %v2722_v59, %v1825_v26  ;;  %2743 = vpow2.f32 %v1371_v3  ;;  %v952_v3 = vadd.f32 %v3670_v63, %v4169_v11  ;;  %v1113_v34 = vadd.f32 %v3672_v62, %v4169_v11 }
 0x19b   : > { %v2726_v18 = vpop.eup %2725  ;;  %2076 = vst [vmem:[%s3406_s11 + $0x78] sm:$0xff] %v1948_v45  ;;  %v1955_v47 = vmul.f32 %v2724_v39, %v1827_v7  ;;  %2745 = vpow2.f32 %v1381_v31  ;;  %v1218_v31 = vsub.f32 0.0, %v948_v58  ;;  %v1220_v32 = vsub.f32 0.0, %v1109_v44  ;;  %v1836_v44 = vld [vmem:[%s3378_s8 + $0xf8] sm:$0xff] }
 0x19c   : > { %v2728_v23 = vpop.eup %2727  ;;  %2081 = vst [vmem:[%s3406_s11 + $0xa0] sm:$0xff] %v1953_v5  ;;  %v1954_v6 = vmul.f32 %v2726_v18, %v1826_v48  ;;  %2747 = vpow2.f32 %v1385_v61  ;;  %v954_v19 = vadd.f32 %v3675_v55, %v4169_v11  ;;  %v1225_v7 = vsub.f32 0.0, %v952_v3  ;;  %v1835_v18 = vld [vmem:[%s3378_s8 + $0xf0] sm:$0xff]  ;;  %v1841_v3 = vld [vmem:[%s3378_s8 + $0x120] sm:$0xff] }
 0x19d   : > { %v2730_v60 = vpop.eup %2729  ;;  %2083 = vst [vmem:[%s3406_s11 + $0xb0] sm:$0xff] %v1955_v47  ;;  %v1956_v30 = vmul.f32 %v2728_v23, %v1828_v40  ;;  %2749 = vpow2.f32 %v1383_v38  ;;  %v1227_v62 = vsub.f32 0.0, %v1113_v34  ;;  %v1399_v38 = vmul.f32 1.442695, %v1218_v31  ;;  %v4170_v23 = vld [vmem:[#allocation6_spill] sm:$0xff]  ;;  %v4172_v34 = vld [vmem:[#allocation7_spill] sm:$0xff] }
 0x19e   : > { %v2732_v17 = vpop.eup %2731  ;;  %2082 = vst [vmem:[%s3406_s11 + $0xa8] sm:$0xff] %v1954_v6  ;;  %v1579_v50 = vadd.f32 1.0, %v2730_v60  ;;  %2751 = vpow2.f32 %v1387_v4  ;;  %v1115_v43 = vadd.f32 %v3677_v10, %v4169_v11  ;;  %v1403_v5 = vmul.f32 1.442695, %v1220_v32  ;;  %v4174_v32 = vld [vmem:[#allocation22_spill] sm:$0xff] }
 0x19f   : > { %v2734_v37 = vpop.eup %2733  ;;  %2084 = vst [vmem:[%s3406_s11 + $0xb8] sm:$0xff] %v1956_v30  ;;  %v1961_v29 = vmul.f32 %v2732_v17, %v1833_v0  ;;  %2753 = vpow2.f32 %v1397_v2  ;;  %v1226_v40 = vsub.f32 0.0, %v954_v19  ;;  %v1413_v2 = vmul.f32 1.442695, %v1225_v7  ;;  %v1834_v17 = vld [vmem:[%s3378_s8 + $0xe8] sm:$0xff] }
 0x1a0   : > { %v2736_v16 = vpop.eup %2735  ;;  %2755 = vrcp.f32 %v1579_v50  ;;  %v1578_v12 = vadd.f32 1.0, %v2734_v37  ;;  %v958_v6 = vadd.f32 %v3687_v13, %v4170_v23  ;;  %v1417_v10 = vmul.f32 1.442695, %v1227_v62  ;;  %v1842_v7 = vld [vmem:[%s3378_s8 + $0x128] sm:$0xff] }
 0x1a1   : > { %v2738_v57 = vpop.eup %2737  ;;  %2089 = vst [vmem:[%s3406_s11 + $0xe0] sm:$0xff] %v1961_v29  ;;  %v1580_v9 = vadd.f32 1.0, %v2736_v16  ;;  %2757 = vpow2.f32 %v1401_v49  ;;  %v1119_v30 = vadd.f32 %v3689_v15, %v4170_v23  ;;  %v1228_v58 = vsub.f32 0.0, %v1115_v43  ;;  %v4175_v43 = vld [vmem:[#allocation23_spill] sm:$0xff] }
 0x1a2   : > { %v2740_v21 = vpop.eup %2739  ;;  %2759 = vrcp.f32 %v1578_v12  ;;  %v1585_v26 = vadd.f32 1.0, %v2738_v57  ;;  %v960_v37 = vadd.f32 %v3694_v8, %v4170_v23  ;;  %v1415_v16 = vmul.f32 1.442695, %v1226_v40  ;;  %v4171_v12 = vld [vmem:[#allocation19_spill] sm:$0xff] }
 0x1a3   : > { %v2742_v27 = vpop.eup %2741  ;;  %2761 = vrcp.f32 %v1580_v9  ;;  %v1587_v54 = vadd.f32 1.0, %v2740_v21  ;;  %v1121_v11 = vadd.f32 %v4171_v12, %v4170_v23  ;;  %v1233_v9 = vsub.f32 0.0, %v958_v6  ;;  %v4173_v21 = vld [vmem:[#allocation21_spill] sm:$0xff]  ;;  %v1857_v12 = vld [vmem:[%s3378_s8 + $0x1a0] sm:$0xff] }
 0x1a4   : > { %v2744_v28 = vpop.eup %2743  ;;  %2763 = vrcp.f32 %v1585_v26  ;;  %v1586_v63 = vadd.f32 1.0, %v2742_v27  ;;  %v964_v26 = vadd.f32 %v4173_v21, %v4172_v34  ;;  %v1843_v27 = vld [vmem:[%s3378_s8 + $0x130] sm:$0xff]  ;;  %v1125_v19 = vadd.f32 %v4174_v32, %v4172_v34 }
 0x1a5   : > { %v2746_v61 = vpop.eup %2745  ;;  %2765 = vrcp.f32 %v1587_v54  ;;  %v1588_v59 = vadd.f32 1.0, %v2744_v28  ;;  %v1235_v54 = vsub.f32 0.0, %v1119_v30  ;;  %v1859_v21 = vld [vmem:[%s3378_s8 + $0x1b0] sm:$0xff] }
 0x1a6   : > { %v2748_v45 = vpop.eup %2747  ;;  %2767 = vrcp.f32 %v1586_v63  ;;  %v1593_v48 = vadd.f32 1.0, %v2746_v61  ;;  %v1419_v61 = vmul.f32 1.442695, %v1228_v58  ;;  %v4176_v32 = vld [vmem:[#allocation24_spill] sm:$0xff] }
 0x1a7   : > { %v2750_v39 = vpop.eup %2749  ;;  %2769 = vrcp.f32 %v1588_v59  ;;  %v1595_v55 = vadd.f32 1.0, %v2748_v45  ;;  %v1234_v59 = vsub.f32 0.0, %v960_v37  ;;  %v1852_v37 = vld [vmem:[%s3378_s8 + $0x178] sm:$0xff] }
 0x1a8   : > { %v2752_v4 = vpop.eup %2751  ;;  %2771 = vrcp.f32 %v1593_v48  ;;  %v1594_v47 = vadd.f32 1.0, %v2750_v39  ;;  %v1844_v48 = vld [vmem:[%s3378_s8 + $0x138] sm:$0xff]  ;;  %v966_v39 = vadd.f32 %v4175_v43, %v4172_v34 }
 0x1a9   : > { %v2754_v0 = vpop.eup %2753  ;;  %2773 = vrcp.f32 %v1595_v55  ;;  %v1596_v60 = vadd.f32 1.0, %v2752_v4  ;;  %v1849_v4 = vld [vmem:[%s3378_s8 + $0x160] sm:$0xff] }
 0x1aa   : > { %v2756_v49 = vpop.eup %2755  ;;  %2775 = vrcp.f32 %v1594_v47  ;;  %v1601_v50 = vadd.f32 1.0, %v2754_v0  ;;  %v1241_v47 = vsub.f32 0.0, %v964_v26  ;;  %v1851_v0 = vld [vmem:[%s3378_s8 + $0x170] sm:$0xff] }
 0x1ab   : > { %v2758_v29 = vpop.eup %2757  ;;  %v1963_v13 = vmul.f32 %v2756_v49, %v1835_v18  ;;  %2777 = vrcp.f32 %v1596_v60  ;;  %v1429_v18 = vmul.f32 1.442695, %v1233_v9  ;;  %v1243_v60 = vsub.f32 0.0, %v1125_v19 }
 0x1ac   : > { %v2760_v15 = vpop.eup %2759  ;;  %2779 = vrcp.f32 %v1601_v50  ;;  %v1603_v57 = vadd.f32 1.0, %v2758_v29  ;;  %v1127_v19 = vadd.f32 %v4176_v32, %v4172_v34 }
 0x1ad   : > { %v2762_v8 = vpop.eup %2761  ;;  %2091 = vst [vmem:[%s3406_s11 + $0xf0] sm:$0xff] %v1963_v13  ;;  %v1962_v31 = vmul.f32 %v2760_v15, %v1834_v17  ;;  %2781 = vpow2.f32 %v1399_v38  ;;  %v1236_v38 = vsub.f32 0.0, %v1121_v11  ;;  %v1850_v17 = vld [vmem:[%s3378_s8 + $0x168] sm:$0xff]  ;;  %v1445_v11 = vmul.f32 1.442695, %v1241_v47 }
 0x1ae   : > { %v2764_v28 = vpop.eup %2763  ;;  %v1964_v63 = vmul.f32 %v2762_v8, %v1836_v44  ;;  %2783 = vrcp.f32 %v1603_v57 }
 0x1af   : > { %v2766_v62 = vpop.eup %2765  ;;  %2090 = vst [vmem:[%s3406_s11 + $0xe8] sm:$0xff] %v1962_v31  ;;  %v1969_v45 = vmul.f32 %v2764_v28, %v1841_v3  ;;  %2785 = vpow2.f32 %v1403_v5  ;;  %v1433_v5 = vmul.f32 1.442695, %v1235_v54  ;;  %v1435_v29 = vmul.f32 1.442695, %v1236_v38 }
 0x1b0   : > { %v2768_v55 = vpop.eup %2767  ;;  %2092 = vst [vmem:[%s3406_s11 + $0xf8] sm:$0xff] %v1964_v63  ;;  %v1971_v40 = vmul.f32 %v2766_v62, %v1843_v27  ;;  %2787 = vpow2.f32 %v1413_v2  ;;  %v1431_v2 = vmul.f32 1.442695, %v1234_v59  ;;  %v1449_v3 = vmul.f32 1.442695, %v1243_v60 }
 0x1b1   : > { %v2770_v23 = vpop.eup %2769  ;;  %2097 = vst [vmem:[%s3406_s11 + $0x120] sm:$0xff] %v1969_v45  ;;  %v1970_v6 = vmul.f32 %v2768_v55, %v1842_v7  ;;  %2789 = vpow2.f32 %v1417_v10  ;;  %v1242_v10 = vsub.f32 0.0, %v966_v39  ;;  %v4177_v7 = vld [vmem:[#allocation8_spill] sm:$0xff] }
 0x1b2   : > { %v2772_v30 = vpop.eup %2771  ;;  %2099 = vst [vmem:[%s3406_s11 + $0x130] sm:$0xff] %v1971_v40  ;;  %v1972_v49 = vmul.f32 %v2770_v23, %v1844_v48  ;;  %2791 = vpow2.f32 %v1415_v16  ;;  %v4179_v48 = vld [vmem:[#allocation26_spill] sm:$0xff]  ;;  %v972_v34 = vadd.f32 %v3727_v1, %v4177_v7 }
 0x1b3   : > { %v2774_v50 = vpop.eup %2773  ;;  %2098 = vst [vmem:[%s3406_s11 + $0x128] sm:$0xff] %v1970_v6  ;;  %v1977_v58 = vmul.f32 %v2772_v30, %v1849_v4  ;;  %2793 = vpow2.f32 %v1419_v61  ;;  %v1447_v31 = vmul.f32 1.442695, %v1242_v10  ;;  %v4178_v61 = vld [vmem:[#allocation25_spill] sm:$0xff]  ;;  %v1131_v38 = vadd.f32 %v4179_v48, %v4177_v7 }
 0x1b4   : > { %v2776_v13 = vpop.eup %2775  ;;  %2100 = vst [vmem:[%s3406_s11 + $0x138] sm:$0xff] %v1972_v49  ;;  %v1979_v44 = vmul.f32 %v2774_v50, %v1851_v0  ;;  %2795 = vpow2.f32 %v1429_v18  ;;  %v970_v59 = vadd.f32 %v4178_v61, %v4177_v7  ;;  %v1244_v4 = vsub.f32 0.0, %v1127_v19  ;;  %v1860_v19 = vld [vmem:[%s3378_s8 + $0x1b8] sm:$0xff] }
 0x1b5   : > { %v2778_v15 = vpop.eup %2777  ;;  %2105 = vst [vmem:[%s3406_s11 + $0x160] sm:$0xff] %v1977_v58  ;;  %v1978_v16 = vmul.f32 %v2776_v13, %v1850_v17  ;;  %2797 = vpow2.f32 %v1433_v5  ;;  %v1251_v5 = vsub.f32 0.0, %v1131_v38  ;;  %v1250_v49 = vsub.f32 0.0, %v972_v34  ;;  %v4180_v17 = vld [vmem:[#allocation27_spill] sm:$0xff]  ;;  %v1867_v34 = vld [vmem:[%s3378_s8 + $0x1f0] sm:$0xff] }
 0x1b6   : > { %v2780_v57 = vpop.eup %2779  ;;  %2107 = vst [vmem:[%s3406_s11 + $0x170] sm:$0xff] %v1979_v44  ;;  %v1980_v9 = vmul.f32 %v2778_v15, %v1852_v37  ;;  %2799 = vpow2.f32 %v1431_v2  ;;  %v1249_v23 = vsub.f32 0.0, %v970_v59  ;;  %v1133_v1 = vadd.f32 %v4180_v17, %v4177_v7  ;;  %v4181_v37 = vld [vmem:[#allocation9_spill] sm:$0xff]  ;;  %v4185_v7 = vld [vmem:[#allocation31_spill] sm:$0xff] }
 0x1b7   : > { %v2782_v26 = vpop.eup %2781  ;;  %2106 = vst [vmem:[%s3406_s11 + $0x168] sm:$0xff] %v1978_v16  ;;  %v1985_v8 = vmul.f32 %v2780_v57, %v1857_v12  ;;  %2801 = vpow2.f32 %v1435_v29  ;;  %v1451_v58 = vmul.f32 1.442695, %v1244_v4  ;;  %v4182_v29 = vld [vmem:[#allocation28_spill] sm:$0xff]  ;;  %v1139_v61 = vadd.f32 %v4185_v7, %v4181_v37  ;;  %v4186_v38 = vld [vmem:[#allocation11_spill] sm:$0xff] }
 0x1b8   : > { %v2784_v27 = vpop.eup %2783  ;;  %2108 = vst [vmem:[%s3406_s11 + $0x178] sm:$0xff] %v1980_v9  ;;  %v1602_v54 = vadd.f32 1.0, %v2782_v26  ;;  %2803 = vpow2.f32 %v1445_v11  ;;  %v976_v10 = vadd.f32 %v4182_v29, %v4181_v37  ;;  %v1461_v12 = vmul.f32 1.442695, %v1249_v23  ;;  %v4183_v11 = vld [vmem:[#allocation29_spill] sm:$0xff]  ;;  %v1866_v23 = vld [vmem:[%s3378_s8 + $0x1e8] sm:$0xff] }
 0x1b9   : > { %v2786_v28 = vpop.eup %2785  ;;  %2113 = vst [vmem:[%s3406_s11 + $0x1a0] sm:$0xff] %v1985_v8  ;;  %v1987_v63 = vmul.f32 %v2784_v27, %v1859_v21  ;;  %2805 = vpow2.f32 %v1449_v3  ;;  %v1137_v15 = vadd.f32 %v4183_v11, %v4181_v37  ;;  %v1858_v3 = vld [vmem:[%s3378_s8 + $0x1a8] sm:$0xff]  ;;  %v1465_v9 = vmul.f32 1.442695, %v1251_v5  ;;  %v4184_v21 = vld [vmem:[#allocation30_spill] sm:$0xff] }
 0x1ba   : > { %v2788_v62 = vpop.eup %2787  ;;  %2807 = vrcp.f32 %v1602_v54  ;;  %v1604_v45 = vadd.f32 1.0, %v2786_v28  ;;  %v978_v26 = vadd.f32 %v4184_v21, %v4181_v37  ;;  %v1463_v27 = vmul.f32 1.442695, %v1250_v49  ;;  %v1875_v37 = vld [vmem:[%s3378_s8 + $0x230] sm:$0xff]  ;;  %v1874_v11 = vld [vmem:[%s3378_s8 + $0x228] sm:$0xff] }
 0x1bb   : > { %v2790_v43 = vpop.eup %2789  ;;  %2115 = vst [vmem:[%s3406_s11 + $0x1b0] sm:$0xff] %v1987_v63  ;;  %v1609_v39 = vadd.f32 1.0, %v2788_v62  ;;  %2809 = vpow2.f32 %v1447_v31  ;;  %v1252_v54 = vsub.f32 0.0, %v1133_v1  ;;  %v1257_v63 = vsub.f32 0.0, %v976_v10  ;;  %v1873_v1 = vld [vmem:[%s3378_s8 + $0x220] sm:$0xff] }
 0x1bc   : > { %v2792_v55 = vpop.eup %2791  ;;  %2811 = vrcp.f32 %v1604_v45  ;;  %v1611_v40 = vadd.f32 1.0, %v2790_v43  ;;  %v1865_v45 = vld [vmem:[%s3378_s8 + $0x1e0] sm:$0xff]  ;;  %v1259_v48 = vsub.f32 0.0, %v1137_v15  ;;  %v982_v43 = vadd.f32 %v3761_v35, %v4186_v38 }
 0x1bd   : > { %v2794_v18 = vpop.eup %2793  ;;  %2813 = vrcp.f32 %v1609_v39  ;;  %v1610_v47 = vadd.f32 1.0, %v2792_v55  ;;  %v1143_v4 = vadd.f32 %v3765_v36, %v4186_v38  ;;  %v984_v35 = vadd.f32 %v3767_v51, %v4186_v38 }
 0x1be   : > { %v2796_v6 = vpop.eup %2795  ;;  %2815 = vrcp.f32 %v1611_v40  ;;  %v1612_v0 = vadd.f32 1.0, %v2794_v18  ;;  %v1258_v40 = vsub.f32 0.0, %v978_v26  ;;  %v1260_v49 = vsub.f32 0.0, %v1139_v61  ;;  %v1881_v26 = vld [vmem:[%s3378_s8 + $0x260] sm:$0xff] }
 0x1bf   : > { %v2798_v60 = vpop.eup %2797  ;;  %2817 = vrcp.f32 %v1610_v47  ;;  %v1617_v30 = vadd.f32 1.0, %v2796_v6  ;;  %v1467_v6 = vmul.f32 1.442695, %v1252_v54  ;;  %v1481_v29 = vmul.f32 1.442695, %v1259_v48 }
 0x1c0   : > { %v2800_v2 = vpop.eup %2799  ;;  %2819 = vrcp.f32 %v1612_v0  ;;  %v1619_v50 = vadd.f32 1.0, %v2798_v60  ;;  %v1868_v60 = vld [vmem:[%s3378_s8 + $0x1f8] sm:$0xff]  ;;  %v1267_v10 = vsub.f32 0.0, %v1143_v4  ;;  %v1266_v15 = vsub.f32 0.0, %v984_v35 }
 0x1c1   : > { %v2802_v13 = vpop.eup %2801  ;;  %2821 = vrcp.f32 %v1617_v30  ;;  %v1618_v44 = vadd.f32 1.0, %v2800_v2  ;;  %v1477_v30 = vmul.f32 1.442695, %v1257_v63  ;;  %v1265_v2 = vsub.f32 0.0, %v982_v43 }
 0x1c2   : > { %v2804_v16 = vpop.eup %2803  ;;  %2823 = vrcp.f32 %v1619_v50  ;;  %v1620_v57 = vadd.f32 1.0, %v2802_v13  ;;  %v1145_v50 = vadd.f32 %v3771_v42, %v4186_v38  ;;  %v1495_v7 = vmul.f32 1.442695, %v1266_v15 }
 0x1c3   : > { %v2806_v8 = vpop.eup %2805  ;;  %2825 = vrcp.f32 %v1618_v44  ;;  %v1625_v31 = vadd.f32 1.0, %v2804_v16 }
 0x1c4   : > { %v2808_v32 = vpop.eup %2807  ;;  %2827 = vrcp.f32 %v1620_v57  ;;  %v1627_v28 = vadd.f32 1.0, %v2806_v8  ;;  %v1483_v57 = vmul.f32 1.442695, %v1260_v49  ;;  %v1493_v8 = vmul.f32 1.442695, %v1265_v2 }
 0x1c5   : > { %v2810_v59 = vpop.eup %2809  ;;  %v1986_v62 = vmul.f32 %v2808_v32, %v1858_v3  ;;  %2829 = vrcp.f32 %v1625_v31  ;;  %v1876_v3 = vld [vmem:[%s3378_s8 + $0x238] sm:$0xff]  ;;  %v1268_v31 = vsub.f32 0.0, %v1145_v50  ;;  %v1883_v32 = vld [vmem:[%s3378_s8 + $0x270] sm:$0xff] }
 0x1c6   : > { %v2812_v39 = vpop.eup %2811  ;;  %2831 = vrcp.f32 %v1627_v28  ;;  %v1626_v55 = vadd.f32 1.0, %v2810_v59 }
 0x1c7   : > { %v2814_v18 = vpop.eup %2813  ;;  %2114 = vst [vmem:[%s3406_s11 + $0x1a8] sm:$0xff] %v1986_v62  ;;  %v1988_v47 = vmul.f32 %v2812_v39, %v1860_v19  ;;  %2833 = vpow2.f32 %v1451_v58  ;;  %v1497_v19 = vmul.f32 1.442695, %v1267_v10  ;;  %v1882_v62 = vld [vmem:[%s3378_s8 + $0x268] sm:$0xff]  ;;  %v1499_v38 = vmul.f32 1.442695, %v1268_v31 }
 0x1c8   : > { %v2816_v0 = vpop.eup %2815  ;;  %v1993_v5 = vmul.f32 %v2814_v18, %v1865_v45  ;;  %2835 = vrcp.f32 %v1626_v55 }
 0x1c9   : > { %v2818_v36 = vpop.eup %2817  ;;  %2116 = vst [vmem:[%s3406_s11 + $0x1b8] sm:$0xff] %v1988_v47  ;;  %v1995_v17 = vmul.f32 %v2816_v0, %v1867_v34  ;;  %2837 = vpow2.f32 %v1461_v12  ;;  %v1479_v12 = vmul.f32 1.442695, %v1258_v40  ;;  %v4187_v34 = vld [vmem:[#allocation18_spill] sm:$0xff] }
 0x1ca   : > { %v2820_v51 = vpop.eup %2819  ;;  %2121 = vst [vmem:[%s3406_s11 + $0x1e0] sm:$0xff] %v1993_v5  ;;  %v1994_v58 = vmul.f32 %v2818_v36, %v1866_v23  ;;  %2839 = vpow2.f32 %v1465_v9  ;;  %v988_v55 = vadd.f32 %v3777_v56, %v4187_v34  ;;  %v1149_v18 = vadd.f32 %v3779_v14, %v4187_v34 }
 0x1cb   : > { %v2822_v13 = vpop.eup %2821  ;;  %2123 = vst [vmem:[%s3406_s11 + $0x1f0] sm:$0xff] %v1995_v17  ;;  %v1996_v44 = vmul.f32 %v2820_v51, %v1868_v60  ;;  %2841 = vpow2.f32 %v1463_v27  ;;  %v1151_v2 = vadd.f32 %v3786_v41, %v4187_v34  ;;  %v4188_v51 = vld [vmem:[#allocation20_spill] sm:$0xff] }
 0x1cc   : > { %v2824_v42 = vpop.eup %2823  ;;  %2122 = vst [vmem:[%s3406_s11 + $0x1e8] sm:$0xff] %v1994_v58  ;;  %v2001_v16 = vmul.f32 %v2822_v13, %v1873_v1  ;;  %2843 = vpow2.f32 %v1467_v6  ;;  %v990_v6 = vadd.f32 %v3784_v53, %v4187_v34  ;;  %v1273_v60 = vsub.f32 0.0, %v988_v55 }
 0x1cd   : > { %v2826_v9 = vpop.eup %2825  ;;  %2124 = vst [vmem:[%s3406_s11 + $0x1f8] sm:$0xff] %v1996_v44  ;;  %v2003_v21 = vmul.f32 %v2824_v42, %v1875_v37  ;;  %2845 = vpow2.f32 %v1477_v30  ;;  %v1275_v36 = vsub.f32 0.0, %v1149_v18  ;;  %v994_v58 = vadd.f32 %v3792_v22, %v4188_v51  ;;  %v1884_v42 = vld [vmem:[%s3378_s8 + $0x278] sm:$0xff] }
 0x1ce   : > { %v2828_v27 = vpop.eup %2827  ;;  %2129 = vst [vmem:[%s3406_s11 + $0x220] sm:$0xff] %v2001_v16  ;;  %v2002_v54 = vmul.f32 %v2826_v9, %v1874_v11  ;;  %2847 = vpow2.f32 %v1481_v29  ;;  %v1274_v1 = vsub.f32 0.0, %v990_v6  ;;  %v1509_v10 = vmul.f32 1.442695, %v1273_v60  ;;  %v1899_v6 = vld [vmem:[%s3378_s8 + $0x2f0] sm:$0xff] }
 0x1cf   : > { %v2830_v28 = vpop.eup %2829  ;;  %2131 = vst [vmem:[%s3406_s11 + $0x230] sm:$0xff] %v2003_v21  ;;  %v2004_v63 = vmul.f32 %v2828_v27, %v1876_v3  ;;  %2849 = vpow2.f32 %v1479_v12  ;;  %v1155_v13 = vadd.f32 %v3794_v33, %v4188_v51  ;;  %v1513_v12 = vmul.f32 1.442695, %v1275_v36 }
 0x1d0   : > { %v2832_v61 = vpop.eup %2831  ;;  %2130 = vst [vmem:[%s3406_s11 + $0x228] sm:$0xff] %v2002_v54  ;;  %v2009_v59 = vmul.f32 %v2830_v28, %v1881_v26  ;;  %2851 = vpow2.f32 %v1483_v57  ;;  %v996_v41 = vadd.f32 %v3799_v52, %v4188_v51  ;;  %v1511_v22 = vmul.f32 1.442695, %v1274_v1 }
 0x1d1   : > { %v2834_v45 = vpop.eup %2833  ;;  %2132 = vst [vmem:[%s3406_s11 + $0x238] sm:$0xff] %v2004_v63  ;;  %v2011_v48 = vmul.f32 %v2832_v61, %v1883_v32  ;;  %2853 = vpow2.f32 %v1493_v8  ;;  %v1276_v3 = vsub.f32 0.0, %v1151_v2  ;;  %v1281_v33 = vsub.f32 0.0, %v994_v58  ;;  %v1889_v8 = vld [vmem:[%s3378_s8 + $0x2a0] sm:$0xff] }
 0x1d2   : > { %v2836_v43 = vpop.eup %2835  ;;  %2137 = vst [vmem:[%s3406_s11 + $0x260] sm:$0xff] %v2009_v59  ;;  %v1628_v39 = vadd.f32 1.0, %v2834_v45  ;;  %2855 = vpow2.f32 %v1497_v19  ;;  %v1157_v21 = vadd.f32 %v3801_v25, %v4188_v51  ;;  %v1283_v52 = vsub.f32 0.0, %v1155_v13  ;;  %v1891_v19 = vld [vmem:[%s3378_s8 + $0x2b0] sm:$0xff] }
 0x1d3   : > { %v2838_v40 = vpop.eup %2837  ;;  %2139 = vst [vmem:[%s3406_s11 + $0x270] sm:$0xff] %v2011_v48  ;;  %v2010_v4 = vmul.f32 %v2836_v43, %v1882_v62  ;;  %2857 = vpow2.f32 %v1495_v7  ;;  %v1000_v27 = vadd.f32 %v3806_v24, %v3716_v20  ;;  %v1282_v28 = vsub.f32 0.0, %v996_v41  ;;  %v1890_v7 = vld [vmem:[%s3378_s8 + $0x2a8] sm:$0xff]  ;;  %v4189_v62 = vld [vmem:[#allocation32_spill] sm:$0xff] }
 0x1d4   : > { %v2840_v47 = vpop.eup %2839  ;;  %2859 = vrcp.f32 %v1628_v39  ;;  %v1633_v23 = vadd.f32 1.0, %v2838_v40  ;;  %v1161_v63 = vadd.f32 %v3810_v46, %v3716_v20  ;;  %v1515_v59 = vmul.f32 1.442695, %v1276_v3  ;;  %v4190_v39 = vld [vmem:[#allocation33_spill] sm:$0xff]  ;;  %v1897_v40 = vld [vmem:[%s3378_s8 + $0x2e0] sm:$0xff] }
 0x1d5   : > { %v2842_v35 = vpop.eup %2841  ;;  %2138 = vst [vmem:[%s3406_s11 + $0x268] sm:$0xff] %v2010_v4  ;;  %v1635_v0 = vadd.f32 1.0, %v2840_v47  ;;  %2861 = vpow2.f32 %v1499_v38  ;;  %v1002_v45 = vadd.f32 %v4189_v62, %v3716_v20  ;;  %v1892_v38 = vld [vmem:[%s3378_s8 + $0x2b8] sm:$0xff]  ;;  %v1284_v43 = vsub.f32 0.0, %v1157_v21 }
 0x1d6   : > { %v2844_v5 = vpop.eup %2843  ;;  %2863 = vrcp.f32 %v1633_v23  ;;  %v1634_v56 = vadd.f32 1.0, %v2842_v35  ;;  %v1163_v46 = vadd.f32 %v4190_v39, %v3716_v20  ;;  %v1525_v4 = vmul.f32 1.442695, %v1281_v33  ;;  %v1908_v3 = vld [vmem:[%s3378_s8 + $0x338] sm:$0xff] }
 0x1d7   : > { %v2846_v30 = vpop.eup %2845  ;;  %2865 = vrcp.f32 %v1635_v0  ;;  %v1636_v49 = vadd.f32 1.0, %v2844_v5  ;;  %v1289_v18 = vsub.f32 0.0, %v1000_v27  ;;  %v1529_v35 = vmul.f32 1.442695, %v1283_v52 }
 0x1d8   : > { %v2848_v17 = vpop.eup %2847  ;;  %2867 = vrcp.f32 %v1634_v56  ;;  %v1641_v14 = vadd.f32 1.0, %v2846_v30  ;;  %v1291_v0 = vsub.f32 0.0, %v1161_v63  ;;  %v1898_v56 = vld [vmem:[%s3378_s8 + $0x2e8] sm:$0xff]  ;;  %v1527_v60 = vmul.f32 1.442695, %v1282_v28 }
 0x1d9   : > { %v2850_v53 = vpop.eup %2849  ;;  %2869 = vrcp.f32 %v1636_v49  ;;  %v1643_v50 = vadd.f32 1.0, %v2848_v17  ;;  %v1290_v30 = vsub.f32 0.0, %v1002_v45  ;;  %v1900_v17 = vld [vmem:[%s3378_s8 + $0x2f8] sm:$0xff]  ;;  %v1292_v1 = vsub.f32 0.0, %v1163_v46 }
 0x1da   : > { %v2852_v37 = vpop.eup %2851  ;;  %2871 = vrcp.f32 %v1641_v14  ;;  %v1642_v29 = vadd.f32 1.0, %v2850_v53  ;;  %v1531_v14 = vmul.f32 1.442695, %v1284_v43  ;;  %v1541_v51 = vmul.f32 1.442695, %v1289_v18  ;;  %v1913_v43 = vld [vmem:[%s3378_s8 + $0x360] sm:$0xff] }
 0x1db   : > { %v2854_v44 = vpop.eup %2853  ;;  %2873 = vrcp.f32 %v1643_v50  ;;  %v1644_v11 = vadd.f32 1.0, %v2852_v37  ;;  %v1905_v50 = vld [vmem:[%s3378_s8 + $0x320] sm:$0xff] }
 0x1dc   : > { %v2856_v15 = vpop.eup %2855  ;;  %2875 = vrcp.f32 %v1642_v29  ;;  %v1649_v16 = vadd.f32 1.0, %v2854_v44  ;;  %v1907_v29 = vld [vmem:[%s3378_s8 + $0x330] sm:$0xff] }
 0x1dd   : > { %v2858_v57 = vpop.eup %2857  ;;  %2877 = vrcp.f32 %v1644_v11  ;;  %v1651_v9 = vadd.f32 1.0, %v2856_v15  ;;  %v1906_v11 = vld [vmem:[%s3378_s8 + $0x328] sm:$0xff] }
 0x1de   : > { %v2860_v26 = vpop.eup %2859  ;;  %2879 = vrcp.f32 %v1649_v16  ;;  %v1650_v31 = vadd.f32 1.0, %v2858_v57 }
 0x1df   : > { %v2862_v54 = vpop.eup %2861  ;;  %v2012_v32 = vmul.f32 %v2860_v26, %v1884_v42  ;;  %2881 = vrcp.f32 %v1651_v9  ;;  %v1547_v42 = vmul.f32 1.442695, %v1292_v1  ;;  %v1924_v1 = vld [vmem:[%s3378_s8 + $0x3b8] sm:$0xff] }
 0x1e0   : > { %v2864_v25 = vpop.eup %2863  ;;  %2883 = vrcp.f32 %v1650_v31  ;;  %v1652_v61 = vadd.f32 1.0, %v2862_v54 }
 0x1e1   : > { %v2866_v24 = vpop.eup %2865  ;;  %2140 = vst [vmem:[%s3406_s11 + $0x278] sm:$0xff] %v2012_v32  ;;  %v2017_v48 = vmul.f32 %v2864_v25, %v1889_v8  ;;  %2885 = vpow2.f32 %v1509_v10  ;;  %v1545_v10 = vmul.f32 1.442695, %v1291_v0 }
 0x1e2   : > { %v2868_v34 = vpop.eup %2867  ;;  %v2019_v55 = vmul.f32 %v2866_v24, %v1891_v19  ;;  %2887 = vrcp.f32 %v1652_v61 }
 0x1e3   : > { %v2870_v47 = vpop.eup %2869  ;;  %2145 = vst [vmem:[%s3406_s11 + $0x2a0] sm:$0xff] %v2017_v48  ;;  %v2018_v23 = vmul.f32 %v2868_v34, %v1890_v7  ;;  %2889 = vpow2.f32 %v1513_v12  ;;  %v1543_v12 = vmul.f32 1.442695, %v1290_v30 }
 0x1e4   : > { %v2872_v5 = vpop.eup %2871  ;;  %2147 = vst [vmem:[%s3406_s11 + $0x2b0] sm:$0xff] %v2019_v55  ;;  %v2020_v20 = vmul.f32 %v2870_v47, %v1892_v38  ;;  %2891 = vpow2.f32 %v1511_v22  ;;  %v1914_v47 = vld [vmem:[%s3378_s8 + $0x368] sm:$0xff] }
 0x1e5   : > { %v2874_v49 = vpop.eup %2873  ;;  %2146 = vst [vmem:[%s3406_s11 + $0x2a8] sm:$0xff] %v2018_v23  ;;  %v2025_v36 = vmul.f32 %v2872_v5, %v1897_v40  ;;  %2893 = vpow2.f32 %v1515_v59  ;;  %v1915_v40 = vld [vmem:[%s3378_s8 + $0x370] sm:$0xff]  ;;  %v1921_v5 = vld [vmem:[%s3378_s8 + $0x3a0] sm:$0xff] }
 0x1e6   : > { %v2876_v2 = vpop.eup %2875  ;;  %2148 = vst [vmem:[%s3406_s11 + $0x2b8] sm:$0xff] %v2020_v20  ;;  %v2027_v53 = vmul.f32 %v2874_v49, %v1899_v6  ;;  %2895 = vpow2.f32 %v1525_v4  ;;  %v1916_v6 = vld [vmem:[%s3378_s8 + $0x378] sm:$0xff] }
 0x1e7   : > { %v2878_v58 = vpop.eup %2877  ;;  %2153 = vst [vmem:[%s3406_s11 + $0x2e0] sm:$0xff] %v2025_v36  ;;  %v2026_v37 = vmul.f32 %v2876_v2, %v1898_v56  ;;  %2897 = vpow2.f32 %v1529_v35  ;;  %v1922_v36 = vld [vmem:[%s3378_s8 + $0x3a8] sm:$0xff] }
 0x1e8   : > { %v2880_v13 = vpop.eup %2879  ;;  %2155 = vst [vmem:[%s3406_s11 + $0x2f0] sm:$0xff] %v2027_v53  ;;  %v2028_v44 = vmul.f32 %v2878_v58, %v1900_v17  ;;  %2899 = vpow2.f32 %v1527_v60  ;;  %v1923_v60 = vld [vmem:[%s3378_s8 + $0x3b0] sm:$0xff] }
 0x1e9   : > { %v2882_v41 = vpop.eup %2881  ;;  %2154 = vst [vmem:[%s3406_s11 + $0x2e8] sm:$0xff] %v2026_v37  ;;  %v2033_v15 = vmul.f32 %v2880_v13, %v1905_v50  ;;  %2901 = vpow2.f32 %v1531_v14  ;;  %v1929_v50 = vld [vmem:[%s3378_s8 + $0x3e0] sm:$0xff]  ;;  %v1931_v37 = vld [vmem:[%s3378_s8 + $0x3f0] sm:$0xff]  ;;  %v1930_v13 = vld [vmem:[%s3378_s8 + $0x3e8] sm:$0xff] }
 0x1ea   : > { %v2884_v16 = vpop.eup %2883  ;;  %2156 = vst [vmem:[%s3406_s11 + $0x2f8] sm:$0xff] %v2028_v44  ;;  %v2035_v22 = vmul.f32 %v2882_v41, %v1907_v29  ;;  %2903 = vpow2.f32 %v1541_v51 }
 0x1eb   : > { %v2886_v57 = vpop.eup %2885  ;;  %2161 = vst [vmem:[%s3406_s11 + $0x320] sm:$0xff] %v2033_v15  ;;  %v2034_v9 = vmul.f32 %v2884_v16, %v1906_v11  ;;  %2905 = vpow2.f32 %v1545_v10 }
 0x1ec   : > { %v2888_v33 = vpop.eup %2887  ;;  %2163 = vst [vmem:[%s3406_s11 + $0x330] sm:$0xff] %v2035_v22  ;;  %v1657_v21 = vadd.f32 1.0, %v2886_v57  ;;  %2907 = vpow2.f32 %v1543_v12  ;;  %v1932_v12 = vld [vmem:[%s3378_s8 + $0x3f8] sm:$0xff] }
 0x1ed   : > { %v2890_v26 = vpop.eup %2889  ;;  %2162 = vst [vmem:[%s3406_s11 + $0x328] sm:$0xff] %v2034_v9  ;;  %v2036_v8 = vmul.f32 %v2888_v33, %v1908_v3  ;;  %2909 = vpow2.f32 %v1547_v42 }
 0x1ee   : > { %v2892_v31 = vpop.eup %2891  ;;  %2911 = vrcp.f32 %v1657_v21  ;;  %v1659_v52 = vadd.f32 1.0, %v2890_v26 }
 0x1ef   : > { %v2894_v27 = vpop.eup %2893  ;;  %2164 = vst [vmem:[%s3406_s11 + $0x338] sm:$0xff] %v2036_v8  ;;  %v1658_v54 = vadd.f32 1.0, %v2892_v31 }
 0x1f0   : > { %v2896_v32 = vpop.eup %2895  ;;  %2913 = vrcp.f32 %v1659_v52  ;;  %v1660_v19 = vadd.f32 1.0, %v2894_v27 }
 0x1f1   : > { %v2898_v28 = vpop.eup %2897  ;;  %2915 = vrcp.f32 %v1658_v54  ;;  %v1665_v63 = vadd.f32 1.0, %v2896_v32 }
 0x1f2   : > { %v2900_v25 = vpop.eup %2899  ;;  %2917 = vrcp.f32 %v1660_v19  ;;  %v1667_v7 = vadd.f32 1.0, %v2898_v28 }
 0x1f3   : > { %v2902_v61 = vpop.eup %2901  ;;  %2919 = vrcp.f32 %v1665_v63  ;;  %v1666_v59 = vadd.f32 1.0, %v2900_v25 }
 0x1f4   : > { %v2904_v62 = vpop.eup %2903  ;;  %2921 = vrcp.f32 %v1667_v7  ;;  %v1668_v45 = vadd.f32 1.0, %v2902_v61 }
 0x1f5   : > { %v2906_v24 = vpop.eup %2905  ;;  %2923 = vrcp.f32 %v1666_v59  ;;  %v1673_v48 = vadd.f32 1.0, %v2904_v62 }
 0x1f6   : > { %v2908_v38 = vpop.eup %2907  ;;  %2925 = vrcp.f32 %v1668_v45  ;;  %v1675_v39 = vadd.f32 1.0, %v2906_v24 }
 0x1f7   : > { %v2910_v46 = vpop.eup %2909  ;;  %2927 = vrcp.f32 %v1673_v48  ;;  %v1674_v34 = vadd.f32 1.0, %v2908_v38 }
 0x1f8   : > { %v2912_v55 = vpop.eup %2911  ;;  %2929 = vrcp.f32 %v1675_v39  ;;  %v1676_v4 = vadd.f32 1.0, %v2910_v46 }
 0x1f9   : > { %v2041_v18 = vmul.f32 %v2912_v55, %v1913_v43  ;;  %2931 = vrcp.f32 %v1674_v34 }
 0x1fa   : > { %v2914_v23 = vpop.eup %2913  ;;  %2933 = vrcp.f32 %v1676_v4 }
 0x1fb   : > { %v2916_v35 = vpop.eup %2915  ;;  %2169 = vst [vmem:[%s3406_s11 + $0x360] sm:$0xff] %v2041_v18  ;;  %v2043_v0 = vmul.f32 %v2914_v23, %v1915_v40 }
 0x1fc   : > { %v2918_v20 = vpop.eup %2917  ;;  %v2042_v56 = vmul.f32 %v2916_v35, %v1914_v47 }
 0x1fd   : > { %v2920_v30 = vpop.eup %2919  ;;  %2171 = vst [vmem:[%s3406_s11 + $0x370] sm:$0xff] %v2043_v0  ;;  %v2044_v49 = vmul.f32 %v2918_v20, %v1916_v6 }
 0x1fe   : > { %v2922_v17 = vpop.eup %2921  ;;  %2170 = vst [vmem:[%s3406_s11 + $0x368] sm:$0xff] %v2042_v56  ;;  %v2049_v14 = vmul.f32 %v2920_v30, %v1921_v5 }
 0x1ff   : > { %v2924_v2 = vpop.eup %2923  ;;  %2172 = vst [vmem:[%s3406_s11 + $0x378] sm:$0xff] %v2044_v49  ;;  %v2051_v53 = vmul.f32 %v2922_v17, %v1923_v60 }
 0x200   : > { %v2926_v51 = vpop.eup %2925  ;;  %2177 = vst [vmem:[%s3406_s11 + $0x3a0] sm:$0xff] %v2049_v14  ;;  %v2050_v58 = vmul.f32 %v2924_v2, %v1922_v36 }
 0x201   : > { %v2928_v29 = vpop.eup %2927  ;;  %2179 = vst [vmem:[%s3406_s11 + $0x3b0] sm:$0xff] %v2051_v53  ;;  %v2052_v10 = vmul.f32 %v2926_v51, %v1924_v1 }
 0x202   : > { %v2930_v44 = vpop.eup %2929  ;;  %2178 = vst [vmem:[%s3406_s11 + $0x3a8] sm:$0xff] %v2050_v58  ;;  %v2057_v11 = vmul.f32 %v2928_v29, %v1929_v50 }
 0x203   : > { %v2932_v41 = vpop.eup %2931  ;;  %2180 = vst [vmem:[%s3406_s11 + $0x3b8] sm:$0xff] %v2052_v10  ;;  %v2059_v15 = vmul.f32 %v2930_v44, %v1931_v37 }
 0x204   : > { %v2934_v42 = vpop.eup %2933  ;;  %2185 = vst [vmem:[%s3406_s11 + $0x3e0] sm:$0xff] %v2057_v11  ;;  %v2058_v16 = vmul.f32 %v2932_v41, %v1930_v13 }
 0x205   : > { %2187 = vst [vmem:[%s3406_s11 + $0x3f0] sm:$0xff] %v2059_v15  ;;  %v2060_v22 = vmul.f32 %v2934_v42, %v1932_v12 }
 0x206   : > { %2186 = vst [vmem:[%s3406_s11 + $0x3e8] sm:$0xff] %v2058_v16 }
 0x207   : > { %2188 = vst [vmem:[%s3406_s11 + $0x3f8] sm:$0xff] %v2060_v22 }
 0x208 PF: > { %s15_s20 = sadd.s32 1, %s2957_s20   ;;  %s4191_s18 = smov %s2953_s19 }
 0x209   : > { %p12_p5 = scmp.ge.s32.totalorder %s15_s20, 4   ;;  %s4192_s19 = smov %s4194_s21 }
 0x20b   :  { %14 = sbr.rel (!%p12_p5) target bundleno = 2 (0x2), region = 76 }

// kernel: esa_layer.4
= control target key start
LH: loop header
LB: loop body
LE: loop exit
PB: predicated region body
PF: predicated region fallthrough
CT: control target
= control target key end

     0   :  { %s5562_s29 = smov 0   ;;  %s6699_s0 = inlined_call_operand.vmem [shape: f32[2,32,256], index: 0, kind: input, shape index: {}]   ;;  %s6700_s1 = inlined_call_operand.vmem [shape: f32[3,15,32], index: 1, kind: input, shape index: {}]   ;;  %s6701_s2 = inlined_call_operand.vmem [shape: f32[3,256,120], index: 2, kind: input, shape index: {}]   ;;  %s6702_s3 = inlined_call_operand.vmem [shape: f32[1,120], index: 3, kind: input, shape index: {}]   ;;  %s6703_s4 = inlined_call_operand.vmem [shape: f32[7,120,24], index: 4, kind: input, shape index: {}]   ;;  %s6704_s5 = inlined_call_operand.vmem [shape: f32[7,3,15], index: 5, kind: input, shape index: {}]   ;;  %s6705_s6 = inlined_call_operand.vmem [shape: f32[3,24,24], index: 6, kind: input, shape index: {}]   ;;  %s6706_s7 = inlined_call_operand.vmem [shape: f32[1,24], index: 7, kind: input, shape index: {}]   ;;  %s6707_s8 = inlined_call_operand.vmem [shape: f32[3,24,24], index: 8, kind: input, shape index: {}]   ;;  %s6708_s9 = inlined_call_operand.vmem [shape: f32[1,24], index: 9, kind: input, shape index: {}]   ;;  %s6709_s10 = inlined_call_operand.vmem [shape: f32[3,24,24], index: 10, kind: input, shape index: {}]   ;;  %s6710_s11 = inlined_call_operand.vmem [shape: f32[1,24], index: 11, kind: input, shape index: {}]   ;;  %s6711_s12 = inlined_call_operand.vmem [shape: f32[32,3], index: 12, kind: input, shape index: {}]   ;;  %s6712_s13 = inlined_call_operand.vmem [shape: f32[8,24,32], index: 13, kind: input, shape index: {}]   ;;  %s6713_s14 = inlined_call_operand.vmem [shape: f32[2,8,32,32], index: 14, kind: output, shape index: {}]  }
   0x1 LB: > { %s3916_s30 = sadd.s32 4294967295, %s5481_s29   ;;  %p3920_p0 = scmp.ge.s32.totalorder %s5481_s29, 1  ;;  %s5481_s29 = sphi %s5562_s29, %s24_s29  }
   0x2   : > { %p412_p1 = scmp.lt.s32.totalorder %s5481_s29, 3 }
   0x4   : > { %p413_p2 = pnand %p3920_p0, %p412_p1 }
   0x5   : > { %p458_p3 = scmp.lt.s32.totalorder (!%p413_p2), %s3916_s30, 1  ;;  %v5483_v0 = vmov (!%p413_p2), 0.0   ;;  %v3947_v4 = vld [vmem:[%s6701_s2 + $0x180] sm:$0xff] (!%p413_p2)  ;;  %v3948_v5 = vld [vmem:[%s6701_s2 + $0x188] sm:$0xff] (!%p413_p2)  ;;  %v3949_v23 = vld [vmem:[%s6701_s2 + $0x190] sm:$0xff] (!%p413_p2)  ;;  %vm478_vm0 = vcmask (!%p413_p2), 261120  }
   0x6   : > { %416 = sbr.rel (%p413_p2) target bundleno = 2378 (0x94a), region = 76  ;;  %549 = vmatprep.mubr.f32.mxu0 (!%p413_p2), %v5483_v0  ;;  %667 = vmatprep.mubr.f32.mxu1 (!%p413_p2), %v5483_v0  ;;  %v578_v6 = vld [vmem:[%s6701_s2 + $0x80] sm:$0xff] (!%p413_p2)  ;;  %v579_v15 = vld [vmem:[%s6701_s2 + $0x88] sm:$0xff] (!%p413_p2)  ;;  %v5076_v17 = vpack.c.bf16 (!%p413_p2), %v3948_v5, %v3947_v4  ;;  %v3950_v24 = vld [vmem:[%s6701_s2 + $0x198] sm:$0xff] (!%p413_p2)  ;;  %vm1083_vm1 = vcmask (!%p413_p2), 982016   ;;  %vm5485_vm2 = vmmov (!%p413_p2), 0  }
   0x7   : > { %v5108_v18 = vpack.c.bf16 (!%p413_p2), %v579_v15, %v578_v6  ;;  %v3931_v19 = vld [vmem:[%s6701_s2 + $0x100] sm:$0xff] (!%p413_p2)  ;;  %v3932_v20 = vld [vmem:[%s6701_s2 + $0x108] sm:$0xff] (!%p413_p2)  ;;  %v580_v25 = vld [vmem:[%s6701_s2 + $0x90] sm:$0xff] (!%p413_p2)  ;;  %v5080_v33 = vpack.c.bf16 (!%p413_p2), %v3950_v24, %v3949_v23  ;;  %vm1728_vm3 = vcmask (!%p413_p2), 1046528   ;;  %vm5486_vm4 = vmmov (!%p413_p2), 1  }
   0x8   : > { %v562_v21 = vld [vmem:[%s6701_s2] sm:$0xff] (!%p413_p2)  ;;  %v563_v22 = vld [vmem:[%s6701_s2 + $0x8] sm:$0xff] (!%p413_p2)  ;;  %v581_v26 = vld [vmem:[%s6701_s2 + $0x98] sm:$0xff] (!%p413_p2)  ;;  %v5078_v29 = vpack.c.bf16 (!%p413_p2), %v3932_v20, %v3931_v19  ;;  %vm1724_vm6 = vcmask (!%p413_p2), 121856   ;;  %vm2258_vm7 = vcmask (!%p413_p2), 192512   ;;  %vm2260_vm8 = vcmask (!%p413_p2), 190464  }
   0x9   : > { %v476_v27 = vld [vmem:[%s6700_s1] sm:$0xff] (!%p413_p2)  ;;  %v3927_v28 = vld [vmem:[%s6700_s1 + $0x10] sm:$0xff] (!%p413_p2)  ;;  %v5110_v30 = vpack.c.bf16 (!%p413_p2), %v563_v22, %v562_v21  ;;  %v3934_v32 = vld [vmem:[%s6701_s2 + $0x118] sm:$0xff] (!%p413_p2)  ;;  %v5112_v34 = vpack.c.bf16 (!%p413_p2), %v581_v26, %v580_v25  ;;  %2259 = vst.msk [vmem:[#allocation2] sm:$0x1f] (!%p413_p2), %vm2258_vm7, %v5483_v0  ;;  %vm2271_vm9 = vcmask (!%p413_p2), 195584  }
   0xa   : > { %v3933_v31 = vld [vmem:[%s6701_s2 + $0x110] sm:$0xff] (!%p413_p2)  ;;  %v565_v36 = vld [vmem:[%s6701_s2 + $0x18] sm:$0xff] (!%p413_p2)  ;;  %v3951_v37 = vld [vmem:[%s6701_s2 + $0x1a0] sm:$0xff] (!%p413_p2)  ;;  %vm2997_vm10 = vcmask (!%p413_p2), 23552   ;;  %vm3010_vm11 = vcmask (!%p413_p2), 1042432  }
   0xb   : > { %v564_v35 = vld [vmem:[%s6701_s2 + $0x10] sm:$0xff] (!%p413_p2)  ;;  %v3952_v38 = vld [vmem:[%s6701_s2 + $0x1a8] sm:$0xff] (!%p413_p2)  ;;  %v582_v39 = vld [vmem:[%s6701_s2 + $0xa0] sm:$0xff] (!%p413_p2)  ;;  %v5082_v43 = vpack.c.bf16 (!%p413_p2), %v3934_v32, %v3933_v31 }
   0xc   : > { %v583_v40 = vld [vmem:[%s6701_s2 + $0xa8] sm:$0xff] (!%p413_p2)  ;;  %v3928_v42 = vld [vmem:[%s6700_s1 + $0x18] sm:$0x7f] (!%p413_p2)  ;;  %v5114_v44 = vpack.c.bf16 (!%p413_p2), %v565_v36, %v564_v35  ;;  %v3935_v45 = vld [vmem:[%s6701_s2 + $0x120] sm:$0xff] (!%p413_p2)  ;;  %v5084_v47 = vpack.c.bf16 (!%p413_p2), %v3952_v38, %v3951_v37 }
   0xd   : > { %s6717_s30 = smov (!%p458_p3, %s3916_s30), 1  ;;  %v477_v41 = vld [vmem:[%s6700_s1 + $0x8] sm:$0x7f]  ;;  %v5116_v48 = vpack.c.bf16 %v583_v40, %v582_v39  ;;  %v566_v49 = vld [vmem:[%s6701_s2 + $0x20] sm:$0xff]  ;;  %v3953_v51 = vld [vmem:[%s6701_s2 + $0x1b0] sm:$0xff] }
   0xe   : > { %s4242_s15 = sshll.u32 %s6717_s30, 6  ;;  %v3936_v46 = vld [vmem:[%s6701_s2 + $0x128] sm:$0xff]  ;;  %v3954_v52 = vld [vmem:[%s6701_s2 + $0x1b8] sm:$0xff]  ;;  %v584_v53 = vld [vmem:[%s6701_s2 + $0xb0] sm:$0xff]  ;;  %s4243_s19 = sshll.u32 %s6717_s30, 8 }
   0xf   : > { %s462_s18 = scalar_lea.vmem %s6699_s0, %s4242_s15  ;;  %v567_v50 = vld [vmem:[%s6701_s2 + $0x28] sm:$0xff]  ;;  %v585_v54 = vld [vmem:[%s6701_s2 + $0xb8] sm:$0xff]  ;;  %v5086_v55 = vpack.c.bf16 %v3936_v46, %v3935_v45  ;;  %v3937_v57 = vld [vmem:[%s6701_s2 + $0x130] sm:$0xff]  ;;  %v5088_v59 = vpack.c.bf16 %v3954_v52, %v3953_v51  ;;  %s6630_s22 = scalar_lea.vmem %s6713_s14, %s4243_s19 }
  0x10   : > { %v469_v1 = vld [vmem:[%s462_s18 + $0x8] sm:$0xff]  ;;  %v471_v2 = vld [vmem:[%s462_s18 + $0x18] sm:$0xff]  ;;  %v468_v3 = vld [vmem:[%s462_s18] sm:$0xff]  ;;  %v5118_v56 = vpack.c.bf16 %v567_v50, %v566_v49  ;;  %v5120_v60 = vpack.c.bf16 %v585_v54, %v584_v53 }
  0x11   : > { %v5587_v7 = vpack.c.bf16 %v471_v2, %v469_v1  ;;  %v470_v8 = vld [vmem:[%s462_s18 + $0x10] sm:$0xff]  ;;  %v473_v9 = vld [vmem:[%s462_s18 + $0x28] sm:$0xff]  ;;  %v475_v10 = vld [vmem:[%s462_s18 + $0x38] sm:$0xff] }
  0x12   : > { %v5589_v11 = vpack.c.bf16 %v470_v8, %v468_v3  ;;  %v5591_v12 = vpack.c.bf16 %v475_v10, %v473_v9  ;;  %v472_v13 = vld [vmem:[%s462_s18 + $0x20] sm:$0xff]  ;;  %v474_v14 = vld [vmem:[%s462_s18 + $0x30] sm:$0xff]  ;;  %v3938_v58 = vld [vmem:[%s6701_s2 + $0x138] sm:$0xff] }
  0x13   : > { %5061 = vmatprep.subr.bf16.mxu0 %v5587_v7  ;;  %5069 = vmatprep.subr.bf16.mxu1 %v5587_v7  ;;  %v5600_v16 = vpack.c.bf16 %v474_v14, %v472_v13  ;;  %v568_v61 = vld [vmem:[%s6701_s2 + $0x30] sm:$0xff]  ;;  %v569_v62 = vld [vmem:[%s6701_s2 + $0x38] sm:$0xff]  ;;  %v3955_v63 = vld [vmem:[%s6701_s2 + $0x1c0] sm:$0xff]  ;;  %v5090_v4 = vpack.c.bf16 %v3938_v58, %v3937_v57 }
  0x14   : > { %5063 = vmatpush1.bf16.msra.mxu0 %v5589_v11  ;;  %5071 = vmatpush1.bf16.msra.mxu1 %v5589_v11  ;;  %v3956_v1 = vld [vmem:[%s6701_s2 + $0x1c8] sm:$0xff]  ;;  %v586_v2 = vld [vmem:[%s6701_s2 + $0xc0] sm:$0xff]  ;;  %v5122_v5 = vpack.c.bf16 %v569_v62, %v568_v61  ;;  %v3957_v15 = vld [vmem:[%s6701_s2 + $0x1d0] sm:$0xff] }
  0x15   : > { %5065 = vmatprep.subr.bf16.mxu0 %v5591_v12  ;;  %5073 = vmatprep.subr.bf16.mxu1 %v5591_v12  ;;  %v587_v3 = vld [vmem:[%s6701_s2 + $0xc8] sm:$0xff]  ;;  %v3939_v6 = vld [vmem:[%s6701_s2 + $0x140] sm:$0xff]  ;;  %v5092_v9 = vpack.c.bf16 %v3956_v1, %v3955_v63  ;;  %v589_v19 = vld [vmem:[%s6701_s2 + $0xd8] sm:$0xff] }
  0x16   : > { %v3940_v8 = vld [vmem:[%s6701_s2 + $0x148] sm:$0xff]  ;;  %v5124_v10 = vpack.c.bf16 %v587_v3, %v586_v2  ;;  %v570_v13 = vld [vmem:[%s6701_s2 + $0x40] sm:$0xff]  ;;  %v3941_v22 = vld [vmem:[%s6701_s2 + $0x150] sm:$0xff] }
  0x17   : > { %v571_v14 = vld [vmem:[%s6701_s2 + $0x48] sm:$0xff]  ;;  %v5094_v20 = vpack.c.bf16 %v3940_v8, %v3939_v6  ;;  %v3942_v23 = vld [vmem:[%s6701_s2 + $0x158] sm:$0xff]  ;;  %v572_v26 = vld [vmem:[%s6701_s2 + $0x50] sm:$0xff] }
  0x18   : > { %5067 = vmatpush1.bf16.msra.mxu0 %v5600_v16  ;;  %5075 = vmatpush1.bf16.msra.mxu1 %v5600_v16  ;;  %v5126_v21 = vpack.c.bf16 %v571_v14, %v570_v13  ;;  %v591_v31 = vld [vmem:[%s6701_s2 + $0xe8] sm:$0xff]  ;;  %v5098_v32 = vpack.c.bf16 %v3942_v23, %v3941_v22  ;;  %v574_v38 = vld [vmem:[%s6701_s2 + $0x60] sm:$0xff]  ;;  %v3961_v40 = vld [vmem:[%s6701_s2 + $0x1f0] sm:$0xff] }
  0x19   : > { %5077 = vmatprep.subr.bf16.mxu0 %v5076_v17  ;;  %5109 = vmatprep.subr.bf16.mxu1 %v5108_v18  ;;  %v3958_v17 = vld [vmem:[%s6701_s2 + $0x1d8] sm:$0xff]  ;;  %v588_v18 = vld [vmem:[%s6701_s2 + $0xd0] sm:$0xff]  ;;  %v3944_v35 = vld [vmem:[%s6701_s2 + $0x168] sm:$0xff] }
  0x1a   : > { %v5096_v24 = vpack.c.bf16 %v3958_v17, %v3957_v15  ;;  %v5128_v25 = vpack.c.bf16 %v589_v19, %v588_v18  ;;  %v575_v39 = vld [vmem:[%s6701_s2 + $0x68] sm:$0xff]  ;;  %v3946_v49 = vld [vmem:[%s6701_s2 + $0x178] sm:$0xff]  ;;  %v576_v50 = vld [vmem:[%s6701_s2 + $0x70] sm:$0xff] }
  0x1b   : > { %3925 = vmatmul.mubr.msk.f32.vlgmr.msra.gmra.mrb[0].mxu0 %vm478_vm0, %v476_v27  ;;  %3929 = vmatmul.mubr.msk.f32.vlgmr.msra.gmra.mrb[0].mxu1 %vm478_vm0, %v3927_v28  ;;  %v573_v27 = vld [vmem:[%s6701_s2 + $0x58] sm:$0xff]  ;;  %v3959_v28 = vld [vmem:[%s6701_s2 + $0x1e0] sm:$0xff]  ;;  %v5134_v45 = vpack.c.bf16 %v575_v39, %v574_v38  ;;  %v3968_v58 = vld [vmem:[%s6701_s2 + $0x208] sm:$0xff] }
  0x1c   : > { %555 = vmatprep.mubr.f32.mxu0 %v5483_v0  ;;  %673 = vmatprep.mubr.f32.mxu1 %v5483_v0  ;;  %v577_v52 = vld [vmem:[%s6701_s2 + $0x78] sm:$0xff]  ;;  %v3983_v54 = vld [vmem:[%s6701_s2 + $0x280] sm:$0xff]  ;;  %v3969_v3 = vld [vmem:[%s6701_s2 + $0x210] sm:$0xff] }
  0x1d   : > { %5079 = vmatpush3.bf16.msra.mxu0 %v5078_v29  ;;  %5111 = vmatpush3.bf16.msra.mxu1 %v5110_v30  ;;  %v3960_v29 = vld [vmem:[%s6701_s2 + $0x1e8] sm:$0xff]  ;;  %v590_v30 = vld [vmem:[%s6701_s2 + $0xe0] sm:$0xff]  ;;  %v5138_v53 = vpack.c.bf16 %v577_v52, %v576_v50  ;;  %v3973_v22 = vld [vmem:[%s6701_s2 + $0x230] sm:$0xff] }
  0x1e   : > { %5081 = vmatprep.subr.bf16.mxu0 %v5080_v33  ;;  %5113 = vmatprep.subr.bf16.mxu1 %v5112_v34  ;;  %v5130_v33 = vpack.c.bf16 %v573_v27, %v572_v26  ;;  %v3943_v34 = vld [vmem:[%s6701_s2 + $0x160] sm:$0xff]  ;;  %v5100_v36 = vpack.c.bf16 %v3960_v29, %v3959_v28  ;;  %v5132_v37 = vpack.c.bf16 %v591_v31, %v590_v30  ;;  %v3988_v6 = vld [vmem:[%s6701_s2 + $0x2a8] sm:$0xff]  ;;  %v3974_v23 = vld [vmem:[%s6701_s2 + $0x238] sm:$0xff] }
  0x1f   : > { %3926 = vmatmul.mubr.msk.f32.gmra.mrb[2].mxu0 %vm478_vm0, %v477_v41  ;;  %3930 = vmatmul.mubr.msk.f32.gmra.mrb[2].mxu1 %vm478_vm0, %v3928_v42  ;;  %v3962_v41 = vld [vmem:[%s6701_s2 + $0x1f8] sm:$0xff]  ;;  %v592_v42 = vld [vmem:[%s6701_s2 + $0xf0] sm:$0xff]  ;;  %v3967_v57 = vld [vmem:[%s6701_s2 + $0x200] sm:$0xff]  ;;  %v5162_v26 = vpack.c.bf16 %v3974_v23, %v3973_v22 }
  0x20   : > { %v5104_v46 = vpack.c.bf16 %v3962_v41, %v3961_v40  ;;  %v5150_v62 = vpack.c.bf16 %v3968_v58, %v3967_v57  ;;  %v3971_v17 = vld [vmem:[%s6701_s2 + $0x220] sm:$0xff]  ;;  %v3972_v18 = vld [vmem:[%s6701_s2 + $0x228] sm:$0xff]  ;;  %v3993_v30 = vld [vmem:[%s6701_s2 + $0x2d0] sm:$0xff] }
  0x21   : > { %5083 = vmatpush3.bf16.msra.mxu0 %v5082_v43  ;;  %5115 = vmatpush3.bf16.msra.mxu1 %v5114_v44  ;;  %v593_v43 = vld [vmem:[%s6701_s2 + $0xf8] sm:$0xff]  ;;  %v5102_v44 = vpack.c.bf16 %v3944_v35, %v3943_v34  ;;  %v3963_v19 = vld [vmem:[%s6700_s1 + $0x20] sm:$0xff]  ;;  %v3976_v29 = vld [vmem:[%s6701_s2 + $0x248] sm:$0xff] }
  0x22   : > { %5085 = vmatprep.subr.bf16.mxu0 %v5084_v47  ;;  %5117 = vmatprep.subr.bf16.mxu1 %v5116_v48  ;;  %v5136_v47 = vpack.c.bf16 %v593_v43, %v592_v42  ;;  %v3945_v48 = vld [vmem:[%s6701_s2 + $0x170] sm:$0xff]  ;;  %v3975_v28 = vld [vmem:[%s6701_s2 + $0x240] sm:$0xff]  ;;  %v3994_v31 = vld [vmem:[%s6701_s2 + $0x2d8] sm:$0xff] }
  0x23   : > { %v5106_v51 = vpack.c.bf16 %v3946_v49, %v3945_v48  ;;  %v3977_v34 = vld [vmem:[%s6701_s2 + $0x250] sm:$0xff]  ;;  %v3978_v35 = vld [vmem:[%s6701_s2 + $0x258] sm:$0xff]  ;;  %v3996_v38 = vld [vmem:[%s6701_s2 + $0x2e8] sm:$0xff] }
  0x24   : > { %v3979_v40 = vld [vmem:[%s6701_s2 + $0x260] sm:$0xff]  ;;  %v3980_v41 = vld [vmem:[%s6701_s2 + $0x268] sm:$0xff]  ;;  %v3997_v43 = vld [vmem:[%s6701_s2 + $0x2f0] sm:$0xff] }
  0x25   : > { %5087 = vmatpush3.bf16.msra.mxu0 %v5086_v55  ;;  %5119 = vmatpush3.bf16.msra.mxu1 %v5118_v56  ;;  %v3984_v55 = vld [vmem:[%s6701_s2 + $0x288] sm:$0xff]  ;;  %v5174_v42 = vpack.c.bf16 %v3980_v41, %v3979_v40  ;;  %v1068_v49 = vld [vmem:[%s6703_s4] sm:$0xff]  ;;  %vm6276_vm5 = vmpackc.low %vm1728_vm3, %vm5486_vm4 }
  0x26   : > { %5089 = vmatprep.subr.bf16.mxu0 %v5088_v59  ;;  %5121 = vmatprep.subr.bf16.mxu1 %v5120_v60  ;;  %v5148_v56 = vpack.c.bf16 %v3984_v55, %v3983_v54  ;;  %v3986_v59 = vld [vmem:[%s6701_s2 + $0x298] sm:$0xff]  ;;  %v1069_v50 = vld [vmem:[%s6703_s4 + $0x8] sm:$0xff]  ;;  %v1070_v54 = vld [vmem:[%s6703_s4 + $0x10] sm:$0xff] }
  0x27   : > { %v5180_v52 = vpack.c.bf16 %v1069_v50, %v1068_v49  ;;  %v1071_v55 = vld [vmem:[%s6703_s4 + $0x18] sm:$0xff]  ;;  %v1072_v58 = vld [vmem:[%s6703_s4 + $0x20] sm:$0xff]  ;;  %v1081_v41 = vld [vmem:[%s6703_s4 + $0x68] sm:$0xff] }
  0x28   : > { %v5184_v57 = vpack.c.bf16 %v1071_v55, %v1070_v54  ;;  %v1080_v40 = vld [vmem:[%s6703_s4 + $0x60] sm:$0xff]  ;;  %v4020_v49 = vld [vmem:[%s6703_s4 + $0xf8] sm:$0xff]  ;;  %v4036_v50 = vld [vmem:[%s6703_s4 + $0x168] sm:$0xff] }
  0x29   : > { %5091 = vmatpush3.bf16.msra.mxu0 %v5090_v4  ;;  %5123 = vmatpush3.bf16.msra.mxu1 %v5122_v5  ;;  %v3970_v4 = vld [vmem:[%s6701_s2 + $0x218] sm:$0xff]  ;;  %v3987_v5 = vld [vmem:[%s6701_s2 + $0x2a0] sm:$0xff] }
  0x2a   : > { %5093 = vmatprep.subr.bf16.mxu0 %v5092_v9  ;;  %5125 = vmatprep.subr.bf16.mxu1 %v5124_v10  ;;  %v5154_v14 = vpack.c.bf16 %v3970_v4, %v3969_v3  ;;  %v5156_v15 = vpack.c.bf16 %v3988_v6, %v3987_v5 }
  0x2d   : > { %5095 = vmatpush3.bf16.msra.mxu0 %v5094_v20  ;;  %5127 = vmatpush3.bf16.msra.mxu1 %v5126_v21  ;;  %v5158_v20 = vpack.c.bf16 %v3972_v18, %v3971_v17 }
  0x2e   : > { %5097 = vmatprep.subr.bf16.mxu0 %v5096_v24  ;;  %5129 = vmatprep.subr.bf16.mxu1 %v5128_v25  ;;  %v3992_v24 = vld [vmem:[%s6701_s2 + $0x2c8] sm:$0xff] }
  0x2f   : > { %v3964_v25 = vld [vmem:[%s6700_s1 + $0x28] sm:$0x7f] }
  0x31   : > { %5099 = vmatpush3.bf16.msra.mxu0 %v5098_v32  ;;  %5131 = vmatpush3.bf16.msra.mxu1 %v5130_v33  ;;  %v5166_v32 = vpack.c.bf16 %v3976_v29, %v3975_v28  ;;  %v5168_v33 = vpack.c.bf16 %v3994_v31, %v3993_v30  ;;  %v4008_v28 = vld [vmem:[%s6703_s4 + $0xa8] sm:$0xff]  ;;  %v4009_v29 = vld [vmem:[%s6703_s4 + $0xb0] sm:$0xff]  ;;  %v4010_v31 = vld [vmem:[%s6703_s4 + $0xb8] sm:$0xff] }
  0x32   : > { %5101 = vmatprep.subr.bf16.mxu0 %v5100_v36  ;;  %5133 = vmatprep.subr.bf16.mxu1 %v5132_v37  ;;  %v5170_v36 = vpack.c.bf16 %v3978_v35, %v3977_v34  ;;  %v3995_v37 = vld [vmem:[%s6701_s2 + $0x2e0] sm:$0xff]  ;;  %v5220_v30 = vpack.c.bf16 %v4009_v29, %v4008_v28  ;;  %v1078_v34 = vld [vmem:[%s6703_s4 + $0x50] sm:$0xff]  ;;  %v1079_v35 = vld [vmem:[%s6703_s4 + $0x58] sm:$0xff] }
  0x33   : > { %v5172_v39 = vpack.c.bf16 %v3996_v38, %v3995_v37  ;;  %v5200_v37 = vpack.c.bf16 %v1079_v35, %v1078_v34  ;;  %v4013_v38 = vld [vmem:[%s6703_s4 + $0xd0] sm:$0xff]  ;;  %v4046_v28 = vld [vmem:[%s6703_s4 + $0x1b8] sm:$0xff]  ;;  %v4047_v29 = vld [vmem:[%s6703_s4 + $0x1c0] sm:$0xff] }
  0x34   : > { %v4048_v34 = vld [vmem:[%s6703_s4 + $0x1c8] sm:$0xff]  ;;  %v4049_v35 = vld [vmem:[%s6703_s4 + $0x1d0] sm:$0xff] }
  0x35   : > { %5103 = vmatpush3.bf16.msra.mxu0 %v5102_v44  ;;  %5135 = vmatpush3.bf16.msra.mxu1 %v5134_v45  ;;  %v3998_v44 = vld [vmem:[%s6701_s2 + $0x2f8] sm:$0xff] }
  0x36   : > { %5105 = vmatprep.subr.bf16.mxu0 %v5104_v46  ;;  %5137 = vmatprep.subr.bf16.mxu1 %v5136_v47  ;;  %v5176_v45 = vpack.c.bf16 %v3998_v44, %v3997_v43  ;;  %v3981_v46 = vld [vmem:[%s6701_s2 + $0x270] sm:$0xff]  ;;  %v3982_v47 = vld [vmem:[%s6701_s2 + $0x278] sm:$0xff]  ;;  %v5204_v43 = vpack.c.bf16 %v1081_v41, %v1080_v40  ;;  %v4015_v44 = vld [vmem:[%s6703_s4 + $0xe0] sm:$0xff] }
  0x37   : > { %v5178_v48 = vpack.c.bf16 %v3982_v47, %v3981_v46  ;;  %v1082_v46 = vld [vmem:[%s6703_s4 + $0x70] sm:$0xff]  ;;  %v4016_v47 = vld [vmem:[%s6703_s4 + $0xe8] sm:$0xff]  ;;  %v4053_v40 = vld [vmem:[%s6703_s4 + $0x1e0] sm:$0xff] }
  0x38   : > { %v4054_v41 = vld [vmem:[%s6703_s4 + $0x1e8] sm:$0xff] }
  0x39   : > { %5107 = vmatpush3.bf16.msra.mxu0 %v5106_v51  ;;  %5139 = vmatpush3.bf16.msra.mxu1 %v5138_v53  ;;  %v4002_v51 = vld [vmem:[%s6703_s4 + $0x78] sm:$0xff]  ;;  %v4003_v53 = vld [vmem:[%s6703_s4 + $0x80] sm:$0xff] }
  0x3a   : > { %5141 = vmatprep.subr.bf16.mxu0 %v5587_v7  ;;  %5149 = vmatprep.subr.bf16.mxu1 %v5148_v56  ;;  %v3985_v7 = vld [vmem:[%s6701_s2 + $0x290] sm:$0xff]  ;;  %v5208_v56 = vpack.c.bf16 %v4003_v53, %v4002_v51 }
  0x3b   : > { %v5152_v2 = vpack.c.bf16 %v3986_v59, %v3985_v7  ;;  %v1073_v7 = vld [vmem:[%s6703_s4 + $0x28] sm:$0xff]  ;;  %v4037_v51 = vld [vmem:[%s6703_s4 + $0x170] sm:$0xff] }
  0x3c   : > { %v5188_v59 = vpack.c.bf16 %v1073_v7, %v1072_v58  ;;  %v5264_v53 = vpack.c.bf16 %v4037_v51, %v4036_v50 }
  0xee   : > { %v551_v60 = vpop.f32.mrb[0].mxu0  ;;  %v669_v61 = vpop.f32.mrb[0].mxu1 }
  0xef   : > { %v553_v63 = vpop.f32.mrb[1].mxu0  ;;  %v671_v1 = vpop.f32.mrb[1].mxu1 }
  0xf0   : > { %777 = vmatprep.mubr.f32.mxu0 %v671_v1  ;;  %852 = vmatprep.mubr.f32.mxu1 %v553_v63  ;;  %v1076_v63 = vld [vmem:[%s6703_s4 + $0x40] sm:$0xff]  ;;  %v1077_v1 = vld [vmem:[%s6703_s4 + $0x48] sm:$0xff] }
  0xf1   : > { %778 = vmatmul.mubr.f32.vlgmr.msra.gmra.mrb[4].mxu0 %v669_v61  ;;  %853 = vmatmul.mubr.f32.vlgmr.msra.gmra.mrb[4].mxu1 %v551_v60  ;;  %v1074_v60 = vld [vmem:[%s6703_s4 + $0x30] sm:$0xff]  ;;  %v1075_v61 = vld [vmem:[%s6703_s4 + $0x38] sm:$0xff] }
  0xf2   : > { %v557_v8 = vpop.f32.mrb[2].mxu0  ;;  %v675_v9 = vpop.f32.mrb[2].mxu1  ;;  %5143 = vmatpush1.bf16.msra.mxu0 %v5589_v11  ;;  %5151 = vmatpush3.bf16.msra.mxu1 %v5150_v62  ;;  %v3989_v11 = vld [vmem:[%s6701_s2 + $0x2b0] sm:$0xff]  ;;  %v5192_v62 = vpack.c.bf16 %v1075_v61, %v1074_v60 }
  0xf3   : > { %v559_v10 = vpop.f32.mrb[3].mxu0  ;;  %v677_v13 = vpop.f32.mrb[3].mxu1  ;;  %5145 = vmatprep.subr.bf16.mxu0 %v5591_v12  ;;  %5153 = vmatprep.subr.bf16.mxu1 %v5152_v2  ;;  %v3990_v12 = vld [vmem:[%s6701_s2 + $0x2b8] sm:$0xff]  ;;  %v5196_v2 = vpack.c.bf16 %v1077_v1, %v1076_v63  ;;  %v4022_v1 = vld [vmem:[%s6703_s4 + $0x108] sm:$0xff] }
  0xf4   : > { %782 = vmatprep.mubr.f32.mxu0 %v677_v13  ;;  %857 = vmatprep.mubr.f32.mxu1 %v559_v10  ;;  %v5160_v21 = vpack.c.bf16 %v3990_v12, %v3989_v11  ;;  %v4004_v12 = vld [vmem:[%s6703_s4 + $0x88] sm:$0xff] }
  0xf5   : > { %783 = vmatmul.mubr.f32.gmra.mrb[6].mxu0 %v675_v9  ;;  %858 = vmatmul.mubr.f32.gmra.mrb[6].mxu1 %v557_v8 }
  0xf6   : > { %5147 = vmatpush1.bf16.msra.mxu0 %v5600_v16  ;;  %936 = vmatprep.mubr.f32.mxu0 %v5483_v0  ;;  %v3991_v16 = vld [vmem:[%s6701_s2 + $0x2c0] sm:$0xff] }
  0xf7   : > { %5155 = vmatpush3.bf16.msra.mxu1 %v5154_v14  ;;  %v5164_v27 = vpack.c.bf16 %v3992_v24, %v3991_v16  ;;  %5181 = vmatprep.subr.bf16.mxu0 %v5180_v52  ;;  %v4006_v16 = vld [vmem:[%s6703_s4 + $0x98] sm:$0xff]  ;;  %v4007_v24 = vld [vmem:[%s6703_s4 + $0xa0] sm:$0xff] }
  0xf8   : > { %5157 = vmatprep.subr.bf16.mxu1 %v5156_v15 }
  0xf9   : > { %3965 = vmatmul.mubr.msk.f32.vlgmr.msra.gmra.mrb[8].mxu0 %vm478_vm0, %v3963_v19  ;;  %v4005_v19 = vld [vmem:[%s6703_s4 + $0x90] sm:$0xff] }
  0xfa   : > { %942 = vmatprep.mubr.f32.mxu0 %v5483_v0  ;;  %5183 = vmatpush3.bf16.msra.mxu0 %v5180_v52  ;;  %v5212_v23 = vpack.c.bf16 %v4005_v19, %v4004_v12  ;;  %v4043_v12 = vld [vmem:[%s6703_s4 + $0x1a0] sm:$0xff] }
  0xfb   : > { %5159 = vmatpush3.bf16.msra.mxu1 %v5158_v20  ;;  %5185 = vmatprep.subr.bf16.mxu0 %v5184_v57 }
  0xfc   : > { %5161 = vmatprep.subr.bf16.mxu1 %v5160_v21 }
  0xfd   : > { %3966 = vmatmul.mubr.msk.f32.gmra.mrb[10].mxu0 %vm478_vm0, %v3964_v25 }
  0xfe   : > { %5187 = vmatpush3.bf16.msra.mxu0 %v5184_v57  ;;  %v3999_v57 = vld [vmem:[%s6702_s3] ss:$0 sm:$0xff] }
  0xff   : > { %5163 = vmatpush3.bf16.msra.mxu1 %v5162_v26  ;;  %5189 = vmatprep.subr.bf16.mxu0 %v5188_v59 }
 0x100   : > { %5165 = vmatprep.subr.bf16.mxu1 %v5164_v27  ;;  %v5216_v27 = vpack.c.bf16 %v4007_v24, %v4006_v16  ;;  %v4045_v16 = vld [vmem:[%s6703_s4 + $0x1b0] sm:$0xff] }
 0x102   : > { %5191 = vmatpush3.bf16.msra.mxu0 %v5188_v59 }
 0x103   : > { %5167 = vmatpush3.bf16.msra.mxu1 %v5166_v32  ;;  %5193 = vmatprep.subr.bf16.mxu0 %v5192_v62  ;;  %v4011_v32 = vld [vmem:[%s6703_s4 + $0xc0] sm:$0xff] }
 0x104   : > { %5169 = vmatprep.subr.bf16.mxu1 %v5168_v33  ;;  %v5224_v33 = vpack.c.bf16 %v4011_v32, %v4010_v31  ;;  %v5284_v31 = vpack.c.bf16 %v4047_v29, %v4046_v28  ;;  %v4031_v32 = vld [vmem:[%s6703_s4 + $0x150] sm:$0xff] }
 0x105   : > { %v4091_v29 = vld [vmem:[%s6703_s4 + $0x2f0] sm:$0xff] }
 0x106   : > { %5195 = vmatpush3.bf16.msra.mxu0 %v5192_v62  ;;  %v4021_v62 = vld [vmem:[%s6703_s4 + $0x100] sm:$0xff] }
 0x107   : > { %5171 = vmatpush3.bf16.msra.mxu1 %v5170_v36  ;;  %5197 = vmatprep.subr.bf16.mxu0 %v5196_v2  ;;  %v4012_v36 = vld [vmem:[%s6703_s4 + $0xc8] sm:$0xff] }
 0x108   : > { %5173 = vmatprep.subr.bf16.mxu1 %v5172_v39  ;;  %v5228_v39 = vpack.c.bf16 %v4013_v38, %v4012_v36  ;;  %v4033_v38 = vld [vmem:[%s6703_s4 + $0x160] sm:$0xff] }
 0x10a   : > { %5199 = vmatpush3.bf16.msra.mxu0 %v5196_v2  ;;  %v4038_v2 = vld [vmem:[%s6703_s4 + $0x178] sm:$0xff] }
 0x10b   : > { %5175 = vmatpush3.bf16.msra.mxu1 %v5174_v42  ;;  %5201 = vmatprep.subr.bf16.mxu0 %v5200_v37  ;;  %v4014_v42 = vld [vmem:[%s6703_s4 + $0xd8] sm:$0xff] }
 0x10c   : > { %5177 = vmatprep.subr.bf16.mxu1 %v5176_v45  ;;  %v5232_v45 = vpack.c.bf16 %v4015_v44, %v4014_v42  ;;  %v4070_v42 = vld [vmem:[%s6703_s4 + $0x258] sm:$0xff]  ;;  %v4055_v44 = vld [vmem:[%s6703_s4 + $0x1f0] sm:$0xff] }
 0x10e   : > { %5203 = vmatpush3.bf16.msra.mxu0 %v5200_v37  ;;  %v5288_v37 = vpack.c.bf16 %v4049_v35, %v4048_v34  ;;  %v4095_v35 = vld [vmem:[%s6703_s4 + $0x310] sm:$0xff] }
 0x10f   : > { %5179 = vmatpush3.bf16.msra.mxu1 %v5178_v48  ;;  %5205 = vmatprep.subr.bf16.mxu0 %v5204_v43  ;;  %v4019_v48 = vld [vmem:[%s6703_s4 + $0xf0] sm:$0xff] }
 0x110   : > { %5209 = vmatprep.subr.bf16.mxu1 %v5208_v56  ;;  %v5236_v52 = vpack.c.bf16 %v4020_v49, %v4019_v48  ;;  %v4072_v48 = vld [vmem:[%s6703_s4 + $0x268] sm:$0xff]  ;;  %v4073_v49 = vld [vmem:[%s6703_s4 + $0x270] sm:$0xff] }
 0x111   : > { %v5324_v51 = vpack.c.bf16 %v4073_v49, %v4072_v48 }
 0x112   : > { %5207 = vmatpush3.bf16.msra.mxu0 %v5204_v43  ;;  %v4071_v43 = vld [vmem:[%s6703_s4 + $0x260] sm:$0xff] }
 0x113   : > { %4623 = vmatprep.subr.mxu0 %v1082_v46 }
 0x116   : > { %4624 = vmatpush3.msra.mxu0 %v1082_v46  ;;  %v5320_v46 = vpack.c.bf16 %v4071_v43, %v4070_v42  ;;  %v4101_v43 = vld [vmem:[%s6703_s4 + $0x340] sm:$0xff] }
 0x117   : > { %5237 = vmatprep.subr.bf16.mxu0 %v5236_v52 }
 0x1c4   : > { %v4276_v3 = vpop.f32.mrb[4].mxu0  ;;  %v4314_v4 = vpop.f32.mrb[4].mxu1 }
 0x1c5   : > { %v4277_v5 = vpop.f32.mrb[5].mxu0  ;;  %v4315_v6 = vpop.f32.mrb[5].mxu1 }
 0x1c6   : > { %v4278_v8 = vadd.f32 %v4277_v5, %v4276_v3  ;;  %v4316_v9 = vadd.f32 %v4315_v6, %v4314_v4  ;;  %v4039_v3 = vld [vmem:[%s6703_s4 + $0x180] sm:$0xff]  ;;  %v4023_v5 = vld [vmem:[%s6703_s4 + $0x110] sm:$0xff]  ;;  %v5240_v6 = vpack.c.bf16 %v4022_v1, %v4021_v62 }
 0x1c7   : > { %v4061_v1 = vld [vmem:[%s6703_s4 + $0x220] sm:$0xff] }
 0x1c8   : > { %v5950_v10 = vadd.f32 %v4316_v9, %v4278_v8  ;;  %v4279_v13 = vpop.f32.mrb[6].mxu0  ;;  %v4317_v14 = vpop.f32.mrb[6].mxu1  ;;  %v5268_v8 = vpack.c.bf16 %v4039_v3, %v4038_v2  ;;  %v4024_v9 = vld [vmem:[%s6703_s4 + $0x118] sm:$0xff]  ;;  %v4062_v2 = vld [vmem:[%s6703_s4 + $0x228] sm:$0xff] }
 0x1c9   : > { %v4280_v15 = vpop.f32.mrb[7].mxu0  ;;  %v4318_v17 = vpop.f32.mrb[7].mxu1  ;;  %v4078_v3 = vld [vmem:[%s6703_s4 + $0x298] sm:$0xff] }
 0x1ca   : > { %v4281_v18 = vadd.f32 %v4280_v15, %v4279_v13  ;;  %v4319_v11 = vadd.f32 %v4318_v17, %v4317_v14  ;;  %v4041_v13 = vld [vmem:[%s6703_s4 + $0x190] sm:$0xff]  ;;  %v5244_v14 = vpack.c.bf16 %v4024_v9, %v4023_v5  ;;  %v4025_v17 = vld [vmem:[%s6703_s4 + $0x120] sm:$0xff] }
 0x1cb   : > { %v4079_v5 = vld [vmem:[%s6703_s4 + $0x2a0] sm:$0xff]  ;;  %v4063_v9 = vld [vmem:[%s6703_s4 + $0x230] sm:$0xff] }
 0x1cc   : > { %v5958_v20 = vadd.f32 %v4319_v11, %v4281_v18  ;;  %v938_v21 = vpop.f32.mrb[8].mxu0  ;;  %v4026_v18 = vld [vmem:[%s6703_s4 + $0x128] sm:$0xff]  ;;  %v4042_v11 = vld [vmem:[%s6703_s4 + $0x198] sm:$0xff] }
 0x1cd   : > { %v940_v22 = vpop.f32.mrb[9].mxu0  ;;  %v5248_v19 = vpack.c.bf16 %v4026_v18, %v4025_v17  ;;  %v4065_v18 = vld [vmem:[%s6703_s4 + $0x240] sm:$0xff] }
 0x1ce   : > { %1046 = vmatprep.mubr.f32.mxu1 %v940_v22  ;;  %v4028_v22 = vld [vmem:[%s6703_s4 + $0x138] sm:$0xff] }
 0x1cf   : > { %1047 = vmatmul.mubr.f32.vlgmr.msra.gmra.mrb[8].mxu1 %v938_v21  ;;  %v4027_v21 = vld [vmem:[%s6703_s4 + $0x130] sm:$0xff] }
 0x1d0   : > { %v944_v25 = vpop.f32.mrb[10].mxu0  ;;  %5211 = vmatpush3.bf16.msra.mxu1 %v5208_v56  ;;  %v5252_v24 = vpack.c.bf16 %v4028_v22, %v4027_v21  ;;  %v4067_v22 = vld [vmem:[%s6703_s4 + $0x250] sm:$0xff] }
 0x1d1   : > { %v946_v26 = vpop.f32.mrb[11].mxu0  ;;  %5213 = vmatprep.subr.bf16.mxu1 %v5212_v23 }
 0x1d2   : > { %1051 = vmatprep.mubr.f32.mxu1 %v946_v26  ;;  %v4029_v26 = vld [vmem:[%s6703_s4 + $0x140] sm:$0xff] }
 0x1d3   : > { %1052 = vmatmul.mubr.f32.gmra.mrb[10].mxu1 %v944_v25 }
 0x1d4   : > { %5215 = vmatpush3.bf16.msra.mxu1 %v5212_v23  ;;  %v4044_v23 = vld [vmem:[%s6703_s4 + $0x1a8] sm:$0xff] }
 0x1d5   : > { %5217 = vmatprep.subr.bf16.mxu1 %v5216_v27  ;;  %v5280_v25 = vpack.c.bf16 %v4045_v16, %v4044_v23  ;;  %v4084_v23 = vld [vmem:[%s6703_s4 + $0x2c8] sm:$0xff]  ;;  %v4087_v16 = vld [vmem:[%s6703_s4 + $0x2d0] sm:$0xff] }
 0x1d8   : > { %5219 = vmatpush3.bf16.msra.mxu1 %v5216_v27  ;;  %v4030_v27 = vld [vmem:[%s6703_s4 + $0x148] sm:$0xff] }
 0x1d9   : > { %5221 = vmatprep.subr.bf16.mxu1 %v5220_v30 }
 0x1dc   : > { %5223 = vmatpush3.bf16.msra.mxu1 %v5220_v30  ;;  %v5256_v30 = vpack.c.bf16 %v4030_v27, %v4029_v26  ;;  %v4090_v26 = vld [vmem:[%s6703_s4 + $0x2e8] sm:$0xff] }
 0x1dd   : > { %5225 = vmatprep.subr.bf16.mxu1 %v5224_v33 }
 0x1e0   : > { %5227 = vmatpush3.bf16.msra.mxu1 %v5224_v33  ;;  %v4032_v33 = vld [vmem:[%s6703_s4 + $0x158] sm:$0xff] }
 0x1e1   : > { %5229 = vmatprep.subr.bf16.mxu1 %v5228_v39  ;;  %v5260_v36 = vpack.c.bf16 %v4032_v33, %v4031_v32  ;;  %v4093_v32 = vld [vmem:[%s6703_s4 + $0x300] sm:$0xff]  ;;  %v4094_v33 = vld [vmem:[%s6703_s4 + $0x308] sm:$0xff] }
 0x1e2   : > { %v5360_v34 = vpack.c.bf16 %v4094_v33, %v4093_v32 }
 0x1e4   : > { %5231 = vmatpush3.bf16.msra.mxu1 %v5228_v39  ;;  %v4050_v39 = vld [vmem:[%s6703_s4 + $0x1d8] sm:$0xff] }
 0x1e5   : > { %5233 = vmatprep.subr.bf16.mxu1 %v5232_v45 }
 0x1e8   : > { %5235 = vmatpush3.bf16.msra.mxu1 %v5232_v45  ;;  %v5292_v45 = vpack.c.bf16 %v4054_v41, %v4053_v40  ;;  %v4099_v40 = vld [vmem:[%s6703_s4 + $0x330] sm:$0xff]  ;;  %v4100_v41 = vld [vmem:[%s6703_s4 + $0x338] sm:$0xff] }
 0x1e9   : > { %4656 = vmatprep.subr.mxu1 %v4016_v47  ;;  %v5372_v42 = vpack.c.bf16 %v4100_v41, %v4099_v40 }
 0x1ec   : > { %4657 = vmatpush3.msra.mxu1 %v4016_v47  ;;  %v4056_v47 = vld [vmem:[%s6703_s4 + $0x1f8] sm:$0xff] }
 0x1ed   : > { %5265 = vmatprep.subr.bf16.mxu1 %v5264_v53  ;;  %v5296_v50 = vpack.c.bf16 %v4056_v47, %v4055_v44  ;;  %v5484_v44 = vmov 0.0|0.0  }
 0x2a2   : > { %v4352_v54 = vpop.f32.mrb[8].mxu1 }
 0x2a3   : > { %v4353_v55 = vpop.f32.mrb[9].mxu1 }
 0x2a4   : > { %v4354_v56 = vadd.f32 %v4353_v55, %v4352_v54  ;;  %v4074_v54 = vld [vmem:[%s6703_s4 + $0x278] sm:$0xff]  ;;  %v4075_v55 = vld [vmem:[%s6703_s4 + $0x280] sm:$0xff] }
 0x2a6   : > { %v1057_v58 = vadd.f32 %v4354_v56, %v5950_v10  ;;  %v4355_v7 = vpop.f32.mrb[10].mxu1  ;;  %v4040_v10 = vld [vmem:[%s6703_s4 + $0x188] sm:$0xff] }
 0x2a7   : > { %v4356_v59 = vpop.f32.mrb[11].mxu1  ;;  %v5272_v15 = vpack.c.bf16 %v4041_v13, %v4040_v10  ;;  %v4064_v10 = vld [vmem:[%s6703_s4 + $0x238] sm:$0xff]  ;;  %v4080_v13 = vld [vmem:[%s6703_s4 + $0x2a8] sm:$0xff] }
 0x2a8   : > { %v6024_v60 = vadd.f32 %v3999_v57, %v1057_v58  ;;  %v4357_v61 = vadd.f32 %v4356_v59, %v4355_v7  ;;  %v4059_v58 = vld [vmem:[%s6703_s4 + $0x210] sm:$0xff]  ;;  %v4060_v7 = vld [vmem:[%s6703_s4 + $0x218] sm:$0xff]  ;;  %v4076_v59 = vld [vmem:[%s6703_s4 + $0x288] sm:$0xff] }
 0x2a9   : > { %v5304_v62 = vpack.c.bf16 %v4060_v7, %v4059_v58 }
 0x2aa   : > { %v1058_v63 = vadd.f32 %v4357_v61, %v5958_v20  ;;  %4625 = vmatprep.mubr.msk.f32.mxu0 %vm1083_vm1, %v6024_v60  ;;  %4658 = vmatprep.mubr.msk.f32.mxu1 %vm1083_vm1, %v6024_v60  ;;  %v5276_v20 = vpack.c.bf16 %v4043_v12, %v4042_v11  ;;  %v4077_v61 = vld [vmem:[%s6703_s4 + $0x290] sm:$0xff]  ;;  %v4066_v11 = vld [vmem:[%s6703_s4 + $0x248] sm:$0xff]  ;;  %v4082_v12 = vld [vmem:[%s6703_s4 + $0x2b8] sm:$0xff] }
 0x2ac   : > { %v6043_v4 = vadd.f32 %v3999_v57, %v1058_v63  ;;  %v5328_v57 = vpack.c.bf16 %v4075_v55, %v4074_v54  ;;  %v5332_v63 = vpack.c.bf16 %v4077_v61, %v4076_v59 }
 0x2ae   : > { %4626 = vmatmul.mubr.msk.f32.vlgmr.msra.gmra.mrb[12].mxu0 %vm1083_vm1, %v6043_v4  ;;  %4659 = vmatmul.mubr.msk.f32.vlgmr.msra.gmra.mrb[12].mxu1 %vm1083_vm1, %v6043_v4 }
 0x2af   : > { %5239 = vmatpush3.bf16.msra.mxu0 %v5236_v52  ;;  %5267 = vmatpush3.bf16.msra.mxu1 %v5264_v53  ;;  %v4057_v52 = vld [vmem:[%s6703_s4 + $0x200] sm:$0xff]  ;;  %v4058_v53 = vld [vmem:[%s6703_s4 + $0x208] sm:$0xff] }
 0x2b0   : > { %4691 = vmatprep.mubr.msk.f32.mxu0 %vm1083_vm1, %v6024_v60  ;;  %4724 = vmatprep.mubr.msk.f32.mxu1 %vm1083_vm1, %v6024_v60  ;;  %v5300_v56 = vpack.c.bf16 %v4058_v53, %v4057_v52 }
 0x2b1   : > { %5241 = vmatprep.subr.bf16.mxu0 %v5240_v6  ;;  %5269 = vmatprep.subr.bf16.mxu1 %v5268_v8 }
 0x2b3   : > { %5243 = vmatpush3.bf16.msra.mxu0 %v5240_v6  ;;  %5271 = vmatpush3.bf16.msra.mxu1 %v5268_v8  ;;  %v5308_v6 = vpack.c.bf16 %v4062_v2, %v4061_v1  ;;  %v5336_v8 = vpack.c.bf16 %v4079_v5, %v4078_v3 }
 0x2b4   : > { %5245 = vmatprep.subr.bf16.mxu0 %v5244_v14  ;;  %5273 = vmatprep.subr.bf16.mxu1 %v5272_v15 }
 0x2b7   : > { %5247 = vmatpush3.bf16.msra.mxu0 %v5244_v14  ;;  %5275 = vmatpush3.bf16.msra.mxu1 %v5272_v15  ;;  %v4081_v14 = vld [vmem:[%s6703_s4 + $0x2b0] sm:$0xff]  ;;  %v5312_v15 = vpack.c.bf16 %v4064_v10, %v4063_v9 }
 0x2b8   : > { %5249 = vmatprep.subr.bf16.mxu0 %v5248_v19  ;;  %5277 = vmatprep.subr.bf16.mxu1 %v5276_v20  ;;  %v5340_v17 = vpack.c.bf16 %v4081_v14, %v4080_v13  ;;  %v1723_v13 = vld [vmem:[%s6704_s5] sm:$0x7]  ;;  %v4109_v14 = vld [vmem:[%s6704_s5 + $0x8] sm:$0x7] }
 0x2bb   : > { %5251 = vmatpush3.bf16.msra.mxu0 %v5248_v19  ;;  %5279 = vmatpush3.bf16.msra.mxu1 %v5276_v20  ;;  %v4083_v19 = vld [vmem:[%s6703_s4 + $0x2c0] sm:$0xff]  ;;  %v5316_v20 = vpack.c.bf16 %v4066_v11, %v4065_v18  ;;  %v4112_v18 = vld [vmem:[%s6704_s5 + $0xc] sm:$0x7]  ;;  %v4121_v11 = vld [vmem:[%s6704_s5 + $0x18] sm:$0x7] }
 0x2bc   : > { %5253 = vmatprep.subr.bf16.mxu0 %v5252_v24  ;;  %5281 = vmatprep.subr.bf16.mxu1 %v5280_v25  ;;  %v5344_v21 = vpack.c.bf16 %v4083_v19, %v4082_v12  ;;  %v4118_v12 = vld [vmem:[%s6704_s5 + $0x14] sm:$0x7]  ;;  %v4124_v19 = vld [vmem:[%s6705_s6 + $0x18] sm:$0xff] }
 0x2bf   : > { %5255 = vmatpush3.bf16.msra.mxu0 %v5252_v24  ;;  %5283 = vmatpush3.bf16.msra.mxu1 %v5280_v25  ;;  %v4088_v24 = vld [vmem:[%s6703_s4 + $0x2d8] sm:$0xff]  ;;  %v4089_v25 = vld [vmem:[%s6703_s4 + $0x2e0] sm:$0xff] }
 0x2c0   : > { %5257 = vmatprep.subr.bf16.mxu0 %v5256_v30  ;;  %5285 = vmatprep.subr.bf16.mxu1 %v5284_v31  ;;  %v5348_v27 = vpack.c.bf16 %v4088_v24, %v4087_v16  ;;  %v5352_v28 = vpack.c.bf16 %v4090_v26, %v4089_v25  ;;  %v4126_v24 = vld [vmem:[%s6705_s6 + $0x28] sm:$0xff]  ;;  %v2265_v25 = vld [vmem:[%s6705_s6 + $0x10] sm:$0xff] }
 0x2c3   : > { %5259 = vmatpush3.bf16.msra.mxu0 %v5256_v30  ;;  %5287 = vmatpush3.bf16.msra.mxu1 %v5284_v31  ;;  %v4092_v30 = vld [vmem:[%s6703_s4 + $0x2f8] sm:$0xff] }
 0x2c4   : > { %5261 = vmatprep.subr.bf16.mxu0 %v5260_v36  ;;  %5289 = vmatprep.subr.bf16.mxu1 %v5288_v37  ;;  %v5356_v31 = vpack.c.bf16 %v4092_v30, %v4091_v29 }
 0x2c7   : > { %5263 = vmatpush3.bf16.msra.mxu0 %v5260_v36  ;;  %5291 = vmatpush3.bf16.msra.mxu1 %v5288_v37  ;;  %v4097_v37 = vld [vmem:[%s6703_s4 + $0x320] sm:$0xff] }
 0x2c8   : > { %4689 = vmatprep.subr.mxu0 %v4033_v38  ;;  %4722 = vmatprep.subr.mxu1 %v4050_v39 }
 0x2cb   : > { %4690 = vmatpush3.msra.mxu0 %v4033_v38  ;;  %4723 = vmatpush3.msra.mxu1 %v4050_v39  ;;  %v4098_v38 = vld [vmem:[%s6703_s4 + $0x328] sm:$0xff] }
 0x2cc   : > { %4692 = vmatmul.mubr.msk.f32.vlgmr.msra.gmra.mrb[14].mxu0 %vm1083_vm1, %v6043_v4  ;;  %4725 = vmatmul.mubr.msk.f32.vlgmr.msra.gmra.mrb[14].mxu1 %vm1083_vm1, %v6043_v4  ;;  %v5368_v39 = vpack.c.bf16 %v4098_v38, %v4097_v37 }
 0x2cd   : > { %5293 = vmatprep.subr.bf16.mxu0 %v5292_v45  ;;  %5321 = vmatprep.subr.bf16.mxu1 %v5320_v46 }
 0x2ce   : > { %5295 = vmatpush3.bf16.msra.mxu0 %v5292_v45  ;;  %4757 = vmatprep.mubr.msk.f32.mxu0 %vm1083_vm1, %v6024_v60 }
 0x2cf   : > { %5323 = vmatpush3.bf16.msra.mxu1 %v5320_v46  ;;  %4790 = vmatprep.mubr.msk.f32.mxu1 %vm1083_vm1, %v6024_v60 }
 0x2d0   : > { %5297 = vmatprep.subr.bf16.mxu0 %v5296_v50  ;;  %5325 = vmatprep.subr.bf16.mxu1 %v5324_v51 }
 0x2d2   : > { %5299 = vmatpush3.bf16.msra.mxu0 %v5296_v50 }
 0x2d3   : > { %5327 = vmatpush3.bf16.msra.mxu1 %v5324_v51  ;;  %5301 = vmatprep.subr.bf16.mxu0 %v5300_v56 }
 0x2d4   : > { %5329 = vmatprep.subr.bf16.mxu1 %v5328_v57 }
 0x2d6   : > { %5303 = vmatpush3.bf16.msra.mxu0 %v5300_v56 }
 0x2d7   : > { %5331 = vmatpush3.bf16.msra.mxu1 %v5328_v57  ;;  %5305 = vmatprep.subr.bf16.mxu0 %v5304_v62 }
 0x2d8   : > { %5333 = vmatprep.subr.bf16.mxu1 %v5332_v63 }
 0x2da   : > { %5307 = vmatpush3.bf16.msra.mxu0 %v5304_v62 }
 0x2db   : > { %5335 = vmatpush3.bf16.msra.mxu1 %v5332_v63  ;;  %5309 = vmatprep.subr.bf16.mxu0 %v5308_v6 }
 0x2dc   : > { %5337 = vmatprep.subr.bf16.mxu1 %v5336_v8 }
 0x2de   : > { %5311 = vmatpush3.bf16.msra.mxu0 %v5308_v6 }
 0x2df   : > { %5339 = vmatpush3.bf16.msra.mxu1 %v5336_v8  ;;  %5313 = vmatprep.subr.bf16.mxu0 %v5312_v15 }
 0x2e0   : > { %5341 = vmatprep.subr.bf16.mxu1 %v5340_v17 }
 0x2e2   : > { %5315 = vmatpush3.bf16.msra.mxu0 %v5312_v15  ;;  %v4106_v15 = vld [vmem:[%s6704_s5 + $0x4] sm:$0x7] }
 0x2e3   : > { %5343 = vmatpush3.bf16.msra.mxu1 %v5340_v17  ;;  %5317 = vmatprep.subr.bf16.mxu0 %v5316_v20  ;;  %v4115_v17 = vld [vmem:[%s6704_s5 + $0x10] sm:$0x7] }
 0x2e4   : > { %5345 = vmatprep.subr.bf16.mxu1 %v5344_v21 }
 0x2e6   : > { %5319 = vmatpush3.bf16.msra.mxu0 %v5316_v20  ;;  %v4125_v20 = vld [vmem:[%s6705_s6 + $0x20] sm:$0xff] }
 0x2e7   : > { %5347 = vmatpush3.bf16.msra.mxu1 %v5344_v21  ;;  %4755 = vmatprep.subr.mxu0 %v4067_v22  ;;  %v5405_v21 = vpack.c.bf16 %v4125_v20, %v4124_v19  ;;  %v4145_v19 = vld [vmem:[%s6709_s10 + $0x20] sm:$0xff] }
 0x2e8   : > { %4788 = vmatprep.subr.mxu1 %v4084_v23 }
 0x2ea   : > { %4756 = vmatpush3.msra.mxu0 %v4067_v22  ;;  %v2263_v22 = vld [vmem:[%s6705_s6] sm:$0xff] }
 0x2eb   : > { %4789 = vmatpush3.msra.mxu1 %v4084_v23  ;;  %4758 = vmatmul.mubr.msk.f32.vlgmr.msra.gmra.mrb[16].mxu0 %vm1083_vm1, %v6043_v4  ;;  %v2264_v23 = vld [vmem:[%s6705_s6 + $0x8] sm:$0xff] }
 0x2ec   : > { %4791 = vmatmul.mubr.msk.f32.vlgmr.msra.gmra.mrb[16].mxu1 %vm1083_vm1, %v6043_v4  ;;  %5349 = vmatprep.subr.bf16.mxu0 %v5348_v27  ;;  %v5408_v16 = vpack.c.bf16 %v2264_v23, %v2263_v22  ;;  %v2753_v22 = vld [vmem:[%s6709_s10 + $0x8] sm:$0xff] }
 0x2ed   : > { %5351 = vmatpush3.bf16.msra.mxu0 %v5348_v27  ;;  %4823 = vmatprep.mubr.msk.f32.mxu0 %vm1083_vm1, %v6024_v60  ;;  %v4096_v60 = vld [vmem:[%s6703_s4 + $0x318] sm:$0xff] }
 0x2ee   : > { %5353 = vmatprep.subr.bf16.mxu0 %v5352_v28  ;;  %v5364_v36 = vpack.c.bf16 %v4096_v60, %v4095_v35  ;;  %5376 = vmatprep.subr.bf16.mxu1 %v5484_v44 }
 0x2ef   : > { %4830 = vmatprep.mubr.msk.f32.mxu1 %vm5485_vm2, %v5483_v0 }
 0x2f1   : > { %5355 = vmatpush3.bf16.msra.mxu0 %v5352_v28 }
 0x2f2   : > { %5357 = vmatprep.subr.bf16.mxu0 %v5356_v31 }
 0x2f5   : > { %5359 = vmatpush3.bf16.msra.mxu0 %v5356_v31 }
 0x2f6   : > { %5361 = vmatprep.subr.bf16.mxu0 %v5360_v34 }
 0x2f9   : > { %5363 = vmatpush3.bf16.msra.mxu0 %v5360_v34 }
 0x2fa   : > { %5365 = vmatprep.subr.bf16.mxu0 %v5364_v36 }
 0x2fd   : > { %5367 = vmatpush3.bf16.msra.mxu0 %v5364_v36 }
 0x2fe   : > { %5369 = vmatprep.subr.bf16.mxu0 %v5368_v39 }
 0x301   : > { %5371 = vmatpush3.bf16.msra.mxu0 %v5368_v39 }
 0x302   : > { %5373 = vmatprep.subr.bf16.mxu0 %v5372_v42 }
 0x305   : > { %5375 = vmatpush3.bf16.msra.mxu0 %v5372_v42 }
 0x306   : > { %4821 = vmatprep.subr.mxu0 %v4101_v43 }
 0x309   : > { %4822 = vmatpush3.msra.mxu0 %v4101_v43 }
 0x30a   : > { %4824 = vmatmul.mubr.msk.f32.vlgmr.msra.gmra.mrb[18].mxu0 %vm1083_vm1, %v6043_v4  ;;  %5384 = vmatprep.subr.bf16.mxu0 %v5484_v44 }
 0x30b   : > { %4844 = vmatprep.mubr.msk.f32.mxu0 %vm5485_vm2, %v5483_v0 }
 0x381   : > { %v4627_v45 = vpop.f32.mrb[12].mxu0  ;;  %v4660_v46 = vpop.f32.mrb[12].mxu1 }
 0x382   : > { %v1257_v47 = vmax.f32 %v4627_v45, %v4660_v46  ;;  %v1156_v48 = vpop.f32.mrb[13].mxu0  ;;  %v1247_v49 = vpop.f32.mrb[13].mxu1  ;;  %v4129_v46 = vld [vmem:[%s6705_s6 + $0x30] sm:$0xff] }
 0x383   : > { %v1256_v50 = vmax.f32 %v1156_v48, %v1247_v49 }
 0x39f   : > { %v4693_v51 = vpop.f32.mrb[14].mxu0  ;;  %v4726_v4 = vpop.f32.mrb[14].mxu1 }
 0x3a0   : > { %v1350_v52 = vmax.f32 %v1257_v47, %v4693_v51  ;;  %v1340_v53 = vpop.f32.mrb[15].mxu0  ;;  %v1433_v54 = vpop.f32.mrb[15].mxu1  ;;  %v4130_v47 = vld [vmem:[%s6705_s6 + $0x38] sm:$0xff]  ;;  %v4131_v51 = vld [vmem:[%s6705_s6 + $0x40] sm:$0xff] }
 0x3a1   : > { %v1349_v55 = vmax.f32 %v1256_v50, %v1340_v53  ;;  %v5411_v48 = vpack.c.bf16 %v4130_v47, %v4129_v46  ;;  %v4135_v53 = vld [vmem:[%s6707_s8 + $0x20] sm:$0xff] }
 0x3a2   : > { %v1443_v56 = vmax.f32 %v1350_v52, %v4726_v4  ;;  %v4134_v52 = vld [vmem:[%s6707_s8 + $0x18] sm:$0xff] }
 0x3a3   : > { %v1442_v57 = vmax.f32 %v1349_v55, %v1433_v54  ;;  %v5414_v54 = vpack.c.bf16 %v4135_v53, %v4134_v52  ;;  %v2508_v55 = vld [vmem:[%s6707_s8] sm:$0xff] }
 0x3a4   : > { %v4164_v52 = vld [vmem:[%s6712_s13 + $0x20] sm:$0xff] }
 0x3be   : > { %v4759_v58 = vpop.f32.mrb[16].mxu0 }
 0x3bf   : > { %v1536_v7 = vmax.f32 %v1443_v56, %v4759_v58  ;;  %v4792_v59 = vpop.f32.mrb[16].mxu1  ;;  %v1526_v61 = vpop.f32.mrb[17].mxu0  ;;  %v2509_v56 = vld [vmem:[%s6707_s8 + $0x8] sm:$0xff] }
 0x3c0   : > { %v1535_v62 = vmax.f32 %v1442_v57, %v1526_v61  ;;  %v1619_v63 = vpop.f32.mrb[17].mxu1  ;;  %v5417_v57 = vpack.c.bf16 %v2509_v56, %v2508_v55  ;;  %v4136_v58 = vld [vmem:[%s6707_s8 + $0x28] sm:$0xff] }
 0x3c1   : > { %v1629_v1 = vmax.f32 %v1536_v7, %v4792_v59  ;;  %v2510_v7 = vld [vmem:[%s6707_s8 + $0x10] sm:$0xff] }
 0x3c2   : > { %v1628_v2 = vmax.f32 %v1535_v62, %v1619_v63 }
 0x3dd   : > { %v4825_v3 = vpop.f32.mrb[18].mxu0 }
 0x3de   : > { %v1722_v5 = vmax.f32 %v1629_v1, %v4825_v3  ;;  %v1712_v6 = vpop.f32.mrb[19].mxu0  ;;  %v4133_v3 = vld [vmem:[%s6706_s7] ss:$0 sm:$0xff] }
 0x3df   : > { %v1721_v8 = vmax.f32 %v1628_v2, %v1712_v6 }
 0x3e1   : > { %v5377_v10 = vpack.c.bf16 %v1722_v5, %v1721_v8 }
 0x3e3   : > { %5379 = vmatpush3.bf16.msk.msra.mxu1 %vm6276_vm5, %v5377_v10  ;;  %5387 = vmatpush3.bf16.msk.msra.mxu0 %vm6276_vm5, %v5377_v10 }
 0x3e4   : > { %5380 = vmatprep.subr.bf16.mxu1 %v5484_v44  ;;  %5392 = vmatprep.subr.bf16.mxu0 %v5484_v44 }
 0x3e6   : > { %4831 = vmatmul.mubr.msk.f32.vlgmr.msra.gmra.mrb[18].mxu1 %vm1724_vm6, %v1723_v13  ;;  %4845 = vmatmul.mubr.msk.f32.vlgmr.msra.gmra.mrb[20].mxu0 %vm1724_vm6, %v4109_v14  ;;  %v4140_v13 = vld [vmem:[%s6707_s8 + $0x38] sm:$0xff] }
 0x3e7   : > { %5383 = vmatpush3.bf16.msk.msra.mxu1 %vm6276_vm5, %v5377_v10  ;;  %5395 = vmatpush3.bf16.msk.msra.mxu0 %vm6276_vm5, %v5377_v10 }
 0x3e8   : > { %4837 = vmatprep.mubr.msk.f32.mxu1 %vm5485_vm2, %v5483_v0  ;;  %5388 = vmatprep.subr.bf16.mxu1 %v5484_v44 }
 0x3e9   : > { %4858 = vmatprep.mubr.msk.f32.mxu0 %vm5485_vm2, %v5483_v0  ;;  %5400 = vmatprep.subr.bf16.mxu0 %v5484_v44 }
 0x3ea   : > { %4838 = vmatmul.mubr.msk.f32.vlgmr.msra.gmra.mrb[20].mxu1 %vm1724_vm6, %v4106_v15  ;;  %4859 = vmatmul.mubr.msk.f32.vlgmr.msra.gmra.mrb[22].mxu0 %vm1724_vm6, %v4115_v17 }
 0x3eb   : > { %5391 = vmatpush3.bf16.msk.msra.mxu1 %vm6276_vm5, %v5377_v10  ;;  %5403 = vmatpush3.bf16.msk.msra.mxu0 %vm6276_vm5, %v5377_v10 }
 0x3ec   : > { %4851 = vmatprep.mubr.msk.f32.mxu1 %vm5485_vm2, %v5483_v0  ;;  %5396 = vmatprep.subr.bf16.mxu1 %v5484_v44 }
 0x3ed   : > { %4872 = vmatprep.mubr.msk.f32.mxu0 %vm5485_vm2, %v5483_v0  ;;  %5407 = vmatprep.subr.bf16.mxu0 %v5484_v44 }
 0x3ee   : > { %4852 = vmatmul.mubr.msk.f32.vlgmr.msra.gmra.mrb[22].mxu1 %vm1724_vm6, %v4112_v18  ;;  %4873 = vmatmul.mubr.msk.f32.vlgmr.msra.gmra.mrb[24].mxu0 %vm1724_vm6, %v4121_v11  ;;  %v4141_v18 = vld [vmem:[%s6707_s8 + $0x40] sm:$0xff] }
 0x3ef   : > { %5399 = vmatpush3.bf16.msk.msra.mxu1 %vm6276_vm5, %v5377_v10  ;;  %4865 = vmatprep.mubr.msk.f32.mxu1 %vm5485_vm2, %v5483_v0  ;;  %v4139_v10 = vld [vmem:[%s6707_s8 + $0x30] sm:$0xff] }
 0x3f0   : > { %5404 = vmatprep.subr.bf16.mxu1 %v5484_v44  ;;  %4890 = vmatprep.mubr.msk.f32.mxu0 %vm5485_vm2, %v5483_v0  ;;  %v5420_v14 = vpack.c.bf16 %v4140_v13, %v4139_v10  ;;  %v4187_v10 = vld [vmem:[%s6712_s13 + $0x58] sm:$0xff]  ;;  %v4196_v13 = vld [vmem:[%s6712_s13 + $0x60] sm:$0xff] }
 0x3f1   : > { %5409 = vmatpush3.bf16.msra.mxu0 %v5408_v16  ;;  %v4146_v16 = vld [vmem:[%s6709_s10 + $0x28] sm:$0xff] }
 0x3f2   : > { %4866 = vmatmul.mubr.msk.f32.vlgmr.msra.gmra.mrb[24].mxu1 %vm1724_vm6, %v4118_v12  ;;  %4888 = vmatprep.subr.mxu0 %v5483_v0  ;;  %v4144_v12 = vld [vmem:[%s6709_s10 + $0x18] sm:$0xff] }
 0x3f3   : > { %4881 = vmatprep.mubr.msk.f32.mxu1 %vm5485_vm2, %v5483_v0  ;;  %5406 = vmatpush3.bf16.msra.mxu1 %v5405_v21  ;;  %v5423_v20 = vpack.c.bf16 %v4145_v19, %v4144_v12  ;;  %v2752_v21 = vld [vmem:[%s6709_s10] sm:$0xff] }
 0x3f4   : > { %4879 = vmatprep.subr.mxu1 %v5483_v0  ;;  %v5426_v23 = vpack.c.bf16 %v2753_v22, %v2752_v21  ;;  %v4209_v21 = vld [vmem:[%s6712_s13 + $0x88] sm:$0xff]  ;;  %v4218_v22 = vld [vmem:[%s6712_s13 + $0x90] sm:$0xff] }
 0x3f5   : > { %4889 = vmatpush3.msra.mxu0 %v2265_v25 }
 0x3f6   : > { %5413 = vmatprep.subr.bf16.mxu0 %v5484_v44 }
 0x3f7   : > { %4880 = vmatpush3.msra.mxu1 %v4126_v24  ;;  %v2754_v24 = vld [vmem:[%s6709_s10 + $0x10] sm:$0xff] }
 0x3f8   : > { %5410 = vmatprep.subr.bf16.mxu1 %v5484_v44 }
 0x4b9   : > { %v1798_v26 = vpop.f32.mrb[18].mxu1  ;;  %v1949_v27 = vpop.f32.mrb[20].mxu0 }
 0x4ba   : > { %v4832_v28 = vpop.f32.mrb[19].mxu1  ;;  %v4846_v29 = vpop.f32.mrb[21].mxu0 }
 0x4bd   : > { %v1873_v30 = vpop.f32.mrb[20].mxu1  ;;  %v2101_v31 = vpop.f32.mrb[22].mxu0 }
 0x4be   : > { %v1877_v32 = vmax.f32 %v1798_v26, %v1873_v30  ;;  %v4839_v33 = vpop.f32.mrb[21].mxu1  ;;  %v4860_v34 = vpop.f32.mrb[23].mxu0 }
 0x4c0   : > { %v1953_v35 = vmax.f32 %v1877_v32, %v1949_v27 }
 0x4c1   : > { %v2025_v60 = vpop.f32.mrb[22].mxu1  ;;  %v2253_v36 = vpop.f32.mrb[24].mxu0 }
 0x4c2   : > { %v2029_v37 = vmax.f32 %v1953_v35, %v2025_v60  ;;  %v4853_v38 = vpop.f32.mrb[23].mxu1  ;;  %v4874_v39 = vpop.f32.mrb[25].mxu0  ;;  %v4150_v60 = vld [vmem:[%s6709_s10 + $0x38] sm:$0xff] }
 0x4c3   : > { %v4151_v39 = vld [vmem:[%s6709_s10 + $0x40] sm:$0xff] }
 0x4c4   : > { %v2105_v40 = vmax.f32 %v2029_v37, %v2101_v31  ;;  %v4143_v31 = vld [vmem:[%s6708_s9] ss:$0 sm:$0xff] }
 0x4c5   : > { %v2177_v41 = vpop.f32.mrb[24].mxu1 }
 0x4c6   : > { %v2181_v42 = vmax.f32 %v2105_v40, %v2177_v41  ;;  %v4867_v43 = vpop.f32.mrb[25].mxu1  ;;  %v2993_v41 = vld [vmem:[%s6711_s12] sm:$0xff] }
 0x4c8   : > { %v2257_v45 = vmax.f32 %v2181_v42, %v2253_v36  ;;  %v3099_v42 = vld [vmem:[%s6712_s13] sm:$0xff] }
 0x4ca   : > { %2261 = vst.msk [vmem:[#allocation2 + $0x1] sm:$0x7] %vm2260_vm8, %v2257_v45 }
 0x4d1   : > { %v2266_v49 = vld [vmem:[#allocation2 + $0x1] sm:$0x7] }
 0x4d2   : > { %v2262_v50 = vld [vmem:[#allocation2] sm:$0x7]  ;;  %4882 = vmatmul.mubr.msk.f32.vlgmr.msra.gmra.mrb[26].mxu1 %vm2271_vm9, %v2266_v49 }
 0x4d3   : > { %4891 = vmatmul.mubr.msk.f32.vlgmr.msra.gmra.mrb[26].mxu0 %vm2271_vm9, %v2262_v50  ;;  %5412 = vmatpush3.bf16.msra.mxu1 %v5411_v48  ;;  %v2418_v4 = vld [vmem:[#allocation2 + $0x2] sm:$0x7] }
 0x4d4   : > { %4899 = vmatprep.mubr.msk.f32.mxu1 %vm5485_vm2, %v5483_v0  ;;  %4897 = vmatprep.subr.mxu1 %v5483_v0 }
 0x4d5   : > { %4908 = vmatprep.mubr.msk.f32.mxu0 %vm5485_vm2, %v5483_v0  ;;  %5415 = vmatpush3.bf16.msra.mxu0 %v5414_v54 }
 0x4d6   : > { %4906 = vmatprep.subr.mxu0 %v5483_v0 }
 0x4d7   : > { %4898 = vmatpush3.msra.mxu1 %v4131_v51  ;;  %v4153_v51 = vld [vmem:[%s6710_s11] ss:$0 sm:$0xff] }
 0x4d8   : > { %4900 = vmatmul.mubr.msk.f32.vlgmr.msra.gmra.mrb[28].mxu1 %vm2271_vm9, %v2418_v4  ;;  %5416 = vmatprep.subr.bf16.mxu1 %v5484_v44  ;;  %v4163_v4 = vld [vmem:[%s6712_s13 + $0x18] sm:$0xff] }
 0x4d9   : > { %4917 = vmatprep.mubr.msk.f32.mxu1 %vm5485_vm2, %v5483_v0  ;;  %5418 = vmatpush3.bf16.msra.mxu1 %v5417_v57  ;;  %v5435_v56 = vpack.c.bf16 %v4164_v52, %v4163_v4  ;;  %v2994_v57 = vld [vmem:[%s6711_s12 + $0x8] sm:$0xff] }
 0x4da   : > { %4915 = vmatprep.subr.mxu1 %v5483_v0  ;;  %4907 = vmatpush3.msra.mxu0 %v4136_v58  ;;  %v2995_v58 = vld [vmem:[%s6711_s12 + $0x10] sm:$0xff] }
 0x4db   : > { %5419 = vmatprep.subr.bf16.mxu0 %v5484_v44 }
 0x4dd   : > { %4916 = vmatpush3.msra.mxu1 %v2510_v7  ;;  %v2996_v7 = vld [vmem:[%s6711_s12 + $0x18] sm:$0xff] }
 0x4de   : > { %5422 = vmatprep.subr.bf16.mxu1 %v5484_v44 }
 0x5a5   : > { %v2341_v59 = vpop.f32.mrb[26].mxu1 }
 0x5a6   : > { %v2414_v61 = vpop.f32.mrb[26].mxu0  ;;  %v4883_v63 = vpop.f32.mrb[27].mxu1 }
 0x5a7   : > { %v2415_v62 = vadd.f32 %v2414_v61, %v2341_v59  ;;  %v4892_v1 = vpop.f32.mrb[27].mxu0  ;;  %v3101_v59 = vld [vmem:[%s6712_s13 + $0x10] sm:$0xff]  ;;  %v4165_v61 = vld [vmem:[%s6712_s13 + $0x28] sm:$0xff]  ;;  %v4175_v63 = vld [vmem:[%s6712_s13 + $0x38] sm:$0xff] }
 0x5a8   : > { %v4185_v1 = vld [vmem:[%s6712_s13 + $0x48] sm:$0xff] }
 0x5ab   : > { %v2492_v2 = vpop.f32.mrb[28].mxu1 }
 0x5ac   : > { %v2496_v5 = vadd.f32 %v2492_v2, %v2415_v62  ;;  %v4901_v6 = vpop.f32.mrb[29].mxu1  ;;  %v4174_v62 = vld [vmem:[%s6712_s13 + $0x30] sm:$0xff] }
 0x5ad   : > { %v5439_v2 = vpack.c.bf16 %v4175_v63, %v4174_v62 }
 0x5ae   : > { %v2504_v8 = vadd.f32 %v4133_v3, %v2496_v5  ;;  %v4186_v3 = vld [vmem:[%s6712_s13 + $0x50] sm:$0xff] }
 0x5af   : > { %v5443_v5 = vpack.c.bf16 %v4186_v3, %v4185_v1 }
 0x5b0   : > { %v2505_v9 = vmax.f32 %v2504_v8, 0.0 }
 0x5b2   : > { %2506 = vst.msk [vmem:[#allocation2 + $0x1] sm:$0x7] %vm2260_vm8, %v2505_v9  ;;  %v4176_v9 = vld [vmem:[%s6712_s13 + $0x40] sm:$0xff] }
 0x5b9   : > { %v2511_v15 = vld [vmem:[#allocation2 + $0x1] sm:$0x7] }
 0x5ba   : > { %v2507_v17 = vld [vmem:[#allocation2] sm:$0x7]  ;;  %4909 = vmatmul.mubr.msk.f32.vlgmr.msra.gmra.mrb[28].mxu0 %vm2271_vm9, %v2511_v15  ;;  %v4207_v15 = vld [vmem:[%s6712_s13 + $0x78] sm:$0xff] }
 0x5bb   : > { %4918 = vmatmul.mubr.msk.f32.vlgmr.msra.gmra.mrb[30].mxu1 %vm2271_vm9, %v2507_v17  ;;  %5421 = vmatpush3.bf16.msra.mxu0 %v5420_v14  ;;  %v2662_v11 = vld [vmem:[#allocation2 + $0x2] sm:$0x7]  ;;  %v4197_v14 = vld [vmem:[%s6712_s13 + $0x68] sm:$0xff] }
 0x5bc   : > { %4926 = vmatprep.mubr.msk.f32.mxu0 %vm5485_vm2, %v5483_v0  ;;  %4924 = vmatprep.subr.mxu0 %v5483_v0  ;;  %v4208_v17 = vld [vmem:[%s6712_s13 + $0x80] sm:$0xff]  ;;  %v5447_v12 = vpack.c.bf16 %v4197_v14, %v4196_v13 }
 0x5bd   : > { %4935 = vmatprep.mubr.msk.f32.mxu1 %vm5485_vm2, %v5483_v0  ;;  %5424 = vmatpush3.bf16.msra.mxu1 %v5423_v20  ;;  %v5451_v19 = vpack.c.bf16 %v4208_v17, %v4207_v15  ;;  %v4198_v20 = vld [vmem:[%s6712_s13 + $0x70] sm:$0xff] }
 0x5be   : > { %4933 = vmatprep.subr.mxu1 %v5483_v0 }
 0x5bf   : > { %4925 = vmatpush3.msra.mxu0 %v4141_v18 }
 0x5c0   : > { %4927 = vmatmul.mubr.msk.f32.vlgmr.msra.gmra.mrb[30].mxu0 %vm2271_vm9, %v2662_v11  ;;  %5425 = vmatprep.subr.bf16.mxu0 %v5484_v44 }
 0x5c1   : > { %4944 = vmatprep.mubr.msk.f32.mxu0 %vm5485_vm2, %v5483_v0  ;;  %5427 = vmatpush3.bf16.msra.mxu0 %v5426_v23  ;;  %v4219_v23 = vld [vmem:[%s6712_s13 + $0x98] sm:$0xff] }
 0x5c2   : > { %4942 = vmatprep.subr.mxu0 %v5483_v0  ;;  %4934 = vmatpush3.msra.mxu1 %v4146_v16  ;;  %v4229_v16 = vld [vmem:[%s6712_s13 + $0xa8] sm:$0xff] }
 0x5c3   : > { %5428 = vmatprep.subr.bf16.mxu1 %v5484_v44  ;;  %v4149_v44 = vld [vmem:[%s6709_s10 + $0x30] sm:$0xff] }
 0x5c4   : > { %v5429_v36 = vpack.c.bf16 %v4150_v60, %v4149_v44 }
 0x5c5   : > { %4943 = vmatpush3.msra.mxu0 %v2754_v24  ;;  %v4230_v24 = vld [vmem:[%s6712_s13 + $0xb0] sm:$0xff] }
 0x68d   : > { %v2585_v25 = vpop.f32.mrb[28].mxu0 }
 0x68e   : > { %v2658_v26 = vpop.f32.mrb[30].mxu1  ;;  %v4910_v28 = vpop.f32.mrb[29].mxu0 }
 0x68f   : > { %v2659_v27 = vadd.f32 %v2658_v26, %v2585_v25  ;;  %v4919_v29 = vpop.f32.mrb[31].mxu1  ;;  %v5455_v25 = vpack.c.bf16 %v4219_v23, %v4218_v22  ;;  %v5459_v26 = vpack.c.bf16 %v4230_v24, %v4229_v16  ;;  %v4231_v28 = vld [vmem:[%s6712_s13 + $0xb8] sm:$0xff] }
 0x693   : > { %v2736_v30 = vpop.f32.mrb[30].mxu0 }
 0x694   : > { %v2740_v32 = vadd.f32 %v2736_v30, %v2659_v27  ;;  %v4928_v33 = vpop.f32.mrb[31].mxu0  ;;  %v4220_v27 = vld [vmem:[%s6712_s13 + $0xa0] sm:$0xff] }
 0x696   : > { %v2748_v34 = vadd.f32 %v4143_v31, %v2740_v32 }
 0x698   : > { %v2749_v35 = vmax.f32 %v2748_v34, 0.0 }
 0x69a   : > { %2750 = vst.msk [vmem:[#allocation2 + $0x1] sm:$0x7] %vm2260_vm8, %v2749_v35 }
 0x6a1   : > { %v2755_v37 = vld [vmem:[#allocation2 + $0x1] sm:$0x7] }
 0x6a2   : > { %v2751_v38 = vld [vmem:[#allocation2] sm:$0x7]  ;;  %4936 = vmatmul.mubr.msk.f32.vlgmr.msra.gmra.mrb[32].mxu1 %vm2271_vm9, %v2755_v37 }
 0x6a3   : > { %4945 = vmatmul.mubr.msk.f32.vlgmr.msra.gmra.mrb[32].mxu0 %vm2271_vm9, %v2751_v38  ;;  %5430 = vmatpush3.bf16.msra.mxu1 %v5429_v36  ;;  %v2906_v40 = vld [vmem:[#allocation2 + $0x2] sm:$0x7] }
 0x6a4   : > { %4953 = vmatprep.mubr.msk.f32.mxu1 %vm5485_vm2, %v5483_v0  ;;  %4951 = vmatprep.subr.mxu1 %v5483_v0  ;;  %v3100_v0 = vld [vmem:[%s6712_s13 + $0x8] sm:$0xff] }
 0x6a5   : > { %4958 = vmatprep.mubr.msk.f32.mxu0 %vm2997_vm10, %v2993_v41  ;;  %v5431_v43 = vpack.c.bf16 %v3100_v0, %v3099_v42 }
 0x6a7   : > { %4952 = vmatpush3.msra.mxu1 %v4151_v39 }
 0x6a8   : > { %4954 = vmatmul.mubr.msk.f32.vlgmr.msra.gmra.mrb[34].mxu1 %vm2271_vm9, %v2906_v40  ;;  %5432 = vmatprep.subr.bf16.mxu1 %v5431_v43 }
 0x6a9   : > { %5434 = vmatpush3.bf16.msra.mxu1 %v5431_v43 }
 0x6aa   : > { %4968 = vmatprep.subr.mxu1 %v3101_v59 }
 0x6ad   : > { %4969 = vmatpush3.msra.mxu1 %v3101_v59 }
 0x6ae   : > { %5440 = vmatprep.subr.bf16.mxu1 %v5439_v2 }
 0x775   : > { %v2829_v45 = vpop.f32.mrb[32].mxu1 }
 0x776   : > { %v2902_v46 = vpop.f32.mrb[32].mxu0  ;;  %v4937_v48 = vpop.f32.mrb[33].mxu1 }
 0x777   : > { %v2903_v47 = vadd.f32 %v2902_v46, %v2829_v45  ;;  %v4946_v49 = vpop.f32.mrb[33].mxu0 }
 0x77b   : > { %v2980_v50 = vpop.f32.mrb[34].mxu1 }
 0x77c   : > { %v2984_v53 = vadd.f32 %v2980_v50, %v2903_v47  ;;  %v4955_v54 = vpop.f32.mrb[35].mxu1 }
 0x77e   : > { %v2992_v55 = vadd.f32 %v4153_v51, %v2984_v53 }
 0x780   : > { %4956 = vmatprep.subr.msk.mxu0 %vm3010_vm11, %v2992_v55 }
 0x781   : > { %4957 = vmatpush3.msk.msra.mxu0 %vm3010_vm11, %v2992_v55 }
 0x782   : > { %4959 = vmatmul.mubr.msk.f32.vlgmr.msra.gmra.mrb[34].mxu0 %vm2997_vm10, %v2994_v57  ;;  %5436 = vmatprep.subr.bf16.mxu0 %v5435_v56 }
 0x783   : > { %4961 = vmatprep.mubr.msk.f32.mxu0 %vm2997_vm10, %v2995_v58  ;;  %5438 = vmatpush3.bf16.msra.mxu0 %v5435_v56 }
 0x784   : > { %4980 = vmatprep.subr.mxu0 %v4165_v61 }
 0x786   : > { %4962 = vmatmul.mubr.msk.f32.gmra.mrb[36].mxu0 %vm2997_vm10, %v2996_v7 }
 0x787   : > { %4981 = vmatpush3.msra.mxu0 %v4165_v61 }
 0x788   : > { %5444 = vmatprep.subr.bf16.mxu0 %v5443_v5 }
 0x855   : > { %v6522_v6 = vpop.f32.mrb[34].mxu0 }
 0x856   : > { %v6524_v8 = vpop.f32.mrb[35].mxu0 }
 0x857   : > { %4970 = vmatprep.mubr.msk.f32.mxu1 %vm2271_vm9, %v6524_v8  ;;  %4982 = vmatprep.mubr.msk.f32.mxu0 %vm2271_vm9, %v6524_v8 }
 0x858   : > { %4971 = vmatmul.mubr.msk.f32.vlgmr.msra.gmra.mrb[36].mxu1 %vm2271_vm9, %v6522_v6  ;;  %4983 = vmatmul.mubr.msk.f32.vlgmr.msra.gmra.mrb[38].mxu0 %vm2271_vm9, %v6522_v6 }
 0x859   : > { %v6552_v18 = vpop.f32.mrb[36].mxu0  ;;  %5442 = vmatpush3.bf16.msra.mxu1 %v5439_v2  ;;  %5446 = vmatpush3.bf16.msra.mxu0 %v5443_v5 }
 0x85a   : > { %v3090_v11 = vpop.f32.mrb[37].mxu0  ;;  %4992 = vmatprep.subr.mxu1 %v4176_v9  ;;  %5004 = vmatprep.subr.mxu0 %v4187_v10 }
 0x85b   : > { %4973 = vmatprep.mubr.msk.f32.mxu1 %vm2271_vm9, %v3090_v11  ;;  %4985 = vmatprep.mubr.msk.f32.mxu0 %vm2271_vm9, %v3090_v11 }
 0x85c   : > { %4974 = vmatmul.mubr.msk.f32.gmra.mrb[38].mxu1 %vm2271_vm9, %v6552_v18  ;;  %4986 = vmatmul.mubr.msk.f32.gmra.mrb[40].mxu0 %vm2271_vm9, %v6552_v18 }
 0x85d   : > { %4994 = vmatprep.mubr.msk.f32.mxu1 %vm2271_vm9, %v6524_v8  ;;  %5006 = vmatprep.mubr.msk.f32.mxu0 %vm2271_vm9, %v6524_v8 }
 0x85e   : > { %4993 = vmatpush3.msra.mxu1 %v4176_v9  ;;  %5005 = vmatpush3.msra.mxu0 %v4187_v10 }
 0x85f   : > { %5448 = vmatprep.subr.bf16.mxu1 %v5447_v12  ;;  %5452 = vmatprep.subr.bf16.mxu0 %v5451_v19 }
 0x860   : > { %4995 = vmatmul.mubr.msk.f32.vlgmr.msra.gmra.mrb[40].mxu1 %vm2271_vm9, %v6522_v6  ;;  %5007 = vmatmul.mubr.msk.f32.vlgmr.msra.gmra.mrb[42].mxu0 %vm2271_vm9, %v6522_v6 }
 0x861   : > { %4997 = vmatprep.mubr.msk.f32.mxu1 %vm2271_vm9, %v3090_v11  ;;  %5009 = vmatprep.mubr.msk.f32.mxu0 %vm2271_vm9, %v3090_v11 }
 0x862   : > { %5450 = vmatpush3.bf16.msra.mxu1 %v5447_v12  ;;  %5454 = vmatpush3.bf16.msra.mxu0 %v5451_v19 }
 0x863   : > { %5016 = vmatprep.subr.mxu1 %v4198_v20  ;;  %5028 = vmatprep.subr.mxu0 %v4209_v21 }
 0x864   : > { %4998 = vmatmul.mubr.msk.f32.gmra.mrb[42].mxu1 %vm2271_vm9, %v6552_v18  ;;  %5010 = vmatmul.mubr.msk.f32.gmra.mrb[44].mxu0 %vm2271_vm9, %v6552_v18 }
 0x865   : > { %5018 = vmatprep.mubr.msk.f32.mxu1 %vm2271_vm9, %v6524_v8  ;;  %5030 = vmatprep.mubr.msk.f32.mxu0 %vm2271_vm9, %v6524_v8 }
 0x866   : > { %5017 = vmatpush3.msra.mxu1 %v4198_v20  ;;  %5029 = vmatpush3.msra.mxu0 %v4209_v21 }
 0x867   : > { %5456 = vmatprep.subr.bf16.mxu1 %v5455_v25  ;;  %5460 = vmatprep.subr.bf16.mxu0 %v5459_v26 }
 0x868   : > { %5019 = vmatmul.mubr.msk.f32.vlgmr.msra.gmra.mrb[44].mxu1 %vm2271_vm9, %v6522_v6  ;;  %5031 = vmatmul.mubr.msk.f32.vlgmr.msra.gmra.mrb[46].mxu0 %vm2271_vm9, %v6522_v6 }
 0x869   : > { %5021 = vmatprep.mubr.msk.f32.mxu1 %vm2271_vm9, %v3090_v11  ;;  %5033 = vmatprep.mubr.msk.f32.mxu0 %vm2271_vm9, %v3090_v11 }
 0x86a   : > { %5458 = vmatpush3.bf16.msra.mxu1 %v5455_v25  ;;  %5462 = vmatpush3.bf16.msra.mxu0 %v5459_v26 }
 0x86b   : > { %5040 = vmatprep.subr.mxu1 %v4220_v27  ;;  %5052 = vmatprep.subr.mxu0 %v4231_v28 }
 0x86c   : > { %5022 = vmatmul.mubr.msk.f32.gmra.mrb[46].mxu1 %vm2271_vm9, %v6552_v18  ;;  %5034 = vmatmul.mubr.msk.f32.gmra.mrb[48].mxu0 %vm2271_vm9, %v6552_v18 }
 0x86d   : > { %5042 = vmatprep.mubr.msk.f32.mxu1 %vm2271_vm9, %v6524_v8  ;;  %5054 = vmatprep.mubr.msk.f32.mxu0 %vm2271_vm9, %v6524_v8 }
 0x86e   : > { %5041 = vmatpush3.msra.mxu1 %v4220_v27  ;;  %5053 = vmatpush3.msra.mxu0 %v4231_v28 }
 0x870   : > { %5043 = vmatmul.mubr.msk.f32.vlgmr.msra.gmra.mrb[48].mxu1 %vm2271_vm9, %v6522_v6  ;;  %5055 = vmatmul.mubr.msk.f32.vlgmr.msra.gmra.mrb[50].mxu0 %vm2271_vm9, %v6522_v6 }
 0x871   : > { %5045 = vmatprep.mubr.msk.f32.mxu1 %vm2271_vm9, %v3090_v11  ;;  %5057 = vmatprep.mubr.msk.f32.mxu0 %vm2271_vm9, %v3090_v11 }
 0x874   : > { %5046 = vmatmul.mubr.msk.f32.gmra.mrb[50].mxu1 %vm2271_vm9, %v6552_v18  ;;  %5058 = vmatmul.mubr.msk.f32.gmra.mrb[52].mxu0 %vm2271_vm9, %v6552_v18 }
 0x92b   : > { %v4972_v29 = vpop.f32.mrb[36].mxu1  ;;  %v4984_v30 = vpop.f32.mrb[38].mxu0 }
 0x92c   : > { %3200 = vst.msk [vmem:[%s6630_s22 + $0x8] sm:$0xff] %vm478_vm0, %v4972_v29  ;;  %4171 = vst.msk [vmem:[%s6630_s22 + $0x28] sm:$0xff] %vm478_vm0, %v4984_v30  ;;  %v3180_v31 = vpop.f32.mrb[37].mxu1  ;;  %v3273_v32 = vpop.f32.mrb[39].mxu0 }
 0x92d   : > { %3199 = vst.msk [vmem:[%s6630_s22] sm:$0xff] %vm478_vm0, %v3180_v31  ;;  %4170 = vst.msk [vmem:[%s6630_s22 + $0x20] sm:$0xff] %vm478_vm0, %v3273_v32 }
 0x92f   : > { %v4975_v33 = vpop.f32.mrb[38].mxu1  ;;  %v4987_v34 = vpop.f32.mrb[40].mxu0 }
 0x930   : > { %3202 = vst.msk [vmem:[%s6630_s22 + $0x18] sm:$0xff] %vm478_vm0, %v4975_v33  ;;  %4173 = vst.msk [vmem:[%s6630_s22 + $0x38] sm:$0xff] %vm478_vm0, %v4987_v34  ;;  %v3190_v35 = vpop.f32.mrb[39].mxu1  ;;  %v3283_v44 = vpop.f32.mrb[41].mxu0 }
 0x931   : > { %3201 = vst.msk [vmem:[%s6630_s22 + $0x10] sm:$0xff] %vm478_vm0, %v3190_v35  ;;  %4172 = vst.msk [vmem:[%s6630_s22 + $0x30] sm:$0xff] %vm478_vm0, %v3283_v44 }
 0x933   : > { %v4996_v60 = vpop.f32.mrb[40].mxu1  ;;  %v5008_v36 = vpop.f32.mrb[42].mxu0 }
 0x934   : > { %4182 = vst.msk [vmem:[%s6630_s22 + $0x48] sm:$0xff] %vm478_vm0, %v4996_v60  ;;  %4193 = vst.msk [vmem:[%s6630_s22 + $0x68] sm:$0xff] %vm478_vm0, %v5008_v36  ;;  %v3367_v37 = vpop.f32.mrb[41].mxu1  ;;  %v3461_v38 = vpop.f32.mrb[43].mxu0 }
 0x935   : > { %4181 = vst.msk [vmem:[%s6630_s22 + $0x40] sm:$0xff] %vm478_vm0, %v3367_v37  ;;  %4192 = vst.msk [vmem:[%s6630_s22 + $0x60] sm:$0xff] %vm478_vm0, %v3461_v38 }
 0x937   : > { %v4999_v39 = vpop.f32.mrb[42].mxu1  ;;  %v5011_v40 = vpop.f32.mrb[44].mxu0 }
 0x938   : > { %4184 = vst.msk [vmem:[%s6630_s22 + $0x58] sm:$0xff] %vm478_vm0, %v4999_v39  ;;  %4195 = vst.msk [vmem:[%s6630_s22 + $0x78] sm:$0xff] %vm478_vm0, %v5011_v40  ;;  %v3377_v41 = vpop.f32.mrb[43].mxu1  ;;  %v3471_v42 = vpop.f32.mrb[45].mxu0 }
 0x939   : > { %4183 = vst.msk [vmem:[%s6630_s22 + $0x50] sm:$0xff] %vm478_vm0, %v3377_v41  ;;  %4194 = vst.msk [vmem:[%s6630_s22 + $0x70] sm:$0xff] %vm478_vm0, %v3471_v42 }
 0x93b   : > { %v5020_v0 = vpop.f32.mrb[44].mxu1  ;;  %v5032_v43 = vpop.f32.mrb[46].mxu0 }
 0x93c   : > { %4204 = vst.msk [vmem:[%s6630_s22 + $0x88] sm:$0xff] %vm478_vm0, %v5020_v0  ;;  %4215 = vst.msk [vmem:[%s6630_s22 + $0xa8] sm:$0xff] %vm478_vm0, %v5032_v43  ;;  %v3555_v45 = vpop.f32.mrb[45].mxu1  ;;  %v3649_v46 = vpop.f32.mrb[47].mxu0 }
 0x93d   : > { %4203 = vst.msk [vmem:[%s6630_s22 + $0x80] sm:$0xff] %vm478_vm0, %v3555_v45  ;;  %4214 = vst.msk [vmem:[%s6630_s22 + $0xa0] sm:$0xff] %vm478_vm0, %v3649_v46 }
 0x93f   : > { %v5023_v47 = vpop.f32.mrb[46].mxu1  ;;  %v5035_v48 = vpop.f32.mrb[48].mxu0 }
 0x940   : > { %4206 = vst.msk [vmem:[%s6630_s22 + $0x98] sm:$0xff] %vm478_vm0, %v5023_v47  ;;  %4217 = vst.msk [vmem:[%s6630_s22 + $0xb8] sm:$0xff] %vm478_vm0, %v5035_v48  ;;  %v3565_v49 = vpop.f32.mrb[47].mxu1  ;;  %v3659_v50 = vpop.f32.mrb[49].mxu0 }
 0x941   : > { %4205 = vst.msk [vmem:[%s6630_s22 + $0x90] sm:$0xff] %vm478_vm0, %v3565_v49  ;;  %4216 = vst.msk [vmem:[%s6630_s22 + $0xb0] sm:$0xff] %vm478_vm0, %v3659_v50 }
 0x943   : > { %v5044_v51 = vpop.f32.mrb[48].mxu1  ;;  %v5056_v4 = vpop.f32.mrb[50].mxu0 }
 0x944   : > { %4226 = vst.msk [vmem:[%s6630_s22 + $0xc8] sm:$0xff] %vm478_vm0, %v5044_v51  ;;  %4237 = vst.msk [vmem:[%s6630_s22 + $0xe8] sm:$0xff] %vm478_vm0, %v5056_v4  ;;  %v3743_v52 = vpop.f32.mrb[49].mxu1  ;;  %v3837_v53 = vpop.f32.mrb[51].mxu0 }
 0x945   : > { %4225 = vst.msk [vmem:[%s6630_s22 + $0xc0] sm:$0xff] %vm478_vm0, %v3743_v52  ;;  %4236 = vst.msk [vmem:[%s6630_s22 + $0xe0] sm:$0xff] %vm478_vm0, %v3837_v53 }
 0x947   : > { %v5047_v54 = vpop.f32.mrb[50].mxu1  ;;  %v5059_v55 = vpop.f32.mrb[52].mxu0 }
 0x948   : > { %4228 = vst.msk [vmem:[%s6630_s22 + $0xd8] sm:$0xff] %vm478_vm0, %v5047_v54  ;;  %4239 = vst.msk [vmem:[%s6630_s22 + $0xf8] sm:$0xff] %vm478_vm0, %v5059_v55  ;;  %v3753_v56 = vpop.f32.mrb[51].mxu1  ;;  %v3847_v57 = vpop.f32.mrb[53].mxu0 }
 0x949   : > { %4227 = vst.msk [vmem:[%s6630_s22 + $0xd0] sm:$0xff] %vm478_vm0, %v3753_v56  ;;  %4238 = vst.msk [vmem:[%s6630_s22 + $0xf0] sm:$0xff] %vm478_vm0, %v3847_v57 }
 0x94a PF: > { %s24_s29 = sadd.s32 1, %s5481_s29  }
 0x94b   : > { %p21_p4 = scmp.ge.s32.totalorder %s24_s29, 4  }
 0x94d   :  { %23 = sbr.rel (!%p21_p4) target bundleno = 1 (0x1), region = 142 }

</bundles_post_ra>
